<compile_context>
chip_gen: v7x
topology: tpu7x:2x2x1
jax: 0.10.0
libtpu: 0.0.40
codegen_flags: <defaults>
</compile_context>

<pallas_src>
import functools

import jax
import jax.numpy as jnp
import numpy as np
from jax.experimental import pallas as pl
from jax.experimental.pallas import tpu as pltpu

EXPANSION = 4
BN_EPS = 1e-5


# ---------------------------------------------------------------------------
# Fused BottleNeck kernel: Nb images per grid step
# ---------------------------------------------------------------------------
def _bottleneck_kernel(stride, has_shortcut, *refs):
    if has_shortcut:
        (x_ref, w1_ref, w2_ref, w3_ref, wsc_ref, bias_ref, o_ref, h1pad_ref) = refs
    else:
        (x_ref, w1_ref, w2_ref, w3_ref, bias_ref, o_ref, h1pad_ref) = refs
        wsc_ref = None

    Nb, H, W, Cin = x_ref.shape
    mid = w1_ref.shape[1]
    _, Ho, Wo, cexp = o_ref.shape
    f32 = jnp.float32
    bf16 = h1pad_ref.dtype

    bias = bias_ref[...]                      # (4, Cmax) f32 (packed BN biases)
    b1 = bias[0:1, :mid]
    b2 = bias[1:2, :mid]
    b3 = bias[2:3, :cexp]

    # ---- conv1: 1x1 (BN scale pre-folded into w1) + bias + ReLU -------------
    x = x_ref[...]                                            # (Nb,H,W,Cin) bf16
    x2d = x.reshape(Nb * H * W, Cin)
    h1 = jnp.maximum(
        jnp.dot(x2d, w1_ref[...], preferred_element_type=f32) + b1, 0.0)

    # ---- halo kept on-chip ---------------------------------------------------
    # Zero only the 1-pixel border (the interior is fully overwritten); done
    # every step so each TensorCore's private scratch is always initialized.
    zrow = jnp.zeros((Nb, 1, W + 2, mid), bf16)
    zcol = jnp.zeros((Nb, H, 1, mid), bf16)
    h1pad_ref[:, 0:1, 7:W + 9, :] = zrow                      # top halo row
    h1pad_ref[:, H + 1:H + 2, 7:W + 9, :] = zrow              # bottom halo row
    h1pad_ref[:, 1:H + 1, 7:8, :] = zcol                      # left halo col
    h1pad_ref[:, 1:H + 1, W + 8:W + 9, :] = zcol              # right halo col
    # Sublane-aligned interior write (starts at padded column 8).
    h1pad_ref[:, 1:H + 1, 8:W + 8, :] = h1.reshape(Nb, H, W, mid).astype(bf16)

    # ---- conv2: 3x3 stride-s, 9 MXU taps accumulated in registers -----------
    w2 = w2_ref[...]                                          # (3,3,mid,mid) bf16
    acc = None
    for kh in range(3):
        for kw in range(3):
            tap = h1pad_ref[:, kh:kh + H, 7 + kw:7 + kw + W, :]   # (Nb,H,W,mid)
            if stride != 1:
                tap = tap[:, ::stride, ::stride, :]               # (Nb,Ho,Wo,mid)
            part = jnp.dot(tap.reshape(Nb * Ho * Wo, mid), w2[kh, kw],
                           preferred_element_type=f32)
            acc = part if acc is None else acc + part
    h2 = jnp.maximum(acc + b2, 0.0).astype(bf16)

    # ---- conv3: 1x1 + bias ---------------------------------------------------
    h3 = jnp.dot(h2, w3_ref[...], preferred_element_type=f32) + b3

    # ---- shortcut ------------------------------------------------------------
    if has_shortcut:
        bsc = bias[3:4, :cexp]
        xs = x if stride == 1 else x[:, ::stride, ::stride, :]
        sc = jnp.dot(xs.reshape(Nb * Ho * Wo, Cin), wsc_ref[...],
                     preferred_element_type=f32) + bsc
    else:                                     # identity (stride==1, Cin==cexp)
        sc = x2d.astype(f32)

    out = jnp.maximum(h3 + sc, 0.0)
    o_ref[...] = out.reshape(Nb, Ho, Wo, cexp).astype(o_ref.dtype)


# ---------------------------------------------------------------------------
# Parameter prep: BN folding into weights (eval-mode running stats)
# ---------------------------------------------------------------------------
def _fold_bn(gamma, beta, mean, var):
    scale = gamma / jnp.sqrt(var + BN_EPS)
    bias = beta - mean * scale
    return scale.astype(jnp.float32), bias.astype(jnp.float32)


def _fold_params(params, in_channels, stride):
    """Fold BN scales into conv weights (legit constant folding) in bf16."""
    bf16 = jnp.bfloat16
    mid = params["w1"].shape[0]
    cexp = params["w3"].shape[0]
    s1, b1 = _fold_bn(*params["bn1"])
    s2, b2 = _fold_bn(*params["bn2"])
    s3, b3 = _fold_bn(*params["bn3"])
    # OIHW -> matmul/HWIO layouts, BN scale folded into output channels.
    w1 = (jnp.transpose(params["w1"][:, :, 0, 0], (1, 0)) * s1[None, :]).astype(bf16)   # (Cin, mid)
    w2 = (jnp.transpose(params["w2"], (2, 3, 1, 0)) * s2[None, None, None, :]).astype(bf16)  # (3,3,mid,mid)
    w3 = (jnp.transpose(params["w3"][:, :, 0, 0], (1, 0)) * s3[None, :]).astype(bf16)   # (mid, cexp)
    has_shortcut = (stride != 1) or (in_channels != cexp)
    if has_shortcut:
        ssc, bsc = _fold_bn(*params["bn_sc"])
        wsc = (jnp.transpose(params["w_sc"][:, :, 0, 0], (1, 0)) * ssc[None, :]).astype(bf16)  # (Cin, cexp)
    else:
        wsc, bsc = None, None
    return dict(w1=w1, w2=w2, w3=w3, wsc=wsc, b1=b1, b2=b2, b3=b3, bsc=bsc,
                mid=mid, cexp=cexp, has_shortcut=has_shortcut)


def init_bottleneck_params(key, in_channels, out_channels):
    """Deterministic synthetic parameters in PyTorch layouts (OIHW)."""
    mid = out_channels
    cexp = out_channels * EXPANSION
    keys = iter(jax.random.split(key, 20))

    def conv_w(shape):
        return jax.random.normal(next(keys), shape, jnp.float32) * 0.1

    def bn(c):
        gamma = 1.0 + 0.1 * jax.random.normal(next(keys), (c,), jnp.float32)
        beta = 0.1 * jax.random.normal(next(keys), (c,), jnp.float32)
        mean = 0.1 * jax.random.normal(next(keys), (c,), jnp.float32)
        var = 0.5 + jnp.abs(jax.random.normal(next(keys), (c,), jnp.float32))
        return (gamma, beta, mean, var)

    return {
        "w1": conv_w((mid, in_channels, 1, 1)),
        "bn1": bn(mid),
        "w2": conv_w((mid, mid, 3, 3)),
        "bn2": bn(mid),
        "w3": conv_w((cexp, mid, 1, 1)),
        "bn3": bn(cexp),
        "w_sc": conv_w((cexp, in_channels, 1, 1)),
        "bn_sc": bn(cexp),
    }


def _pick_batch_tile(n, per_image_bytes, budget_bytes):
    """Largest divisor Nb of n whose activation working set fits `budget_bytes`,
    while keeping >= 2 grid steps (so a 'parallel' grid can use both v7x TCs)."""
    best = 1
    for nb in range(1, n + 1):
        if n % nb:
            continue
        if nb * per_image_bytes > budget_bytes:
            continue
        if n >= 2 and n // nb < 2:
            continue
        best = nb
    return best


# ---------------------------------------------------------------------------
# Forward wrapper (NCHW in / NCHW out like the PyTorch module; bf16 output)
# ---------------------------------------------------------------------------
def bottleneck_forward(x_nchw, params, stride=1):
    bf16 = jnp.bfloat16
    N, Cin, H, W = x_nchw.shape
    assert H % stride == 0 and W % stride == 0, "spatial dims must divide stride"
    p = _fold_params(params, Cin, stride)
    mid, cexp, has_shortcut = p["mid"], p["cexp"], p["has_shortcut"]
    Ho, Wo = H // stride, W // stride

    x = jnp.transpose(x_nchw, (0, 2, 3, 1)).astype(bf16)      # NHWC bf16

    # Pack all per-channel BN biases into one (4, Cmax) f32 tensor.
    cmax = max(mid, cexp)
    bias_pack = jnp.zeros((4, cmax), jnp.float32)
    bias_pack = bias_pack.at[0, :mid].set(p["b1"])
    bias_pack = bias_pack.at[1, :mid].set(p["b2"])
    bias_pack = bias_pack.at[2, :cexp].set(p["b3"])
    if has_shortcut:
        bias_pack = bias_pack.at[3, :cexp].set(p["bsc"])

    # Per-image activation working-set estimate (double-buffered I/O blocks,
    # padded-h1 scratch, live f32 intermediates) -> batch-tile selection.
    per_img = (2 * H * W * Cin * 2
               + 2 * Ho * Wo * cexp * 2
               + (H + 2) * (W + 16) * mid * 2
               + H * W * mid * 4
               + Ho * Wo * (mid + 2 * cexp) * 4)
    Nb = _pick_batch_tile(N, per_img, budget_bytes=16 << 20)
    grid = (N // Nb,)

    weight_bytes = 2 * 2 * (Cin * mid + 9 * mid * mid + mid * cexp
                            + (Cin * cexp if has_shortcut else 0)) + 2 * 4 * 4 * cmax
    # Sized to the real working set; capped at 56 MiB (safe on v7x's 64 MiB VMEM).
    vmem_limit = int(min(56 << 20, max(32 << 20, 2 * Nb * per_img + 2 * weight_bytes)))

    inputs = [x, p["w1"], p["w2"], p["w3"]]
    in_specs = [
        pl.BlockSpec((Nb, H, W, Cin), lambda n: (n, 0, 0, 0)),
        pl.BlockSpec((Cin, mid), lambda n: (0, 0)),
        pl.BlockSpec((3, 3, mid, mid), lambda n: (0, 0, 0, 0)),
        pl.BlockSpec((mid, cexp), lambda n: (0, 0)),
    ]
    if has_shortcut:
        inputs.append(p["wsc"])
        in_specs.append(pl.BlockSpec((Cin, cexp), lambda n: (0, 0)))
    inputs.append(bias_pack)
    in_specs.append(pl.BlockSpec((4, cmax), lambda n: (0, 0)))

    kern = functools.partial(_bottleneck_kernel, stride, has_shortcut)
    out = pl.pallas_call(
        kern,
        out_shape=jax.ShapeDtypeStruct((N, Ho, Wo, cexp), bf16),
        grid=grid,
        in_specs=in_specs,
        out_specs=pl.BlockSpec((Nb, Ho, Wo, cexp), lambda n: (n, 0, 0, 0)),
        scratch_shapes=[
            # Zero-bordered h1 with interior at padded column 8 (sublane-aligned).
            pltpu.VMEM((Nb, H + 2, W + 16, mid), bf16),
        ],
        compiler_params=pltpu.CompilerParams(
            dimension_semantics=("parallel",),
            vmem_limit_bytes=vmem_limit),
    )(*inputs)
    return jnp.transpose(out, (0, 3, 1, 2))                   # -> NCHW (bf16)


# ---------------------------------------------------------------------------
# Pure-JAX reference (same BN folding / bf16 rounding points for a tight check)
# ---------------------------------------------------------------------------
def bottleneck_reference(x_nchw, params, stride=1):
    bf16 = jnp.bfloat16
    Cin = x_nchw.shape[1]
    p = _fold_params(params, Cin, stride)
    x = jnp.transpose(x_nchw, (0, 2, 3, 1)).astype(bf16)

    def conv(h, w_hwio, s, pad):
        return jax.lax.conv_general_dilated(
            h, w_hwio, (s, s), [(pad, pad)] * 2,
            dimension_numbers=("NHWC", "HWIO", "NHWC"),
            preferred_element_type=jnp.float32)

    h = jax.nn.relu(conv(x, p["w1"][None, None], 1, 0) + p["b1"]).astype(bf16)
    h = jax.nn.relu(conv(h, p["w2"], stride, 1) + p["b2"]).astype(bf16)
    h = conv(h, p["w3"][None, None], 1, 0) + p["b3"]
    if p["has_shortcut"]:
        sc = conv(x, p["wsc"][None, None], stride, 0) + p["bsc"]
    else:
        sc = x.astype(jnp.float32)
    out = jax.nn.relu(h + sc).astype(bf16)
    return jnp.transpose(out, (0, 3, 1, 2))


# ---------------------------------------------------------------------------
if __name__ == "__main__":
    key = jax.random.PRNGKey(0)
    k_x, k_p, k_x2, k_p2 = jax.random.split(key, 4)

    # Projection-shortcut block (like the module when channels change).
    N, Cin, H, W = 4, 16, 16, 16
    out_channels = 8                     # mid=8, cexp=32
    x = jax.random.normal(k_x, (N, Cin, H, W), jnp.float32)
    params = init_bottleneck_params(k_p, Cin, out_channels)
    for stride in (1, 2):
        out = jax.block_until_ready(bottleneck_forward(x, params, stride=stride))
        ref = jax.block_until_ready(bottleneck_reference(x, params, stride=stride))
        np.testing.assert_allclose(np.asarray(out, np.float32),
                                   np.asarray(ref, np.float32),
                                   rtol=2e-2, atol=2e-2)

    # Identity-shortcut block (stride 1, in_channels == expansion * out_channels).
    N2, Cin2 = 2, 32
    x2 = jax.random.normal(k_x2, (N2, Cin2, H, W), jnp.float32)
    params2 = init_bottleneck_params(k_p2, Cin2, out_channels)
    out2 = jax.block_until_ready(bottleneck_forward(x2, params2, stride=1))
    ref2 = jax.block_until_ready(bottleneck_reference(x2, params2, stride=1))
    np.testing.assert_allclose(np.asarray(out2, np.float32),
                               np.asarray(ref2, np.float32),
                               rtol=2e-2, atol=2e-2)

    print("KERNEL_OK")
</pallas_src>

<mosaic_0001>
module attributes {stable_mosaic.version = 11 : i64} {
  func.func @_bottleneck_kernel(%arg0: i32, %arg1: memref<2x16x16x16xbf16, #tpu.memory_space<vmem>>, %arg2: memref<16x8xbf16, #tpu.memory_space<vmem>>, %arg3: memref<3x3x8x8xbf16, #tpu.memory_space<vmem>>, %arg4: memref<8x32xbf16, #tpu.memory_space<vmem>>, %arg5: memref<16x32xbf16, #tpu.memory_space<vmem>>, %arg6: memref<4x32xf32, #tpu.memory_space<vmem>>, %arg7: memref<2x16x16x32xbf16, #tpu.memory_space<vmem>>, %arg8: memref<2x18x32x8xbf16, #tpu.memory_space<vmem>>) attributes {dimension_semantics = [#tpu.dimension_semantics<parallel>], iteration_bounds = array<i64: 2>, scalar_prefetch = 0 : i64, scratch_operands = 1 : i64, tpu.core_type = #tpu.core_type<tc>, window_params = [{transform_indices = @transform_0, window_bounds = array<i64: 2, 16, 16, 16>}, {pipeline_mode = #tpu.pipeline_mode<synchronous>, transform_indices = @transform_1, window_bounds = array<i64: 16, 8>}, {pipeline_mode = #tpu.pipeline_mode<synchronous>, transform_indices = @transform_2, window_bounds = array<i64: 3, 3, 8, 8>}, {pipeline_mode = #tpu.pipeline_mode<synchronous>, transform_indices = @transform_3, window_bounds = array<i64: 8, 32>}, {pipeline_mode = #tpu.pipeline_mode<synchronous>, transform_indices = @transform_4, window_bounds = array<i64: 16, 32>}, {pipeline_mode = #tpu.pipeline_mode<synchronous>, transform_indices = @transform_5, window_bounds = array<i64: 4, 32>}, {transform_indices = @transform_6, window_bounds = array<i64: 2, 16, 16, 32>}]} {
    %c0 = arith.constant 0 : index
    %c0_0 = arith.constant 0 : index
    %0 = vector.load %arg6[%c0, %c0_0] : memref<4x32xf32, #tpu.memory_space<vmem>>, vector<4x32xf32>
    %1 = vector.extract_strided_slice %0 {offsets = [0, 0], sizes = [1, 8], strides = [1, 1]} : vector<4x32xf32> to vector<1x8xf32>
    %2 = vector.extract_strided_slice %0 {offsets = [1, 0], sizes = [1, 8], strides = [1, 1]} : vector<4x32xf32> to vector<1x8xf32>
    %3 = vector.extract_strided_slice %0 {offsets = [2, 0], sizes = [1, 32], strides = [1, 1]} : vector<4x32xf32> to vector<1x32xf32>
    %c0_1 = arith.constant 0 : index
    %c0_2 = arith.constant 0 : index
    %c0_3 = arith.constant 0 : index
    %c0_4 = arith.constant 0 : index
    %4 = vector.load %arg1[%c0_1, %c0_2, %c0_3, %c0_4] : memref<2x16x16x16xbf16, #tpu.memory_space<vmem>>, vector<2x16x16x16xbf16>
    %5 = vector.shape_cast %4 : vector<2x16x16x16xbf16> to vector<512x16xbf16>
    %c0_5 = arith.constant 0 : index
    %c0_6 = arith.constant 0 : index
    %6 = vector.load %arg2[%c0_5, %c0_6] : memref<16x8xbf16, #tpu.memory_space<vmem>>, vector<16x8xbf16>
    %cst = arith.constant dense<0.000000e+00> : vector<512x8xf32>
    %7 = tpu.matmul %5, %6, %cst {dimension_numbers = #tpu.dot_dimension_numbers<[1], [0], [0], [1], [0, 0, 1, 1], [], []>} : vector<512x16xbf16>, vector<16x8xbf16>, vector<512x8xf32> -> vector<512x8xf32>
    %8 = vector.broadcast %1 : vector<1x8xf32> to vector<512x8xf32>
    %9 = arith.addf %7, %8 : vector<512x8xf32>
    %cst_7 = arith.constant 0.000000e+00 : f32
    %10 = vector.broadcast %cst_7 : f32 to vector<512x8xf32>
    %11 = arith.maximumf %9, %10 : vector<512x8xf32>
    %cst_8 = arith.constant 0.000000e+00 : bf16
    %12 = vector.broadcast %cst_8 : bf16 to vector<2x1x18x8xbf16>
    %cst_9 = arith.constant 0.000000e+00 : bf16
    %13 = vector.broadcast %cst_9 : bf16 to vector<2x16x1x8xbf16>
    %c0_10 = arith.constant 0 : index
    %c0_11 = arith.constant 0 : index
    %c7 = arith.constant 7 : index
    %c0_12 = arith.constant 0 : index
    %14 = vector.load %arg8[%c0_10, %c0_11, %c7, %c0_12] : memref<2x18x32x8xbf16, #tpu.memory_space<vmem>>, vector<2x1x18x8xbf16>
    tpu.vector_store %arg8[%c0_10, %c0_11, %c7, %c0_12], %12 {strides = array<i32>} : memref<2x18x32x8xbf16, #tpu.memory_space<vmem>>, vector<2x1x18x8xbf16>,
    %c0_13 = arith.constant 0 : index
    %c17 = arith.constant 17 : index
    %c7_14 = arith.constant 7 : index
    %c0_15 = arith.constant 0 : index
    %15 = vector.load %arg8[%c0_13, %c17, %c7_14, %c0_15] : memref<2x18x32x8xbf16, #tpu.memory_space<vmem>>, vector<2x1x18x8xbf16>
    tpu.vector_store %arg8[%c0_13, %c17, %c7_14, %c0_15], %12 {strides = array<i32>} : memref<2x18x32x8xbf16, #tpu.memory_space<vmem>>, vector<2x1x18x8xbf16>,
    %c0_16 = arith.constant 0 : index
    %c1 = arith.constant 1 : index
    %c7_17 = arith.constant 7 : index
    %c0_18 = arith.constant 0 : index
    %16 = vector.load %arg8[%c0_16, %c1, %c7_17, %c0_18] : memref<2x18x32x8xbf16, #tpu.memory_space<vmem>>, vector<2x16x1x8xbf16>
    tpu.vector_store %arg8[%c0_16, %c1, %c7_17, %c0_18], %13 {strides = array<i32>} : memref<2x18x32x8xbf16, #tpu.memory_space<vmem>>, vector<2x16x1x8xbf16>,
    %c0_19 = arith.constant 0 : index
    %c1_20 = arith.constant 1 : index
    %c24 = arith.constant 24 : index
    %c0_21 = arith.constant 0 : index
    %17 = vector.load %arg8[%c0_19, %c1_20, %c24, %c0_21] : memref<2x18x32x8xbf16, #tpu.memory_space<vmem>>, vector<2x16x1x8xbf16>
    tpu.vector_store %arg8[%c0_19, %c1_20, %c24, %c0_21], %13 {strides = array<i32>} : memref<2x18x32x8xbf16, #tpu.memory_space<vmem>>, vector<2x16x1x8xbf16>,
    %18 = vector.shape_cast %11 : vector<512x8xf32> to vector<2x16x16x8xf32>
    %19 = arith.truncf %18 : vector<2x16x16x8xf32> to vector<2x16x16x8xbf16>
    %c0_22 = arith.constant 0 : index
    %c1_23 = arith.constant 1 : index
    %c8 = arith.constant 8 : index
    %c0_24 = arith.constant 0 : index
    %20 = vector.load %arg8[%c0_22, %c1_23, %c8, %c0_24] : memref<2x18x32x8xbf16, #tpu.memory_space<vmem>>, vector<2x16x16x8xbf16>
    tpu.vector_store %arg8[%c0_22, %c1_23, %c8, %c0_24], %19 {strides = array<i32>} : memref<2x18x32x8xbf16, #tpu.memory_space<vmem>>, vector<2x16x16x8xbf16>,
    %c0_25 = arith.constant 0 : index
    %c0_26 = arith.constant 0 : index
    %c0_27 = arith.constant 0 : index
    %c0_28 = arith.constant 0 : index
    %21 = vector.load %arg3[%c0_25, %c0_26, %c0_27, %c0_28] : memref<3x3x8x8xbf16, #tpu.memory_space<vmem>>, vector<3x3x8x8xbf16>
    %c0_29 = arith.constant 0 : index
    %c0_30 = arith.constant 0 : index
    %c7_31 = arith.constant 7 : index
    %c0_32 = arith.constant 0 : index
    %22 = vector.load %arg8[%c0_29, %c0_30, %c7_31, %c0_32] : memref<2x18x32x8xbf16, #tpu.memory_space<vmem>>, vector<2x16x16x8xbf16>
    %23 = vector.shape_cast %22 : vector<2x16x16x8xbf16> to vector<512x8xbf16>
    %24 = vector.extract_strided_slice %21 {offsets = [0, 0, 0, 0], sizes = [1, 1, 8, 8], strides = [1, 1, 1, 1]} : vector<3x3x8x8xbf16> to vector<1x1x8x8xbf16>
    %25 = vector.shape_cast %24 : vector<1x1x8x8xbf16> to vector<8x8xbf16>
    %cst_33 = arith.constant dense<0.000000e+00> : vector<512x8xf32>
    %26 = tpu.matmul %23, %25, %cst_33 {dimension_numbers = #tpu.dot_dimension_numbers<[1], [0], [0], [1], [0, 0, 1, 1], [], []>} : vector<512x8xbf16>, vector<8x8xbf16>, vector<512x8xf32> -> vector<512x8xf32>
    %c0_34 = arith.constant 0 : index
    %c0_35 = arith.constant 0 : index
    %c8_36 = arith.constant 8 : index
    %c0_37 = arith.constant 0 : index
    %27 = vector.load %arg8[%c0_34, %c0_35, %c8_36, %c0_37] : memref<2x18x32x8xbf16, #tpu.memory_space<vmem>>, vector<2x16x16x8xbf16>
    %28 = vector.shape_cast %27 : vector<2x16x16x8xbf16> to vector<512x8xbf16>
    %29 = vector.extract_strided_slice %21 {offsets = [0, 1, 0, 0], sizes = [1, 1, 8, 8], strides = [1, 1, 1, 1]} : vector<3x3x8x8xbf16> to vector<1x1x8x8xbf16>
    %30 = vector.shape_cast %29 : vector<1x1x8x8xbf16> to vector<8x8xbf16>
    %cst_38 = arith.constant dense<0.000000e+00> : vector<512x8xf32>
    %31 = tpu.matmul %28, %30, %cst_38 {dimension_numbers = #tpu.dot_dimension_numbers<[1], [0], [0], [1], [0, 0, 1, 1], [], []>} : vector<512x8xbf16>, vector<8x8xbf16>, vector<512x8xf32> -> vector<512x8xf32>
    %32 = arith.addf %26, %31 : vector<512x8xf32>
    %c0_39 = arith.constant 0 : index
    %c0_40 = arith.constant 0 : index
    %c9 = arith.constant 9 : index
    %c0_41 = arith.constant 0 : index
    %33 = vector.load %arg8[%c0_39, %c0_40, %c9, %c0_41] : memref<2x18x32x8xbf16, #tpu.memory_space<vmem>>, vector<2x16x16x8xbf16>
    %34 = vector.shape_cast %33 : vector<2x16x16x8xbf16> to vector<512x8xbf16>
    %35 = vector.extract_strided_slice %21 {offsets = [0, 2, 0, 0], sizes = [1, 1, 8, 8], strides = [1, 1, 1, 1]} : vector<3x3x8x8xbf16> to vector<1x1x8x8xbf16>
    %36 = vector.shape_cast %35 : vector<1x1x8x8xbf16> to vector<8x8xbf16>
    %cst_42 = arith.constant dense<0.000000e+00> : vector<512x8xf32>
    %37 = tpu.matmul %34, %36, %cst_42 {dimension_numbers = #tpu.dot_dimension_numbers<[1], [0], [0], [1], [0, 0, 1, 1], [], []>} : vector<512x8xbf16>, vector<8x8xbf16>, vector<512x8xf32> -> vector<512x8xf32>
    %38 = arith.addf %32, %37 : vector<512x8xf32>
    %c0_43 = arith.constant 0 : index
    %c1_44 = arith.constant 1 : index
    %c7_45 = arith.constant 7 : index
    %c0_46 = arith.constant 0 : index
    %39 = vector.load %arg8[%c0_43, %c1_44, %c7_45, %c0_46] : memref<2x18x32x8xbf16, #tpu.memory_space<vmem>>, vector<2x16x16x8xbf16>
    %40 = vector.shape_cast %39 : vector<2x16x16x8xbf16> to vector<512x8xbf16>
    %41 = vector.extract_strided_slice %21 {offsets = [1, 0, 0, 0], sizes = [1, 1, 8, 8], strides = [1, 1, 1, 1]} : vector<3x3x8x8xbf16> to vector<1x1x8x8xbf16>
    %42 = vector.shape_cast %41 : vector<1x1x8x8xbf16> to vector<8x8xbf16>
    %cst_47 = arith.constant dense<0.000000e+00> : vector<512x8xf32>
    %43 = tpu.matmul %40, %42, %cst_47 {dimension_numbers = #tpu.dot_dimension_numbers<[1], [0], [0], [1], [0, 0, 1, 1], [], []>} : vector<512x8xbf16>, vector<8x8xbf16>, vector<512x8xf32> -> vector<512x8xf32>
    %44 = arith.addf %38, %43 : vector<512x8xf32>
    %c0_48 = arith.constant 0 : index
    %c1_49 = arith.constant 1 : index
    %c8_50 = arith.constant 8 : index
    %c0_51 = arith.constant 0 : index
    %45 = vector.load %arg8[%c0_48, %c1_49, %c8_50, %c0_51] : memref<2x18x32x8xbf16, #tpu.memory_space<vmem>>, vector<2x16x16x8xbf16>
    %46 = vector.shape_cast %45 : vector<2x16x16x8xbf16> to vector<512x8xbf16>
    %47 = vector.extract_strided_slice %21 {offsets = [1, 1, 0, 0], sizes = [1, 1, 8, 8], strides = [1, 1, 1, 1]} : vector<3x3x8x8xbf16> to vector<1x1x8x8xbf16>
    %48 = vector.shape_cast %47 : vector<1x1x8x8xbf16> to vector<8x8xbf16>
    %cst_52 = arith.constant dense<0.000000e+00> : vector<512x8xf32>
    %49 = tpu.matmul %46, %48, %cst_52 {dimension_numbers = #tpu.dot_dimension_numbers<[1], [0], [0], [1], [0, 0, 1, 1], [], []>} : vector<512x8xbf16>, vector<8x8xbf16>, vector<512x8xf32> -> vector<512x8xf32>
    %50 = arith.addf %44, %49 : vector<512x8xf32>
    %c0_53 = arith.constant 0 : index
    %c1_54 = arith.constant 1 : index
    %c9_55 = arith.constant 9 : index
    %c0_56 = arith.constant 0 : index
    %51 = vector.load %arg8[%c0_53, %c1_54, %c9_55, %c0_56] : memref<2x18x32x8xbf16, #tpu.memory_space<vmem>>, vector<2x16x16x8xbf16>
    %52 = vector.shape_cast %51 : vector<2x16x16x8xbf16> to vector<512x8xbf16>
    %53 = vector.extract_strided_slice %21 {offsets = [1, 2, 0, 0], sizes = [1, 1, 8, 8], strides = [1, 1, 1, 1]} : vector<3x3x8x8xbf16> to vector<1x1x8x8xbf16>
    %54 = vector.shape_cast %53 : vector<1x1x8x8xbf16> to vector<8x8xbf16>
    %cst_57 = arith.constant dense<0.000000e+00> : vector<512x8xf32>
    %55 = tpu.matmul %52, %54, %cst_57 {dimension_numbers = #tpu.dot_dimension_numbers<[1], [0], [0], [1], [0, 0, 1, 1], [], []>} : vector<512x8xbf16>, vector<8x8xbf16>, vector<512x8xf32> -> vector<512x8xf32>
    %56 = arith.addf %50, %55 : vector<512x8xf32>
    %c0_58 = arith.constant 0 : index
    %c2 = arith.constant 2 : index
    %c7_59 = arith.constant 7 : index
    %c0_60 = arith.constant 0 : index
    %57 = vector.load %arg8[%c0_58, %c2, %c7_59, %c0_60] : memref<2x18x32x8xbf16, #tpu.memory_space<vmem>>, vector<2x16x16x8xbf16>
    %58 = vector.shape_cast %57 : vector<2x16x16x8xbf16> to vector<512x8xbf16>
    %59 = vector.extract_strided_slice %21 {offsets = [2, 0, 0, 0], sizes = [1, 1, 8, 8], strides = [1, 1, 1, 1]} : vector<3x3x8x8xbf16> to vector<1x1x8x8xbf16>
    %60 = vector.shape_cast %59 : vector<1x1x8x8xbf16> to vector<8x8xbf16>
    %cst_61 = arith.constant dense<0.000000e+00> : vector<512x8xf32>
    %61 = tpu.matmul %58, %60, %cst_61 {dimension_numbers = #tpu.dot_dimension_numbers<[1], [0], [0], [1], [0, 0, 1, 1], [], []>} : vector<512x8xbf16>, vector<8x8xbf16>, vector<512x8xf32> -> vector<512x8xf32>
    %62 = arith.addf %56, %61 : vector<512x8xf32>
    %c0_62 = arith.constant 0 : index
    %c2_63 = arith.constant 2 : index
    %c8_64 = arith.constant 8 : index
    %c0_65 = arith.constant 0 : index
    %63 = vector.load %arg8[%c0_62, %c2_63, %c8_64, %c0_65] : memref<2x18x32x8xbf16, #tpu.memory_space<vmem>>, vector<2x16x16x8xbf16>
    %64 = vector.shape_cast %63 : vector<2x16x16x8xbf16> to vector<512x8xbf16>
    %65 = vector.extract_strided_slice %21 {offsets = [2, 1, 0, 0], sizes = [1, 1, 8, 8], strides = [1, 1, 1, 1]} : vector<3x3x8x8xbf16> to vector<1x1x8x8xbf16>
    %66 = vector.shape_cast %65 : vector<1x1x8x8xbf16> to vector<8x8xbf16>
    %cst_66 = arith.constant dense<0.000000e+00> : vector<512x8xf32>
    %67 = tpu.matmul %64, %66, %cst_66 {dimension_numbers = #tpu.dot_dimension_numbers<[1], [0], [0], [1], [0, 0, 1, 1], [], []>} : vector<512x8xbf16>, vector<8x8xbf16>, vector<512x8xf32> -> vector<512x8xf32>
    %68 = arith.addf %62, %67 : vector<512x8xf32>
    %c0_67 = arith.constant 0 : index
    %c2_68 = arith.constant 2 : index
    %c9_69 = arith.constant 9 : index
    %c0_70 = arith.constant 0 : index
    %69 = vector.load %arg8[%c0_67, %c2_68, %c9_69, %c0_70] : memref<2x18x32x8xbf16, #tpu.memory_space<vmem>>, vector<2x16x16x8xbf16>
    %70 = vector.shape_cast %69 : vector<2x16x16x8xbf16> to vector<512x8xbf16>
    %71 = vector.extract_strided_slice %21 {offsets = [2, 2, 0, 0], sizes = [1, 1, 8, 8], strides = [1, 1, 1, 1]} : vector<3x3x8x8xbf16> to vector<1x1x8x8xbf16>
    %72 = vector.shape_cast %71 : vector<1x1x8x8xbf16> to vector<8x8xbf16>
    %cst_71 = arith.constant dense<0.000000e+00> : vector<512x8xf32>
    %73 = tpu.matmul %70, %72, %cst_71 {dimension_numbers = #tpu.dot_dimension_numbers<[1], [0], [0], [1], [0, 0, 1, 1], [], []>} : vector<512x8xbf16>, vector<8x8xbf16>, vector<512x8xf32> -> vector<512x8xf32>
    %74 = arith.addf %68, %73 : vector<512x8xf32>
    %75 = vector.broadcast %2 : vector<1x8xf32> to vector<512x8xf32>
    %76 = arith.addf %74, %75 : vector<512x8xf32>
    %cst_72 = arith.constant 0.000000e+00 : f32
    %77 = vector.broadcast %cst_72 : f32 to vector<512x8xf32>
    %78 = arith.maximumf %76, %77 : vector<512x8xf32>
    %79 = arith.truncf %78 : vector<512x8xf32> to vector<512x8xbf16>
    %c0_73 = arith.constant 0 : index
    %c0_74 = arith.constant 0 : index
    %80 = vector.load %arg4[%c0_73, %c0_74] : memref<8x32xbf16, #tpu.memory_space<vmem>>, vector<8x32xbf16>
    %cst_75 = arith.constant dense<0.000000e+00> : vector<512x32xf32>
    %81 = tpu.matmul %79, %80, %cst_75 {dimension_numbers = #tpu.dot_dimension_numbers<[1], [0], [0], [1], [0, 0, 1, 1], [], []>} : vector<512x8xbf16>, vector<8x32xbf16>, vector<512x32xf32> -> vector<512x32xf32>
    %82 = vector.broadcast %3 : vector<1x32xf32> to vector<512x32xf32>
    %83 = arith.addf %81, %82 : vector<512x32xf32>
    %84 = vector.extract_strided_slice %0 {offsets = [3, 0], sizes = [1, 32], strides = [1, 1]} : vector<4x32xf32> to vector<1x32xf32>
    %85 = vector.shape_cast %4 : vector<2x16x16x16xbf16> to vector<512x16xbf16>
    %c0_76 = arith.constant 0 : index
    %c0_77 = arith.constant 0 : index
    %86 = vector.load %arg5[%c0_76, %c0_77] : memref<16x32xbf16, #tpu.memory_space<vmem>>, vector<16x32xbf16>
    %cst_78 = arith.constant dense<0.000000e+00> : vector<512x32xf32>
    %87 = tpu.matmul %85, %86, %cst_78 {dimension_numbers = #tpu.dot_dimension_numbers<[1], [0], [0], [1], [0, 0, 1, 1], [], []>} : vector<512x16xbf16>, vector<16x32xbf16>, vector<512x32xf32> -> vector<512x32xf32>
    %88 = vector.broadcast %84 : vector<1x32xf32> to vector<512x32xf32>
    %89 = arith.addf %87, %88 : vector<512x32xf32>
    %90 = arith.addf %83, %89 : vector<512x32xf32>
    %cst_79 = arith.constant 0.000000e+00 : f32
    %91 = vector.broadcast %cst_79 : f32 to vector<512x32xf32>
    %92 = arith.maximumf %90, %91 : vector<512x32xf32>
    %93 = vector.shape_cast %92 : vector<512x32xf32> to vector<2x16x16x32xf32>
    %94 = arith.truncf %93 : vector<2x16x16x32xf32> to vector<2x16x16x32xbf16>
    %c0_80 = arith.constant 0 : index
    %c0_81 = arith.constant 0 : index
    %c0_82 = arith.constant 0 : index
    %c0_83 = arith.constant 0 : index
    %95 = vector.load %arg7[%c0_80, %c0_81, %c0_82, %c0_83] : memref<2x16x16x32xbf16, #tpu.memory_space<vmem>>, vector<2x16x16x32xbf16>
    tpu.vector_store %arg7[%c0_80, %c0_81, %c0_82, %c0_83], %94 {strides = array<i32>} : memref<2x16x16x32xbf16, #tpu.memory_space<vmem>>, vector<2x16x16x32xbf16>,
    return
  }
  func.func @transform_0(%arg0: i32) -> (i32, i32, i32, i32) {
    %c0_i32 = arith.constant 0 : i32
    %c0_i32_0 = arith.constant 0 : i32
    %c0_i32_1 = arith.constant 0 : i32
    %c0_i32_2 = arith.constant 0 : i32
    return %arg0, %c0_i32, %c0_i32_0, %c0_i32_1 : i32, i32, i32, i32
  }
  func.func @transform_1(%arg0: i32) -> (i32, i32) {
    %c0_i32 = arith.constant 0 : i32
    %c0_i32_0 = arith.constant 0 : i32
    %c0_i32_1 = arith.constant 0 : i32
    return %c0_i32, %c0_i32_0 : i32, i32
  }
  func.func @transform_2(%arg0: i32) -> (i32, i32, i32, i32) {
    %c0_i32 = arith.constant 0 : i32
    %c0_i32_0 = arith.constant 0 : i32
    %c0_i32_1 = arith.constant 0 : i32
    %c0_i32_2 = arith.constant 0 : i32
    %c0_i32_3 = arith.constant 0 : i32
    return %c0_i32, %c0_i32_0, %c0_i32_1, %c0_i32_2 : i32, i32, i32, i32
  }
  func.func @transform_3(%arg0: i32) -> (i32, i32) {
    %c0_i32 = arith.constant 0 : i32
    %c0_i32_0 = arith.constant 0 : i32
    %c0_i32_1 = arith.constant 0 : i32
    return %c0_i32, %c0_i32_0 : i32, i32
  }
  func.func @transform_4(%arg0: i32) -> (i32, i32) {
    %c0_i32 = arith.constant 0 : i32
    %c0_i32_0 = arith.constant 0 : i32
    %c0_i32_1 = arith.constant 0 : i32
    return %c0_i32, %c0_i32_0 : i32, i32
  }
  func.func @transform_5(%arg0: i32) -> (i32, i32) {
    %c0_i32 = arith.constant 0 : i32
    %c0_i32_0 = arith.constant 0 : i32
    %c0_i32_1 = arith.constant 0 : i32
    return %c0_i32, %c0_i32_0 : i32, i32
  }
  func.func @transform_6(%arg0: i32) -> (i32, i32, i32, i32) {
    %c0_i32 = arith.constant 0 : i32
    %c0_i32_0 = arith.constant 0 : i32
    %c0_i32_1 = arith.constant 0 : i32
    %c0_i32_2 = arith.constant 0 : i32
    return %arg0, %c0_i32, %c0_i32_0, %c0_i32_1 : i32, i32, i32, i32
  }
}

</mosaic_0001>

<bundles_post_ra>
// kernel: tpu_custom_call.1
= control target key start
LH: loop header
LB: loop body
LE: loop exit
PB: predicated region body
PF: predicated region fallthrough
CT: control target
= control target key end

     0   :  { %11 = vsyncpa [#allocation4], 0  ;;  %s16194_s0 = inlined_call_operand.hbm [shape: bf16[4,16,16,16], index: 0, kind: input, shape index: {}]   ;;  %s16195_s1 = inlined_call_operand.vmem [shape: bf16[16,8], index: 1, kind: input, shape index: {}]   ;;  %s16196_s2 = inlined_call_operand.hbm [shape: bf16[3,3,8,8], index: 2, kind: input, shape index: {}]   ;;  %s16197_s3 = inlined_call_operand.vmem [shape: bf16[8,32], index: 3, kind: input, shape index: {}]   ;;  %s16198_s4 = inlined_call_operand.vmem [shape: bf16[16,32], index: 4, kind: input, shape index: {}]   ;;  %s16199_s5 = inlined_call_operand.vmem [shape: f32[4,32], index: 5, kind: input, shape index: {}]   ;;  %s16200_s6 = inlined_call_operand.hbm [shape: bf16[4,16,16,32], index: 6, kind: output, shape index: {}]  }
   0x1   :  { %13 = vsyncpa [#allocation4 + $0x1], 0 }
   0x2   :  { %14 = vsyncpa [#allocation7], 0 }
   0x3   :  { %15 = vsyncpa [#allocation5], 0 }
   0x4   :  { %17 = vsyncpa [#allocation5 + $0x1], 0  ;;  %s13789_s21 = smov 0   ;;  %s13791_s22 = smov 0  }
   0x5   :  { %s13793_s23 = smov 0   ;;  %s13795_s24 = smov 0  }
   0x6 LB: > { %s13810_s25 = sadd.s32 4294967295, %s13745_s24   ;;  %s10885_s26 = sadd.s32 4294967294, %s13745_s24   ;;  %s13745_s24 = sphi %s13795_s24, %s16342_s24   ;;  %s13741_s23 = sphi %s13793_s23, %s16341_s23   ;;  %s13737_s22 = sphi %s13791_s22, %s16340_s22   ;;  %s13733_s21 = sphi %s13789_s21, %s16339_s21  }
   0x7   : > { %p43_p0 = scmp.ne.s32.totalorder %s13737_s22, %s13733_s21  ;;  %p16201_p1 = scmp.eq.s32.totalorder %s13810_s25, 0 }
   0x8   : > { %p178_p3 = scmp.eq.s32.totalorder %s10885_s26, 1  ;;  %p10886_p5 = scmp.ge.s32.totalorder %s13745_s24, 1 }
   0x9   : > { %p13819_p4 = por %p16201_p1, %p43_p0  ;;  %p185_p7 = scmp.lt.s32.totalorder %s13745_s24, 3 }
   0xa   : > { %p13824_p6 = por %p178_p3, %p43_p0  ;;  %s13747_s30 = smov [#allocation6]  }
   0xb   : > { %s16204_s27 = scalar_select %p13819_p4, 1, 0 }
   0xc   : > { %s16205_s28 = scalar_select %p13824_p6, 1, 0 }
   0xd   : > { %p13829_p8 = pnand %p10886_p5, %p185_p7  ;;  %s200_s7 = sshll.u32 %s13747_s30, 4  ;;  %s13833_s7 = int_to_ptr.vmem [resolvable:$true] %s200_s7 }
   0xe   : > { %s13845_s9 = sadd.s32 1, %s13745_s24   ;;  %s30_s10 = sadd.s32 1, %s13741_s23 }
   0xf   : > { %s16206_s29 = scalar_select %p13829_p8, 1, 0 }
  0x10   : > { %p13363_p9 = pneg %p13829_p8  ;;  %s27_s11 = ssub.s32 %s13745_s24, %s13845_s9 }
  0x11   : > { %s13617_s14 = scalar_lea.hbm %s16196_s2, 576 }
  0x12   : > { %p13840_p11 = pnand %p13363_p9, %p16201_p1  ;;  %p13618_p12 = scmp.ne.s32.totalorder %s16196_s2, %s13617_s14 }
  0x13   : > { %p13624_p5 = scmp.lt.u32.totalorder %s13617_s14, %s16196_s2 }
  0x14   : > { %p13619_p13 = pneg %p13840_p11 }
  0x16   : > { %p13620_p0 = pnand %p13619_p13, %p13618_p12 }
  0x18   : > { %p13621_p3 = pneg %p13620_p0 }
  0x1a   : > { %p13626_p7 = pnand %p13624_p5, %p13621_p3 }
  0x1c   : > { %13629 = shalt.err (!%p13626_p7)
}
  0x1d   : > { %s13630_s19 = scalar_lea.vmem %s13833_s7, 576  ;;  %p13638_p2 = scmp.lt.s32.totalorder %s13833_s7, %s13833_s7 }
  0x1e   : > { %p13631_p9 = scmp.ne.s32.totalorder %s13833_s7, %s13630_s19  ;;  %p13639_p6 = scmp.lt.s32.totalorder %s13630_s19, %s13630_s19 }
  0x20   : > { %p13633_p10 = pnand %p13631_p9, %p13619_p13  ;;  %p13640_p4 = por %p13639_p6, %p13638_p2 }
  0x22   : > { %p13634_p1 = pneg %p13633_p10 }
  0x24   : > { %p13641_p8 = pnand %p13640_p4, %p13634_p1 }
  0x26   : > { %13644 = shalt.err (!%p13641_p8)
}
  0x27   : > { %s13748_s20 = smov 64   ;;  %s13749_s26 = smov 4  }
  0x28   : > { %13366 = dma.hbm_to_vmem [thread:$0]  (!%p13840_p11), %s16196_s2, 576, %s13833_s7, [#allocation7], %s13748_s20, %s13748_s20, %s13749_s26  }
  0x29   : > { %p28_p1 = scmp.eq.s32.totalorder %s27_s11, 0  ;;  %p37_p2 = scmp.ne.s32.totalorder %s13741_s23, %s13737_s22 }
  0x2a   : > { %p38_p4 = scmp.eq.s32.totalorder %s13745_s24, 0  ;;  %p13376_p6 = scmp.lt.s32.totalorder %s13745_s24, 2 }
  0x2b   : > { %s13879_s13 = scalar_select %p28_p1, %s13741_s23, %s30_s10  }
  0x2c   : > { %p39_p8 = por %p38_p4, %p37_p2  ;;  %p16208_p10 = scmp.eq.s32.totalorder %s13810_s25, 1 }
  0x2d   : > { %s223_s8 = sand.u32 1, %s13741_s23   ;;  %s11386_s15 = sshll.u32 %s13745_s24, 12 }
  0x2e   : > { %p13883_p12 = por %p16208_p10, %p37_p2  ;;  %s10889_s16 = sshll.u32 %s223_s8, 8 }
  0x2f   : > { %s13892_s19 = scalar_lea.hbm %s16194_s0, %s11386_s15  ;;  %s227_s7 = scalar_lea.vmem [#allocation3], %s10889_s16 }
  0x30   : > { %s235_s10 = sshll.u32 %s227_s7, 4  ;;  %p13894_p11 = pnand %p13376_p6, %p39_p8  ;;  %s13898_s10 = int_to_ptr.vmem [resolvable:$true] %s235_s10 }
  0x31   : > { %s13900_s30 = scalar_lea.sflag [#allocation4], %s223_s8  ;;  %s13645_s12 = scalar_lea.hbm %s13892_s19, 4096 }
  0x32   : > { %p13646_p13 = scmp.ne.s32.totalorder %s13892_s19, %s13645_s12  ;;  %p13647_p0 = pneg %p13894_p11 }
  0x33   : > { %s13650_s17 = scalar_lea.hbm %s16194_s0, 8192  ;;  %p13651_p7 = scmp.lt.u32.totalorder %s13892_s19, %s16194_s0 }
  0x34   : > { %p13648_p3 = pnand %p13647_p0, %p13646_p13  ;;  %p13652_p9 = scmp.lt.u32.totalorder %s13650_s17, %s13645_s12 }
  0x35   : > { %p13654_p2 = scmp.lt.u32.totalorder %s13645_s12, %s13892_s19 }
  0x36   : > { %p13649_p5 = pneg %p13648_p3  ;;  %p13653_p1 = por %p13652_p9, %p13651_p7 }
  0x38   : > { %p13655_p4 = por %p13654_p2, %p13653_p1 }
  0x3a   : > { %p13656_p6 = pnand %p13655_p4, %p13649_p5 }
  0x3c   : > { %13659 = shalt.err (!%p13656_p6)
}
  0x3d   : > { %s13660_s8 = scalar_lea.vmem %s13898_s10, 4096  ;;  %s13750_s15 = smov [#allocation3]  }
  0x3e   : > { %p13661_p8 = scmp.ne.s32.totalorder %s13898_s10, %s13660_s8  ;;  %s13665_s16 = sshll.u32 %s13750_s15, 4  ;;  %s13666_s16 = int_to_ptr.vmem [resolvable:$false] %s13665_s16 }
  0x3f   : > { %s13667_s18 = scalar_lea.vmem %s13666_s16, 8192  ;;  %p13668_p3 = scmp.lt.s32.totalorder %s13898_s10, %s13666_s16 }
  0x40   : > { %p13663_p10 = pnand %p13661_p8, %p13647_p0  ;;  %p13669_p7 = scmp.lt.s32.totalorder %s13667_s18, %s13660_s8 }
  0x42   : > { %p13664_p13 = pneg %p13663_p10  ;;  %p13670_p9 = por %p13669_p7, %p13668_p3 }
  0x44   : > { %p13671_p1 = pnand %p13670_p9, %p13664_p13 }
  0x46   : > { %13674 = shalt.err (!%p13671_p1)
}
  0x47   : > { %13370 = dma.hbm_to_vmem [thread:$0]  (!%p13894_p11), %s13892_s19, 4096, %s13898_s10, %s13900_s30, %s13748_s20, %s13748_s20, %s13749_s26  }
  0x48   : > { %p16211_p0 = scmp.ne.s32.totalorder %s16206_s29, 0 }
  0x4a   : > { %247 = sbr.rel (%p16211_p0) target bundleno = 1761 (0x6e1), region = 44 }
  0x51   : > { %s13934_s12 = sand.u32 1, %s13737_s22   ;;  %p16212_p5 = scmp.ne.s32.totalorder %s16204_s27, 0 }
  0x52   : > { %s10894_s17 = sshll.u32 %s13934_s12, 8  ;;  %s250_s7 = scalar_lea.sflag [#allocation4], %s13934_s12 }
  0x53   : > { %s13940_s11 = scalar_lea.vmem [#allocation3], %s10894_s17 }
  0x54   : > { %13720 = dma.done.wait (%p16212_p5), %s250_s7, 4096  }
  0x55   : > { %13722 = vsyncadd (%p16212_p5), %s250_s7, 4294963200  ;;  %p16213_p11 = scmp.eq.s32.totalorder %s13810_s25, 0 }
  0x57   : > { %13724 = dma.done.wait (%p16213_p11), [#allocation7], 576   ;;  %p16214_p2 = pmov %p16213_p11 }
  0x58   : > { %v13416_v0 = vld [vmem:[%s16195_s1] sm:$0xff]   ;;  %vm526_vm0 = vcmask 130048   ;;  %v13418_v2 = vld [vmem:[%s13940_s11 + $0x8] sm:$0xff]   ;;  %v13419_v3 = vld [vmem:[%s13940_s11 + $0x10] sm:$0xff]   ;;  %vm976_vm1 = vcmask 64515   ;;  %vm982_vm3 = vcmask 61440  }
  0x59   : > { %13726 = vsyncadd (%p16214_p2), [#allocation7], 4294966720  ;;  %v13417_v1 = vld [vmem:[%s13940_s11] sm:$0xff]   ;;  %11849 = vmatprep.subr.bf16.mxu0 %v13416_v0  ;;  %v13420_v4 = vld [vmem:[%s13940_s11 + $0x18] sm:$0xff]   ;;  %vm977_vm2 = vsmask.f32 7950 }
  0x5a   : > { %11850 = vmatpush3.bf16.msra.mxu0 %v13416_v0  ;;  %11851 = vmatprep.mubr.msk.bf16.mxu0 %vm526_vm0, %v13417_v1  ;;  %v13421_v5 = vld [vmem:[%s13940_s11 + $0x20] sm:$0xff]   ;;  %v13422_v6 = vld [vmem:[%s13940_s11 + $0x28] sm:$0xff]   ;;  %v13423_v7 = vld [vmem:[%s13940_s11 + $0x30] sm:$0xff]   ;;  %vm983_vm4 = vsmask.f32 4352  ;;  %vm1008_vm7 = vcmask 60419  }
  0x5b   : > { %v13424_v8 = vld [vmem:[%s13940_s11 + $0x38] sm:$0xff]   ;;  %v13425_v9 = vld [vmem:[%s13940_s11 + $0x40] sm:$0xff]   ;;  %v13426_v10 = vld [vmem:[%s13940_s11 + $0x48] sm:$0xff]   ;;  %vm2111_vm9 = vcmask 1043456   ;;  %vm2208_vm10 = vcmask 64512   ;;  %vm1332_vm11 = vcmask 64516  }
  0x5c   : > { %v13427_v11 = vld [vmem:[%s13940_s11 + $0x50] sm:$0xff]   ;;  %v13428_v12 = vld [vmem:[%s13940_s11 + $0x58] sm:$0xff]   ;;  %v13429_v13 = vld [vmem:[%s13940_s11 + $0x60] sm:$0xff]   ;;  %vm1334_vm12 = vcmask 60416   ;;  %vm1106_vm13 = vcmask 61444   ;;  %s15953_s18 = scalar_lea.vmem [#allocation8], %s10894_s17 }
  0x5d   : > { %11852 = vmatmul.mubr.msk.bf16.vlgmr.msra.gmra.mrb[0].mxu0 %vm526_vm0, %v13418_v2  ;;  %v13430_v14 = vld [vmem:[%s13940_s11 + $0x68] sm:$0xff]   ;;  %v13431_v15 = vld [vmem:[%s13940_s11 + $0x70] sm:$0xff]   ;;  %v13432_v16 = vld [vmem:[%s13940_s11 + $0x78] sm:$0xff]   ;;  %vm3018_vm15 = vsmask.f32 3328  ;;  %s11452_s17 = sshll.u32 %s13810_s25, 12 }
  0x5e   : > { %11855 = vmatprep.mubr.msk.bf16.mxu0 %vm526_vm0, %v13419_v3  ;;  %v13433_v17 = vld [vmem:[%s13940_s11 + $0x80] sm:$0xff]   ;;  %v13434_v18 = vld [vmem:[%s13940_s11 + $0x88] sm:$0xff]   ;;  %v13435_v19 = vld [vmem:[%s13940_s11 + $0x90] sm:$0xff]   ;;  %s10802_s7 = sshll.u32 %s15953_s18, 4  ;;  %s16142_s20 = scalar_lea.hbm %s16200_s6, %s11452_s17  ;;  %s16144_s7 = int_to_ptr.vmem [resolvable:$true] %s10802_s7 }
  0x5f   : > { %v13436_v20 = vld [vmem:[%s13940_s11 + $0x98] sm:$0xff]   ;;  %v13437_v21 = vld [vmem:[%s13940_s11 + $0xa0] sm:$0xff]   ;;  %v13438_v22 = vld [vmem:[%s13940_s11 + $0xa8] sm:$0xff]   ;;  %s10788_s25 = scalar_lea.sflag [#allocation5], %s13934_s12  ;;  %s13675_s27 = scalar_lea.vmem %s16144_s7, 4096 }
  0x60   : > { %v13439_v23 = vld [vmem:[%s13940_s11 + $0xb0] sm:$0xff]   ;;  %v13440_v24 = vld [vmem:[%s13940_s11 + $0xb8] sm:$0xff]   ;;  %v13441_v25 = vld [vmem:[%s13940_s11 + $0xc0] sm:$0xff]   ;;  %p13676_p4 = scmp.ne.s32.totalorder %s16144_s7, %s13675_s27  ;;  %s13751_s26 = smov [#allocation8]  }
  0x61   : > { %v13442_v26 = vld [vmem:[%s13940_s11 + $0xc8] sm:$0xff]   ;;  %vm14004_vm5 = vmand %vm976_vm1, %vm977_vm2  ;;  %v979_v28 = vld [vmem:[#allocation2] sm:$0xf8]  ;;  %s13679_s19 = sshll.u32 %s13751_s26, 4  ;;  %s13680_s19 = int_to_ptr.vmem [resolvable:$false] %s13679_s19 }
  0x62   : > { %v985_v29 = vld [vmem:[#allocation2 + $0x8] sm:$0x1f]  ;;  %v13443_v30 = vld [vmem:[%s13940_s11 + $0xd0] sm:$0xff]   ;;  %v980_v31 = vsel %vm14004_vm5, 0, %v979_v28  ;;  %vm14012_vm6 = vmand %vm982_vm3, %vm983_vm4  ;;  %p13677_p6 = pnand %p13676_p4, %p13883_p12  ;;  %s13681_s10 = scalar_lea.vmem %s13680_s19, 8192 }
  0x63   : > { %981 = vst [vmem:[#allocation2] sm:$0xf8] %v980_v31  ;;  %v986_v33 = vsel %vm14012_vm6, 0, %v985_v29  ;;  %vm14018_vm8 = vmand %vm1008_vm7, %vm977_vm2  ;;  %v1010_v35 = vld [vmem:[#allocation2 + $0x10] sm:$0x8]  ;;  %v13444_v39 = vld [vmem:[%s13940_s11 + $0xd8] sm:$0xff]   ;;  %v356_v31 = vlaneseq  ;;  %p13682_p10 = scmp.lt.s32.totalorder %s16144_s7, %s13680_s19  ;;  %p13683_p13 = scmp.lt.s32.totalorder %s13681_s10, %s13675_s27 }
  0x64   : > { %987 = vst [vmem:[#allocation2 + $0x8] sm:$0x1f] %v986_v33  ;;  %v1013_v36 = vld [vmem:[#allocation2 + $0x20] sm:$0x8]  ;;  %v1011_v37 = vsel %vm14018_vm8, 0, %v1010_v35  ;;  %v13446_v44 = vld [vmem:[%s13940_s11 + $0xe8] sm:$0xff]   ;;  %vm14716_vm14 = vmand %vm1106_vm13, %vm983_vm4  ;;  %p13678_p8 = pneg %p13677_p6 }
  0x65   : > { %11856 = vmatmul.mubr.msk.bf16.gmra.mrb[4].mxu0 %vm526_vm0, %v13420_v4  ;;  %v1014_v38 = vsel %vm14018_vm8, 0, %v1013_v36  ;;  %1012 = vst [vmem:[#allocation2 + $0x10] sm:$0x8] %v1011_v37  ;;  %v13445_v40 = vld [vmem:[%s13940_s11 + $0xe0] sm:$0xff]   ;;  %v1401_v43 = vld [vmem:[#allocation6 + $0xc] sm:$0xf]  ;;  %p13684_p3 = por %p13683_p13, %p13682_p10 }
  0x66   : > { %11859 = vmatprep.mubr.msk.bf16.mxu0 %vm526_vm0, %v13421_v5  ;;  %1015 = vst [vmem:[#allocation2 + $0x20] sm:$0x8] %v1014_v38  ;;  %v1399_v41 = vld [vmem:[#allocation6 + $0x4] sm:$0xf]  ;;  %13348 = vmatprep.subr.msk.bf16.mxu1 %vm2111_vm9, %v1401_v43  ;;  %v13447_v45 = vld [vmem:[%s13940_s11 + $0xf0] sm:$0xff]   ;;  %v4720_v46 = vsel %vm2111_vm9, %v1401_v43, 0 }
  0x67   : > { %13345 = vmatprep.subr.msk.bf16.mxu0 %vm2111_vm9, %v1399_v41  ;;  %v2307_v42 = vsel %vm2111_vm9, %v1399_v41, 0  ;;  %v1019_v47 = vld [vmem:[#allocation2 + $0x40] sm:$0x8]  ;;  %12114 = vmatpush3.bf16.msra.mxu1 %v4720_v46  ;;  %v1016_v48 = vld [vmem:[#allocation2 + $0x30] sm:$0x8]  ;;  %v13448_v55 = vld [vmem:[%s13940_s11 + $0xf8] sm:$0xff]   ;;  %p13685_p7 = pnand %p13684_p3, %p13678_p8 }
  0x68   : > { %11916 = vmatpush3.bf16.msra.mxu0 %v2307_v42  ;;  %v1020_v49 = vsel %vm14018_vm8, 0, %v1019_v47  ;;  %v1017_v52 = vsel %vm14018_vm8, 0, %v1016_v48  ;;  %v14046_v57 = vld [vmem:[#allocation6 + $0x10] sm:$0xf]  ;;  %v1025_v58 = vld [vmem:[#allocation2 + $0x60] sm:$0x8] }
  0x69   : > { %1021 = vst [vmem:[#allocation2 + $0x40] sm:$0x8] %v1020_v49  ;;  %1018 = vst [vmem:[#allocation2 + $0x30] sm:$0x8] %v1017_v52  ;;  %13349 = vmatprep.subr.msk.bf16.mxu1 %vm2111_vm9, %v14046_v57  ;;  %v1022_v59 = vld [vmem:[#allocation2 + $0x50] sm:$0x8] }
  0x6a   : > { %v2015_v51 = vld [vmem:[#allocation2] sm:$0xf0]  ;;  %v1026_v60 = vsel %vm14018_vm8, 0, %v1025_v58  ;;  %v1023_v61 = vsel %vm14018_vm8, 0, %v1022_v59  ;;  %v1031_v62 = vld [vmem:[#allocation2 + $0x80] sm:$0x8] }
  0x6b   : > { %v1408_v50 = vld [vmem:[#allocation2 + $0x8] sm:$0xf]  ;;  %v2112_v53 = vrot.slane %v2015_v51, 4  ;;  %1027 = vst [vmem:[#allocation2 + $0x60] sm:$0x8] %v1026_v60  ;;  %v1032_v0 = vsel %vm14018_vm8, 0, %v1031_v62 }
  0x6c   : > { %v2113_v54 = vrot.slane %v1408_v50, 4  ;;  %1024 = vst [vmem:[#allocation2 + $0x50] sm:$0x8] %v1023_v61  ;;  %v1028_v63 = vld [vmem:[#allocation2 + $0x70] sm:$0x8]  ;;  %v14088_v35 = vshrl.u32 %v356_v31, 7 }
  0x6d   : > { %11860 = vmatmul.mubr.msk.bf16.gmra.mrb[8].mxu0 %vm526_vm0, %v13422_v6  ;;  %v1029_v1 = vsel %vm14018_vm8, 0, %v1028_v63  ;;  %1033 = vst [vmem:[#allocation2 + $0x80] sm:$0x8] %v1032_v0  ;;  %v1037_v2 = vld [vmem:[#allocation2 + $0xa0] sm:$0x8] }
  0x6e   : > { %11863 = vmatprep.mubr.msk.bf16.mxu0 %vm526_vm0, %v13423_v7  ;;  %v2114_v56 = vsel %vm2111_vm9, %v2112_v53, %v2113_v54  ;;  %1030 = vst [vmem:[#allocation2 + $0x70] sm:$0x8] %v1029_v1  ;;  %v1034_v3 = vld [vmem:[#allocation2 + $0x90] sm:$0x8]  ;;  %v1038_v4 = vsel %vm14018_vm8, 0, %v1037_v2 }
  0x6f   : > { %v1035_v5 = vsel %vm14018_vm8, 0, %v1034_v3  ;;  %1039 = vst [vmem:[#allocation2 + $0xa0] sm:$0x8] %v1038_v4  ;;  %v1043_v6 = vld [vmem:[#allocation2 + $0xc0] sm:$0x8] }
  0x70   : > { %1036 = vst [vmem:[#allocation2 + $0x90] sm:$0x8] %v1035_v5  ;;  %v1040_v7 = vld [vmem:[#allocation2 + $0xb0] sm:$0x8]  ;;  %v1073_v33 = vld [vmem:[#allocation2 + $0x180] sm:$0x8] }
  0x71   : > { %v1064_v28 = vld [vmem:[#allocation2 + $0x150] sm:$0x8]  ;;  %v1074_v37 = vsel %vm14018_vm8, 0, %v1073_v33  ;;  %v1079_v42 = vld [vmem:[#allocation2 + $0x1a0] sm:$0x8] }
  0x72   : > { %v1070_v36 = vld [vmem:[#allocation2 + $0x170] sm:$0x8]  ;;  %1075 = vst [vmem:[#allocation2 + $0x180] sm:$0x8] %v1074_v37  ;;  %v1085_v62 = vld [vmem:[#allocation2 + $0x1c0] sm:$0x8] }
  0x73   : > { %v1071_v38 = vsel %vm14018_vm8, 0, %v1070_v36  ;;  %v1082_v2 = vld [vmem:[#allocation2 + $0x1b0] sm:$0x8]  ;;  %v1086_v3 = vsel %vm14018_vm8, 0, %v1085_v62 }
  0x74   : > { %1072 = vst [vmem:[#allocation2 + $0x170] sm:$0x8] %v1071_v38  ;;  %1087 = vst [vmem:[#allocation2 + $0x1c0] sm:$0x8] %v1086_v3 }
  0x75   : > { %11864 = vmatmul.mubr.msk.bf16.gmra.mrb[12].mxu0 %vm526_vm0, %v13424_v8  ;;  %v1044_v8 = vsel %vm14018_vm8, 0, %v1043_v6 }
  0x76   : > { %11867 = vmatprep.mubr.msk.bf16.mxu0 %vm526_vm0, %v13425_v9  ;;  %v1041_v9 = vsel %vm14018_vm8, 0, %v1040_v7  ;;  %1045 = vst [vmem:[#allocation2 + $0xc0] sm:$0x8] %v1044_v8  ;;  %v1083_v7 = vsel %vm14018_vm8, 0, %v1082_v2 }
  0x77   : > { %1042 = vst [vmem:[#allocation2 + $0xb0] sm:$0x8] %v1041_v9  ;;  %1084 = vst [vmem:[#allocation2 + $0x1b0] sm:$0x8] %v1083_v7 }
  0x7d   : > { %11868 = vmatmul.mubr.msk.bf16.gmra.mrb[16].mxu0 %vm526_vm0, %v13426_v10  ;;  %v1049_v10 = vld [vmem:[#allocation2 + $0xe0] sm:$0x8] }
  0x7e   : > { %11871 = vmatprep.mubr.msk.bf16.mxu0 %vm526_vm0, %v13427_v11  ;;  %v1046_v11 = vld [vmem:[#allocation2 + $0xd0] sm:$0x8] }
  0x85   : > { %11872 = vmatmul.mubr.msk.bf16.gmra.mrb[20].mxu0 %vm526_vm0, %v13428_v12  ;;  %v1050_v12 = vsel %vm14018_vm8, 0, %v1049_v10 }
  0x86   : > { %11875 = vmatprep.mubr.msk.bf16.mxu0 %vm526_vm0, %v13429_v13  ;;  %v1047_v13 = vsel %vm14018_vm8, 0, %v1046_v11  ;;  %1051 = vst [vmem:[#allocation2 + $0xe0] sm:$0x8] %v1050_v12 }
  0x87   : > { %1048 = vst [vmem:[#allocation2 + $0xd0] sm:$0x8] %v1047_v13 }
  0x8d   : > { %11876 = vmatmul.mubr.msk.bf16.gmra.mrb[24].mxu0 %vm526_vm0, %v13430_v14  ;;  %v1055_v14 = vld [vmem:[#allocation2 + $0x100] sm:$0x8] }
  0x8e   : > { %11879 = vmatprep.mubr.msk.bf16.mxu0 %vm526_vm0, %v13431_v15  ;;  %v1052_v15 = vld [vmem:[#allocation2 + $0xf0] sm:$0x8] }
  0x95   : > { %11880 = vmatmul.mubr.msk.bf16.gmra.mrb[28].mxu0 %vm526_vm0, %v13432_v16  ;;  %v1056_v16 = vsel %vm14018_vm8, 0, %v1055_v14 }
  0x96   : > { %11883 = vmatprep.mubr.msk.bf16.mxu0 %vm526_vm0, %v13433_v17  ;;  %v1053_v17 = vsel %vm14018_vm8, 0, %v1052_v15  ;;  %1057 = vst [vmem:[#allocation2 + $0x100] sm:$0x8] %v1056_v16 }
  0x97   : > { %1054 = vst [vmem:[#allocation2 + $0xf0] sm:$0x8] %v1053_v17 }
  0x9d   : > { %11884 = vmatmul.mubr.msk.bf16.gmra.mrb[32].mxu0 %vm526_vm0, %v13434_v18  ;;  %v988_v18 = vld [vmem:[#allocation2 + $0x120] sm:$0xf8] }
  0x9e   : > { %11887 = vmatprep.mubr.msk.bf16.mxu0 %vm526_vm0, %v13435_v19  ;;  %v991_v19 = vld [vmem:[#allocation2 + $0x128] sm:$0x1f] }
  0xa5   : > { %11888 = vmatmul.mubr.msk.bf16.gmra.mrb[36].mxu0 %vm526_vm0, %v13436_v20  ;;  %v1061_v20 = vld [vmem:[#allocation2 + $0x140] sm:$0x8] }
  0xa6   : > { %11891 = vmatprep.mubr.msk.bf16.mxu0 %vm526_vm0, %v13437_v21  ;;  %v989_v21 = vsel %vm14004_vm5, 0, %v988_v18 }
  0xa7   : > { %990 = vst [vmem:[#allocation2 + $0x120] sm:$0xf8] %v989_v21 }
  0xad   : > { %11892 = vmatmul.mubr.msk.bf16.gmra.mrb[40].mxu0 %vm526_vm0, %v13438_v22  ;;  %v992_v22 = vsel %vm14012_vm6, 0, %v991_v19 }
  0xae   : > { %11895 = vmatprep.mubr.msk.bf16.mxu0 %vm526_vm0, %v13439_v23  ;;  %v1058_v23 = vld [vmem:[#allocation2 + $0x130] sm:$0x8]  ;;  %993 = vst [vmem:[#allocation2 + $0x128] sm:$0x1f] %v992_v22  ;;  %v2031_v12 = vld [vmem:[#allocation2 + $0x120] sm:$0xf0] }
  0xaf   : > { %v2160_v18 = vrot.slane %v2031_v12, 4 }
  0xb5   : > { %11896 = vmatmul.mubr.msk.bf16.gmra.mrb[44].mxu0 %vm526_vm0, %v13440_v24  ;;  %v1062_v24 = vsel %vm14018_vm8, 0, %v1061_v20  ;;  %v1440_v11 = vld [vmem:[#allocation2 + $0x128] sm:$0xf] }
  0xb6   : > { %11899 = vmatprep.mubr.msk.bf16.mxu0 %vm526_vm0, %v13441_v25  ;;  %v1059_v25 = vsel %vm14018_vm8, 0, %v1058_v23  ;;  %1063 = vst [vmem:[#allocation2 + $0x140] sm:$0x8] %v1062_v24  ;;  %v2161_v19 = vrot.slane %v1440_v11, 4 }
  0xb7   : > { %1060 = vst [vmem:[#allocation2 + $0x130] sm:$0x8] %v1059_v25  ;;  %v14123_v25 = vsel %vm2111_vm9, %v14046_v57, 0 }
  0xbd   : > { %11900 = vmatmul.mubr.msk.bf16.gmra.mrb[48].mxu0 %vm526_vm0, %v13442_v26  ;;  %v1067_v26 = vld [vmem:[#allocation2 + $0x160] sm:$0x8] }
  0xbe   : > { %11903 = vmatprep.mubr.msk.bf16.mxu0 %vm526_vm0, %v13443_v30  ;;  %v1068_v29 = vsel %vm14018_vm8, 0, %v1067_v26  ;;  %v1065_v30 = vsel %vm14018_vm8, 0, %v1064_v28 }
  0xbf   : > { %1069 = vst [vmem:[#allocation2 + $0x160] sm:$0x8] %v1068_v29  ;;  %1066 = vst [vmem:[#allocation2 + $0x150] sm:$0x8] %v1065_v30 }
  0xc5   : > { %11904 = vmatmul.mubr.msk.bf16.gmra.mrb[52].mxu0 %vm526_vm0, %v13444_v39  ;;  %v358_v39 = vsub.s32 0, %v14088_v35 }
  0xc6   : > { %11907 = vmatprep.mubr.msk.bf16.mxu0 %vm526_vm0, %v13445_v40  ;;  %v289_v40 = vld [vmem:[%s16199_s5] sm:$0xf] }
  0xc7   : > { %v14098_v41 = vrot.slane %v289_v40, %v358_v39  ;;  %v14130_v40 = vsel %vm2111_vm9, %v2160_v18, %v2161_v19 }
  0xcd   : > { %11908 = vmatmul.mubr.msk.bf16.gmra.mrb[56].mxu0 %vm526_vm0, %v13446_v44  ;;  %v1076_v44 = vld [vmem:[#allocation2 + $0x190] sm:$0x8] }
  0xce   : > { %11911 = vmatprep.mubr.msk.bf16.mxu0 %vm526_vm0, %v13447_v45  ;;  %v1080_v45 = vsel %vm14018_vm8, 0, %v1079_v42  ;;  %v1077_v48 = vsel %vm14018_vm8, 0, %v1076_v44 }
  0xcf   : > { %1081 = vst [vmem:[#allocation2 + $0x1a0] sm:$0x8] %v1080_v45  ;;  %1078 = vst [vmem:[#allocation2 + $0x190] sm:$0x8] %v1077_v48 }
  0xd5   : > { %11912 = vmatmul.mubr.msk.bf16.gmra.mrb[60].mxu0 %vm526_vm0, %v13448_v55 }
  0xd6   : > { %11917 = vmatprep.mubr.msk.bf16.mxu0 %vm2208_vm10, %v2114_v56 }
 0x130   : > { %v11853_v43 = vpop.f32.mrb[0].mxu0 }
 0x131   : > { %v666_v46 = vadd.f32 %v11853_v43, %v14098_v41  ;;  %v657_v47 = vpop.f32.mrb[1].mxu0 }
 0x132   : > { %v658_v49 = vadd.f32 %v657_v47, %v14098_v41  ;;  %v11854_v50 = vpop.f32.mrb[2].mxu0 }
 0x133   : > { %v669_v51 = vadd.f32 %v11854_v50, %v14098_v41  ;;  %v660_v52 = vpop.f32.mrb[3].mxu0  ;;  %v914_v54 = vmax.f32 %v666_v46, 0.0 }
 0x134   : > { %v661_v53 = vadd.f32 %v660_v52, %v14098_v41  ;;  %v912_v56 = vmax.f32 %v658_v49, 0.0 }
 0x135   : > { %v915_v55 = vmax.f32 %v669_v51, 0.0 }
 0x136   : > { %v913_v58 = vmax.f32 %v661_v53, 0.0 }
 0x137   : > { %v1205_v59 = vpack.c.bf16 %v915_v55, %v914_v54 }
 0x138   : > { %v1204_v60 = vpack.c.bf16 %v913_v58, %v912_v56  ;;  %v11857_v61 = vpop.f32.mrb[4].mxu0 }
 0x139   : > { %v1269_v63 = vrot.slane %v1205_v59, 4  ;;  %v682_v0 = vadd.f32 %v11857_v61, %v14098_v41  ;;  %v673_v1 = vpop.f32.mrb[5].mxu0 }
 0x13a   : > { %v1268_v4 = vrot.slane %v1204_v60, 4  ;;  %v674_v5 = vadd.f32 %v673_v1, %v14098_v41  ;;  %v11858_v6 = vpop.f32.mrb[6].mxu0 }
 0x13b   : > { %1336 = vst.msk [vmem:[#allocation2 + $0x20] sm:$0xf0] %vm1332_vm11, %v1269_v63  ;;  %v685_v8 = vadd.f32 %v11858_v6, %v14098_v41  ;;  %v676_v9 = vpop.f32.mrb[7].mxu0  ;;  %v918_v13 = vmax.f32 %v682_v0, 0.0 }
 0x13c   : > { %1337 = vst.msk [vmem:[#allocation2 + $0x28] sm:$0xf] %vm1334_vm12, %v1269_v63  ;;  %1335 = vst.msk [vmem:[#allocation2 + $0x18] sm:$0xf] %vm1334_vm12, %v1268_v4  ;;  %v677_v10 = vadd.f32 %v676_v9, %v14098_v41  ;;  %v916_v15 = vmax.f32 %v674_v5, 0.0 }
 0x13d   : > { %1333 = vst.msk [vmem:[#allocation2 + $0x10] sm:$0xf0] %vm1332_vm11, %v1268_v4  ;;  %v919_v14 = vmax.f32 %v685_v8, 0.0 }
 0x13e   : > { %v917_v16 = vmax.f32 %v677_v10, 0.0 }
 0x13f   : > { %v1207_v17 = vpack.c.bf16 %v919_v14, %v918_v13 }
 0x140   : > { %v1206_v20 = vpack.c.bf16 %v917_v16, %v916_v15  ;;  %v11861_v21 = vpop.f32.mrb[8].mxu0 }
 0x141   : > { %v1271_v22 = vrot.slane %v1207_v17, 4  ;;  %v698_v23 = vadd.f32 %v11861_v21, %v14098_v41  ;;  %v689_v24 = vpop.f32.mrb[9].mxu0 }
 0x142   : > { %v1270_v26 = vrot.slane %v1206_v20, 4  ;;  %v690_v28 = vadd.f32 %v689_v24, %v14098_v41  ;;  %v11862_v29 = vpop.f32.mrb[10].mxu0  ;;  %v2017_v31 = vld [vmem:[#allocation2 + $0x20] sm:$0xf0] }
 0x143   : > { %v1412_v30 = vld [vmem:[#allocation2 + $0x28] sm:$0xf]  ;;  %1340 = vst.msk [vmem:[#allocation2 + $0x40] sm:$0xf0] %vm1332_vm11, %v1271_v22  ;;  %v922_v33 = vmax.f32 %v698_v23, 0.0  ;;  %v701_v36 = vadd.f32 %v11862_v29, %v14098_v41  ;;  %v692_v37 = vpop.f32.mrb[11].mxu0 }
 0x144   : > { %1341 = vst.msk [vmem:[#allocation2 + $0x48] sm:$0xf] %vm1334_vm12, %v1271_v22  ;;  %v1410_v38 = vld [vmem:[#allocation2 + $0x18] sm:$0xf]  ;;  %v2016_v39 = vld [vmem:[#allocation2 + $0x10] sm:$0xf0]  ;;  %v693_v42 = vadd.f32 %v692_v37, %v14098_v41 }
 0x145   : > { %1338 = vst.msk [vmem:[#allocation2 + $0x30] sm:$0xf0] %vm1332_vm11, %v1270_v26  ;;  %v920_v57 = vmax.f32 %v690_v28, 0.0  ;;  %v2115_v43 = vrot.slane %v2016_v39, 4  ;;  %v2116_v44 = vrot.slane %v1410_v38, 4  ;;  %v923_v46 = vmax.f32 %v701_v36, 0.0 }
 0x146   : > { %1339 = vst.msk [vmem:[#allocation2 + $0x38] sm:$0xf] %vm1334_vm12, %v1270_v26  ;;  %v4015_v45 = vld [vmem:[#allocation2 + $0x10] sm:$0xf8]  ;;  %v2118_v47 = vrot.slane %v2017_v31, 4  ;;  %v2119_v48 = vrot.slane %v1412_v30, 4 }
 0x147   : > { %v4016_v49 = vld [vmem:[#allocation2 + $0x18] sm:$0xf]  ;;  %v4080_v50 = vshrl.u32 %v4015_v45, 16  ;;  %v921_v51 = vmax.f32 %v693_v42, 0.0  ;;  %v2117_v52 = vsel %vm2111_vm9, %v2115_v43, %v2116_v44  ;;  %v4083_v53 = vshll.u32 %v4015_v45, 16 }
 0x148   : > { %v4088_v54 = vshrl.u32 %v4016_v49, 16  ;;  %v4017_v55 = vld [vmem:[#allocation2 + $0x20] sm:$0xf8]  ;;  %v1209_v56 = vpack.c.bf16 %v923_v46, %v922_v33  ;;  %11918 = vmatmul.mubr.msk.bf16.vlgmr.msra.gmra.mrb[64].mxu0 %vm2208_vm10, %v2117_v52  ;;  %v2120_v58 = vsel %vm2111_vm9, %v2118_v47, %v2119_v48  ;;  %v4091_v60 = vshll.u32 %v4016_v49, 16  ;;  %v11865_v62 = vpop.f32.mrb[12].mxu0 }
 0x149   : > { %v4082_v59 = vrot.slane %v4080_v50, 3  ;;  %v1208_v61 = vpack.c.bf16 %v921_v51, %v920_v57  ;;  %11921 = vmatprep.mubr.msk.bf16.mxu0 %vm2208_vm10, %v2120_v58  ;;  %v4085_v63 = vrot.slane %v4083_v53, 4  ;;  %v4097_v1 = vshrl.u32 %v4017_v55, 16  ;;  %v705_v4 = vpop.f32.mrb[13].mxu0  ;;  %v4018_v6 = vld [vmem:[#allocation2 + $0x28] sm:$0xf] }
 0x14a   : > { %v4090_v0 = vrot.slane %v4088_v54, 3  ;;  %v1273_v2 = vrot.slane %v1209_v56, 4  ;;  %v714_v3 = vadd.f32 %v11865_v62, %v14098_v41  ;;  %v4093_v5 = vrot.slane %v4091_v60, 4  ;;  %v11866_v10 = vpop.f32.mrb[14].mxu0  ;;  %v2019_v31 = vld [vmem:[#allocation2 + $0x40] sm:$0xf0] }
 0x14b   : > { %v4100_v7 = vshll.u32 %v4017_v55, 16  ;;  %v1272_v8 = vrot.slane %v1208_v61, 4  ;;  %v706_v9 = vadd.f32 %v705_v4, %v14098_v41  ;;  %v4086_v11 = vor.u32 %v4085_v63, %v4082_v59  ;;  %v1416_v13 = vld [vmem:[#allocation2 + $0x48] sm:$0xf]  ;;  %v708_v16 = vpop.f32.mrb[15].mxu0 }
 0x14c   : > { %v4099_v12 = vrot.slane %v4097_v1, 3  ;;  %1344 = vst.msk [vmem:[#allocation2 + $0x60] sm:$0xf0] %vm1332_vm11, %v1273_v2  ;;  %v926_v14 = vmax.f32 %v714_v3, 0.0  ;;  %v717_v15 = vadd.f32 %v11866_v10, %v14098_v41  ;;  %v4094_v17 = vor.u32 %v4093_v5, %v4090_v0  ;;  %v2018_v24 = vld [vmem:[#allocation2 + $0x30] sm:$0xf0] }
 0x14d   : > { %1345 = vst.msk [vmem:[#allocation2 + $0x68] sm:$0xf] %vm1334_vm12, %v1273_v2  ;;  %v4102_v18 = vrot.slane %v4100_v7, 4  ;;  %v1414_v19 = vld [vmem:[#allocation2 + $0x38] sm:$0xf]  ;;  %v924_v20 = vmax.f32 %v706_v9, 0.0  ;;  %v709_v21 = vadd.f32 %v708_v16, %v14098_v41 }
 0x14e   : > { %1342 = vst.msk [vmem:[#allocation2 + $0x50] sm:$0xf0] %vm1332_vm11, %v1272_v8  ;;  %v4105_v22 = vshrl.u32 %v4018_v6, 16  ;;  %v4108_v23 = vshll.u32 %v4018_v6, 16  ;;  %v927_v26 = vmax.f32 %v717_v15, 0.0  ;;  %v4095_v28 = vsel %vm983_vm4, %v4086_v11, %v4094_v17 }
 0x14f   : > { %1343 = vst.msk [vmem:[#allocation2 + $0x58] sm:$0xf] %vm1334_vm12, %v1272_v8  ;;  %v4103_v29 = vor.u32 %v4102_v18, %v4099_v12  ;;  %v2121_v30 = vrot.slane %v2018_v24, 4  ;;  %v4019_v33 = vld [vmem:[#allocation2 + $0x30] sm:$0xf8]  ;;  %v925_v36 = vmax.f32 %v709_v21, 0.0  ;;  %12115 = vmatprep.mubr.msk.bf16.mxu1 %vm2208_vm10, %v4095_v28 }
 0x150   : > { %v4107_v37 = vrot.slane %v4105_v22, 3  ;;  %v4110_v38 = vrot.slane %v4108_v23, 4  ;;  %v2122_v39 = vrot.slane %v1414_v19, 4  ;;  %v1211_v57 = vpack.c.bf16 %v927_v26, %v926_v14  ;;  %v11869_v48 = vpop.f32.mrb[16].mxu0  ;;  %v4020_v49 = vld [vmem:[#allocation2 + $0x38] sm:$0xf] }
 0x151   : > { %v2124_v42 = vrot.slane %v2019_v31, 4  ;;  %v2125_v43 = vrot.slane %v1416_v13, 4  ;;  %v4114_v44 = vshrl.u32 %v4019_v33, 16  ;;  %v1210_v45 = vpack.c.bf16 %v925_v36, %v924_v20  ;;  %v721_v54 = vpop.f32.mrb[17].mxu0  ;;  %v4021_v56 = vld [vmem:[#allocation2 + $0x40] sm:$0xf8] }
 0x152   : > { %v4111_v46 = vor.u32 %v4110_v38, %v4107_v37  ;;  %v2123_v47 = vsel %vm2111_vm9, %v2121_v30, %v2122_v39  ;;  %v4117_v50 = vshll.u32 %v4019_v33, 16  ;;  %v1275_v51 = vrot.slane %v1211_v57, 4  ;;  %v11870_v61 = vpop.f32.mrb[18].mxu0  ;;  %v4022_v4 = vld [vmem:[#allocation2 + $0x48] sm:$0xf] }
 0x153   : > { %11922 = vmatmul.mubr.msk.bf16.gmra.mrb[68].mxu0 %vm2208_vm10, %v2123_v47  ;;  %v730_v52 = vadd.f32 %v11869_v48, %v14098_v41  ;;  %v2126_v53 = vsel %vm2111_vm9, %v2124_v42, %v2125_v43  ;;  %v4116_v55 = vrot.slane %v4114_v44, 3  ;;  %v1274_v58 = vrot.slane %v1210_v45, 4  ;;  %v724_v1 = vpop.f32.mrb[19].mxu0 }
 0x154   : > { %v4112_v59 = vsel %vm983_vm4, %v4103_v29, %v4111_v46  ;;  %11925 = vmatprep.mubr.msk.bf16.mxu0 %vm2208_vm10, %v2126_v53  ;;  %v722_v60 = vadd.f32 %v721_v54, %v14098_v41  ;;  %v4119_v62 = vrot.slane %v4117_v50, 4  ;;  %1348 = vst.msk [vmem:[#allocation2 + $0x80] sm:$0xf0] %vm1332_vm11, %v1275_v51  ;;  %v733_v0 = vadd.f32 %v11870_v61, %v14098_v41  ;;  %v1420_v30 = vld [vmem:[#allocation2 + $0x68] sm:$0xf] }
 0x155   : > { %1349 = vst.msk [vmem:[#allocation2 + $0x88] sm:$0xf] %vm1334_vm12, %v1275_v51  ;;  %12116 = vmatmul.mubr.msk.bf16.vlgmr.msra.gmra.mrb[0].mxu1 %vm2208_vm10, %v4112_v59  ;;  %v930_v63 = vmax.f32 %v730_v52, 0.0  ;;  %v4122_v2 = vshrl.u32 %v4020_v49, 16  ;;  %v4125_v3 = vshll.u32 %v4020_v49, 16  ;;  %v725_v6 = vadd.f32 %v724_v1, %v14098_v41 }
 0x156   : > { %1346 = vst.msk [vmem:[#allocation2 + $0x70] sm:$0xf0] %vm1332_vm11, %v1274_v58  ;;  %12180 = vmatpush3.bf16.msra.mxu1 %v14123_v25  ;;  %v928_v5 = vmax.f32 %v722_v60, 0.0  ;;  %v4120_v7 = vor.u32 %v4119_v62, %v4116_v55  ;;  %v4131_v8 = vshrl.u32 %v4021_v56, 16  ;;  %v2020_v9 = vld [vmem:[#allocation2 + $0x50] sm:$0xf0] }
 0x157   : > { %1347 = vst.msk [vmem:[#allocation2 + $0x78] sm:$0xf] %vm1334_vm12, %v1274_v58  ;;  %v931_v10 = vmax.f32 %v733_v0, 0.0  ;;  %v4124_v11 = vrot.slane %v4122_v2, 3  ;;  %v4127_v12 = vrot.slane %v4125_v3, 4  ;;  %v4134_v13 = vshll.u32 %v4021_v56, 16 }
 0x158   : > { %v1418_v14 = vld [vmem:[#allocation2 + $0x58] sm:$0xf]  ;;  %v929_v15 = vmax.f32 %v725_v6, 0.0  ;;  %v4133_v16 = vrot.slane %v4131_v8, 3  ;;  %v4139_v17 = vshrl.u32 %v4022_v4, 16  ;;  %v4142_v18 = vshll.u32 %v4022_v4, 16 }
 0x159   : > { %v1213_v19 = vpack.c.bf16 %v931_v10, %v930_v63  ;;  %v4128_v20 = vor.u32 %v4127_v12, %v4124_v11  ;;  %v4136_v21 = vrot.slane %v4134_v13, 4  ;;  %v2127_v22 = vrot.slane %v2020_v9, 4  ;;  %v2021_v25 = vld [vmem:[#allocation2 + $0x60] sm:$0xf0]  ;;  %v11873_v29 = vpop.f32.mrb[20].mxu0 }
 0x15a   : > { %v1212_v23 = vpack.c.bf16 %v929_v15, %v928_v5  ;;  %v4141_v24 = vrot.slane %v4139_v17, 3  ;;  %v4144_v26 = vrot.slane %v4142_v18, 4  ;;  %v2128_v28 = vrot.slane %v1418_v14, 4  ;;  %v737_v38 = vpop.f32.mrb[21].mxu0  ;;  %v4023_v39 = vld [vmem:[#allocation2 + $0x50] sm:$0xf8] }
 0x15b   : > { %v1277_v31 = vrot.slane %v1213_v19, 4  ;;  %v4129_v33 = vsel %vm983_vm4, %v4120_v7, %v4128_v20  ;;  %v4137_v36 = vor.u32 %v4136_v21, %v4133_v16  ;;  %v746_v37 = vadd.f32 %v11873_v29, %v14098_v41  ;;  %v11874_v45 = vpop.f32.mrb[22].mxu0  ;;  %v4024_v46 = vld [vmem:[#allocation2 + $0x58] sm:$0xf]  ;;  %v4025_v56 = vld [vmem:[#allocation2 + $0x60] sm:$0xf8] }
 0x15c   : > { %v1276_v57 = vrot.slane %v1212_v23, 4  ;;  %12119 = vmatprep.mubr.msk.bf16.mxu1 %vm2208_vm10, %v4129_v33  ;;  %v4145_v42 = vor.u32 %v4144_v26, %v4141_v24  ;;  %v2129_v43 = vsel %vm2111_vm9, %v2127_v22, %v2128_v28  ;;  %v2130_v44 = vrot.slane %v2021_v25, 4  ;;  %v740_v51 = vpop.f32.mrb[23].mxu0  ;;  %v4026_v62 = vld [vmem:[#allocation2 + $0x68] sm:$0xf] }
 0x15d   : > { %1352 = vst.msk [vmem:[#allocation2 + $0xa0] sm:$0xf0] %vm1332_vm11, %v1277_v31  ;;  %11926 = vmatmul.mubr.msk.bf16.gmra.mrb[72].mxu0 %vm2208_vm10, %v2129_v43  ;;  %v934_v47 = vmax.f32 %v746_v37, 0.0  ;;  %v2131_v48 = vrot.slane %v1420_v30, 4  ;;  %v738_v49 = vadd.f32 %v737_v38, %v14098_v41  ;;  %v749_v50 = vadd.f32 %v11874_v45, %v14098_v41  ;;  %v2022_v8 = vld [vmem:[#allocation2 + $0x70] sm:$0xf0] }
 0x15e   : > { %1353 = vst.msk [vmem:[#allocation2 + $0xa8] sm:$0xf] %vm1334_vm12, %v1277_v31  ;;  %1351 = vst.msk [vmem:[#allocation2 + $0x98] sm:$0xf] %vm1334_vm12, %v1276_v57  ;;  %v4146_v52 = vsel %vm983_vm4, %v4137_v36, %v4145_v42  ;;  %v741_v53 = vadd.f32 %v740_v51, %v14098_v41  ;;  %v4148_v54 = vshrl.u32 %v4023_v39, 16  ;;  %v4151_v55 = vshll.u32 %v4023_v39, 16 }
 0x15f   : > { %1350 = vst.msk [vmem:[#allocation2 + $0x90] sm:$0xf0] %vm1332_vm11, %v1276_v57  ;;  %12120 = vmatmul.mubr.msk.bf16.gmra.mrb[4].mxu1 %vm2208_vm10, %v4146_v52  ;;  %v2132_v58 = vsel %vm2111_vm9, %v2130_v44, %v2131_v48  ;;  %v932_v59 = vmax.f32 %v738_v49, 0.0  ;;  %v935_v60 = vmax.f32 %v749_v50, 0.0  ;;  %v4156_v61 = vshrl.u32 %v4024_v46, 16 }
 0x160   : > { %11929 = vmatprep.mubr.msk.bf16.mxu0 %vm2208_vm10, %v2132_v58  ;;  %v933_v63 = vmax.f32 %v741_v53, 0.0  ;;  %v4150_v0 = vrot.slane %v4148_v54, 3  ;;  %v4153_v1 = vrot.slane %v4151_v55, 4  ;;  %v4159_v2 = vshll.u32 %v4024_v46, 16  ;;  %v1422_v3 = vld [vmem:[#allocation2 + $0x78] sm:$0xf] }
 0x161   : > { %v1215_v4 = vpack.c.bf16 %v935_v60, %v934_v47  ;;  %v4158_v5 = vrot.slane %v4156_v61, 3  ;;  %v4165_v6 = vshrl.u32 %v4025_v56, 16  ;;  %v4168_v7 = vshll.u32 %v4025_v56, 16  ;;  %v1424_v9 = vld [vmem:[#allocation2 + $0x88] sm:$0xf]  ;;  %v11877_v14 = vpop.f32.mrb[24].mxu0 }
 0x162   : > { %v1214_v10 = vpack.c.bf16 %v933_v63, %v932_v59  ;;  %v4154_v11 = vor.u32 %v4153_v1, %v4150_v0  ;;  %v4161_v12 = vrot.slane %v4159_v2, 4  ;;  %v4173_v13 = vshrl.u32 %v4026_v62, 16  ;;  %v2023_v15 = vld [vmem:[#allocation2 + $0x80] sm:$0xf0]  ;;  %v753_v20 = vpop.f32.mrb[25].mxu0 }
 0x163   : > { %v1279_v16 = vrot.slane %v1215_v4, 4  ;;  %v4167_v17 = vrot.slane %v4165_v6, 3  ;;  %v4170_v18 = vrot.slane %v4168_v7, 4  ;;  %v4176_v19 = vshll.u32 %v4026_v62, 16  ;;  %v11878_v24 = vpop.f32.mrb[26].mxu0 }
 0x164   : > { %v1278_v21 = vrot.slane %v1214_v10, 4  ;;  %v4162_v22 = vor.u32 %v4161_v12, %v4158_v5  ;;  %v4175_v25 = vrot.slane %v4173_v13, 3  ;;  %v2133_v23 = vrot.slane %v2022_v8, 4  ;;  %v756_v31 = vpop.f32.mrb[27].mxu0  ;;  %v4027_v33 = vld [vmem:[#allocation2 + $0x70] sm:$0xf8] }
 0x165   : > { %1356 = vst.msk [vmem:[#allocation2 + $0xc0] sm:$0xf0] %vm1332_vm11, %v1279_v16  ;;  %v4171_v26 = vor.u32 %v4170_v18, %v4167_v17  ;;  %v4178_v28 = vrot.slane %v4176_v19, 4  ;;  %v2134_v29 = vrot.slane %v1422_v3, 4  ;;  %v762_v30 = vadd.f32 %v11877_v14, %v14098_v41  ;;  %v4028_v57 = vld [vmem:[#allocation2 + $0x78] sm:$0xf] }
 0x166   : > { %1357 = vst.msk [vmem:[#allocation2 + $0xc8] sm:$0xf] %vm1334_vm12, %v1279_v16  ;;  %1355 = vst.msk [vmem:[#allocation2 + $0xb8] sm:$0xf] %vm1334_vm12, %v1278_v21  ;;  %v4163_v36 = vsel %vm983_vm4, %v4154_v11, %v4162_v22  ;;  %v2136_v37 = vrot.slane %v2023_v15, 4  ;;  %v2137_v38 = vrot.slane %v1424_v9, 4  ;;  %v754_v39 = vadd.f32 %v753_v20, %v14098_v41 }
 0x167   : > { %1354 = vst.msk [vmem:[#allocation2 + $0xb0] sm:$0xf0] %vm1332_vm11, %v1278_v21  ;;  %12123 = vmatprep.mubr.msk.bf16.mxu1 %vm2208_vm10, %v4163_v36  ;;  %v4179_v42 = vor.u32 %v4178_v28, %v4175_v25  ;;  %v2135_v43 = vsel %vm2111_vm9, %v2133_v23, %v2134_v29  ;;  %v938_v44 = vmax.f32 %v762_v30, 0.0  ;;  %v765_v45 = vadd.f32 %v11878_v24, %v14098_v41  ;;  %v4029_v46 = vld [vmem:[#allocation2 + $0x80] sm:$0xf8] }
 0x168   : > { %11930 = vmatmul.mubr.msk.bf16.gmra.mrb[76].mxu0 %vm2208_vm10, %v2135_v43  ;;  %v2138_v47 = vsel %vm2111_vm9, %v2136_v37, %v2137_v38  ;;  %v936_v48 = vmax.f32 %v754_v39, 0.0  ;;  %v757_v49 = vadd.f32 %v756_v31, %v14098_v41  ;;  %v4182_v50 = vshrl.u32 %v4027_v33, 16  ;;  %v4030_v51 = vld [vmem:[#allocation2 + $0x88] sm:$0xf]  ;;  %v1398_v56 = vld [vmem:[#allocation6] sm:$0xf] }
 0x169   : > { %v4180_v52 = vsel %vm983_vm4, %v4171_v26, %v4179_v42  ;;  %11933 = vmatprep.mubr.msk.bf16.mxu0 %vm2208_vm10, %v2138_v47  ;;  %v939_v53 = vmax.f32 %v765_v45, 0.0  ;;  %v4185_v54 = vshll.u32 %v4027_v33, 16  ;;  %v4190_v55 = vshrl.u32 %v4028_v57, 16  ;;  %v11881_v62 = vpop.f32.mrb[28].mxu0  ;;  %13346 = vmatprep.subr.msk.bf16.mxu0 %vm2111_vm9, %v1398_v56  ;;  %v2024_v3 = vld [vmem:[#allocation2 + $0x90] sm:$0xf0] }
 0x16a   : > { %12124 = vmatmul.mubr.msk.bf16.gmra.mrb[8].mxu1 %vm2208_vm10, %v4180_v52  ;;  %v937_v58 = vmax.f32 %v757_v49, 0.0  ;;  %v4184_v59 = vrot.slane %v4182_v50, 3  ;;  %v4193_v60 = vshll.u32 %v4028_v57, 16  ;;  %v4199_v61 = vshrl.u32 %v4029_v46, 16  ;;  %v1428_v4 = vld [vmem:[#allocation2 + $0xa8] sm:$0xf] }
 0x16b   : > { %v1217_v63 = vpack.c.bf16 %v939_v53, %v938_v44  ;;  %v4187_v0 = vrot.slane %v4185_v54, 4  ;;  %v4192_v1 = vrot.slane %v4190_v55, 3  ;;  %v4202_v2 = vshll.u32 %v4029_v46, 16  ;;  %v769_v5 = vpop.f32.mrb[29].mxu0  ;;  %v1426_v10 = vld [vmem:[#allocation2 + $0x98] sm:$0xf] }
 0x16c   : > { %v1216_v6 = vpack.c.bf16 %v937_v58, %v936_v48  ;;  %v4195_v7 = vrot.slane %v4193_v60, 4  ;;  %v4201_v8 = vrot.slane %v4199_v61, 3  ;;  %v4207_v9 = vshrl.u32 %v4030_v51, 16  ;;  %v11882_v11 = vpop.f32.mrb[30].mxu0  ;;  %v2025_v16 = vld [vmem:[#allocation2 + $0xa0] sm:$0xf0] }
 0x16d   : > { %v1281_v12 = vrot.slane %v1217_v63, 4  ;;  %v4188_v13 = vor.u32 %v4187_v0, %v4184_v59  ;;  %v4204_v14 = vrot.slane %v4202_v2, 4  ;;  %v4210_v15 = vshll.u32 %v4030_v51, 16  ;;  %v772_v17 = vpop.f32.mrb[31].mxu0  ;;  %v4031_v26 = vld [vmem:[#allocation2 + $0x90] sm:$0xf8] }
 0x16e   : > { %v1280_v18 = vrot.slane %v1216_v6, 4  ;;  %v4196_v19 = vor.u32 %v4195_v7, %v4192_v1  ;;  %v4209_v20 = vrot.slane %v4207_v9, 3  ;;  %v2139_v21 = vrot.slane %v2024_v3, 4  ;;  %v4032_v33 = vld [vmem:[#allocation2 + $0x98] sm:$0xf] }
 0x16f   : > { %1360 = vst.msk [vmem:[#allocation2 + $0xe0] sm:$0xf0] %vm1332_vm11, %v1281_v12  ;;  %v4205_v22 = vor.u32 %v4204_v14, %v4201_v8  ;;  %v4212_v25 = vrot.slane %v4210_v15, 4  ;;  %v2140_v23 = vrot.slane %v1426_v10, 4  ;;  %v778_v24 = vadd.f32 %v11881_v62, %v14098_v41  ;;  %v4033_v57 = vld [vmem:[#allocation2 + $0xa0] sm:$0xf8] }
 0x170   : > { %1361 = vst.msk [vmem:[#allocation2 + $0xe8] sm:$0xf] %vm1334_vm12, %v1281_v12  ;;  %1359 = vst.msk [vmem:[#allocation2 + $0xd8] sm:$0xf] %vm1334_vm12, %v1280_v18  ;;  %v4197_v28 = vsel %vm983_vm4, %v4188_v13, %v4196_v19  ;;  %v2142_v29 = vrot.slane %v2025_v16, 4  ;;  %v2143_v30 = vrot.slane %v1428_v4, 4  ;;  %v770_v31 = vadd.f32 %v769_v5, %v14098_v41 }
 0x171   : > { %1358 = vst.msk [vmem:[#allocation2 + $0xd0] sm:$0xf0] %vm1332_vm11, %v1280_v18  ;;  %12127 = vmatprep.mubr.msk.bf16.mxu1 %vm2208_vm10, %v4197_v28  ;;  %v4213_v36 = vor.u32 %v4212_v25, %v4209_v20  ;;  %v2141_v37 = vsel %vm2111_vm9, %v2139_v21, %v2140_v23  ;;  %v942_v38 = vmax.f32 %v778_v24, 0.0  ;;  %v781_v39 = vadd.f32 %v11882_v11, %v14098_v41  ;;  %v11885_v46 = vpop.f32.mrb[32].mxu0  ;;  %v1403_v47 = vld [vmem:[#allocation6 + $0x14] sm:$0xf] }
 0x172   : > { %11934 = vmatmul.mubr.msk.bf16.gmra.mrb[80].mxu0 %vm2208_vm10, %v2141_v37  ;;  %v2144_v42 = vsel %vm2111_vm9, %v2142_v29, %v2143_v30  ;;  %v940_v43 = vmax.f32 %v770_v31, 0.0  ;;  %v773_v44 = vadd.f32 %v772_v17, %v14098_v41  ;;  %v4216_v45 = vshrl.u32 %v4031_v26, 16  ;;  %v4034_v52 = vld [vmem:[#allocation2 + $0xa8] sm:$0xf]  ;;  %v785_v53 = vpop.f32.mrb[33].mxu0  ;;  %13350 = vmatprep.subr.msk.bf16.mxu1 %vm2111_vm9, %v1403_v47 }
 0x173   : > { %v4214_v48 = vsel %vm983_vm4, %v4205_v22, %v4213_v36  ;;  %11937 = vmatprep.mubr.msk.bf16.mxu0 %vm2208_vm10, %v2144_v42  ;;  %v943_v49 = vmax.f32 %v781_v39, 0.0  ;;  %v4219_v50 = vshll.u32 %v4031_v26, 16  ;;  %v4224_v51 = vshrl.u32 %v4032_v33, 16  ;;  %v11886_v59 = vpop.f32.mrb[34].mxu0  ;;  %v2026_v0 = vld [vmem:[#allocation2 + $0xb0] sm:$0xf0] }
 0x174   : > { %12128 = vmatmul.mubr.msk.bf16.gmra.mrb[12].mxu1 %vm2208_vm10, %v4214_v48  ;;  %v941_v54 = vmax.f32 %v773_v44, 0.0  ;;  %v4218_v55 = vrot.slane %v4216_v45, 3  ;;  %v4227_v56 = vshll.u32 %v4032_v33, 16  ;;  %v4233_v58 = vshrl.u32 %v4033_v57, 16  ;;  %v1432_v1 = vld [vmem:[#allocation2 + $0xc8] sm:$0xf] }
 0x175   : > { %v1219_v60 = vpack.c.bf16 %v943_v49, %v942_v38  ;;  %v4221_v61 = vrot.slane %v4219_v50, 4  ;;  %v4226_v62 = vrot.slane %v4224_v51, 3  ;;  %v4236_v63 = vshll.u32 %v4033_v57, 16  ;;  %v788_v2 = vpop.f32.mrb[35].mxu0  ;;  %v1430_v7 = vld [vmem:[#allocation2 + $0xb8] sm:$0xf] }
 0x176   : > { %v1218_v3 = vpack.c.bf16 %v941_v54, %v940_v43  ;;  %v4229_v4 = vrot.slane %v4227_v56, 4  ;;  %v4235_v5 = vrot.slane %v4233_v58, 3  ;;  %v4241_v6 = vshrl.u32 %v4034_v52, 16  ;;  %v2027_v12 = vld [vmem:[#allocation2 + $0xc0] sm:$0xf0] }
 0x177   : > { %v1283_v8 = vrot.slane %v1219_v60, 4  ;;  %v4222_v9 = vor.u32 %v4221_v61, %v4218_v55  ;;  %v4238_v10 = vrot.slane %v4236_v63, 4  ;;  %v4244_v11 = vshll.u32 %v4034_v52, 16  ;;  %v4035_v21 = vld [vmem:[#allocation2 + $0xb0] sm:$0xf8] }
 0x178   : > { %v1282_v13 = vrot.slane %v1218_v3, 4  ;;  %v4230_v14 = vor.u32 %v4229_v4, %v4226_v62  ;;  %v4243_v15 = vrot.slane %v4241_v6, 3  ;;  %v2145_v16 = vrot.slane %v2026_v0, 4  ;;  %v4036_v26 = vld [vmem:[#allocation2 + $0xb8] sm:$0xf]  ;;  %v11889_v28 = vpop.f32.mrb[36].mxu0 }
 0x179   : > { %1364 = vst.msk [vmem:[#allocation2 + $0x100] sm:$0xf0] %vm1332_vm11, %v1283_v8  ;;  %v4239_v17 = vor.u32 %v4238_v10, %v4235_v5  ;;  %v4246_v18 = vrot.slane %v4244_v11, 4  ;;  %v2146_v19 = vrot.slane %v1430_v7, 4  ;;  %v794_v20 = vadd.f32 %v11885_v46, %v14098_v41  ;;  %v4037_v36 = vld [vmem:[#allocation2 + $0xc0] sm:$0xf8] }
 0x17a   : > { %1365 = vst.msk [vmem:[#allocation2 + $0x108] sm:$0xf] %vm1334_vm12, %v1283_v8  ;;  %1363 = vst.msk [vmem:[#allocation2 + $0xf8] sm:$0xf] %vm1334_vm12, %v1282_v13  ;;  %v4231_v22 = vsel %vm983_vm4, %v4222_v9, %v4230_v14  ;;  %v2148_v25 = vrot.slane %v2027_v12, 4  ;;  %v2149_v23 = vrot.slane %v1432_v1, 4  ;;  %v786_v24 = vadd.f32 %v785_v53, %v14098_v41 }
 0x17b   : > { %1362 = vst.msk [vmem:[#allocation2 + $0xf0] sm:$0xf0] %vm1332_vm11, %v1282_v13  ;;  %12131 = vmatprep.mubr.msk.bf16.mxu1 %vm2208_vm10, %v4231_v22  ;;  %v4247_v29 = vor.u32 %v4246_v18, %v4243_v15  ;;  %v2147_v30 = vsel %vm2111_vm9, %v2145_v16, %v2146_v19  ;;  %v946_v31 = vmax.f32 %v794_v20, 0.0  ;;  %v797_v33 = vadd.f32 %v11886_v59, %v14098_v41  ;;  %v801_v37 = vpop.f32.mrb[37].mxu0  ;;  %v4038_v48 = vld [vmem:[#allocation2 + $0xc8] sm:$0xf] }
 0x17c   : > { %11938 = vmatmul.mubr.msk.bf16.gmra.mrb[84].mxu0 %vm2208_vm10, %v2147_v30  ;;  %v2150_v38 = vsel %vm2111_vm9, %v2148_v25, %v2149_v23  ;;  %v944_v39 = vmax.f32 %v786_v24, 0.0  ;;  %v789_v57 = vadd.f32 %v788_v2, %v14098_v41  ;;  %v4250_v42 = vshrl.u32 %v4035_v21, 16  ;;  %v11890_v43 = vpop.f32.mrb[38].mxu0  ;;  %v2028_v59 = vld [vmem:[#allocation2 + $0xd0] sm:$0xf0] }
 0x17d   : > { %v4248_v44 = vsel %vm983_vm4, %v4239_v17, %v4247_v29  ;;  %11941 = vmatprep.mubr.msk.bf16.mxu0 %vm2208_vm10, %v2150_v38  ;;  %v947_v45 = vmax.f32 %v797_v33, 0.0  ;;  %v4253_v46 = vshll.u32 %v4035_v21, 16  ;;  %v4258_v47 = vshrl.u32 %v4036_v26, 16  ;;  %v804_v49 = vpop.f32.mrb[39].mxu0  ;;  %v1436_v60 = vld [vmem:[#allocation2 + $0xe8] sm:$0xf] }
 0x17e   : > { %12132 = vmatmul.mubr.msk.bf16.gmra.mrb[16].mxu1 %vm2208_vm10, %v4248_v44  ;;  %v945_v50 = vmax.f32 %v789_v57, 0.0  ;;  %v4252_v51 = vrot.slane %v4250_v42, 3  ;;  %v4261_v52 = vshll.u32 %v4036_v26, 16  ;;  %v4267_v53 = vshrl.u32 %v4037_v36, 16  ;;  %v1434_v1 = vld [vmem:[#allocation2 + $0xd8] sm:$0xf] }
 0x17f   : > { %v1221_v54 = vpack.c.bf16 %v947_v45, %v946_v31  ;;  %v4255_v55 = vrot.slane %v4253_v46, 4  ;;  %v4260_v56 = vrot.slane %v4258_v47, 3  ;;  %v4270_v58 = vshll.u32 %v4037_v36, 16  ;;  %v2029_v6 = vld [vmem:[#allocation2 + $0xe0] sm:$0xf0] }
 0x180   : > { %v1220_v61 = vpack.c.bf16 %v945_v50, %v944_v39  ;;  %v4263_v62 = vrot.slane %v4261_v52, 4  ;;  %v4269_v63 = vrot.slane %v4267_v53, 3  ;;  %v4275_v0 = vshrl.u32 %v4038_v48, 16  ;;  %v14230_v11 = vpop.f32.mrb[40].mxu0  ;;  %v4039_v16 = vld [vmem:[#allocation2 + $0xd0] sm:$0xf8] }
 0x181   : > { %v1285_v2 = vrot.slane %v1221_v54, 4  ;;  %v4256_v3 = vor.u32 %v4255_v55, %v4252_v51  ;;  %v4272_v4 = vrot.slane %v4270_v58, 4  ;;  %v4278_v5 = vshll.u32 %v4038_v48, 16  ;;  %v14235_v17 = vpop.f32.mrb[41].mxu0  ;;  %v4040_v22 = vld [vmem:[#allocation2 + $0xd8] sm:$0xf] }
 0x182   : > { %v1284_v7 = vrot.slane %v1220_v61, 4  ;;  %v4264_v8 = vor.u32 %v4263_v62, %v4260_v56  ;;  %v4277_v9 = vrot.slane %v4275_v0, 3  ;;  %v2151_v10 = vrot.slane %v2028_v59, 4  ;;  %v11894_v25 = vpop.f32.mrb[42].mxu0  ;;  %v4041_v29 = vld [vmem:[#allocation2 + $0xe0] sm:$0xf8] }
 0x183   : > { %1368 = vst.msk [vmem:[#allocation2 + $0x140] sm:$0xf0] %vm1332_vm11, %v1285_v2  ;;  %v4273_v12 = vor.u32 %v4272_v4, %v4269_v63  ;;  %v4280_v13 = vrot.slane %v4278_v5, 4  ;;  %v2152_v14 = vrot.slane %v1434_v1, 4  ;;  %v810_v15 = vadd.f32 %v11889_v28, %v14098_v41  ;;  %v820_v30 = vpop.f32.mrb[43].mxu0 }
 0x184   : > { %1369 = vst.msk [vmem:[#allocation2 + $0x148] sm:$0xf] %vm1334_vm12, %v1285_v2  ;;  %1367 = vst.msk [vmem:[#allocation2 + $0x138] sm:$0xf] %vm1334_vm12, %v1284_v7  ;;  %v4265_v18 = vsel %vm983_vm4, %v4256_v3, %v4264_v8  ;;  %v2154_v19 = vrot.slane %v2029_v6, 4  ;;  %v2155_v20 = vrot.slane %v1436_v60, 4  ;;  %v802_v21 = vadd.f32 %v801_v37, %v14098_v41 }
 0x185   : > { %1366 = vst.msk [vmem:[#allocation2 + $0x130] sm:$0xf0] %vm1332_vm11, %v1284_v7  ;;  %12135 = vmatprep.mubr.msk.bf16.mxu1 %vm2208_vm10, %v4265_v18  ;;  %v4281_v23 = vor.u32 %v4280_v13, %v4277_v9  ;;  %v2153_v24 = vsel %vm2111_vm9, %v2151_v10, %v2152_v14  ;;  %v950_v26 = vmax.f32 %v810_v15, 0.0  ;;  %v813_v28 = vadd.f32 %v11890_v43, %v14098_v41  ;;  %v4042_v44 = vld [vmem:[#allocation2 + $0xe8] sm:$0xf] }
 0x186   : > { %11942 = vmatmul.mubr.msk.bf16.gmra.mrb[88].mxu0 %vm2208_vm10, %v2153_v24  ;;  %v2156_v31 = vsel %vm2111_vm9, %v2154_v19, %v2155_v20  ;;  %v948_v33 = vmax.f32 %v802_v21, 0.0  ;;  %v805_v36 = vadd.f32 %v804_v49, %v14098_v41  ;;  %v4284_v37 = vshrl.u32 %v4039_v16, 16  ;;  %v2030_v49 = vld [vmem:[#allocation2 + $0xf0] sm:$0xf0]  ;;  %v1438_v58 = vld [vmem:[#allocation2 + $0xf8] sm:$0xf] }
 0x187   : > { %v4282_v38 = vsel %vm983_vm4, %v4273_v12, %v4281_v23  ;;  %11945 = vmatprep.mubr.msk.bf16.mxu0 %vm2208_vm10, %v2156_v31  ;;  %v951_v39 = vmax.f32 %v813_v28, 0.0  ;;  %v4287_v57 = vshll.u32 %v4039_v16, 16  ;;  %v4292_v42 = vshrl.u32 %v4040_v22, 16  ;;  %v4043_v5 = vld [vmem:[#allocation2 + $0xf0] sm:$0xf8] }
 0x188   : > { %12136 = vmatmul.mubr.msk.bf16.gmra.mrb[20].mxu1 %vm2208_vm10, %v4282_v38  ;;  %v949_v43 = vmax.f32 %v805_v36, 0.0  ;;  %v4286_v45 = vrot.slane %v4284_v37, 3  ;;  %v4295_v46 = vshll.u32 %v4040_v22, 16  ;;  %v4301_v47 = vshrl.u32 %v4041_v29, 16  ;;  %v14250_v59 = vpop.f32.mrb[44].mxu0 }
 0x189   : > { %v1223_v48 = vpack.c.bf16 %v951_v39, %v950_v26  ;;  %v4289_v50 = vrot.slane %v4287_v57, 4  ;;  %v4294_v51 = vrot.slane %v4292_v42, 3  ;;  %v4304_v52 = vshll.u32 %v4041_v29, 16  ;;  %v14252_v0 = vpop.f32.mrb[45].mxu0  ;;  %v4044_v18 = vld [vmem:[#allocation2 + $0xf8] sm:$0xf] }
 0x18a   : > { %v1222_v53 = vpack.c.bf16 %v949_v43, %v948_v33  ;;  %v4297_v54 = vrot.slane %v4295_v46, 4  ;;  %v4303_v55 = vrot.slane %v4301_v47, 3  ;;  %v4309_v56 = vshrl.u32 %v4042_v44, 16  ;;  %v14254_v6 = vpop.f32.mrb[46].mxu0  ;;  %v4045_v22 = vld [vmem:[#allocation2 + $0x100] sm:$0xf8] }
 0x18b   : > { %v1287_v60 = vrot.slane %v1223_v48, 4  ;;  %v4290_v61 = vor.u32 %v4289_v50, %v4286_v45  ;;  %v4306_v62 = vrot.slane %v4304_v52, 4  ;;  %v4312_v63 = vshll.u32 %v4042_v44, 16  ;;  %v14260_v12 = vpop.f32.mrb[47].mxu0  ;;  %v1442_v33 = vld [vmem:[#allocation2 + $0x138] sm:$0xf] }
 0x18c   : > { %v1286_v1 = vrot.slane %v1222_v53, 4  ;;  %v4298_v2 = vor.u32 %v4297_v54, %v4294_v51  ;;  %v4311_v3 = vrot.slane %v4309_v56, 3  ;;  %v2157_v4 = vrot.slane %v2030_v49, 4  ;;  %v2032_v36 = vld [vmem:[#allocation2 + $0x130] sm:$0xf0] }
 0x18d   : > { %1372 = vst.msk [vmem:[#allocation2 + $0x160] sm:$0xf0] %vm1332_vm11, %v1287_v60  ;;  %v4307_v7 = vor.u32 %v4306_v62, %v4303_v55  ;;  %v4314_v8 = vrot.slane %v4312_v63, 4  ;;  %v2158_v9 = vrot.slane %v1438_v58, 4  ;;  %v826_v10 = vadd.f32 %v14230_v11, %v14098_v41  ;;  %v2033_v42 = vld [vmem:[#allocation2 + $0x140] sm:$0xf0] }
 0x18e   : > { %1373 = vst.msk [vmem:[#allocation2 + $0x168] sm:$0xf] %vm1334_vm12, %v1287_v60  ;;  %1371 = vst.msk [vmem:[#allocation2 + $0x158] sm:$0xf] %vm1334_vm12, %v1286_v1  ;;  %v4299_v13 = vsel %vm983_vm4, %v4290_v61, %v4298_v2  ;;  %v818_v14 = vadd.f32 %v14235_v17, %v14098_v41  ;;  %v829_v15 = vadd.f32 %v11894_v25, %v14098_v41  ;;  %v4318_v21 = vshrl.u32 %v4043_v5, 16 }
 0x18f   : > { %1370 = vst.msk [vmem:[#allocation2 + $0x150] sm:$0xf0] %vm1332_vm11, %v1286_v1  ;;  %v821_v16 = vadd.f32 %v820_v30, %v14098_v41  ;;  %12139 = vmatprep.mubr.msk.bf16.mxu1 %vm2208_vm10, %v4299_v13  ;;  %v4315_v19 = vor.u32 %v4314_v8, %v4311_v3  ;;  %v2159_v11 = vsel %vm2111_vm9, %v2157_v4, %v2158_v9  ;;  %v954_v20 = vmax.f32 %v826_v10, 0.0  ;;  %v4046_v17 = vld [vmem:[#allocation2 + $0x108] sm:$0xf] }
 0x190   : > { %11946 = vmatmul.mubr.msk.bf16.gmra.mrb[92].mxu0 %vm2208_vm10, %v2159_v11  ;;  %v952_v23 = vmax.f32 %v818_v14, 0.0  ;;  %v955_v24 = vmax.f32 %v829_v15, 0.0  ;;  %v4321_v28 = vshll.u32 %v4043_v5, 16  ;;  %v4320_v29 = vrot.slane %v4318_v21, 3  ;;  %v14276_v44 = vpop.f32.mrb[48].mxu0 }
 0x191   : > { %v953_v26 = vmax.f32 %v821_v16, 0.0  ;;  %v4316_v25 = vsel %vm983_vm4, %v4307_v7, %v4315_v19  ;;  %v4326_v30 = vshrl.u32 %v4044_v18, 16  ;;  %v4329_v31 = vshll.u32 %v4044_v18, 16  ;;  %11949 = vmatprep.mubr.msk.bf16.mxu0 %vm2208_vm10, %v14130_v40  ;;  %v14278_v48 = vpop.f32.mrb[49].mxu0  ;;  %v1444_v49 = vld [vmem:[#allocation2 + $0x148] sm:$0xf] }
 0x192   : > { %12140 = vmatmul.mubr.msk.bf16.gmra.mrb[24].mxu1 %vm2208_vm10, %v4316_v25  ;;  %v1225_v37 = vpack.c.bf16 %v955_v24, %v954_v20  ;;  %v4323_v39 = vrot.slane %v4321_v28, 4  ;;  %v4335_v57 = vshrl.u32 %v4045_v22, 16  ;;  %v4338_v46 = vshll.u32 %v4045_v22, 16  ;;  %v14280_v53 = vpop.f32.mrb[50].mxu0  ;;  %v4047_v2 = vld [vmem:[#allocation2 + $0x130] sm:$0xf8] }
 0x193   : > { %v1224_v38 = vpack.c.bf16 %v953_v26, %v952_v23  ;;  %v4328_v43 = vrot.slane %v4326_v30, 3  ;;  %v4331_v45 = vrot.slane %v4329_v31, 4  ;;  %v4343_v47 = vshrl.u32 %v4046_v17, 16  ;;  %v14282_v60 = vpop.f32.mrb[51].mxu0  ;;  %v4048_v8 = vld [vmem:[#allocation2 + $0x138] sm:$0xf] }
 0x194   : > { %v1289_v50 = vrot.slane %v1225_v37, 4  ;;  %v4324_v40 = vor.u32 %v4323_v39, %v4320_v29  ;;  %v4337_v52 = vrot.slane %v4335_v57, 3  ;;  %v4340_v55 = vrot.slane %v4338_v46, 4  ;;  %v4049_v19 = vld [vmem:[#allocation2 + $0x140] sm:$0xf8] }
 0x195   : > { %v1288_v51 = vrot.slane %v1224_v38, 4  ;;  %v4332_v54 = vor.u32 %v4331_v45, %v4328_v43  ;;  %v4345_v56 = vrot.slane %v4343_v47, 3  ;;  %v4346_v58 = vshll.u32 %v4046_v17, 16  ;;  %v4050_v11 = vld [vmem:[#allocation2 + $0x148] sm:$0xf] }
 0x196   : > { %1376 = vst.msk [vmem:[#allocation2 + $0x180] sm:$0xf0] %vm1332_vm11, %v1289_v50  ;;  %v2163_v61 = vrot.slane %v2032_v36, 4  ;;  %v2164_v62 = vrot.slane %v1442_v33, 4  ;;  %v842_v63 = vadd.f32 %v14250_v59, %v14098_v41  ;;  %v2166_v1 = vrot.slane %v2033_v42, 4 }
 0x197   : > { %1377 = vst.msk [vmem:[#allocation2 + $0x188] sm:$0xf] %vm1334_vm12, %v1289_v50  ;;  %1375 = vst.msk [vmem:[#allocation2 + $0x178] sm:$0xf] %vm1334_vm12, %v1288_v51  ;;  %v4333_v3 = vsel %vm983_vm4, %v4324_v40, %v4332_v54  ;;  %v4341_v4 = vor.u32 %v4340_v55, %v4337_v52  ;;  %v4348_v5 = vrot.slane %v4346_v58, 4  ;;  %v2167_v7 = vrot.slane %v1444_v49, 4 }
 0x198   : > { %1374 = vst.msk [vmem:[#allocation2 + $0x170] sm:$0xf0] %vm1332_vm11, %v1288_v51  ;;  %12143 = vmatprep.mubr.msk.bf16.mxu1 %vm2208_vm10, %v4333_v3  ;;  %v2165_v9 = vsel %vm2111_vm9, %v2163_v61, %v2164_v62  ;;  %v958_v10 = vmax.f32 %v842_v63, 0.0  ;;  %v834_v13 = vadd.f32 %v14252_v0, %v14098_v41  ;;  %v845_v14 = vadd.f32 %v14254_v6, %v14098_v41  ;;  %v14302_v23 = vpop.f32.mrb[52].mxu0  ;;  %v1446_v31 = vld [vmem:[#allocation2 + $0x158] sm:$0xf] }
 0x199   : > { %v4349_v59 = vor.u32 %v4348_v5, %v4345_v56  ;;  %11950 = vmatmul.mubr.msk.bf16.gmra.mrb[96].mxu0 %vm2208_vm10, %v2165_v9  ;;  %v2168_v15 = vsel %vm2111_vm9, %v2166_v1, %v2167_v7  ;;  %v837_v16 = vadd.f32 %v14260_v12, %v14098_v41  ;;  %v4352_v18 = vshrl.u32 %v4047_v2, 16  ;;  %v14305_v17 = vpop.f32.mrb[53].mxu0  ;;  %v1448_v33 = vld [vmem:[#allocation2 + $0x168] sm:$0xf]  ;;  %v2034_v42 = vld [vmem:[#allocation2 + $0x150] sm:$0xf0] }
 0x19a   : > { %11953 = vmatprep.mubr.msk.bf16.mxu0 %vm2208_vm10, %v2168_v15  ;;  %v956_v20 = vmax.f32 %v834_v13, 0.0  ;;  %v959_v21 = vmax.f32 %v845_v14, 0.0  ;;  %v4355_v22 = vshll.u32 %v4047_v2, 16  ;;  %v4360_v0 = vshrl.u32 %v4048_v8, 16  ;;  %v14308_v36 = vpop.f32.mrb[54].mxu0 }
 0x19b   : > { %v4350_v6 = vsel %vm983_vm4, %v4341_v4, %v4349_v59  ;;  %v957_v24 = vmax.f32 %v837_v16, 0.0  ;;  %v4354_v26 = vrot.slane %v4352_v18, 3  ;;  %v4363_v28 = vshll.u32 %v4048_v8, 16  ;;  %v14310_v43 = vpop.f32.mrb[55].mxu0  ;;  %v2035_v51 = vld [vmem:[#allocation2 + $0x160] sm:$0xf0] }
 0x19c   : > { %12144 = vmatmul.mubr.msk.bf16.gmra.mrb[28].mxu1 %vm2208_vm10, %v4350_v6  ;;  %v1227_v12 = vpack.c.bf16 %v959_v21, %v958_v10  ;;  %v4357_v25 = vrot.slane %v4355_v22, 4  ;;  %v4362_v29 = vrot.slane %v4360_v0, 3  ;;  %v4369_v30 = vshrl.u32 %v4049_v19, 16  ;;  %v4051_v62 = vld [vmem:[#allocation2 + $0x150] sm:$0xf8] }
 0x19d   : > { %v1226_v37 = vpack.c.bf16 %v957_v24, %v956_v20  ;;  %v4365_v38 = vrot.slane %v4363_v28, 4  ;;  %v4372_v39 = vshll.u32 %v4049_v19, 16  ;;  %v4377_v57 = vshrl.u32 %v4050_v11, 16  ;;  %v4052_v4 = vld [vmem:[#allocation2 + $0x158] sm:$0xf] }
 0x19e   : > { %v1291_v45 = vrot.slane %v1227_v12, 4  ;;  %v4358_v46 = vor.u32 %v4357_v25, %v4354_v26  ;;  %v4371_v47 = vrot.slane %v4369_v30, 3  ;;  %v4380_v50 = vshll.u32 %v4050_v11, 16  ;;  %v4053_v15 = vld [vmem:[#allocation2 + $0x160] sm:$0xf8] }
 0x19f   : > { %v1290_v40 = vrot.slane %v1226_v37, 4  ;;  %v4366_v52 = vor.u32 %v4365_v38, %v4362_v29  ;;  %v4374_v49 = vrot.slane %v4372_v39, 4  ;;  %v4379_v54 = vrot.slane %v4377_v57, 3  ;;  %v4054_v20 = vld [vmem:[#allocation2 + $0x168] sm:$0xf] }
 0x1a0   : > { %1380 = vst.msk [vmem:[#allocation2 + $0x1a0] sm:$0xf0] %vm1332_vm11, %v1291_v45  ;;  %v4382_v55 = vrot.slane %v4380_v50, 4  ;;  %v2169_v56 = vrot.slane %v2034_v42, 4  ;;  %v2170_v58 = vrot.slane %v1446_v31, 4  ;;  %v858_v61 = vadd.f32 %v14276_v44, %v14098_v41  ;;  %v14323_v9 = vpop.f32.mrb[56].mxu0 }
 0x1a1   : > { %1381 = vst.msk [vmem:[#allocation2 + $0x1a8] sm:$0xf] %vm1334_vm12, %v1291_v45  ;;  %1379 = vst.msk [vmem:[#allocation2 + $0x198] sm:$0xf] %vm1334_vm12, %v1290_v40  ;;  %v4367_v63 = vsel %vm983_vm4, %v4358_v46, %v4366_v52  ;;  %v4375_v1 = vor.u32 %v4374_v49, %v4371_v47  ;;  %v2172_v2 = vrot.slane %v2035_v51, 4  ;;  %v2173_v3 = vrot.slane %v1448_v33, 4 }
 0x1a2   : > { %1378 = vst.msk [vmem:[#allocation2 + $0x190] sm:$0xf0] %vm1332_vm11, %v1290_v40  ;;  %12147 = vmatprep.mubr.msk.bf16.mxu1 %vm2208_vm10, %v4367_v63  ;;  %v4383_v5 = vor.u32 %v4382_v55, %v4379_v54  ;;  %v2171_v7 = vsel %vm2111_vm9, %v2169_v56, %v2170_v58  ;;  %v962_v8 = vmax.f32 %v858_v61, 0.0  ;;  %v850_v44 = vadd.f32 %v14278_v48, %v14098_v41  ;;  %v14331_v16 = vpop.f32.mrb[57].mxu0  ;;  %v1450_v25 = vld [vmem:[#allocation2 + $0x178] sm:$0xf] }
 0x1a3   : > { %11954 = vmatmul.mubr.msk.bf16.gmra.mrb[100].mxu0 %vm2208_vm10, %v2171_v7  ;;  %v2174_v10 = vsel %vm2111_vm9, %v2172_v2, %v2173_v3  ;;  %v861_v13 = vadd.f32 %v14280_v53, %v14098_v41  ;;  %v853_v14 = vadd.f32 %v14282_v60, %v14098_v41  ;;  %v4386_v59 = vshrl.u32 %v4051_v62, 16  ;;  %v14335_v21 = vpop.f32.mrb[58].mxu0  ;;  %v2036_v37 = vld [vmem:[#allocation2 + $0x170] sm:$0xf0]  ;;  %v1452_v38 = vld [vmem:[#allocation2 + $0x188] sm:$0xf] }
 0x1a4   : > { %v4384_v18 = vsel %vm983_vm4, %v4375_v1, %v4383_v5  ;;  %11957 = vmatprep.mubr.msk.bf16.mxu0 %vm2208_vm10, %v2174_v10  ;;  %v960_v48 = vmax.f32 %v850_v44, 0.0  ;;  %v4389_v19 = vshll.u32 %v4051_v62, 16  ;;  %v4394_v11 = vshrl.u32 %v4052_v4, 16  ;;  %v14338_v6 = vpop.f32.mrb[59].mxu0  ;;  %v2037_v46 = vld [vmem:[#allocation2 + $0x180] sm:$0xf0] }
 0x1a5   : > { %12148 = vmatmul.mubr.msk.bf16.gmra.mrb[32].mxu1 %vm2208_vm10, %v4384_v18  ;;  %v963_v53 = vmax.f32 %v861_v13, 0.0  ;;  %v961_v22 = vmax.f32 %v853_v14, 0.0  ;;  %v4388_v0 = vrot.slane %v4386_v59, 3  ;;  %v4397_v60 = vshll.u32 %v4052_v4, 16  ;;  %v4055_v56 = vld [vmem:[#allocation2 + $0x170] sm:$0xf8] }
 0x1a6   : > { %v4391_v24 = vrot.slane %v4389_v19, 4  ;;  %v4396_v26 = vrot.slane %v4394_v11, 3  ;;  %v4403_v28 = vshrl.u32 %v4053_v15, 16  ;;  %v4406_v12 = vshll.u32 %v4053_v15, 16  ;;  %v4056_v7 = vld [vmem:[#allocation2 + $0x178] sm:$0xf] }
 0x1a7   : > { %v1229_v29 = vpack.c.bf16 %v963_v53, %v962_v8  ;;  %v1228_v30 = vpack.c.bf16 %v961_v22, %v960_v48  ;;  %v4399_v31 = vrot.slane %v4397_v60, 4  ;;  %v4411_v33 = vshrl.u32 %v4054_v20, 16  ;;  %v4057_v14 = vld [vmem:[#allocation2 + $0x180] sm:$0xf8]  ;;  %v4058_v48 = vld [vmem:[#allocation2 + $0x188] sm:$0xf] }
 0x1a8   : > { %v4392_v39 = vor.u32 %v4391_v24, %v4388_v0  ;;  %v4405_v57 = vrot.slane %v4403_v28, 3  ;;  %v4408_v42 = vrot.slane %v4406_v12, 4  ;;  %v4414_v45 = vshll.u32 %v4054_v20, 16  ;;  %v14340_v58 = vpop.f32.mrb[60].mxu0  ;;  %v1456_v28 = vld [vmem:[#allocation2 + $0x1a8] sm:$0xf] }
 0x1a9   : > { %v1293_v47 = vrot.slane %v1229_v29, 4  ;;  %v1292_v50 = vrot.slane %v1228_v30, 4  ;;  %v4400_v51 = vor.u32 %v4399_v31, %v4396_v26  ;;  %v4413_v40 = vrot.slane %v4411_v33, 3  ;;  %v14355_v8 = vpop.f32.mrb[61].mxu0  ;;  %v1454_v26 = vld [vmem:[#allocation2 + $0x198] sm:$0xf] }
 0x1aa   : > { %v4409_v52 = vor.u32 %v4408_v42, %v4405_v57  ;;  %v4416_v49 = vrot.slane %v4414_v45, 4  ;;  %v2175_v54 = vrot.slane %v2036_v37, 4  ;;  %v2176_v55 = vrot.slane %v1450_v25, 4  ;;  %v14361_v59 = vpop.f32.mrb[62].mxu0  ;;  %v2038_v31 = vld [vmem:[#allocation2 + $0x190] sm:$0xf0] }
 0x1ab   : > { %1384 = vst.msk [vmem:[#allocation2 + $0x1c0] sm:$0xf0] %vm1332_vm11, %v1293_v47  ;;  %1382 = vst.msk [vmem:[#allocation2 + $0x1b0] sm:$0xf0] %vm1332_vm11, %v1292_v50  ;;  %v4401_v61 = vsel %vm983_vm4, %v4392_v39, %v4400_v51  ;;  %v874_v62 = vadd.f32 %v14302_v23, %v14098_v41  ;;  %v2178_v63 = vrot.slane %v2037_v46, 4  ;;  %v2179_v1 = vrot.slane %v1452_v38, 4 }
 0x1ac   : > { %1385 = vst.msk [vmem:[#allocation2 + $0x1c8] sm:$0xf] %vm1334_vm12, %v1293_v47  ;;  %1383 = vst.msk [vmem:[#allocation2 + $0x1b8] sm:$0xf] %vm1334_vm12, %v1292_v50  ;;  %12151 = vmatprep.mubr.msk.bf16.mxu1 %vm2208_vm10, %v4401_v61  ;;  %v4417_v2 = vor.u32 %v4416_v49, %v4413_v40  ;;  %v2177_v3 = vsel %vm2111_vm9, %v2175_v54, %v2176_v55  ;;  %v866_v4 = vadd.f32 %v14305_v17, %v14098_v41  ;;  %v14365_v19 = vpop.f32.mrb[63].mxu0 }
 0x1ad   : > { %v877_v5 = vadd.f32 %v14308_v36, %v14098_v41  ;;  %11958 = vmatmul.mubr.msk.bf16.gmra.mrb[104].mxu0 %vm2208_vm10, %v2177_v3  ;;  %v966_v44 = vmax.f32 %v874_v62, 0.0  ;;  %v2180_v23 = vsel %vm2111_vm9, %v2178_v63, %v2179_v1  ;;  %v869_v10 = vadd.f32 %v14310_v43, %v14098_v41  ;;  %v2039_v57 = vld [vmem:[#allocation2 + $0x1a0] sm:$0xf0]  ;;  %v4059_v49 = vld [vmem:[#allocation2 + $0x190] sm:$0xf8] }
 0x1ae   : > { %v4420_v13 = vshrl.u32 %v4055_v56, 16  ;;  %v4418_v17 = vsel %vm983_vm4, %v4409_v52, %v4417_v2  ;;  %11961 = vmatprep.mubr.msk.bf16.mxu0 %vm2208_vm10, %v2180_v23  ;;  %v964_v36 = vmax.f32 %v866_v4, 0.0  ;;  %v4423_v18 = vshll.u32 %v4055_v56, 16  ;;  %v4060_v62 = vld [vmem:[#allocation2 + $0x198] sm:$0xf] }
 0x1af   : > { %v967_v15 = vmax.f32 %v877_v5, 0.0  ;;  %12152 = vmatmul.mubr.msk.bf16.gmra.mrb[36].mxu1 %vm2208_vm10, %v4418_v17  ;;  %v965_v11 = vmax.f32 %v869_v10, 0.0  ;;  %v4428_v53 = vshrl.u32 %v4056_v7, 16  ;;  %v4431_v43 = vshll.u32 %v4056_v7, 16 }
 0x1b0   : > { %v4422_v20 = vrot.slane %v4420_v13, 3  ;;  %v4425_v0 = vrot.slane %v4423_v18, 4  ;;  %v4437_v60 = vshrl.u32 %v4057_v14, 16  ;;  %v4440_v24 = vshll.u32 %v4057_v14, 16 }
 0x1b1   : > { %v1231_v22 = vpack.c.bf16 %v967_v15, %v966_v44  ;;  %v1230_v12 = vpack.c.bf16 %v965_v11, %v964_v36  ;;  %v4430_v25 = vrot.slane %v4428_v53, 3  ;;  %v4433_v29 = vrot.slane %v4431_v43, 4  ;;  %v4061_v44 = vld [vmem:[#allocation2 + $0x1a0] sm:$0xf8] }
 0x1b2   : > { %v4445_v30 = vshrl.u32 %v4058_v48, 16  ;;  %v4426_v37 = vor.u32 %v4425_v0, %v4422_v20  ;;  %v4439_v38 = vrot.slane %v4437_v60, 3  ;;  %v4442_v39 = vrot.slane %v4440_v24, 4  ;;  %v2040_v53 = vld [vmem:[#allocation2 + $0x1b0] sm:$0xf0] }
 0x1b3   : > { %v1295_v33 = vrot.slane %v1231_v22, 4  ;;  %v1294_v42 = vrot.slane %v1230_v12, 4  ;;  %v4434_v45 = vor.u32 %v4433_v29, %v4430_v25  ;;  %v4448_v47 = vshll.u32 %v4058_v48, 16  ;;  %v1458_v18 = vld [vmem:[#allocation2 + $0x1b8] sm:$0xf] }
 0x1b4   : > { %v4447_v46 = vrot.slane %v4445_v30, 3  ;;  %v4443_v50 = vor.u32 %v4442_v39, %v4439_v38  ;;  %v2181_v51 = vrot.slane %v2038_v31, 4  ;;  %v2182_v40 = vrot.slane %v1454_v26, 4  ;;  %v1460_v24 = vld [vmem:[#allocation2 + $0x1c8] sm:$0xf] }
 0x1b5   : > { %1388 = vst.msk [vmem:[#allocation2 + $0x1e0] sm:$0xf0] %vm1332_vm11, %v1295_v33  ;;  %v890_v52 = vadd.f32 %v14323_v9, %v14098_v41  ;;  %1386 = vst.msk [vmem:[#allocation2 + $0x1d0] sm:$0xf0] %vm1332_vm11, %v1294_v42  ;;  %v4435_v54 = vsel %vm983_vm4, %v4426_v37, %v4434_v45  ;;  %v4450_v55 = vrot.slane %v4448_v47, 4  ;;  %v2184_v56 = vrot.slane %v2039_v57, 4 }
 0x1b6   : > { %1389 = vst.msk [vmem:[#allocation2 + $0x1e8] sm:$0xf] %vm1334_vm12, %v1295_v33  ;;  %1387 = vst.msk [vmem:[#allocation2 + $0x1d8] sm:$0xf] %vm1334_vm12, %v1294_v42  ;;  %v2185_v61 = vrot.slane %v1456_v28, 4  ;;  %12155 = vmatprep.mubr.msk.bf16.mxu1 %vm2208_vm10, %v4435_v54  ;;  %v2183_v63 = vsel %vm2111_vm9, %v2181_v51, %v2182_v40  ;;  %v882_v2 = vadd.f32 %v14331_v16, %v14098_v41  ;;  %v4454_v7 = vshrl.u32 %v4059_v49, 16 }
 0x1b7   : > { %v970_v1 = vmax.f32 %v890_v52, 0.0  ;;  %v893_v9 = vadd.f32 %v14335_v21, %v14098_v41  ;;  %v4451_v3 = vor.u32 %v4450_v55, %v4447_v46  ;;  %11962 = vmatmul.mubr.msk.bf16.gmra.mrb[108].mxu0 %vm2208_vm10, %v2183_v63  ;;  %v885_v5 = vadd.f32 %v14338_v6, %v14098_v41  ;;  %v4062_v16 = vld [vmem:[#allocation2 + $0x1a8] sm:$0xf]  ;;  %v2041_v29 = vld [vmem:[#allocation2 + $0x1c0] sm:$0xf0] }
 0x1b8   : > { %v2186_v4 = vsel %vm2111_vm9, %v2184_v56, %v2185_v61  ;;  %v968_v23 = vmax.f32 %v882_v2, 0.0  ;;  %v4457_v13 = vshll.u32 %v4059_v49, 16  ;;  %v4462_v14 = vshrl.u32 %v4060_v62, 16  ;;  %v4063_v45 = vld [vmem:[#allocation2 + $0x1b0] sm:$0xf8] }
 0x1b9   : > { %11965 = vmatprep.mubr.msk.bf16.mxu0 %vm2208_vm10, %v2186_v4  ;;  %v971_v10 = vmax.f32 %v893_v9, 0.0  ;;  %v4452_v17 = vsel %vm983_vm4, %v4443_v50, %v4451_v3  ;;  %v969_v21 = vmax.f32 %v885_v5, 0.0  ;;  %v4456_v36 = vrot.slane %v4454_v7, 3  ;;  %v4064_v40 = vld [vmem:[#allocation2 + $0x1b8] sm:$0xf] }
 0x1ba   : > { %v4465_v15 = vshll.u32 %v4060_v62, 16  ;;  %12156 = vmatmul.mubr.msk.bf16.gmra.mrb[40].mxu1 %vm2208_vm10, %v4452_v17  ;;  %v4459_v11 = vrot.slane %v4457_v13, 4  ;;  %v4464_v6 = vrot.slane %v4462_v14, 3  ;;  %v4471_v20 = vshrl.u32 %v4061_v44, 16  ;;  %v4065_v63 = vld [vmem:[#allocation2 + $0x1c0] sm:$0xf8] }
 0x1bb   : > { %v1233_v48 = vpack.c.bf16 %v971_v10, %v970_v1  ;;  %v1232_v43 = vpack.c.bf16 %v969_v21, %v968_v23  ;;  %v4474_v0 = vshll.u32 %v4061_v44, 16  ;;  %v4479_v60 = vshrl.u32 %v4062_v16, 16  ;;  %v1088_v13 = vld [vmem:[#allocation2 + $0x1d0] sm:$0x8] }
 0x1bc   : > { %v4467_v22 = vrot.slane %v4465_v15, 4  ;;  %v4460_v28 = vor.u32 %v4459_v11, %v4456_v36  ;;  %v4473_v12 = vrot.slane %v4471_v20, 3  ;;  %v4482_v25 = vshll.u32 %v4062_v16, 16  ;;  %v2042_v15 = vld [vmem:[#allocation2 + $0x1d0] sm:$0xf0] }
 0x1bd   : > { %v1297_v26 = vrot.slane %v1233_v48, 4  ;;  %v1296_v30 = vrot.slane %v1232_v43, 4  ;;  %v4476_v33 = vrot.slane %v4474_v0, 4  ;;  %v4481_v37 = vrot.slane %v4479_v60, 3  ;;  %v1462_v36 = vld [vmem:[#allocation2 + $0x1d8] sm:$0xf] }
 0x1be   : > { %v4468_v31 = vor.u32 %v4467_v22, %v4464_v6  ;;  %v4484_v38 = vrot.slane %v4482_v25, 4  ;;  %v2187_v39 = vrot.slane %v2040_v53, 4  ;;  %v2188_v57 = vrot.slane %v1458_v18, 4  ;;  %v2043_v20 = vld [vmem:[#allocation2 + $0x1e0] sm:$0xf0] }
 0x1bf   : > { %1392 = vst.msk [vmem:[#allocation2 + $0x200] sm:$0xf0] %vm1332_vm11, %v1297_v26  ;;  %v906_v42 = vadd.f32 %v14340_v58, %v14098_v41  ;;  %1390 = vst.msk [vmem:[#allocation2 + $0x1f0] sm:$0xf0] %vm1332_vm11, %v1296_v30  ;;  %v4477_v47 = vor.u32 %v4476_v33, %v4473_v12  ;;  %v2190_v50 = vrot.slane %v2041_v29, 4  ;;  %v2191_v51 = vrot.slane %v1460_v24, 4 }
 0x1c0   : > { %1393 = vst.msk [vmem:[#allocation2 + $0x208] sm:$0xf] %vm1334_vm12, %v1297_v26  ;;  %1391 = vst.msk [vmem:[#allocation2 + $0x1f8] sm:$0xf] %vm1334_vm12, %v1296_v30  ;;  %v4469_v46 = vsel %vm983_vm4, %v4460_v28, %v4468_v31  ;;  %v4485_v52 = vor.u32 %v4484_v38, %v4481_v37  ;;  %v2189_v49 = vsel %vm2111_vm9, %v2187_v39, %v2188_v57  ;;  %v4488_v62 = vshrl.u32 %v4063_v45, 16 }
 0x1c1   : > { %12159 = vmatprep.mubr.msk.bf16.mxu1 %vm2208_vm10, %v4469_v46  ;;  %v974_v54 = vmax.f32 %v906_v42, 0.0  ;;  %v898_v58 = vadd.f32 %v14355_v8, %v14098_v41  ;;  %11966 = vmatmul.mubr.msk.bf16.gmra.mrb[112].mxu0 %vm2208_vm10, %v2189_v49  ;;  %v2192_v55 = vsel %vm2111_vm9, %v2190_v50, %v2191_v51  ;;  %v909_v56 = vadd.f32 %v14361_v59, %v14098_v41  ;;  %v4066_v8 = vld [vmem:[#allocation2 + $0x1c8] sm:$0xf]  ;;  %v1091_v53 = vld [vmem:[#allocation2 + $0x1e0] sm:$0x8] }
 0x1c2   : > { %v901_v61 = vadd.f32 %v14365_v19, %v14098_v41  ;;  %v4486_v1 = vsel %vm983_vm4, %v4477_v47, %v4485_v52  ;;  %11969 = vmatprep.mubr.msk.bf16.mxu0 %vm2208_vm10, %v2192_v55  ;;  %v4491_v9 = vshll.u32 %v4063_v45, 16  ;;  %v4496_v3 = vshrl.u32 %v4064_v40, 16  ;;  %v1464_v19 = vld [vmem:[#allocation2 + $0x1e8] sm:$0xf]  ;;  %v4068_v24 = vld [vmem:[#allocation2 + $0x1d8] sm:$0xf] }
 0x1c3   : > { %v972_v2 = vmax.f32 %v898_v58, 0.0  ;;  %12160 = vmatmul.mubr.msk.bf16.gmra.mrb[44].mxu1 %vm2208_vm10, %v4486_v1  ;;  %v975_v4 = vmax.f32 %v909_v56, 0.0  ;;  %v4490_v7 = vrot.slane %v4488_v62, 3  ;;  %v4499_v44 = vshll.u32 %v4064_v40, 16  ;;  %v4070_v29 = vld [vmem:[#allocation2 + $0x1e8] sm:$0xf] }
 0x1c4   : > { %v973_v5 = vmax.f32 %v901_v61, 0.0  ;;  %v4493_v59 = vrot.slane %v4491_v9, 4  ;;  %v4498_v23 = vrot.slane %v4496_v3, 3  ;;  %v4505_v10 = vshrl.u32 %v4065_v63, 16  ;;  %v1094_v57 = vld [vmem:[#allocation2 + $0x1f0] sm:$0x8] }
 0x1c5   : > { %v4508_v41 = vshll.u32 %v4065_v63, 16  ;;  %v1235_v14 = vpack.c.bf16 %v975_v4, %v974_v54  ;;  %v4501_v17 = vrot.slane %v4499_v44, 4  ;;  %v4513_v21 = vshrl.u32 %v4066_v8, 16  ;;  %v1097_v62 = vld [vmem:[#allocation2 + $0x200] sm:$0x8] }
 0x1c6   : > { %v1234_v16 = vpack.c.bf16 %v973_v5, %v972_v2  ;;  %v4494_v18 = vor.u32 %v4493_v59, %v4490_v7  ;;  %v4507_v48 = vrot.slane %v4505_v10, 3  ;;  %v4516_v6 = vshll.u32 %v4066_v8, 16  ;;  %v2044_v38 = vld [vmem:[#allocation2 + $0x1f0] sm:$0xf0]  ;;  %v2045_v51 = vld [vmem:[#allocation2 + $0x200] sm:$0xf0] }
 0x1c7   : > { %v4510_v11 = vrot.slane %v4508_v41, 4  ;;  %v1299_v43 = vrot.slane %v1235_v14, 4  ;;  %v4502_v0 = vor.u32 %v4501_v17, %v4498_v23  ;;  %v4515_v60 = vrot.slane %v4513_v21, 3  ;;  %v1468_v39 = vld [vmem:[#allocation2 + $0x208] sm:$0xf] }
 0x1c8   : > { %v1298_v22 = vrot.slane %v1234_v16, 4  ;;  %v4518_v28 = vrot.slane %v4516_v6, 4  ;;  %v2193_v12 = vrot.slane %v2042_v15, 4  ;;  %v2194_v25 = vrot.slane %v1462_v36, 4  ;;  %v1466_v50 = vld [vmem:[#allocation2 + $0x1f8] sm:$0xf] }
 0x1c9   : > { %v4511_v26 = vor.u32 %v4510_v11, %v4507_v48  ;;  %1396 = vst.msk [vmem:[#allocation2 + $0x220] sm:$0xf0] %vm1332_vm11, %v1299_v43  ;;  %v4503_v30 = vsel %vm983_vm4, %v4494_v18, %v4502_v0  ;;  %v2196_v31 = vrot.slane %v2043_v20, 4  ;;  %v2197_v33 = vrot.slane %v1464_v19, 4  ;;  %v4072_v58 = vld [vmem:[#allocation2 + $0x1f8] sm:$0xf] }
 0x1ca   : > { %1397 = vst.msk [vmem:[#allocation2 + $0x228] sm:$0xf] %vm1334_vm12, %v1299_v43  ;;  %1395 = vst.msk [vmem:[#allocation2 + $0x218] sm:$0xf] %vm1334_vm12, %v1298_v22  ;;  %v1089_v37 = vsel %vm14018_vm8, 0, %v1088_v13  ;;  %12163 = vmatprep.mubr.msk.bf16.mxu1 %vm2208_vm10, %v4503_v30  ;;  %v4519_v42 = vor.u32 %v4518_v28, %v4515_v60  ;;  %v2195_v45 = vsel %vm2111_vm9, %v2193_v12, %v2194_v25  ;;  %v4530_v46 = vshrl.u32 %v4068_v24, 16 }
 0x1cb   : > { %1394 = vst.msk [vmem:[#allocation2 + $0x210] sm:$0xf0] %vm1332_vm11, %v1298_v22  ;;  %1090 = vst [vmem:[#allocation2 + $0x1d0] sm:$0x8] %v1089_v37  ;;  %v4533_v47 = vshll.u32 %v4068_v24, 16  ;;  %11970 = vmatmul.mubr.msk.bf16.gmra.mrb[116].mxu0 %vm2208_vm10, %v2195_v45  ;;  %v2198_v40 = vsel %vm2111_vm9, %v2196_v31, %v2197_v33  ;;  %v1092_v52 = vsel %vm14018_vm8, 0, %v1091_v53 }
 0x1cc   : > { %v4547_v49 = vshrl.u32 %v4070_v29, 16  ;;  %v4550_v54 = vshll.u32 %v4070_v29, 16  ;;  %v4520_v55 = vsel %vm983_vm4, %v4511_v26, %v4519_v42  ;;  %11973 = vmatprep.mubr.msk.bf16.mxu0 %vm2208_vm10, %v2198_v40  ;;  %v14423_v56 = vrot.slane %v4530_v46, 3  ;;  %1093 = vst [vmem:[#allocation2 + $0x1e0] sm:$0x8] %v1092_v52 }
 0x1cd   : > { %v2199_v61 = vrot.slane %v2044_v38, 4  ;;  %12164 = vmatmul.mubr.msk.bf16.gmra.mrb[48].mxu1 %vm2208_vm10, %v4520_v55  ;;  %v4535_v63 = vrot.slane %v4533_v47, 4  ;;  %v2200_v9 = vrot.slane %v1466_v50, 4  ;;  %v4074_v3 = vld [vmem:[#allocation2 + $0x208] sm:$0xf]  ;;  %v2202_v8 = vrot.slane %v2045_v51, 4 }
 0x1ce   : > { %v14426_v1 = vrot.slane %v4547_v49, 3  ;;  %v14428_v2 = vrot.slane %v4550_v54, 4  ;;  %v2203_v4 = vrot.slane %v1468_v39, 4  ;;  %v1095_v5 = vsel %vm14018_vm8, 0, %v1094_v57  ;;  %v1100_v23 = vld [vmem:[#allocation2 + $0x210] sm:$0x8] }
 0x1cf   : > { %v4564_v7 = vshrl.u32 %v4072_v58, 16  ;;  %1096 = vst [vmem:[#allocation2 + $0x1f0] sm:$0x8] %v1095_v5  ;;  %v4567_v44 = vshll.u32 %v4072_v58, 16  ;;  %v1098_v59 = vsel %vm14018_vm8, 0, %v1097_v62  ;;  %v2201_v10 = vsel %vm2111_vm9, %v2199_v61, %v2200_v9 }
 0x1d0   : > { %1099 = vst [vmem:[#allocation2 + $0x200] sm:$0x8] %v1098_v59  ;;  %v4581_v19 = vshrl.u32 %v4074_v3, 16  ;;  %v4584_v13 = vshll.u32 %v4074_v3, 16  ;;  %v4536_v17 = vor.u32 %v4535_v63, %v14423_v56  ;;  %v4553_v21 = vor.u32 %v14428_v2, %v14426_v1  ;;  %v1103_v29 = vld [vmem:[#allocation2 + $0x220] sm:$0x8] }
 0x1d1   : > { %v14435_v41 = vrot.slane %v4564_v7, 3  ;;  %v1470_v14 = vld [vmem:[#allocation2 + $0x218] sm:$0xf]  ;;  %v14440_v36 = vrot.slane %v4567_v44, 4  ;;  %v2204_v6 = vsel %vm2111_vm9, %v2202_v8, %v2203_v4  ;;  %v1101_v60 = vsel %vm14018_vm8, 0, %v1100_v23 }
 0x1d2   : > { %v4067_v16 = vld [vmem:[#allocation2 + $0x1d0] sm:$0xf8]  ;;  %v2206_v18 = vrot.slane %v1470_v14, 4  ;;  %v14443_v20 = vrot.slane %v4581_v19, 3  ;;  %v4076_v53 = vld [vmem:[#allocation2 + $0x218] sm:$0xf] }
 0x1d3   : > { %v2046_v15 = vld [vmem:[#allocation2 + $0x210] sm:$0xf0]  ;;  %v4522_v48 = vshrl.u32 %v4067_v16, 16  ;;  %v4525_v11 = vshll.u32 %v4067_v16, 16  ;;  %v4069_v43 = vld [vmem:[#allocation2 + $0x1e0] sm:$0xf8]  ;;  %11974 = vmatmul.mubr.msk.bf16.gmra.mrb[120].mxu0 %vm2208_vm10, %v2201_v10  ;;  %v4570_v30 = vor.u32 %v14440_v36, %v14435_v41 }
 0x1d4   : > { %v14446_v22 = vrot.slane %v4584_v13, 4  ;;  %v2205_v0 = vrot.slane %v2046_v15, 4  ;;  %v4598_v24 = vshrl.u32 %v4076_v53, 16  ;;  %v4539_v12 = vshrl.u32 %v4069_v43, 16  ;;  %11977 = vmatprep.mubr.msk.bf16.mxu0 %vm2208_vm10, %v2204_v6  ;;  %1102 = vst [vmem:[#allocation2 + $0x210] sm:$0x8] %v1101_v60 }
 0x1d5   : > { %v4524_v26 = vrot.slane %v4522_v48, 3  ;;  %v4527_v28 = vrot.slane %v4525_v11, 4  ;;  %v4542_v25 = vshll.u32 %v4069_v43, 16  ;;  %v4601_v37 = vshll.u32 %v4076_v53, 16  ;;  %v4078_v38 = vld [vmem:[#allocation2 + $0x228] sm:$0xf] }
 0x1d6   : > { %v2207_v31 = vsel %vm2111_vm9, %v2205_v0, %v2206_v18  ;;  %v14454_v33 = vrot.slane %v4598_v24, 3  ;;  %v4541_v57 = vrot.slane %v4539_v12, 3  ;;  %v4071_v45 = vld [vmem:[#allocation2 + $0x1f0] sm:$0xf8]  ;;  %v13450_v46 = vld [vmem:[#allocation6] sm:$0xf]  ;;  %v4587_v1 = vor.u32 %v14446_v22, %v14443_v20 }
 0x1d7   : > { %v4528_v39 = vor.u32 %v4527_v28, %v4524_v26  ;;  %v4544_v42 = vrot.slane %v4542_v25, 4  ;;  %v2695_v47 = vsel %vm2111_vm9, %v13450_v46, 0  ;;  %v4556_v50 = vshrl.u32 %v4071_v45, 16  ;;  %v4073_v40 = vld [vmem:[#allocation2 + $0x200] sm:$0xf8] }
 0x1d8   : > { %v4559_v51 = vshll.u32 %v4071_v45, 16  ;;  %v4603_v52 = vrot.slane %v4601_v37, 4  ;;  %11982 = vmatpush3.bf16.msra.mxu0 %v2695_v47  ;;  %v1104_v49 = vsel %vm14018_vm8, 0, %v1103_v29  ;;  %v4573_v55 = vshrl.u32 %v4073_v40, 16  ;;  %v14460_v61 = vld [vmem:[#allocation2 + $0x10] sm:$0xf0] }
 0x1d9   : > { %v4537_v54 = vsel %vm983_vm4, %v4528_v39, %v4536_v17  ;;  %v4545_v58 = vor.u32 %v4544_v42, %v4541_v57  ;;  %v4576_v56 = vshll.u32 %v4073_v40, 16  ;;  %1105 = vst [vmem:[#allocation2 + $0x220] sm:$0x8] %v1104_v49  ;;  %v4558_v62 = vrot.slane %v4556_v50, 3  ;;  %v1407_v4 = vld [vmem:[#allocation2] sm:$0xf8] }
 0x1da   : > { %12167 = vmatprep.mubr.msk.bf16.mxu1 %vm2208_vm10, %v4537_v54  ;;  %v4561_v63 = vrot.slane %v4559_v51, 4  ;;  %v4615_v2 = vshrl.u32 %v4078_v38, 16  ;;  %v4575_v34 = vrot.slane %v4573_v55, 3  ;;  %v4618_v8 = vshll.u32 %v4078_v38, 16  ;;  %v13451_v16 = vld [vmem:[#allocation2 + $0x18] sm:$0xf] }
 0x1db   : > { %v4554_v9 = vsel %vm983_vm4, %v4545_v58, %v4553_v21  ;;  %v4578_v3 = vrot.slane %v4576_v56, 4  ;;  %11978 = vmatmul.mubr.msk.bf16.gmra.mrb[124].mxu0 %vm2208_vm10, %v2207_v31  ;;  %v4075_v7 = vld [vmem:[#allocation2 + $0x210] sm:$0xf8]  ;;  %v4604_v44 = vor.u32 %v4603_v52, %v14454_v33  ;;  %v5171_v23 = vrot.slane %v14460_v61, 4  ;;  %v13452_v22 = vld [vmem:[#allocation2 + $0x8] sm:$0xf] }
 0x1dc   : > { %12168 = vmatmul.mubr.msk.bf16.gmra.mrb[52].mxu1 %vm2208_vm10, %v4554_v9  ;;  %v4562_v5 = vor.u32 %v4561_v63, %v4558_v62  ;;  %v14469_v59 = vrot.slane %v4615_v2, 3  ;;  %v4590_v41 = vshrl.u32 %v4075_v7, 16  ;;  %v4593_v19 = vshll.u32 %v4075_v7, 16  ;;  %v1409_v15 = vld [vmem:[#allocation2 + $0x10] sm:$0xf8] }
 0x1dd   : > { %v4579_v10 = vor.u32 %v4578_v3, %v4575_v34  ;;  %v4620_v13 = vrot.slane %v4618_v8, 4  ;;  %v5172_v17 = vrot.slane %v13451_v16, 4  ;;  %v1472_v21 = vshrl.u32 %v1407_v4, 16  ;;  %v1411_v33 = vld [vmem:[#allocation2 + $0x20] sm:$0xf8] }
 0x1de   : > { %v4571_v14 = vsel %vm983_vm4, %v4562_v5, %v4570_v30  ;;  %v1475_v36 = vshll.u32 %v1407_v4, 16  ;;  %v4592_v48 = vrot.slane %v4590_v41, 3  ;;  %v4595_v11 = vrot.slane %v4593_v19, 4  ;;  %v13453_v46 = vld [vmem:[#allocation2 + $0x18] sm:$0xf] }
 0x1df   : > { %12171 = vmatprep.mubr.msk.bf16.mxu1 %vm2208_vm10, %v4571_v14  ;;  %v4588_v18 = vsel %vm983_vm4, %v4579_v10, %v4587_v1  ;;  %v4621_v6 = vor.u32 %v4620_v13, %v14469_v59  ;;  %v1474_v53 = vrot.slane %v1472_v21, 3  ;;  %v1480_v0 = vshrl.u32 %v13452_v22, 16  ;;  %v13454_v49 = vld [vmem:[#allocation2 + $0x28] sm:$0xf]  ;;  %v5076_v63 = vld [vmem:[#allocation2 + $0x20] sm:$0xf0] }
 0x1e0   : > { %v4077_v20 = vld [vmem:[#allocation2 + $0x220] sm:$0xf8]  ;;  %v1477_v43 = vrot.slane %v1475_v36, 4  ;;  %v1483_v60 = vshll.u32 %v13452_v22, 16  ;;  %v4596_v24 = vor.u32 %v4595_v11, %v4592_v48  ;;  %v1489_v12 = vshrl.u32 %v1409_v15, 16 }
 0x1e1   : > { %v4607_v26 = vshrl.u32 %v4077_v20, 16  ;;  %v4610_v28 = vshll.u32 %v4077_v20, 16  ;;  %v1482_v29 = vrot.slane %v1480_v0, 3  ;;  %v1492_v31 = vshll.u32 %v1409_v15, 16  ;;  %v1400_v58 = vld [vmem:[#allocation6 + $0x8] sm:$0xf] }
 0x1e2   : > { %v1478_v25 = vor.u32 %v1477_v43, %v1474_v53  ;;  %v1485_v30 = vrot.slane %v1483_v60, 4  ;;  %v4605_v37 = vsel %vm983_vm4, %v4596_v24, %v4604_v44  ;;  %v1491_v57 = vrot.slane %v1489_v12, 3  ;;  %13347 = vmatprep.subr.msk.bf16.mxu0 %vm2111_vm9, %v1400_v58  ;;  %v5077_v34 = vld [vmem:[#allocation2 + $0x30] sm:$0xf0]  ;;  %v13455_v10 = vld [vmem:[#allocation2 + $0x28] sm:$0xf] }
 0x1e3   : > { %v4609_v38 = vrot.slane %v4607_v26, 3  ;;  %v4612_v39 = vrot.slane %v4610_v28, 4  ;;  %v1494_v45 = vrot.slane %v1492_v31, 4  ;;  %v1497_v47 = vshrl.u32 %v13453_v46, 16  ;;  %v1413_v3 = vld [vmem:[#allocation2 + $0x30] sm:$0xf8] }
 0x1e4   : > { %12172 = vmatmul.mubr.msk.bf16.gmra.mrb[56].mxu1 %vm2208_vm10, %v4588_v18  ;;  %v1486_v42 = vor.u32 %v1485_v30, %v1482_v29  ;;  %v1500_v50 = vshll.u32 %v13453_v46, 16  ;;  %v1506_v40 = vshrl.u32 %v1411_v33, 16  ;;  %v1509_v52 = vshll.u32 %v1411_v33, 16  ;;  %v13456_v19 = vld [vmem:[#allocation6 + $0x14] sm:$0xf] }
 0x1e5   : > { %12175 = vmatprep.mubr.msk.bf16.mxu1 %vm2208_vm10, %v4605_v37  ;;  %v4613_v51 = vor.u32 %v4612_v39, %v4609_v38  ;;  %v1514_v54 = vshrl.u32 %v13454_v49, 16  ;;  %v1495_v56 = vor.u32 %v1494_v45, %v1491_v57  ;;  %v1499_v61 = vrot.slane %v1497_v47, 3  ;;  %v13457_v36 = vld [vmem:[#allocation2 + $0x38] sm:$0xf]  ;;  %v5078_v0 = vld [vmem:[#allocation2 + $0x40] sm:$0xf0] }
 0x1e6   : > { %v1487_v55 = vsel %vm983_vm4, %v1478_v25, %v1486_v42  ;;  %v1502_v62 = vrot.slane %v1500_v50, 4  ;;  %v5173_v1 = vsel %vm2111_vm9, %v5171_v23, %v5172_v17  ;;  %v1508_v2 = vrot.slane %v1506_v40, 3  ;;  %v1415_v23 = vld [vmem:[#allocation2 + $0x40] sm:$0xf8]  ;;  %v13458_v48 = vld [vmem:[#allocation2 + $0x38] sm:$0xf] }
 0x1e7   : > { %11983 = vmatprep.mubr.msk.bf16.mxu0 %vm2208_vm10, %v1487_v55  ;;  %v1511_v9 = vrot.slane %v1509_v52, 4  ;;  %v4622_v8 = vsel %vm983_vm4, %v4613_v51, %v4621_v6  ;;  %v1516_v5 = vrot.slane %v1514_v54, 3  ;;  %v1517_v7 = vshll.u32 %v13454_v49, 16  ;;  %v13459_v28 = vld [vmem:[#allocation2 + $0x48] sm:$0xf] }
 0x1e8   : > { %v1503_v4 = vor.u32 %v1502_v62, %v1499_v61  ;;  %v5174_v59 = vrot.slane %v5076_v63, 4  ;;  %v5175_v41 = vrot.slane %v13455_v10, 4  ;;  %v14485_v13 = vsel %vm2111_vm9, %v13456_v19, 0  ;;  %v5079_v25 = vld [vmem:[#allocation2 + $0x50] sm:$0xf0] }
 0x1e9   : > { %v1512_v44 = vor.u32 %v1511_v9, %v1508_v2  ;;  %v1519_v16 = vrot.slane %v1517_v7, 4  ;;  %v5177_v17 = vrot.slane %v5077_v34, 4  ;;  %v1523_v21 = vshrl.u32 %v1413_v3, 16  ;;  %v1417_v37 = vld [vmem:[#allocation2 + $0x50] sm:$0xf8] }
 0x1ea   : > { %v1504_v14 = vsel %vm983_vm4, %v1495_v56, %v1503_v4  ;;  %v5178_v15 = vrot.slane %v13457_v36, 4  ;;  %v1526_v18 = vshll.u32 %v1413_v3, 16  ;;  %v1531_v11 = vshrl.u32 %v13458_v48, 16  ;;  %v1419_v51 = vld [vmem:[#allocation2 + $0x60] sm:$0xf8] }
 0x1eb   : > { %11984 = vmatmul.mubr.msk.bf16.vlgmr.msra.gmra.mrb[64].mxu0 %vm2208_vm10, %v1504_v14  ;;  %v1534_v6 = vshll.u32 %v13458_v48, 16  ;;  %v1520_v20 = vor.u32 %v1519_v16, %v1516_v5  ;;  %v1525_v53 = vrot.slane %v1523_v21, 3  ;;  %v1540_v43 = vshrl.u32 %v1415_v23, 16  ;;  %v13460_v40 = vld [vmem:[#allocation2 + $0x48] sm:$0xf] }
 0x1ec   : > { %12176 = vmatmul.mubr.msk.bf16.gmra.mrb[60].mxu1 %vm2208_vm10, %v4622_v8  ;;  %v1543_v22 = vshll.u32 %v1415_v23, 16  ;;  %v1528_v60 = vrot.slane %v1526_v18, 4  ;;  %v1533_v24 = vrot.slane %v1531_v11, 3  ;;  %v1548_v12 = vshrl.u32 %v13459_v28, 16  ;;  %v13461_v61 = vld [vmem:[#allocation2 + $0x58] sm:$0xf] }
 0x1ed   : > { %12181 = vmatprep.mubr.msk.bf16.mxu1 %vm2208_vm10, %v5173_v1  ;;  %v1536_v26 = vrot.slane %v1534_v6, 4  ;;  %v1521_v29 = vsel %vm983_vm4, %v1512_v44, %v1520_v20  ;;  %v1542_v30 = vrot.slane %v1540_v43, 3  ;;  %v1551_v33 = vshll.u32 %v13459_v28, 16  ;;  %v13462_v1 = vld [vmem:[#allocation2 + $0x58] sm:$0xf] }
 0x1ee   : > { %v1545_v31 = vrot.slane %v1543_v22, 4  ;;  %11987 = vmatprep.mubr.msk.bf16.mxu0 %vm2208_vm10, %v1521_v29  ;;  %v5176_v38 = vsel %vm2111_vm9, %v5174_v59, %v5175_v41  ;;  %v1529_v39 = vor.u32 %v1528_v60, %v1525_v53  ;;  %v1550_v42 = vrot.slane %v1548_v12, 3  ;;  %v1404_v8 = vld [vmem:[#allocation6 + $0x18] sm:$0xf]  ;;  %v5080_v59 = vld [vmem:[#allocation2 + $0x60] sm:$0xf0] }
 0x1ef   : > { %v1537_v57 = vor.u32 %v1536_v26, %v1533_v24  ;;  %v5179_v45 = vsel %vm2111_vm9, %v5177_v17, %v5178_v15  ;;  %v1553_v47 = vrot.slane %v1551_v33, 4  ;;  %v5180_v50 = vrot.slane %v5078_v0, 4  ;;  %v13463_v19 = vld [vmem:[#allocation2 + $0x68] sm:$0xf]  ;;  %v1421_v16 = vld [vmem:[#allocation2 + $0x70] sm:$0xf8] }
 0x1f0   : > { %v1546_v46 = vor.u32 %v1545_v31, %v1542_v30  ;;  %v5181_v52 = vrot.slane %v13460_v40, 4  ;;  %v5183_v49 = vrot.slane %v5079_v25, 4  ;;  %v1557_v54 = vshrl.u32 %v1417_v37, 16  ;;  %v1423_v48 = vld [vmem:[#allocation2 + $0x80] sm:$0xf8] }
 0x1f1   : > { %v1560_v58 = vshll.u32 %v1417_v37, 16  ;;  %v1538_v55 = vsel %vm983_vm4, %v1529_v39, %v1537_v57  ;;  %v1554_v56 = vor.u32 %v1553_v47, %v1550_v42  ;;  %v1565_v62 = vshrl.u32 %v13461_v61, 16  ;;  %v13464_v20 = vld [vmem:[#allocation2 + $0x68] sm:$0xf]  ;;  %v13465_v24 = vld [vmem:[#allocation2 + $0x78] sm:$0xf] }
 0x1f2   : > { %v1568_v63 = vshll.u32 %v13461_v61, 16  ;;  %v5184_v2 = vrot.slane %v13462_v1, 4  ;;  %v1559_v9 = vrot.slane %v1557_v54, 3  ;;  %v1574_v3 = vshrl.u32 %v1419_v51, 16  ;;  %v5081_v28 = vld [vmem:[#allocation2 + $0x70] sm:$0xf0] }
 0x1f3   : > { %11988 = vmatmul.mubr.msk.bf16.gmra.mrb[68].mxu0 %vm2208_vm10, %v1538_v55  ;;  %v1562_v34 = vrot.slane %v1560_v58, 4  ;;  %v1555_v4 = vsel %vm983_vm4, %v1546_v46, %v1554_v56  ;;  %v1567_v5 = vrot.slane %v1565_v62, 3  ;;  %v1577_v44 = vshll.u32 %v1419_v51, 16  ;;  %v5082_v57 = vld [vmem:[#allocation2 + $0x80] sm:$0xf0] }
 0x1f4   : > { %12182 = vmatmul.mubr.msk.bf16.vlgmr.msra.gmra.mrb[0].mxu1 %vm2208_vm10, %v5176_v38  ;;  %v1570_v7 = vrot.slane %v1568_v63, 4  ;;  %v1576_v41 = vrot.slane %v1574_v3, 3  ;;  %v1582_v23 = vshrl.u32 %v13463_v19, 16  ;;  %v1585_v14 = vshll.u32 %v13463_v19, 16  ;;  %11991 = vmatprep.mubr.msk.bf16.mxu0 %vm2208_vm10, %v1555_v4  ;;  %v13466_v38 = vld [vmem:[#allocation2 + $0x88] sm:$0xf] }
 0x1f5   : > { %12246 = vmatpush3.bf16.msra.mxu1 %v14485_v13  ;;  %12185 = vmatprep.mubr.msk.bf16.mxu1 %vm2208_vm10, %v5179_v45  ;;  %v1563_v10 = vor.u32 %v1562_v34, %v1559_v9  ;;  %v1579_v21 = vrot.slane %v1577_v44, 4  ;;  %v5182_v36 = vsel %vm2111_vm9, %v5180_v50, %v5181_v52  ;;  %v5185_v15 = vsel %vm2111_vm9, %v5183_v49, %v5184_v2  ;;  %v1425_v50 = vld [vmem:[#allocation2 + $0x90] sm:$0xf8]  ;;  %v13467_v52 = vld [vmem:[#allocation2 + $0x78] sm:$0xf] }
 0x1f6   : > { %v1571_v17 = vor.u32 %v1570_v7, %v1567_v5  ;;  %13351 = vmatprep.subr.msk.bf16.mxu1 %vm2111_vm9, %v1404_v8  ;;  %v1584_v18 = vrot.slane %v1582_v23, 3  ;;  %v1587_v13 = vrot.slane %v1585_v14, 4  ;;  %v5186_v6 = vrot.slane %v5080_v59, 4  ;;  %v5083_v58 = vld [vmem:[#allocation2 + $0x90] sm:$0xf0] }
 0x1f7   : > { %v1580_v11 = vor.u32 %v1579_v21, %v1576_v41  ;;  %v5187_v53 = vrot.slane %v13464_v20, 4  ;;  %v1591_v43 = vshrl.u32 %v1421_v16, 16  ;;  %v1594_v60 = vshll.u32 %v1421_v16, 16  ;;  %v1427_v63 = vld [vmem:[#allocation2 + $0xa0] sm:$0xf8] }
 0x1f8   : > { %v1572_v22 = vsel %vm983_vm4, %v1563_v10, %v1571_v17  ;;  %v1588_v0 = vor.u32 %v1587_v13, %v1584_v18  ;;  %v1599_v26 = vshrl.u32 %v13465_v24, 16  ;;  %v1602_v25 = vshll.u32 %v13465_v24, 16  ;;  %v13468_v2 = vld [vmem:[#allocation2 + $0x88] sm:$0xf]  ;;  %v13469_v5 = vld [vmem:[#allocation2 + $0x98] sm:$0xf] }
 0x1f9   : > { %v1593_v12 = vrot.slane %v1591_v43, 3  ;;  %v1608_v29 = vshrl.u32 %v1423_v48, 16  ;;  %v1611_v30 = vshll.u32 %v1423_v48, 16  ;;  %v1596_v33 = vrot.slane %v1594_v60, 4  ;;  %v13470_v59 = vld [vmem:[#allocation2 + $0x98] sm:$0xf] }
 0x1fa   : > { %v1589_v31 = vsel %vm983_vm4, %v1580_v11, %v1588_v0  ;;  %v1601_v37 = vrot.slane %v1599_v26, 3  ;;  %v1616_v39 = vshrl.u32 %v13466_v38, 16  ;;  %v1604_v42 = vrot.slane %v1602_v25, 4  ;;  %v13471_v13 = vld [vmem:[#allocation2 + $0xa8] sm:$0xf] }
 0x1fb   : > { %11992 = vmatmul.mubr.msk.bf16.gmra.mrb[72].mxu0 %vm2208_vm10, %v1572_v22  ;;  %v1610_v45 = vrot.slane %v1608_v29, 3  ;;  %v1613_v46 = vrot.slane %v1611_v30, 4  ;;  %v1619_v47 = vshll.u32 %v13466_v38, 16  ;;  %v5188_v51 = vsel %vm2111_vm9, %v5186_v6, %v5187_v53  ;;  %v1429_v6 = vld [vmem:[#allocation2 + $0xb0] sm:$0xf8] }
 0x1fc   : > { %12186 = vmatmul.mubr.msk.bf16.gmra.mrb[4].mxu1 %vm2208_vm10, %v5182_v36  ;;  %11995 = vmatprep.mubr.msk.bf16.mxu0 %vm2208_vm10, %v1589_v31  ;;  %v5189_v40 = vrot.slane %v5081_v28, 4  ;;  %v5190_v49 = vrot.slane %v13467_v52, 4  ;;  %v1618_v54 = vrot.slane %v1616_v39, 3  ;;  %v1597_v55 = vor.u32 %v1596_v33, %v1593_v12  ;;  %v5084_v36 = vld [vmem:[#allocation2 + $0xa0] sm:$0xf0] }
 0x1fd   : > { %12189 = vmatprep.mubr.msk.bf16.mxu1 %vm2208_vm10, %v5185_v15  ;;  %v1605_v56 = vor.u32 %v1604_v42, %v1601_v37  ;;  %v1621_v61 = vrot.slane %v1619_v47, 4  ;;  %v5192_v62 = vrot.slane %v5082_v57, 4  ;;  %v1614_v1 = vor.u32 %v1613_v46, %v1610_v45  ;;  %v1431_v26 = vld [vmem:[#allocation2 + $0xc0] sm:$0xf8]  ;;  %v13472_v25 = vld [vmem:[#allocation2 + $0xa8] sm:$0xf] }
 0x1fe   : > { %v5193_v9 = vrot.slane %v13468_v2, 4  ;;  %v1625_v34 = vshrl.u32 %v1425_v50, 16  ;;  %v1628_v3 = vshll.u32 %v1425_v50, 16  ;;  %v5195_v4 = vrot.slane %v5083_v58, 4  ;;  %v13473_v38 = vld [vmem:[#allocation2 + $0xb8] sm:$0xf] }
 0x1ff   : > { %v1622_v8 = vor.u32 %v1621_v61, %v1618_v54  ;;  %v1633_v7 = vshrl.u32 %v13469_v5, 16  ;;  %v1636_v44 = vshll.u32 %v13469_v5, 16  ;;  %v5196_v10 = vrot.slane %v13470_v59, 4  ;;  %v14521_v57 = vld [vmem:[#allocation2 + $0xb0] sm:$0xf0] }
 0x200   : > { %v1627_v41 = vrot.slane %v1625_v34, 3  ;;  %v1630_v19 = vrot.slane %v1628_v3, 4  ;;  %v1642_v23 = vshrl.u32 %v1427_v63, 16  ;;  %v1606_v14 = vsel %vm983_vm4, %v1597_v55, %v1605_v56  ;;  %v13474_v52 = vld [vmem:[#allocation2 + $0xc8] sm:$0xf] }
 0x201   : > { %v1635_v16 = vrot.slane %v1633_v7, 3  ;;  %v1638_v17 = vrot.slane %v1636_v44, 4  ;;  %v1645_v21 = vshll.u32 %v1427_v63, 16  ;;  %v1623_v15 = vsel %vm983_vm4, %v1614_v1, %v1622_v8  ;;  %v14524_v54 = vld [vmem:[#allocation2 + $0xc0] sm:$0xf0] }
 0x202   : > { %v1644_v18 = vrot.slane %v1642_v23, 3  ;;  %v1650_v48 = vshrl.u32 %v13471_v13, 16  ;;  %v1653_v11 = vshll.u32 %v13471_v13, 16  ;;  %v5191_v20 = vsel %vm2111_vm9, %v5189_v40, %v5190_v49  ;;  %v13475_v2 = vld [vmem:[#allocation2 + $0xb8] sm:$0xf] }
 0x203   : > { %11996 = vmatmul.mubr.msk.bf16.gmra.mrb[76].mxu0 %vm2208_vm10, %v1606_v14  ;;  %v5194_v53 = vsel %vm2111_vm9, %v5192_v62, %v5193_v9  ;;  %v1647_v43 = vrot.slane %v1645_v21, 4  ;;  %v1631_v22 = vor.u32 %v1630_v19, %v1627_v41  ;;  %v1639_v0 = vor.u32 %v1638_v17, %v1635_v16  ;;  %v1433_v62 = vld [vmem:[#allocation2 + $0xd0] sm:$0xf8]  ;;  %v1435_v44 = vld [vmem:[#allocation2 + $0xe0] sm:$0xf8] }
 0x204   : > { %12190 = vmatmul.mubr.msk.bf16.gmra.mrb[8].mxu1 %vm2208_vm10, %v5188_v51  ;;  %11999 = vmatprep.mubr.msk.bf16.mxu0 %vm2208_vm10, %v1623_v15  ;;  %v1652_v60 = vrot.slane %v1650_v48, 3  ;;  %v1655_v24 = vrot.slane %v1653_v11, 4  ;;  %v5197_v28 = vsel %vm2111_vm9, %v5195_v4, %v5196_v10  ;;  %v5198_v12 = vrot.slane %v5084_v36, 4  ;;  %v5087_v7 = vld [vmem:[#allocation2 + $0xd0] sm:$0xf0] }
 0x205   : > { %12193 = vmatprep.mubr.msk.bf16.mxu1 %vm2208_vm10, %v5191_v20  ;;  %v5199_v29 = vrot.slane %v13472_v25, 4  ;;  %v1659_v30 = vshrl.u32 %v1429_v6, 16  ;;  %v1648_v31 = vor.u32 %v1647_v43, %v1644_v18  ;;  %v1662_v37 = vshll.u32 %v1429_v6, 16  ;;  %v13476_v14 = vld [vmem:[#allocation2 + $0xc8] sm:$0xf] }
 0x206   : > { %v1656_v33 = vor.u32 %v1655_v24, %v1652_v60  ;;  %v1667_v39 = vshrl.u32 %v13473_v38, 16  ;;  %v1670_v45 = vshll.u32 %v13473_v38, 16  ;;  %v1676_v46 = vshrl.u32 %v1431_v26, 16  ;;  %v13477_v17 = vld [vmem:[#allocation2 + $0xd8] sm:$0xf] }
 0x207   : > { %v1661_v42 = vrot.slane %v1659_v30, 3  ;;  %v1679_v47 = vshll.u32 %v1431_v26, 16  ;;  %v1640_v50 = vsel %vm983_vm4, %v1631_v22, %v1639_v0  ;;  %v1664_v51 = vrot.slane %v1662_v37, 4  ;;  %v13478_v11 = vld [vmem:[#allocation2 + $0xd8] sm:$0xf] }
 0x208   : > { %v1669_v40 = vrot.slane %v1667_v39, 3  ;;  %v1684_v49 = vshrl.u32 %v13474_v52, 16  ;;  %v1672_v58 = vrot.slane %v1670_v45, 4  ;;  %v1678_v55 = vrot.slane %v1676_v46, 3  ;;  %v5088_v22 = vld [vmem:[#allocation2 + $0xe0] sm:$0xf0] }
 0x209   : > { %v1681_v56 = vrot.slane %v1679_v47, 4  ;;  %v1687_v61 = vshll.u32 %v13474_v52, 16  ;;  %v1657_v63 = vsel %vm983_vm4, %v1648_v31, %v1656_v33  ;;  %v5201_v1 = vrot.slane %v14521_v57, 4  ;;  %v13479_v24 = vld [vmem:[#allocation2 + $0xe8] sm:$0xf] }
 0x20a   : > { %v5202_v9 = vrot.slane %v13475_v2, 4  ;;  %v1686_v34 = vrot.slane %v1684_v49, 3  ;;  %v5200_v3 = vsel %vm2111_vm9, %v5198_v12, %v5199_v29  ;;  %v1665_v8 = vor.u32 %v1664_v51, %v1661_v42  ;;  %v1437_v12 = vld [vmem:[#allocation2 + $0xf0] sm:$0xf8]  ;;  %v13480_v57 = vld [vmem:[#allocation2 + $0xe8] sm:$0xf] }
 0x20b   : > { %12000 = vmatmul.mubr.msk.bf16.gmra.mrb[80].mxu0 %vm2208_vm10, %v1640_v50  ;;  %v1689_v4 = vrot.slane %v1687_v61, 4  ;;  %v5204_v5 = vrot.slane %v14524_v54, 4  ;;  %v1673_v59 = vor.u32 %v1672_v58, %v1669_v40  ;;  %v1682_v10 = vor.u32 %v1681_v56, %v1678_v55  ;;  %v14536_v33 = vld [vmem:[#allocation2 + $0xf0] sm:$0xf0]  ;;  %v14543_v50 = vld [vmem:[#allocation2 + $0x100] sm:$0xf0] }
 0x20c   : > { %12194 = vmatmul.mubr.msk.bf16.gmra.mrb[12].mxu1 %vm2208_vm10, %v5194_v53  ;;  %12003 = vmatprep.mubr.msk.bf16.mxu0 %vm2208_vm10, %v1657_v63  ;;  %v1693_v41 = vshrl.u32 %v1433_v62, 16  ;;  %v1696_v19 = vshll.u32 %v1433_v62, 16  ;;  %v5205_v16 = vrot.slane %v13476_v14, 4  ;;  %v1701_v21 = vshrl.u32 %v13477_v17, 16  ;;  %v13481_v49 = vld [vmem:[#allocation2 + $0xf8] sm:$0xf] }
 0x20d   : > { %12197 = vmatprep.mubr.msk.bf16.mxu1 %vm2208_vm10, %v5197_v28  ;;  %v1690_v23 = vor.u32 %v1689_v4, %v1686_v34  ;;  %v1704_v36 = vshll.u32 %v13477_v17, 16  ;;  %v5207_v15 = vrot.slane %v5087_v7, 4  ;;  %v1710_v48 = vshrl.u32 %v1435_v44, 16  ;;  %v1439_v58 = vld [vmem:[#allocation2 + $0x120] sm:$0xf8] }
 0x20e   : > { %v1695_v18 = vrot.slane %v1693_v41, 3  ;;  %v1698_v13 = vrot.slane %v1696_v19, 4  ;;  %v5208_v6 = vrot.slane %v13478_v11, 4  ;;  %v1703_v20 = vrot.slane %v1701_v21, 3  ;;  %v13482_v2 = vld [vmem:[#allocation2 + $0xf8] sm:$0xf] }
 0x20f   : > { %v1706_v53 = vrot.slane %v1704_v36, 4  ;;  %v1713_v43 = vshll.u32 %v1435_v44, 16  ;;  %v1674_v0 = vsel %vm983_vm4, %v1665_v8, %v1673_v59  ;;  %v1691_v60 = vsel %vm983_vm4, %v1682_v10, %v1690_v23  ;;  %v13483_v44 = vld [vmem:[#allocation2 + $0x108] sm:$0xf]  ;;  %v1443_v36 = vld [vmem:[#allocation2 + $0x140] sm:$0xf8] }
 0x210   : > { %v1718_v26 = vshrl.u32 %v13479_v24, 16  ;;  %v1721_v28 = vshll.u32 %v13479_v24, 16  ;;  %v1699_v25 = vor.u32 %v1698_v13, %v1695_v18  ;;  %v1712_v30 = vrot.slane %v1710_v48, 3  ;;  %v13484_v41 = vld [vmem:[#allocation2 + $0x128] sm:$0xf] }
 0x211   : > { %v1707_v29 = vor.u32 %v1706_v53, %v1703_v20  ;;  %v1715_v31 = vrot.slane %v1713_v43, 4  ;;  %v5210_v39 = vrot.slane %v5088_v22, 4  ;;  %v5211_v42 = vrot.slane %v13480_v57, 4  ;;  %v13485_v53 = vld [vmem:[#allocation2 + $0x138] sm:$0xf] }
 0x212   : > { %v1720_v37 = vrot.slane %v1718_v26, 3  ;;  %v1723_v38 = vrot.slane %v1721_v28, 4  ;;  %v5203_v45 = vsel %vm2111_vm9, %v5201_v1, %v5202_v9  ;;  %v5206_v46 = vsel %vm2111_vm9, %v5204_v5, %v5205_v16  ;;  %v1445_v57 = vld [vmem:[#allocation2 + $0x150] sm:$0xf8] }
 0x213   : > { %12004 = vmatmul.mubr.msk.bf16.gmra.mrb[84].mxu0 %vm2208_vm10, %v1674_v0  ;;  %v1727_v47 = vshrl.u32 %v1437_v12, 16  ;;  %v5209_v51 = vsel %vm2111_vm9, %v5207_v15, %v5208_v6  ;;  %v5213_v40 = vrot.slane %v14536_v33, 4  ;;  %v1730_v52 = vshll.u32 %v1437_v12, 16  ;;  %v14557_v6 = vld [vmem:[#allocation2 + $0x130] sm:$0xf0] }
 0x214   : > { %12198 = vmatmul.mubr.msk.bf16.gmra.mrb[16].mxu1 %vm2208_vm10, %v5200_v3  ;;  %12007 = vmatprep.mubr.msk.bf16.mxu0 %vm2208_vm10, %v1691_v60  ;;  %v1735_v54 = vshrl.u32 %v13481_v49, 16  ;;  %v1716_v55 = vor.u32 %v1715_v31, %v1712_v30  ;;  %v1724_v56 = vor.u32 %v1723_v38, %v1720_v37  ;;  %v1738_v62 = vshll.u32 %v13481_v49, 16  ;;  %v1441_v3 = vld [vmem:[#allocation2 + $0x130] sm:$0xf8]  ;;  %v14562_v31 = vld [vmem:[#allocation2 + $0x140] sm:$0xf0] }
 0x215   : > { %12201 = vmatprep.mubr.msk.bf16.mxu1 %vm2208_vm10, %v5203_v45  ;;  %v1729_v61 = vrot.slane %v1727_v47, 3  ;;  %v1708_v63 = vsel %vm983_vm4, %v1699_v25, %v1707_v29  ;;  %v14550_v1 = vsel %vm2111_vm9, %v5210_v39, %v5211_v42  ;;  %v5214_v9 = vrot.slane %v13482_v2, 4  ;;  %v13486_v29 = vld [vmem:[#allocation2 + $0x148] sm:$0xf]  ;;  %v14569_v45 = vld [vmem:[#allocation2 + $0x138] sm:$0xf] }
 0x216   : > { %v1732_v34 = vrot.slane %v1730_v52, 4  ;;  %v1737_v8 = vrot.slane %v1735_v54, 3  ;;  %v1740_v4 = vrot.slane %v1738_v62, 4  ;;  %v5216_v5 = vrot.slane %v14543_v50, 4  ;;  %v1447_v54 = vld [vmem:[#allocation2 + $0x160] sm:$0xf8] }
 0x217   : > { %v1744_v7 = vshrl.u32 %v1439_v58, 16  ;;  %v5217_v59 = vrot.slane %v13483_v44, 4  ;;  %v1747_v10 = vshll.u32 %v1439_v58, 16  ;;  %v1752_v19 = vshrl.u32 %v13484_v41, 16  ;;  %v6794_v32 = vld [vmem:[#allocation2 + $0x1b0] sm:$0xf8] }
 0x218   : > { %v1755_v23 = vshll.u32 %v13484_v41, 16  ;;  %v1725_v14 = vsel %vm983_vm4, %v1716_v55, %v1724_v56  ;;  %v1733_v16 = vor.u32 %v1732_v34, %v1729_v61  ;;  %v1761_v21 = vshrl.u32 %v1441_v3, 16  ;;  %v14576_v56 = vld [vmem:[#allocation2 + $0x150] sm:$0xf0] }
 0x219   : > { %v1746_v17 = vrot.slane %v1744_v7, 3  ;;  %v1749_v15 = vrot.slane %v1747_v10, 4  ;;  %v1754_v18 = vrot.slane %v1752_v19, 3  ;;  %v1764_v48 = vshll.u32 %v1441_v3, 16  ;;  %v13489_v3 = vld [vmem:[#allocation2 + $0x158] sm:$0xf] }
 0x21a   : > { %v1757_v13 = vrot.slane %v1755_v23, 4  ;;  %v1741_v11 = vor.u32 %v1740_v4, %v1737_v8  ;;  %v14559_v20 = vrot.slane %v1761_v21, 3  ;;  %v1769_v43 = vshrl.u32 %v13485_v53, 16  ;;  %v13490_v23 = vld [vmem:[#allocation2 + $0x168] sm:$0xf] }
 0x21b   : > { %12008 = vmatmul.mubr.msk.bf16.gmra.mrb[88].mxu0 %vm2208_vm10, %v1708_v63  ;;  %v1772_v22 = vshll.u32 %v13485_v53, 16  ;;  %v1750_v0 = vor.u32 %v1749_v15, %v1746_v17  ;;  %v1766_v24 = vrot.slane %v1764_v48, 4  ;;  %v1778_v26 = vshrl.u32 %v1443_v36, 16  ;;  %v13491_v17 = vld [vmem:[#allocation2 + $0x158] sm:$0xf] }
 0x21c   : > { %12202 = vmatmul.mubr.msk.bf16.gmra.mrb[20].mxu1 %vm2208_vm10, %v5206_v46  ;;  %12011 = vmatprep.mubr.msk.bf16.mxu0 %vm2208_vm10, %v1725_v14  ;;  %v1758_v60 = vor.u32 %v1757_v13, %v1754_v18  ;;  %v1771_v28 = vrot.slane %v1769_v43, 3  ;;  %v1781_v25 = vshll.u32 %v1443_v36, 16  ;;  %v1786_v30 = vshrl.u32 %v13486_v29, 16  ;;  %v1449_v18 = vld [vmem:[#allocation2 + $0x170] sm:$0xf8] }
 0x21d   : > { %12205 = vmatprep.mubr.msk.bf16.mxu1 %vm2208_vm10, %v5209_v51  ;;  %v1774_v12 = vrot.slane %v1772_v22, 4  ;;  %v5215_v33 = vsel %vm2111_vm9, %v5213_v40, %v5214_v9  ;;  %v5219_v37 = vrot.slane %v14557_v6, 4  ;;  %v1780_v38 = vrot.slane %v1778_v26, 3  ;;  %v13488_v9 = vld [vmem:[#allocation2 + $0x148] sm:$0xf] }
 0x21e   : > { %v1789_v39 = vshll.u32 %v13486_v29, 16  ;;  %v14567_v42 = vsel %vm2111_vm9, %v5216_v5, %v5217_v59  ;;  %v5220_v46 = vrot.slane %v14569_v45, 4  ;;  %v1783_v47 = vrot.slane %v1781_v25, 4  ;;  %v5094_v59 = vld [vmem:[#allocation2 + $0x160] sm:$0xf0] }
 0x21f   : > { %v1788_v50 = vrot.slane %v1786_v30, 3  ;;  %v1742_v51 = vsel %vm983_vm4, %v1733_v16, %v1741_v11  ;;  %v1759_v52 = vsel %vm983_vm4, %v1750_v0, %v1758_v60  ;;  %v1767_v40 = vor.u32 %v1766_v24, %v14559_v20  ;;  %v5095_v16 = vld [vmem:[#allocation2 + $0x170] sm:$0xf0]  ;;  %v13492_v0 = vld [vmem:[#allocation2 + $0x168] sm:$0xf] }
 0x220   : > { %v1791_v49 = vrot.slane %v1789_v39, 4  ;;  %v1775_v58 = vor.u32 %v1774_v12, %v1771_v28  ;;  %v5222_v55 = vrot.slane %v14562_v31, 4  ;;  %v1795_v61 = vshrl.u32 %v1445_v57, 16  ;;  %v1451_v24 = vld [vmem:[#allocation2 + $0x180] sm:$0xf8] }
 0x221   : > { %v1798_v62 = vshll.u32 %v1445_v57, 16  ;;  %v1784_v63 = vor.u32 %v1783_v47, %v1780_v38  ;;  %v5223_v34 = vrot.slane %v13488_v9, 4  ;;  %v1803_v8 = vshrl.u32 %v13489_v3, 16  ;;  %v13494_v39 = vld [vmem:[#allocation2 + $0x178] sm:$0xf] }
 0x222   : > { %v1792_v2 = vor.u32 %v1791_v49, %v1788_v50  ;;  %v1797_v4 = vrot.slane %v1795_v61, 3  ;;  %v1806_v7 = vshll.u32 %v13489_v3, 16  ;;  %v1812_v44 = vshrl.u32 %v1447_v54, 16  ;;  %v1455_v3 = vld [vmem:[#allocation2 + $0x1a0] sm:$0xf8] }
 0x223   : > { %12012 = vmatmul.mubr.msk.bf16.gmra.mrb[92].mxu0 %vm2208_vm10, %v1742_v51  ;;  %v1800_v5 = vrot.slane %v1798_v62, 4  ;;  %v5225_v10 = vrot.slane %v14576_v56, 4  ;;  %v1805_v41 = vrot.slane %v1803_v8, 3  ;;  %v1815_v19 = vshll.u32 %v1447_v54, 16  ;;  %v13495_v54 = vld [vmem:[#allocation2 + $0x188] sm:$0xf] }
 0x224   : > { %12206 = vmatmul.mubr.msk.bf16.gmra.mrb[24].mxu1 %vm2208_vm10, %v14550_v1  ;;  %12015 = vmatprep.mubr.msk.bf16.mxu0 %vm2208_vm10, %v1759_v52  ;;  %v1820_v14 = vshrl.u32 %v13490_v23, 16  ;;  %v5226_v21 = vrot.slane %v13491_v17, 4  ;;  %v1808_v36 = vrot.slane %v1806_v7, 4  ;;  %v1814_v1 = vrot.slane %v1812_v44, 3  ;;  %v14599_v56 = vld [vmem:[#allocation2 + $0x180] sm:$0xf0] }
 0x225   : > { %12209 = vmatprep.mubr.msk.bf16.mxu1 %vm2208_vm10, %v5215_v33  ;;  %v1823_v15 = vshll.u32 %v13490_v23, 16  ;;  %v1776_v13 = vsel %vm983_vm4, %v1767_v40, %v1775_v58  ;;  %v1793_v48 = vsel %vm983_vm4, %v1784_v63, %v1792_v2  ;;  %v1817_v11 = vrot.slane %v1815_v19, 4  ;;  %v13493_v33 = vld [vmem:[#allocation2 + $0x178] sm:$0xf]  ;;  %v1453_v62 = vld [vmem:[#allocation2 + $0x190] sm:$0xf8] }
 0x226   : > { %v1822_v20 = vrot.slane %v1820_v14, 3  ;;  %v1801_v53 = vor.u32 %v1800_v5, %v1797_v4  ;;  %v5228_v22 = vrot.slane %v5094_v59, 4  ;;  %v5229_v60 = vrot.slane %v13492_v0, 4  ;;  %v14627_v5 = vld [vmem:[#allocation2 + $0x190] sm:$0xf0] }
 0x227   : > { %v1825_v43 = vrot.slane %v1823_v15, 4  ;;  %v1809_v26 = vor.u32 %v1808_v36, %v1805_v41  ;;  %v5231_v28 = vrot.slane %v5095_v16, 4  ;;  %v1829_v12 = vshrl.u32 %v1449_v18, 16  ;;  %v13496_v41 = vld [vmem:[#allocation2 + $0x188] sm:$0xf] }
 0x228   : > { %v1832_v25 = vshll.u32 %v1449_v18, 16  ;;  %v1818_v29 = vor.u32 %v1817_v11, %v1814_v1  ;;  %v5232_v38 = vrot.slane %v13493_v33, 4  ;;  %v1837_v57 = vshrl.u32 %v13494_v39, 16  ;;  %v13497_v23 = vld [vmem:[#allocation2 + $0x198] sm:$0xf] }
 0x229   : > { %v1826_v30 = vor.u32 %v1825_v43, %v1822_v20  ;;  %v14587_v47 = vrot.slane %v1829_v12, 3  ;;  %v1840_v51 = vshll.u32 %v13494_v39, 16  ;;  %v1846_v52 = vshrl.u32 %v1451_v24, 16  ;;  %v5098_v1 = vld [vmem:[#allocation2 + $0x1a0] sm:$0xf0] }
 0x22a   : > { %v14589_v50 = vrot.slane %v1832_v25, 4  ;;  %v5221_v40 = vsel %vm2111_vm9, %v5219_v37, %v5220_v46  ;;  %v1849_v49 = vshll.u32 %v1451_v24, 16  ;;  %v1854_v58 = vshrl.u32 %v13495_v54, 16  ;;  %v5099_v20 = vld [vmem:[#allocation2 + $0x1b0] sm:$0xf0] }
 0x22b   : > { %12016 = vmatmul.mubr.msk.bf16.gmra.mrb[96].mxu0 %vm2208_vm10, %v1776_v13  ;;  %v5224_v61 = vsel %vm2111_vm9, %v5222_v55, %v5223_v34  ;;  %v14607_v45 = vrot.slane %v1840_v51, 4  ;;  %v1857_v6 = vshll.u32 %v13495_v54, 16  ;;  %v5227_v37 = vsel %vm2111_vm9, %v5225_v10, %v5226_v21  ;;  %v1457_v24 = vld [vmem:[#allocation2 + $0x1b0] sm:$0xf8]  ;;  %v13501_v54 = vld [vmem:[#allocation2 + $0x1b8] sm:$0xf] }
 0x22c   : > { %12210 = vmatmul.mubr.msk.bf16.gmra.mrb[28].mxu1 %vm2208_vm10, %v14567_v42  ;;  %12019 = vmatprep.mubr.msk.bf16.mxu0 %vm2208_vm10, %v1793_v48  ;;  %v14605_v42 = vrot.slane %v1837_v57, 3  ;;  %v1810_v46 = vsel %vm983_vm4, %v1801_v53, %v1809_v26  ;;  %v14612_v63 = vsel %vm2111_vm9, %v5228_v22, %v5229_v60  ;;  %v14615_v2 = vsel %vm2111_vm9, %v5231_v28, %v5232_v38  ;;  %v13498_v48 = vld [vmem:[#allocation2 + $0x1a8] sm:$0xf]  ;;  %v13499_v53 = vld [vmem:[#allocation2 + $0x198] sm:$0xf] }
 0x22d   : > { %12213 = vmatprep.mubr.msk.bf16.mxu1 %vm2208_vm10, %v5221_v40  ;;  %v1827_v31 = vsel %vm983_vm4, %v1818_v29, %v1826_v30  ;;  %v1835_v55 = vor.u32 %v14589_v50, %v14587_v47  ;;  %v14620_v9 = vrot.slane %v1846_v52, 3  ;;  %v14622_v34 = vrot.slane %v1849_v49, 4  ;;  %v13500_v38 = vld [vmem:[#allocation2 + $0x1a8] sm:$0xf]  ;;  %v1459_v57 = vld [vmem:[#allocation2 + $0x1c0] sm:$0xf8] }
 0x22e   : > { %v14624_v8 = vrot.slane %v1854_v58, 3  ;;  %v5234_v4 = vrot.slane %v14599_v56, 4  ;;  %v1863_v7 = vshrl.u32 %v1453_v62, 16  ;;  %v1866_v44 = vshll.u32 %v1453_v62, 16  ;;  %v13502_v56 = vld [vmem:[#allocation2 + $0x1b8] sm:$0xf] }
 0x22f   : > { %v1843_v59 = vor.u32 %v14607_v45, %v14605_v42  ;;  %v1859_v10 = vrot.slane %v1857_v6, 4  ;;  %v5235_v19 = vrot.slane %v13496_v41, 4  ;;  %v1871_v14 = vshrl.u32 %v13497_v23, 16 }
 0x230   : > { %v1865_v16 = vrot.slane %v1863_v7, 3  ;;  %v1868_v17 = vrot.slane %v1866_v44, 4  ;;  %v1874_v21 = vshll.u32 %v13497_v23, 16  ;;  %v1880_v36 = vshrl.u32 %v1455_v3, 16  ;;  %v1461_v44 = vld [vmem:[#allocation2 + $0x1d0] sm:$0xf8] }
 0x231   : > { %v5237_v15 = vrot.slane %v14627_v5, 4  ;;  %v1873_v18 = vrot.slane %v1871_v14, 3  ;;  %v1883_v13 = vshll.u32 %v1455_v3, 16  ;;  %v1888_v11 = vshrl.u32 %v13498_v48, 16 }
 0x232   : > { %v5238_v43 = vrot.slane %v13499_v53, 4  ;;  %v1876_v22 = vrot.slane %v1874_v21, 4  ;;  %v1882_v0 = vrot.slane %v1880_v36, 3  ;;  %v1891_v60 = vshll.u32 %v13498_v48, 16  ;;  %v5101_v21 = vld [vmem:[#allocation2 + $0x1d0] sm:$0xf0] }
 0x233   : > { %12020 = vmatmul.mubr.msk.bf16.gmra.mrb[100].mxu0 %vm2208_vm10, %v1810_v46  ;;  %v1852_v26 = vor.u32 %v14622_v34, %v14620_v9  ;;  %v1860_v28 = vor.u32 %v1859_v10, %v14624_v8  ;;  %v1885_v12 = vrot.slane %v1883_v13, 4  ;;  %v1890_v25 = vrot.slane %v1888_v11, 3  ;;  %v13503_v9 = vld [vmem:[#allocation2 + $0x1c8] sm:$0xf]  ;;  %v5100_v10 = vld [vmem:[#allocation2 + $0x1c0] sm:$0xf0] }
 0x234   : > { %12214 = vmatmul.mubr.msk.bf16.gmra.mrb[32].mxu1 %vm2208_vm10, %v5224_v61  ;;  %12023 = vmatprep.mubr.msk.bf16.mxu0 %vm2208_vm10, %v1827_v31  ;;  %v1869_v29 = vor.u32 %v1868_v17, %v1865_v16  ;;  %v1893_v30 = vrot.slane %v1891_v60, 4  ;;  %v5240_v33 = vrot.slane %v5098_v1, 4  ;;  %v5241_v39 = vrot.slane %v13500_v38, 4  ;;  %v13504_v13 = vld [vmem:[#allocation2 + $0x1c8] sm:$0xf] }
 0x235   : > { %12217 = vmatprep.mubr.msk.bf16.mxu1 %vm2208_vm10, %v5227_v37  ;;  %v1877_v47 = vor.u32 %v1876_v22, %v1873_v18  ;;  %v5243_v50 = vrot.slane %v5099_v20, 4  ;;  %v1897_v51 = vshrl.u32 %v1457_v24, 16  ;;  %v1900_v52 = vshll.u32 %v1457_v24, 16  ;;  %v13505_v48 = vld [vmem:[#allocation2 + $0x1d8] sm:$0xf] }
 0x236   : > { %v1886_v40 = vor.u32 %v1885_v12, %v1882_v0  ;;  %v1894_v49 = vor.u32 %v1893_v30, %v1890_v25  ;;  %v5244_v58 = vrot.slane %v13501_v54, 4  ;;  %v1905_v61 = vshrl.u32 %v13502_v56, 16  ;;  %v5102_v12 = vld [vmem:[#allocation2 + $0x1e0] sm:$0xf0]  ;;  %v13507_v25 = vld [vmem:[#allocation2 + $0x1d8] sm:$0xf] }
 0x237   : > { %v14639_v42 = vrot.slane %v1897_v51, 3  ;;  %v14641_v45 = vrot.slane %v1900_v52, 4  ;;  %v1908_v6 = vshll.u32 %v13502_v56, 16  ;;  %v1914_v62 = vshrl.u32 %v1459_v57, 16  ;;  %v5103_v52 = vld [vmem:[#allocation2 + $0x1f0] sm:$0xf0] }
 0x238   : > { %v1844_v37 = vsel %vm983_vm4, %v1835_v55, %v1843_v59  ;;  %v5236_v46 = vsel %vm2111_vm9, %v5234_v4, %v5235_v19  ;;  %v1917_v31 = vshll.u32 %v1459_v57, 16  ;;  %v1922_v34 = vshrl.u32 %v13503_v9, 16  ;;  %v1467_v56 = vld [vmem:[#allocation2 + $0x200] sm:$0xf8] }
 0x239   : > { %v1861_v3 = vsel %vm983_vm4, %v1852_v26, %v1860_v28  ;;  %v5239_v8 = vsel %vm2111_vm9, %v5237_v15, %v5238_v43  ;;  %v14649_v5 = vsel %vm2111_vm9, %v5240_v33, %v5241_v39  ;;  %v1925_v7 = vshll.u32 %v13503_v9, 16  ;;  %v13506_v26 = vld [vmem:[#allocation2 + $0x1e8] sm:$0xf]  ;;  %v1465_v39 = vld [vmem:[#allocation2 + $0x1f0] sm:$0xf8] }
 0x23a   : > { %v1878_v55 = vsel %vm983_vm4, %v1869_v29, %v1877_v47  ;;  %v1895_v4 = vsel %vm983_vm4, %v1886_v40, %v1894_v49  ;;  %v14657_v59 = vsel %vm2111_vm9, %v5243_v50, %v5244_v58  ;;  %v1903_v41 = vor.u32 %v14641_v45, %v14639_v42  ;;  %v13508_v42 = vld [vmem:[#allocation2 + $0x1e8] sm:$0xf] }
 0x23b   : > { %12024 = vmatmul.mubr.msk.bf16.gmra.mrb[104].mxu0 %vm2208_vm10, %v1844_v37  ;;  %v1907_v19 = vrot.slane %v1905_v61, 3  ;;  %v1910_v23 = vrot.slane %v1908_v6, 4  ;;  %v14663_v14 = vrot.slane %v1914_v62, 3  ;;  %v14665_v16 = vrot.slane %v1917_v31, 4  ;;  %v13509_v31 = vld [vmem:[#allocation2 + $0x1f8] sm:$0xf] }
 0x23c   : > { %12218 = vmatmul.mubr.msk.bf16.gmra.mrb[36].mxu1 %vm2208_vm10, %v14612_v63  ;;  %12027 = vmatprep.mubr.msk.bf16.mxu0 %vm2208_vm10, %v1861_v3  ;;  %v1463_v63 = vld [vmem:[#allocation2 + $0x1e0] sm:$0xf8]  ;;  %v14667_v17 = vrot.slane %v1922_v34, 3  ;;  %v1931_v36 = vshrl.u32 %v1461_v44, 16  ;;  %v1934_v1 = vshll.u32 %v1461_v44, 16  ;;  %v14669_v15 = vrot.slane %v1925_v7, 4 }
 0x23d   : > { %12221 = vmatprep.mubr.msk.bf16.mxu1 %vm2208_vm10, %v14615_v2  ;;  %v5246_v18 = vrot.slane %v5100_v10, 4  ;;  %v5247_v2 = vrot.slane %v13504_v13, 4  ;;  %v1939_v11 = vshrl.u32 %v13505_v48, 16  ;;  %v1942_v43 = vshll.u32 %v13505_v48, 16  ;;  %v13510_v34 = vld [vmem:[#allocation2 + $0x1f8] sm:$0xf] }
 0x23e   : > { %v1933_v20 = vrot.slane %v1931_v36, 3  ;;  %v1936_v53 = vrot.slane %v1934_v1, 4  ;;  %v1948_v22 = vshrl.u32 %v1463_v63, 16  ;;  %v1911_v0 = vor.u32 %v1910_v23, %v1907_v19  ;;  %v1469_v1 = vld [vmem:[#allocation2 + $0x210] sm:$0xf8] }
 0x23f   : > { %v5249_v60 = vrot.slane %v5101_v21, 4  ;;  %v1951_v24 = vshll.u32 %v1463_v63, 16  ;;  %v1956_v28 = vshrl.u32 %v13506_v26, 16  ;;  %v5250_v29 = vrot.slane %v13507_v25, 4  ;;  %v13511_v21 = vld [vmem:[#allocation2 + $0x208] sm:$0xf] }
 0x240   : > { %v1941_v30 = vrot.slane %v1939_v11, 3  ;;  %v1944_v33 = vrot.slane %v1942_v43, 4  ;;  %v1959_v38 = vshll.u32 %v13506_v26, 16  ;;  %v1920_v57 = vor.u32 %v14665_v16, %v14663_v14  ;;  %v5104_v14 = vld [vmem:[#allocation2 + $0x200] sm:$0xf0] }
 0x241   : > { %v1950_v47 = vrot.slane %v1948_v22, 3  ;;  %v1953_v50 = vrot.slane %v1951_v24, 4  ;;  %v1958_v51 = vrot.slane %v1956_v28, 3  ;;  %v1928_v40 = vor.u32 %v14669_v15, %v14667_v17  ;;  %v13512_v22 = vld [vmem:[#allocation2 + $0x208] sm:$0xf] }
 0x242   : > { %v14679_v49 = vsel %vm2111_vm9, %v5246_v18, %v5247_v2  ;;  %v1937_v54 = vor.u32 %v1936_v53, %v1933_v20  ;;  %v1961_v58 = vrot.slane %v1959_v38, 4  ;;  %v5252_v61 = vrot.slane %v5102_v12, 4  ;;  %v14700_v53 = vld [vmem:[#allocation2 + $0x210] sm:$0xf0]  ;;  %v13513_v25 = vld [vmem:[#allocation2 + $0x218] sm:$0xf] }
 0x243   : > { %12028 = vmatmul.mubr.msk.bf16.gmra.mrb[108].mxu0 %vm2208_vm10, %v1878_v55  ;;  %v5253_v45 = vrot.slane %v13508_v42, 4  ;;  %v1965_v6 = vshrl.u32 %v1465_v39, 16  ;;  %v1968_v62 = vshll.u32 %v1465_v39, 16  ;;  %v1945_v37 = vor.u32 %v1944_v33, %v1941_v30 }
 0x244   : > { %12222 = vmatmul.mubr.msk.bf16.gmra.mrb[40].mxu1 %vm2208_vm10, %v5236_v46  ;;  %12031 = vmatprep.mubr.msk.bf16.mxu0 %vm2208_vm10, %v1895_v4  ;;  %v5255_v46 = vrot.slane %v5103_v52, 4  ;;  %v5256_v9 = vrot.slane %v13509_v31, 4  ;;  %v1973_v3 = vshrl.u32 %v13510_v34, 16  ;;  %v1954_v7 = vor.u32 %v1953_v50, %v1950_v47  ;;  %v13515_v50 = vld [vmem:[#allocation2 + $0x218] sm:$0xf] }
 0x245   : > { %12225 = vmatprep.mubr.msk.bf16.mxu1 %vm2208_vm10, %v5239_v8  ;;  %v1962_v44 = vor.u32 %v1961_v58, %v1958_v51  ;;  %v1976_v55 = vshll.u32 %v13510_v34, 16  ;;  %v1982_v4 = vshrl.u32 %v1467_v56, 16  ;;  %v1912_v10 = vsel %vm983_vm4, %v1903_v41, %v1911_v0 }
 0x246   : > { %v14684_v19 = vsel %vm2111_vm9, %v5249_v60, %v5250_v29  ;;  %v1967_v8 = vrot.slane %v1965_v6, 3  ;;  %v1985_v23 = vshll.u32 %v1467_v56, 16  ;;  %v1970_v63 = vrot.slane %v1968_v62, 4  ;;  %v13516_v6 = vld [vmem:[#allocation2 + $0x10] sm:$0xf0] }
 0x247   : > { %v1975_v16 = vrot.slane %v1973_v3, 3  ;;  %v1978_v17 = vrot.slane %v1976_v55, 4  ;;  %v1990_v36 = vshrl.u32 %v13511_v21, 16  ;;  %v1929_v15 = vsel %vm983_vm4, %v1920_v57, %v1928_v40  ;;  %v1108_v57 = vld [vmem:[#allocation2 + $0x18] sm:$0x10] }
 0x248   : > { %v1946_v18 = vsel %vm983_vm4, %v1937_v54, %v1945_v37  ;;  %v14689_v13 = vsel %vm2111_vm9, %v5252_v61, %v5253_v45  ;;  %v1993_v41 = vshll.u32 %v13511_v21, 16  ;;  %v1963_v2 = vsel %vm983_vm4, %v1954_v7, %v1962_v44  ;;  %v2986_v40 = vld [vmem:[#allocation2 + $0x8] sm:$0x1f]  ;;  %v5106_v61 = vld [vmem:[#allocation2 + $0x220] sm:$0xf0] }
 0x249   : > { %v14694_v48 = vsel %vm2111_vm9, %v5255_v46, %v5256_v9  ;;  %v14696_v11 = vrot.slane %v1982_v4, 3  ;;  %v14698_v20 = vrot.slane %v1985_v23, 4  ;;  %v5258_v43 = vrot.slane %v5104_v14, 4  ;;  %v13517_v46 = vld [vmem:[#allocation2] sm:$0xf0] }
 0x24a   : > { %v5259_v0 = vrot.slane %v13512_v22, 4  ;;  %v1999_v60 = vshrl.u32 %v1469_v1, 16  ;;  %v2002_v24 = vshll.u32 %v1469_v1, 16  ;;  %v1971_v26 = vor.u32 %v1970_v63, %v1967_v8  ;;  %v1111_v44 = vld [vmem:[#allocation2 + $0x28] sm:$0x10] }
 0x24b   : > { %12032 = vmatmul.mubr.msk.bf16.gmra.mrb[112].mxu0 %vm2208_vm10, %v1912_v10  ;;  %v1979_v28 = vor.u32 %v1978_v17, %v1975_v16  ;;  %v1992_v12 = vrot.slane %v1990_v36, 3  ;;  %v2007_v29 = vshrl.u32 %v13513_v25, 16  ;;  %v1995_v30 = vrot.slane %v1993_v41, 4  ;;  %v13518_v10 = vld [vmem:[#allocation2 + $0x228] sm:$0xf] }
 0x24c   : > { %12226 = vmatmul.mubr.msk.bf16.gmra.mrb[44].mxu1 %vm2208_vm10, %v14649_v5  ;;  %12035 = vmatprep.mubr.msk.bf16.mxu0 %vm2208_vm10, %v1929_v15  ;;  %v5261_v33 = vrot.slane %v14700_v53, 4  ;;  %v2010_v38 = vshll.u32 %v13513_v25, 16  ;;  %v13514_v5 = vld [vmem:[#allocation6 + $0x8] sm:$0xf]  ;;  %v1988_v47 = vor.u32 %v14698_v20, %v14696_v11  ;;  %v5262_v51 = vrot.slane %v13515_v50, 4 }
 0x24d   : > { %12229 = vmatprep.mubr.msk.bf16.mxu1 %vm2208_vm10, %v14657_v59  ;;  %v3660_v39 = vsel %vm2111_vm9, %v13514_v5, 0  ;;  %v2001_v52 = vrot.slane %v1999_v60, 3  ;;  %v2004_v59 = vrot.slane %v2002_v24, 4  ;;  %v14712_v54 = vsel %vm2111_vm9, %v5258_v43, %v5259_v0  ;;  %v13519_v36 = vld [vmem:[#allocation2 + $0x10] sm:$0xf0] }
 0x24e   : > { %12048 = vmatpush3.bf16.msra.mxu0 %v3660_v39  ;;  %v2009_v58 = vrot.slane %v2007_v29, 3  ;;  %v2012_v56 = vrot.slane %v2010_v38, 4  ;;  %v1980_v42 = vsel %vm983_vm4, %v1971_v26, %v1979_v28  ;;  %v5752_v62 = vshrl.u32 %v13516_v6, 16  ;;  %v1114_v41 = vld [vmem:[#allocation2 + $0x38] sm:$0x10] }
 0x24f   : > { %v5755_v37 = vshll.u32 %v13516_v6, 16  ;;  %v3020_v31 = vshrl.u32 %v13517_v46, 16  ;;  %v1996_v9 = vor.u32 %v1995_v30, %v1992_v12  ;;  %v1109_v34 = vsel %vm14716_vm14, 0, %v1108_v57  ;;  %v13521_v60 = vld [vmem:[#allocation2 + $0x20] sm:$0xf0] }
 0x250   : > { %v3023_v3 = vshll.u32 %v13517_v46, 16  ;;  %v3028_v7 = vshrl.u32 %v2986_v40, 16  ;;  %v2005_v55 = vor.u32 %v2004_v59, %v2001_v52  ;;  %v5264_v4 = vrot.slane %v5106_v61, 4  ;;  %1110 = vst [vmem:[#allocation2 + $0x18] sm:$0x10] %v1109_v34 }
 0x251   : > { %v5265_v8 = vrot.slane %v13518_v10, 4  ;;  %v3031_v23 = vshll.u32 %v2986_v40, 16  ;;  %v2013_v14 = vor.u32 %v2012_v56, %v2009_v58  ;;  %v14726_v63 = vrot.slane %v5752_v62, 4  ;;  %v13523_v6 = vld [vmem:[#allocation2 + $0x30] sm:$0xf0] }
 0x252   : > { %v14728_v16 = vrot.slane %v5755_v37, 5  ;;  %v3022_v17 = vrot.slane %v3020_v31, 4  ;;  %v3025_v21 = vrot.slane %v3023_v3, 5  ;;  %v3037_v1 = vshrl.u32 %v13519_v36, 16 }
 0x253   : > { %12036 = vmatmul.mubr.msk.bf16.gmra.mrb[116].mxu0 %vm2208_vm10, %v1946_v18  ;;  %v3040_v15 = vshll.u32 %v13519_v36, 16  ;;  %v1112_v18 = vsel %vm14716_vm14, 0, %v1111_v44  ;;  %v3033_v11 = vrot.slane %v3031_v23, 5  ;;  %v1997_v43 = vsel %vm983_vm4, %v1988_v47, %v1996_v9  ;;  %v13522_v47 = vld [vmem:[#allocation2 + $0x30] sm:$0xf0] }
 0x254   : > { %12230 = vmatmul.mubr.msk.bf16.gmra.mrb[48].mxu1 %vm2208_vm10, %v14679_v49  ;;  %12039 = vmatprep.mubr.msk.bf16.mxu0 %vm2208_vm10, %v1963_v2  ;;  %v3030_v49 = vrot.slane %v3028_v7, 4  ;;  %1113 = vst [vmem:[#allocation2 + $0x28] sm:$0x10] %v1112_v18  ;;  %v13520_v2 = vld [vmem:[#allocation2 + $0x20] sm:$0xf0]  ;;  %v14736_v22 = vsel %vm2111_vm9, %v5261_v33, %v5262_v51  ;;  %v2014_v0 = vsel %vm983_vm4, %v2005_v55, %v2013_v14  ;;  %v5769_v24 = vshrl.u32 %v13521_v60, 16 }
 0x255   : > { %12233 = vmatprep.mubr.msk.bf16.mxu1 %vm2208_vm10, %v14684_v19  ;;  %v3054_v20 = vshrl.u32 %v13520_v2, 16  ;;  %v3057_v53 = vshll.u32 %v13520_v2, 16  ;;  %v14739_v19 = vsel %vm2111_vm9, %v5264_v4, %v5265_v8  ;;  %v5772_v26 = vshll.u32 %v13521_v60, 16  ;;  %v13524_v44 = vld [vmem:[#allocation6 + $0x18] sm:$0xf] }
 0x256   : > { %v1115_v28 = vsel %vm14716_vm14, 0, %v1114_v41  ;;  %v5758_v12 = vor.u32 %v14728_v16, %v14726_v63  ;;  %v14746_v25 = vrot.slane %v3037_v1, 4  ;;  %v14748_v29 = vrot.slane %v3040_v15, 5  ;;  %v1117_v23 = vld [vmem:[#allocation2 + $0x48] sm:$0x10] }
 0x257   : > { %v14750_v30 = vrot.slane %v3054_v20, 4  ;;  %1116 = vst [vmem:[#allocation2 + $0x38] sm:$0x10] %v1115_v28  ;;  %v5719_v33 = vld [vmem:[#allocation2 + $0x18] sm:$0x1f]  ;;  %v3026_v38 = vor.u32 %v3025_v21, %v3022_v17  ;;  %v3034_v5 = vor.u32 %v3033_v11, %v3030_v49  ;;  %v14752_v57 = vrot.slane %v3057_v53, 5 }
 0x258   : > { %v2987_v39 = vld [vmem:[#allocation2 + $0x18] sm:$0x1f]  ;;  %v5786_v50 = vshrl.u32 %v13522_v47, 16  ;;  %v5760_v51 = vshrl.u32 %v5719_v33, 16  ;;  %v5763_v52 = vshll.u32 %v5719_v33, 16  ;;  %v14758_v58 = vrot.slane %v5769_v24, 4 }
 0x259   : > { %v3045_v59 = vshrl.u32 %v2987_v39, 16  ;;  %v3048_v40 = vshll.u32 %v2987_v39, 16  ;;  %v14760_v56 = vrot.slane %v5772_v26, 5  ;;  %v5789_v61 = vshll.u32 %v13522_v47, 16  ;;  %v13527_v63 = vld [vmem:[#allocation2 + $0x50] sm:$0xf0] }
 0x25a   : > { %v3071_v62 = vshrl.u32 %v13523_v6, 16  ;;  %v5765_v37 = vrot.slane %v5763_v52, 5  ;;  %v3035_v34 = vsel %vm3018_vm15, %v3026_v38, %v3034_v5  ;;  %v14766_v55 = vsel %vm2111_vm9, %v13524_v44, 0  ;;  %v1120_v38 = vld [vmem:[#allocation2 + $0x58] sm:$0x10] }
 0x25b   : > { %12040 = vmatmul.mubr.msk.bf16.gmra.mrb[120].mxu0 %vm2208_vm10, %v1980_v42  ;;  %v5762_v42 = vrot.slane %v5760_v51, 4  ;;  %v3047_v46 = vrot.slane %v3045_v59, 4  ;;  %v3050_v31 = vrot.slane %v3048_v40, 5  ;;  %v2988_v9 = vld [vmem:[#allocation2 + $0x28] sm:$0x1f]  ;;  %v3043_v4 = vor.u32 %v14748_v29, %v14746_v25 }
 0x25c   : > { %12234 = vmatmul.mubr.msk.bf16.gmra.mrb[52].mxu1 %vm2208_vm10, %v14689_v13  ;;  %12043 = vmatprep.mubr.msk.bf16.mxu0 %vm2208_vm10, %v1997_v43  ;;  %v3062_v13 = vshrl.u32 %v2988_v9, 16  ;;  %v3065_v3 = vshll.u32 %v2988_v9, 16  ;;  %v5720_v7 = vld [vmem:[#allocation2 + $0x28] sm:$0x1f]  ;;  %v3060_v14 = vor.u32 %v14752_v57, %v14750_v30  ;;  %v5775_v36 = vor.u32 %v14760_v56, %v14758_v58  ;;  %v13525_v57 = vld [vmem:[#allocation2 + $0x40] sm:$0xf0] }
 0x25d   : > { %12237 = vmatprep.mubr.msk.bf16.mxu1 %vm2208_vm10, %v14694_v48  ;;  %v5777_v10 = vshrl.u32 %v5720_v7, 16  ;;  %v5780_v8 = vshll.u32 %v5720_v7, 16  ;;  %v14770_v48 = vrot.slane %v5786_v50, 4  ;;  %v5766_v18 = vor.u32 %v5765_v37, %v5762_v42  ;;  %v13526_v52 = vld [vmem:[#allocation2 + $0x40] sm:$0xf0] }
 0x25e   : > { %v3064_v17 = vrot.slane %v3062_v13, 4  ;;  %v3067_v21 = vrot.slane %v3065_v3, 5  ;;  %v5721_v1 = vld [vmem:[#allocation2 + $0x38] sm:$0x1f]  ;;  %v3051_v41 = vor.u32 %v3050_v31, %v3047_v46  ;;  %v5791_v49 = vrot.slane %v5789_v61, 5 }
 0x25f   : > { %v2989_v15 = vld [vmem:[#allocation2 + $0x38] sm:$0x1f]  ;;  %v14776_v11 = vrot.slane %v3071_v62, 4  ;;  %v5779_v2 = vrot.slane %v5777_v10, 4  ;;  %v5794_v20 = vshrl.u32 %v5721_v1, 16  ;;  %v5797_v53 = vshll.u32 %v5721_v1, 16 }
 0x260   : > { %v3074_v43 = vshll.u32 %v13523_v6, 16  ;;  %v5782_v60 = vrot.slane %v5780_v8, 5  ;;  %v3079_v24 = vshrl.u32 %v2989_v15, 16  ;;  %v3082_v26 = vshll.u32 %v2989_v15, 16  ;;  %v1123_v61 = vld [vmem:[#allocation2 + $0x68] sm:$0x10] }
 0x261   : > { %v1118_v28 = vsel %vm14716_vm14, 0, %v1117_v23  ;;  %v3068_v25 = vor.u32 %v3067_v21, %v3064_v17  ;;  %v5796_v29 = vrot.slane %v5794_v20, 4  ;;  %v5799_v30 = vrot.slane %v5797_v53, 5 }
 0x262   : > { %v3076_v33 = vrot.slane %v3074_v43, 5  ;;  %1119 = vst [vmem:[#allocation2 + $0x48] sm:$0x10] %v1118_v28  ;;  %v3081_v5 = vrot.slane %v3079_v24, 4  ;;  %v3084_v39 = vrot.slane %v3082_v26, 5  ;;  %v3088_v47 = vshrl.u32 %v13525_v57, 16 }
 0x263   : > { %12044 = vmatmul.mubr.msk.bf16.gmra.mrb[124].mxu0 %vm2208_vm10, %v2014_v0  ;;  %v5792_v0 = vor.u32 %v5791_v49, %v14770_v48  ;;  %v3052_v50 = vsel %vm3018_vm15, %v3043_v4, %v3051_v41  ;;  %v3091_v51 = vshll.u32 %v13525_v57, 16  ;;  %v5803_v59 = vshrl.u32 %v13526_v52, 16 }
 0x264   : > { %12238 = vmatmul.mubr.msk.bf16.gmra.mrb[56].mxu1 %vm2208_vm10, %v14712_v54  ;;  %12049 = vmatprep.mubr.msk.bf16.mxu0 %vm2208_vm10, %v3035_v34  ;;  %v5767_v54 = vsel %vm3018_vm15, %v5758_v12, %v5766_v18  ;;  %v5783_v40 = vor.u32 %v5782_v60, %v5779_v2  ;;  %v5800_v58 = vor.u32 %v5799_v30, %v5796_v29  ;;  %v5806_v56 = vshll.u32 %v13526_v52, 16  ;;  %v13528_v34 = vld [vmem:[#allocation2 + $0x50] sm:$0xf0]  ;;  %v13529_v18 = vld [vmem:[#allocation2 + $0x60] sm:$0xf0] }
 0x265   : > { %12241 = vmatprep.mubr.msk.bf16.mxu1 %vm2208_vm10, %v14736_v22  ;;  %v1121_v22 = vsel %vm14716_vm14, 0, %v1120_v38  ;;  %v3069_v6 = vsel %vm3018_vm15, %v3060_v14, %v3068_v25  ;;  %v3077_v62 = vor.u32 %v3076_v33, %v14776_v11  ;;  %v3085_v42 = vor.u32 %v3084_v39, %v3081_v5  ;;  %v13530_v39 = vld [vmem:[#allocation2 + $0x60] sm:$0xf0] }
 0x266   : > { %1122 = vst [vmem:[#allocation2 + $0x58] sm:$0x10] %v1121_v22  ;;  %v5820_v16 = vshrl.u32 %v13527_v63, 16  ;;  %v3090_v12 = vrot.slane %v3088_v47, 4  ;;  %v3093_v37 = vrot.slane %v3091_v51, 5  ;;  %v14796_v46 = vrot.slane %v5803_v59, 4 }
 0x267   : > { %v5823_v31 = vshll.u32 %v13527_v63, 16  ;;  %v14798_v9 = vrot.slane %v5806_v56, 5  ;;  %v3105_v13 = vshrl.u32 %v13528_v34, 16  ;;  %v3108_v3 = vshll.u32 %v13528_v34, 16 }
 0x268   : > { %v1124_v7 = vsel %vm14716_vm14, 0, %v1123_v61  ;;  %v5784_v44 = vsel %vm3018_vm15, %v5775_v36, %v5783_v40  ;;  %v5801_v4 = vsel %vm3018_vm15, %v5792_v0, %v5800_v58  ;;  %v14805_v48 = vrot.slane %v5820_v16, 4  ;;  %v1126_v61 = vld [vmem:[#allocation2 + $0x78] sm:$0x10] }
 0x269   : > { %v2990_v10 = vld [vmem:[#allocation2 + $0x48] sm:$0x1f]  ;;  %v14807_v23 = vrot.slane %v5823_v31, 5  ;;  %1125 = vst [vmem:[#allocation2 + $0x68] sm:$0x10] %v1124_v7  ;;  %v3086_v36 = vsel %vm3018_vm15, %v3077_v62, %v3085_v42  ;;  %v3094_v15 = vor.u32 %v3093_v37, %v3090_v12  ;;  %v3122_v41 = vshrl.u32 %v13529_v18, 16 }
 0x26a   : > { %v5722_v8 = vld [vmem:[#allocation2 + $0x48] sm:$0x1f]  ;;  %v3096_v14 = vshrl.u32 %v2990_v10, 16  ;;  %v3099_v17 = vshll.u32 %v2990_v10, 16  ;;  %v3125_v49 = vshll.u32 %v13529_v18, 16  ;;  %v3107_v20 = vrot.slane %v3105_v13, 4 }
 0x26b   : > { %12050 = vmatmul.mubr.msk.bf16.vlgmr.msra.gmra.mrb[64].mxu0 %vm2208_vm10, %v3052_v50  ;;  %v5811_v21 = vshrl.u32 %v5722_v8, 16  ;;  %v5814_v1 = vshll.u32 %v5722_v8, 16  ;;  %v3110_v53 = vrot.slane %v3108_v3, 5  ;;  %v5826_v26 = vor.u32 %v14807_v23, %v14805_v48 }
 0x26c   : > { %12242 = vmatmul.mubr.msk.bf16.gmra.mrb[60].mxu1 %vm2208_vm10, %v14739_v19  ;;  %12053 = vmatprep.mubr.msk.bf16.mxu0 %vm2208_vm10, %v3069_v6  ;;  %v3098_v11 = vrot.slane %v3096_v14, 4  ;;  %v3101_v2 = vrot.slane %v3099_v17, 5  ;;  %v5809_v19 = vor.u32 %v14798_v9, %v14796_v46  ;;  %v3124_v33 = vrot.slane %v3122_v41, 4  ;;  %v13531_v17 = vld [vmem:[#allocation2 + $0x70] sm:$0xf0] }
 0x26d   : > { %12247 = vmatprep.mubr.msk.bf16.mxu1 %vm2208_vm10, %v5767_v54  ;;  %v14816_v43 = vrot.slane %v5811_v21, 4  ;;  %v14818_v60 = vrot.slane %v5814_v1, 5  ;;  %v5723_v24 = vld [vmem:[#allocation2 + $0x58] sm:$0x1f]  ;;  %v3127_v5 = vrot.slane %v3125_v49, 5  ;;  %v5837_v57 = vshrl.u32 %v13530_v39, 16 }
 0x26e   : > { %v2991_v28 = vld [vmem:[#allocation2 + $0x58] sm:$0x1f]  ;;  %v3102_v25 = vor.u32 %v3101_v2, %v3098_v11  ;;  %v5828_v29 = vshrl.u32 %v5723_v24, 16  ;;  %v5831_v30 = vshll.u32 %v5723_v24, 16  ;;  %v3111_v51 = vor.u32 %v3110_v53, %v3107_v20  ;;  %v13532_v1 = vld [vmem:[#allocation2 + $0x70] sm:$0xf0] }
 0x26f   : > { %v3113_v38 = vshrl.u32 %v2991_v28, 16  ;;  %v3116_v0 = vshll.u32 %v2991_v28, 16  ;;  %v5817_v6 = vor.u32 %v14818_v60, %v14816_v43  ;;  %v5839_v62 = vrot.slane %v5837_v57, 4  ;;  %v1132_v2 = vld [vmem:[#allocation2 + $0x98] sm:$0x10] }
 0x270   : > { %v3103_v47 = vsel %vm3018_vm15, %v3094_v15, %v3102_v25  ;;  %v5830_v54 = vrot.slane %v5828_v29, 4  ;;  %v5833_v50 = vrot.slane %v5831_v30, 5  ;;  %v2992_v52 = vld [vmem:[#allocation2 + $0x68] sm:$0x1f]  ;;  %v5840_v42 = vshll.u32 %v13530_v39, 16 }
 0x271   : > { %v5724_v59 = vld [vmem:[#allocation2 + $0x68] sm:$0x1f]  ;;  %v3115_v40 = vrot.slane %v3113_v38, 4  ;;  %v3118_v58 = vrot.slane %v3116_v0, 5  ;;  %v3130_v56 = vshrl.u32 %v2992_v52, 16  ;;  %v3133_v22 = vshll.u32 %v2992_v52, 16 }
 0x272   : > { %v5845_v63 = vshrl.u32 %v5724_v59, 16  ;;  %v5848_v31 = vshll.u32 %v5724_v59, 16  ;;  %v3128_v34 = vor.u32 %v3127_v5, %v3124_v33  ;;  %v5842_v13 = vrot.slane %v5840_v42, 5  ;;  %v13533_v60 = vld [vmem:[#allocation2 + $0x80] sm:$0xf0] }
 0x273   : > { %12054 = vmatmul.mubr.msk.bf16.gmra.mrb[68].mxu0 %vm2208_vm10, %v3086_v36  ;;  %v3119_v16 = vor.u32 %v3118_v58, %v3115_v40  ;;  %v3132_v12 = vrot.slane %v3130_v56, 4  ;;  %v3135_v37 = vrot.slane %v3133_v22, 5  ;;  %v1127_v7 = vsel %vm14716_vm14, 0, %v1126_v61  ;;  %v13534_v33 = vld [vmem:[#allocation2 + $0x80] sm:$0xf0] }
 0x274   : > { %12248 = vmatmul.mubr.msk.bf16.vlgmr.msra.gmra.mrb[0].mxu1 %vm2208_vm10, %v5784_v44  ;;  %12057 = vmatprep.mubr.msk.bf16.mxu0 %vm2208_vm10, %v3103_v47  ;;  %v5847_v3 = vrot.slane %v5845_v63, 4  ;;  %v1129_v44 = vld [vmem:[#allocation2 + $0x88] sm:$0x10]  ;;  %v5834_v10 = vor.u32 %v5833_v50, %v5830_v54  ;;  %v5850_v14 = vrot.slane %v5848_v31, 5  ;;  %1128 = vst [vmem:[#allocation2 + $0x78] sm:$0x10] %v1127_v7  ;;  %v5843_v18 = vor.u32 %v5842_v13, %v5839_v62 }
 0x275   : > { %12312 = vmatpush3.bf16.msra.mxu1 %v14766_v55  ;;  %12251 = vmatprep.mubr.msk.bf16.mxu1 %vm2208_vm10, %v5801_v4  ;;  %v3136_v8 = vor.u32 %v3135_v37, %v3132_v12  ;;  %v5854_v21 = vshrl.u32 %v13531_v17, 16  ;;  %v3120_v55 = vsel %vm3018_vm15, %v3111_v51, %v3119_v16  ;;  %v5857_v4 = vshll.u32 %v13531_v17, 16  ;;  %v13535_v39 = vld [vmem:[#allocation2 + $0x90] sm:$0xf0] }
 0x276   : > { %v3139_v36 = vshrl.u32 %v13532_v1, 16  ;;  %v3142_v15 = vshll.u32 %v13532_v1, 16  ;;  %v5851_v41 = vor.u32 %v5850_v14, %v5847_v3  ;;  %v1130_v11 = vsel %vm14716_vm14, 0, %v1129_v44  ;;  %v13536_v50 = vld [vmem:[#allocation2 + $0x90] sm:$0xf0] }
 0x277   : > { %v14833_v49 = vrot.slane %v5854_v21, 4  ;;  %v14837_v20 = vrot.slane %v5857_v4, 5  ;;  %1131 = vst [vmem:[#allocation2 + $0x88] sm:$0x10] %v1130_v11  ;;  %v3156_v24 = vshrl.u32 %v13533_v60, 16  ;;  %v5818_v28 = vsel %vm3018_vm15, %v5809_v19, %v5817_v6 }
 0x278   : > { %v14839_v53 = vrot.slane %v3139_v36, 4  ;;  %v3144_v43 = vrot.slane %v3142_v15, 5  ;;  %v3137_v25 = vsel %vm3018_vm15, %v3128_v34, %v3136_v8  ;;  %v3159_v29 = vshll.u32 %v13533_v60, 16  ;;  %v1135_v14 = vld [vmem:[#allocation2 + $0xa8] sm:$0x10] }
 0x279   : > { %v5835_v30 = vsel %vm3018_vm15, %v5826_v26, %v5834_v10  ;;  %v5871_v38 = vshrl.u32 %v13534_v33, 16  ;;  %v5874_v0 = vshll.u32 %v13534_v33, 16  ;;  %v1133_v46 = vsel %vm14716_vm14, 0, %v1132_v2 }
 0x27a   : > { %v5852_v9 = vsel %vm3018_vm15, %v5843_v18, %v5851_v41  ;;  %v3158_v19 = vrot.slane %v3156_v24, 4  ;;  %v3161_v5 = vrot.slane %v3159_v29, 5  ;;  %1134 = vst [vmem:[#allocation2 + $0x98] sm:$0x10] %v1133_v46  ;;  %v5888_v57 = vshrl.u32 %v13535_v39, 16 }
 0x27b   : > { %12058 = vmatmul.mubr.msk.bf16.gmra.mrb[72].mxu0 %vm2208_vm10, %v3120_v55  ;;  %v5725_v48 = vld [vmem:[#allocation2 + $0x78] sm:$0x1f]  ;;  %v5860_v23 = vor.u32 %v14837_v20, %v14833_v49  ;;  %v3145_v47 = vor.u32 %v3144_v43, %v14839_v53  ;;  %v5891_v54 = vshll.u32 %v13535_v39, 16  ;;  %v3173_v51 = vshrl.u32 %v13536_v50, 16 }
 0x27c   : > { %12252 = vmatmul.mubr.msk.bf16.gmra.mrb[4].mxu1 %vm2208_vm10, %v5818_v28  ;;  %12061 = vmatprep.mubr.msk.bf16.mxu0 %vm2208_vm10, %v3137_v25  ;;  %v2993_v26 = vld [vmem:[#allocation2 + $0x78] sm:$0x1f]  ;;  %v5862_v52 = vshrl.u32 %v5725_v48, 16  ;;  %v5865_v59 = vshll.u32 %v5725_v48, 16  ;;  %v5873_v56 = vrot.slane %v5871_v38, 4  ;;  %v5876_v22 = vrot.slane %v5874_v0, 5 }
 0x27d   : > { %12255 = vmatprep.mubr.msk.bf16.mxu1 %vm2208_vm10, %v5835_v30  ;;  %v3147_v40 = vshrl.u32 %v2993_v26, 16  ;;  %v3150_v58 = vshll.u32 %v2993_v26, 16  ;;  %v14860_v61 = vrot.slane %v5888_v57, 4  ;;  %v5893_v6 = vrot.slane %v5891_v54, 5  ;;  %v1138_v38 = vld [vmem:[#allocation2 + $0xb8] sm:$0x10] }
 0x27e   : > { %v5864_v62 = vrot.slane %v5862_v52, 4  ;;  %v5867_v42 = vrot.slane %v5865_v59, 5  ;;  %v2994_v12 = vld [vmem:[#allocation2 + $0x88] sm:$0x1f]  ;;  %v3162_v37 = vor.u32 %v3161_v5, %v3158_v19  ;;  %v3175_v3 = vrot.slane %v3173_v51, 4 }
 0x27f   : > { %v3149_v63 = vrot.slane %v3147_v40, 4  ;;  %v3152_v16 = vrot.slane %v3150_v58, 5  ;;  %v3164_v31 = vshrl.u32 %v2994_v12, 16  ;;  %v3167_v34 = vshll.u32 %v2994_v12, 16  ;;  %v5726_v13 = vld [vmem:[#allocation2 + $0x88] sm:$0x1f] }
 0x280   : > { %v5868_v7 = vor.u32 %v5867_v42, %v5864_v62  ;;  %v5879_v10 = vshrl.u32 %v5726_v13, 16  ;;  %v5882_v8 = vshll.u32 %v5726_v13, 16  ;;  %v5877_v55 = vor.u32 %v5876_v22, %v5873_v56  ;;  %v13537_v19 = vld [vmem:[#allocation2 + $0xa0] sm:$0xf0]  ;;  %v1141_v52 = vld [vmem:[#allocation2 + $0xc8] sm:$0x10] }
 0x281   : > { %v3153_v44 = vor.u32 %v3152_v16, %v3149_v63  ;;  %v3166_v17 = vrot.slane %v3164_v31, 4  ;;  %v3169_v21 = vrot.slane %v3167_v34, 5  ;;  %v5727_v4 = vld [vmem:[#allocation2 + $0x98] sm:$0x1f]  ;;  %v5894_v1 = vor.u32 %v5893_v6, %v14860_v61  ;;  %v13539_v56 = vld [vmem:[#allocation2 + $0xb0] sm:$0xf0] }
 0x282   : > { %v2995_v36 = vld [vmem:[#allocation2 + $0x98] sm:$0x1f]  ;;  %v5869_v15 = vsel %vm3018_vm15, %v5860_v23, %v5868_v7  ;;  %v5881_v41 = vrot.slane %v5879_v10, 4  ;;  %v5884_v49 = vrot.slane %v5882_v8, 5  ;;  %v5896_v2 = vshrl.u32 %v5727_v4, 16 }
 0x283   : > { %v3154_v18 = vsel %vm3018_vm15, %v3145_v47, %v3153_v44  ;;  %v3170_v11 = vor.u32 %v3169_v21, %v3166_v17  ;;  %v5899_v20 = vshll.u32 %v5727_v4, 16  ;;  %v3176_v53 = vshll.u32 %v13536_v50, 16  ;;  %v13538_v23 = vld [vmem:[#allocation2 + $0xa0] sm:$0xf0]  ;;  %v13540_v42 = vld [vmem:[#allocation2 + $0xb0] sm:$0xf0] }
 0x284   : > { %12256 = vmatmul.mubr.msk.bf16.gmra.mrb[8].mxu1 %vm2208_vm10, %v5852_v9  ;;  %12062 = vmatmul.mubr.msk.bf16.gmra.mrb[76].mxu0 %vm2208_vm10, %v3154_v18  ;;  %v5885_v43 = vor.u32 %v5884_v49, %v5881_v41  ;;  %v3181_v60 = vshrl.u32 %v2995_v36, 16  ;;  %v3184_v24 = vshll.u32 %v2995_v36, 16  ;;  %v1136_v28 = vsel %vm14716_vm14, 0, %v1135_v14 }
 0x285   : > { %12259 = vmatprep.mubr.msk.bf16.mxu1 %vm2208_vm10, %v5869_v15  ;;  %v3171_v25 = vsel %vm3018_vm15, %v3162_v37, %v3170_v11  ;;  %v5898_v29 = vrot.slane %v5896_v2, 4  ;;  %v5901_v30 = vrot.slane %v5899_v20, 5  ;;  %v3178_v33 = vrot.slane %v3176_v53, 5  ;;  %1137 = vst [vmem:[#allocation2 + $0xa8] sm:$0x10] %v1136_v28 }
 0x286   : > { %12065 = vmatprep.mubr.msk.bf16.mxu0 %vm2208_vm10, %v3171_v25  ;;  %v5886_v0 = vsel %vm3018_vm15, %v5877_v55, %v5885_v43  ;;  %v3183_v46 = vrot.slane %v3181_v60, 4  ;;  %v3186_v9 = vrot.slane %v3184_v24, 5  ;;  %v3190_v5 = vshrl.u32 %v13537_v19, 16  ;;  %v13541_v55 = vld [vmem:[#allocation2 + $0xc0] sm:$0xf0] }
 0x287   : > { %v5902_v39 = vor.u32 %v5901_v30, %v5898_v29  ;;  %v3179_v57 = vor.u32 %v3178_v33, %v3175_v3  ;;  %v3193_v48 = vshll.u32 %v13537_v19, 16  ;;  %v5905_v26 = vshrl.u32 %v13538_v23, 16 }
 0x288   : > { %v3187_v47 = vor.u32 %v3186_v9, %v3183_v46  ;;  %v3192_v54 = vrot.slane %v3190_v5, 4  ;;  %v5908_v50 = vshll.u32 %v13538_v23, 16  ;;  %v1139_v51 = vsel %vm14716_vm14, 0, %v1138_v38  ;;  %v13542_v38 = vld [vmem:[#allocation2 + $0xc0] sm:$0xf0] }
 0x289   : > { %v5903_v59 = vsel %vm3018_vm15, %v5894_v1, %v5902_v39  ;;  %v3195_v40 = vrot.slane %v3193_v48, 5  ;;  %v5907_v58 = vrot.slane %v5905_v26, 4  ;;  %1140 = vst [vmem:[#allocation2 + $0xb8] sm:$0x10] %v1139_v51  ;;  %v5922_v22 = vshrl.u32 %v13539_v56, 16 }
 0x28a   : > { %v3188_v61 = vsel %vm3018_vm15, %v3179_v57, %v3187_v47  ;;  %v5910_v6 = vrot.slane %v5908_v50, 5  ;;  %v5925_v62 = vshll.u32 %v13539_v56, 16  ;;  %v3207_v63 = vshrl.u32 %v13540_v42, 16 }
 0x28b   : > { %v5924_v16 = vrot.slane %v5922_v22, 4  ;;  %v3210_v12 = vshll.u32 %v13540_v42, 16  ;;  %v1142_v37 = vsel %vm14716_vm14, 0, %v1141_v52  ;;  %v3196_v34 = vor.u32 %v3195_v40, %v3192_v54  ;;  %v1144_v54 = vld [vmem:[#allocation2 + $0xd8] sm:$0x10] }
 0x28c   : > { %12260 = vmatmul.mubr.msk.bf16.gmra.mrb[12].mxu1 %vm2208_vm10, %v5886_v0  ;;  %12066 = vmatmul.mubr.msk.bf16.gmra.mrb[80].mxu0 %vm2208_vm10, %v3188_v61  ;;  %v2996_v31 = vld [vmem:[#allocation2 + $0xa8] sm:$0x1f]  ;;  %v5927_v3 = vrot.slane %v5925_v62, 5  ;;  %v3209_v7 = vrot.slane %v3207_v63, 4  ;;  %1143 = vst [vmem:[#allocation2 + $0xc8] sm:$0x10] %v1142_v37  ;;  %v5911_v17 = vor.u32 %v5910_v6, %v5907_v58 }
 0x28d   : > { %12263 = vmatprep.mubr.msk.bf16.mxu1 %vm2208_vm10, %v5903_v59  ;;  %v5728_v13 = vld [vmem:[#allocation2 + $0xa8] sm:$0x1f]  ;;  %v3198_v44 = vshrl.u32 %v2996_v31, 16  ;;  %v3201_v10 = vshll.u32 %v2996_v31, 16  ;;  %v3212_v21 = vrot.slane %v3210_v12, 5  ;;  %v3224_v4 = vshrl.u32 %v13541_v55, 16 }
 0x28e   : > { %v5913_v8 = vshrl.u32 %v5728_v13, 16  ;;  %v5916_v14 = vshll.u32 %v5728_v13, 16  ;;  %v3227_v1 = vshll.u32 %v13541_v55, 16  ;;  %v5928_v11 = vor.u32 %v5927_v3, %v5924_v16  ;;  %v1147_v63 = vld [vmem:[#allocation2 + $0xe8] sm:$0x10] }
 0x28f   : > { %v3200_v36 = vrot.slane %v3198_v44, 4  ;;  %v3203_v15 = vrot.slane %v3201_v10, 5  ;;  %v3213_v20 = vor.u32 %v3212_v21, %v3209_v7  ;;  %v3226_v53 = vrot.slane %v3224_v4, 4  ;;  %v13543_v31 = vld [vmem:[#allocation2 + $0xd0] sm:$0xf0] }
 0x290   : > { %v5915_v18 = vrot.slane %v5913_v8, 4  ;;  %v5918_v41 = vrot.slane %v5916_v14, 5  ;;  %v5729_v49 = vld [vmem:[#allocation2 + $0xb8] sm:$0x1f]  ;;  %v3229_v43 = vrot.slane %v3227_v1, 5  ;;  %v5939_v0 = vshrl.u32 %v13542_v38, 16 }
 0x291   : > { %v2997_v2 = vld [vmem:[#allocation2 + $0xb8] sm:$0x1f]  ;;  %v3204_v60 = vor.u32 %v3203_v15, %v3200_v36  ;;  %v5930_v28 = vshrl.u32 %v5729_v49, 16  ;;  %v5933_v25 = vshll.u32 %v5729_v49, 16  ;;  %v5942_v52 = vshll.u32 %v13542_v38, 16 }
 0x292   : > { %v5919_v24 = vor.u32 %v5918_v41, %v5915_v18  ;;  %v3215_v29 = vshrl.u32 %v2997_v2, 16  ;;  %v3218_v30 = vshll.u32 %v2997_v2, 16  ;;  %v3230_v33 = vor.u32 %v3229_v43, %v3226_v53  ;;  %v13544_v7 = vld [vmem:[#allocation2 + $0xd0] sm:$0xf0]  ;;  %v1405_v8 = vld [vmem:[#allocation6 + $0x1c] sm:$0xf] }
 0x293   : > { %v3205_v46 = vsel %vm3018_vm15, %v3196_v34, %v3204_v60  ;;  %v5932_v19 = vrot.slane %v5930_v28, 4  ;;  %v5935_v5 = vrot.slane %v5933_v25, 5  ;;  %v2998_v39 = vld [vmem:[#allocation2 + $0xc8] sm:$0x1f]  ;;  %v5941_v51 = vrot.slane %v5939_v0, 4  ;;  %13352 = vmatprep.subr.msk.bf16.mxu1 %vm2111_vm9, %v1405_v8 }
 0x294   : > { %v5920_v9 = vsel %vm3018_vm15, %v5911_v17, %v5919_v24  ;;  %v5730_v57 = vld [vmem:[#allocation2 + $0xc8] sm:$0x1f]  ;;  %12069 = vmatprep.mubr.msk.bf16.mxu0 %vm2208_vm10, %v3205_v46  ;;  %v3217_v48 = vrot.slane %v3215_v29, 4  ;;  %v3220_v23 = vrot.slane %v3218_v30, 5  ;;  %v3232_v26 = vshrl.u32 %v2998_v39, 16 }
 0x295   : > { %12264 = vmatmul.mubr.msk.bf16.gmra.mrb[16].mxu1 %vm2208_vm10, %v5920_v9  ;;  %v3235_v47 = vshll.u32 %v2998_v39, 16  ;;  %v5936_v50 = vor.u32 %v5935_v5, %v5932_v19  ;;  %v5947_v59 = vshrl.u32 %v5730_v57, 16  ;;  %v5950_v22 = vshll.u32 %v5730_v57, 16  ;;  %v1150_v4 = vld [vmem:[#allocation2 + $0xf8] sm:$0x10] }
 0x296   : > { %v3221_v40 = vor.u32 %v3220_v23, %v3217_v48  ;;  %v3234_v58 = vrot.slane %v3232_v26, 4  ;;  %v5944_v6 = vrot.slane %v5942_v52, 5  ;;  %v1145_v42 = vsel %vm14716_vm14, 0, %v1144_v54  ;;  %v13545_v18 = vld [vmem:[#allocation2 + $0xe0] sm:$0xf0] }
 0x297   : > { %v3237_v56 = vrot.slane %v3235_v47, 5  ;;  %v5937_v61 = vsel %vm3018_vm15, %v5928_v11, %v5936_v50  ;;  %v5949_v62 = vrot.slane %v5947_v59, 4  ;;  %v5952_v37 = vrot.slane %v5950_v22, 5  ;;  %1146 = vst [vmem:[#allocation2 + $0xd8] sm:$0x10] %v1145_v42 }
 0x298   : > { %12267 = vmatprep.mubr.msk.bf16.mxu1 %vm2208_vm10, %v5937_v61  ;;  %v3222_v16 = vsel %vm3018_vm15, %v3213_v20, %v3221_v40  ;;  %v5956_v34 = vshrl.u32 %v13543_v31, 16  ;;  %v5945_v13 = vor.u32 %v5944_v6, %v5941_v51  ;;  %v5959_v3 = vshll.u32 %v13543_v31, 16  ;;  %v13546_v2 = vld [vmem:[#allocation2 + $0xe0] sm:$0xf0]  ;;  %v13547_v28 = vld [vmem:[#allocation2 + $0xf0] sm:$0xf0] }
 0x299   : > { %v3238_v12 = vor.u32 %v3237_v56, %v3234_v58  ;;  %12070 = vmatmul.mubr.msk.bf16.gmra.mrb[84].mxu0 %vm2208_vm10, %v3222_v16  ;;  %v3241_v44 = vshrl.u32 %v13544_v7, 16  ;;  %v3244_v10 = vshll.u32 %v13544_v7, 16  ;;  %v5953_v17 = vor.u32 %v5952_v37, %v5949_v62  ;;  %v13548_v46 = vld [vmem:[#allocation2 + $0xf0] sm:$0xf0]  ;;  %v1153_v16 = vld [vmem:[#allocation2 + $0x108] sm:$0x10] }
 0x29a   : > { %v5958_v21 = vrot.slane %v5956_v34, 4  ;;  %v1148_v55 = vsel %vm14716_vm14, 0, %v1147_v63  ;;  %v5961_v1 = vrot.slane %v5959_v3, 5  ;;  %v3258_v41 = vshrl.u32 %v13545_v18, 16 }
 0x29b   : > { %v3239_v14 = vsel %vm3018_vm15, %v3230_v33, %v3238_v12  ;;  %v3243_v36 = vrot.slane %v3241_v44, 4  ;;  %v3246_v15 = vrot.slane %v3244_v10, 5  ;;  %1149 = vst [vmem:[#allocation2 + $0xe8] sm:$0x10] %v1148_v55  ;;  %v5954_v49 = vsel %vm3018_vm15, %v5945_v13, %v5953_v17 }
 0x29c   : > { %12073 = vmatprep.mubr.msk.bf16.mxu0 %vm2208_vm10, %v3239_v14  ;;  %v3261_v11 = vshll.u32 %v13545_v18, 16  ;;  %v5973_v20 = vshrl.u32 %v13546_v2, 16  ;;  %v5976_v53 = vshll.u32 %v13546_v2, 16  ;;  %v1151_v43 = vsel %vm14716_vm14, 0, %v1150_v4  ;;  %v1156_v18 = vld [vmem:[#allocation2 + $0x138] sm:$0x10] }
 0x29d   : > { %12268 = vmatmul.mubr.msk.bf16.gmra.mrb[20].mxu1 %vm2208_vm10, %v5954_v49  ;;  %v3260_v60 = vrot.slane %v3258_v41, 4  ;;  %1152 = vst [vmem:[#allocation2 + $0xf8] sm:$0x10] %v1151_v43  ;;  %v5990_v25 = vshrl.u32 %v13547_v28, 16  ;;  %v5962_v30 = vor.u32 %v5961_v1, %v5958_v21  ;;  %v3247_v38 = vor.u32 %v3246_v15, %v3243_v36 }
 0x29e   : > { %v3263_v24 = vrot.slane %v3261_v11, 5  ;;  %v5731_v29 = vld [vmem:[#allocation2 + $0xd8] sm:$0x1f]  ;;  %v5993_v0 = vshll.u32 %v13547_v28, 16  ;;  %v3275_v9 = vshrl.u32 %v13548_v46, 16  ;;  %v5975_v48 = vrot.slane %v5973_v20, 4 }
 0x29f   : > { %v2999_v33 = vld [vmem:[#allocation2 + $0xd8] sm:$0x1f]  ;;  %v5964_v19 = vshrl.u32 %v5731_v29, 16  ;;  %v5967_v5 = vshll.u32 %v5731_v29, 16  ;;  %v5978_v23 = vrot.slane %v5976_v53, 5  ;;  %v14901_v26 = vrot.slane %v5990_v25, 4 }
 0x2a0   : > { %v3249_v39 = vshrl.u32 %v2999_v33, 16  ;;  %v3252_v57 = vshll.u32 %v2999_v33, 16  ;;  %v5995_v47 = vrot.slane %v5993_v0, 5  ;;  %v3264_v40 = vor.u32 %v3263_v24, %v3260_v60  ;;  %v13549_v60 = vld [vmem:[#allocation2 + $0x100] sm:$0xf0] }
 0x2a1   : > { %v5966_v54 = vrot.slane %v5964_v19, 4  ;;  %v5969_v50 = vrot.slane %v5967_v5, 5  ;;  %v3277_v61 = vrot.slane %v3275_v9, 4  ;;  %v5979_v31 = vor.u32 %v5978_v23, %v5975_v48  ;;  %v3002_v33 = vld [vmem:[#allocation2 + $0x128] sm:$0x1f] }
 0x2a2   : > { %v3251_v51 = vrot.slane %v3249_v39, 4  ;;  %v3254_v52 = vrot.slane %v3252_v57, 5  ;;  %v3000_v59 = vld [vmem:[#allocation2 + $0xe8] sm:$0x1f]  ;;  %v5996_v13 = vor.u32 %v5995_v47, %v14901_v26  ;;  %v3278_v55 = vshll.u32 %v13548_v46, 16 }
 0x2a3   : > { %v3266_v58 = vshrl.u32 %v3000_v59, 16  ;;  %v3269_v56 = vshll.u32 %v3000_v59, 16  ;;  %v5732_v22 = vld [vmem:[#allocation2 + $0xe8] sm:$0x1f]  ;;  %v5970_v6 = vor.u32 %v5969_v50, %v5966_v54  ;;  %v1154_v15 = vsel %vm14716_vm14, 0, %v1153_v16 }
 0x2a4   : > { %v3255_v62 = vor.u32 %v3254_v52, %v3251_v51  ;;  %v5981_v42 = vshrl.u32 %v5732_v22, 16  ;;  %v5984_v63 = vshll.u32 %v5732_v22, 16  ;;  %v5733_v34 = vld [vmem:[#allocation2 + $0xf8] sm:$0x1f]  ;;  %v3280_v2 = vrot.slane %v3278_v55, 5 }
 0x2a5   : > { %v3268_v12 = vrot.slane %v3266_v58, 4  ;;  %v3271_v37 = vrot.slane %v3269_v56, 5  ;;  %v3001_v3 = vld [vmem:[#allocation2 + $0xf8] sm:$0x1f]  ;;  %v5971_v7 = vsel %vm3018_vm15, %v5962_v30, %v5970_v6  ;;  %v5998_v17 = vshrl.u32 %v5733_v34, 16 }
 0x2a6   : > { %v3256_v44 = vsel %vm3018_vm15, %v3247_v38, %v3255_v62  ;;  %v5983_v10 = vrot.slane %v5981_v42, 4  ;;  %v5986_v8 = vrot.slane %v5984_v63, 5  ;;  %12271 = vmatprep.mubr.msk.bf16.mxu1 %vm2208_vm10, %v5971_v7  ;;  %v6001_v21 = vshll.u32 %v5733_v34, 16  ;;  %1155 = vst [vmem:[#allocation2 + $0x108] sm:$0x10] %v1154_v15 }
 0x2a7   : > { %12074 = vmatmul.mubr.msk.bf16.gmra.mrb[88].mxu0 %vm2208_vm10, %v3256_v44  ;;  %v3272_v14 = vor.u32 %v3271_v37, %v3268_v12  ;;  %v3283_v1 = vshrl.u32 %v3001_v3, 16  ;;  %v3286_v36 = vshll.u32 %v3001_v3, 16  ;;  %v6000_v49 = vrot.slane %v5998_v17, 4  ;;  %v13550_v46 = vld [vmem:[#allocation2 + $0x130] sm:$0xf0] }
 0x2a8   : > { %v5987_v4 = vor.u32 %v5986_v8, %v5983_v10  ;;  %v6003_v11 = vrot.slane %v6001_v21, 5  ;;  %v6007_v24 = vshrl.u32 %v13549_v60, 16  ;;  %v3281_v25 = vor.u32 %v3280_v2, %v3277_v61  ;;  %v13551_v57 = vld [vmem:[#allocation2 + $0x120] sm:$0xf0]  ;;  %v13552_v61 = vld [vmem:[#allocation2 + $0x130] sm:$0xf0] }
 0x2a9   : > { %v3273_v41 = vsel %vm3018_vm15, %v3264_v40, %v3272_v14  ;;  %v3285_v53 = vrot.slane %v3283_v1, 4  ;;  %v3288_v43 = vrot.slane %v3286_v36, 5  ;;  %v6010_v29 = vshll.u32 %v13549_v60, 16  ;;  %v1159_v40 = vld [vmem:[#allocation2 + $0x148] sm:$0x10] }
 0x2aa   : > { %12077 = vmatprep.mubr.msk.bf16.mxu0 %vm2208_vm10, %v3273_v41  ;;  %v5988_v20 = vsel %vm3018_vm15, %v5979_v31, %v5987_v4  ;;  %v6004_v28 = vor.u32 %v6003_v11, %v6000_v49  ;;  %v1157_v30 = vsel %vm14716_vm14, 0, %v1156_v18  ;;  %v6009_v0 = vrot.slane %v6007_v24, 4  ;;  %v1162_v49 = vld [vmem:[#allocation2 + $0x158] sm:$0x10]  ;;  %v13554_v24 = vld [vmem:[#allocation2 + $0x140] sm:$0xf0] }
 0x2ab   : > { %12272 = vmatmul.mubr.msk.bf16.gmra.mrb[24].mxu1 %vm2208_vm10, %v5988_v20  ;;  %v3289_v38 = vor.u32 %v3288_v43, %v3285_v53  ;;  %1158 = vst [vmem:[#allocation2 + $0x138] sm:$0x10] %v1157_v30  ;;  %v6024_v9 = vshrl.u32 %v13550_v46, 16  ;;  %v6027_v19 = vshll.u32 %v13550_v46, 16  ;;  %v6012_v39 = vrot.slane %v6010_v29, 5 }
 0x2ac   : > { %v6005_v5 = vsel %vm3018_vm15, %v5996_v13, %v6004_v28  ;;  %v3292_v48 = vshrl.u32 %v13551_v57, 16  ;;  %v3295_v23 = vshll.u32 %v13551_v57, 16  ;;  %v3300_v54 = vshrl.u32 %v3002_v33, 16  ;;  %v13553_v13 = vld [vmem:[#allocation2 + $0x140] sm:$0xf0] }
 0x2ad   : > { %12275 = vmatprep.mubr.msk.bf16.mxu1 %vm2208_vm10, %v6005_v5  ;;  %v3290_v26 = vsel %vm3018_vm15, %v3281_v25, %v3289_v38  ;;  %v14919_v47 = vrot.slane %v6024_v9, 4  ;;  %v6029_v50 = vrot.slane %v6027_v19, 5  ;;  %v3303_v59 = vshll.u32 %v3002_v33, 16  ;;  %v5734_v58 = vld [vmem:[#allocation2 + $0x108] sm:$0x1f] }
 0x2ae   : > { %v3294_v51 = vrot.slane %v3292_v48, 4  ;;  %v3297_v52 = vrot.slane %v3295_v23, 5  ;;  %v6013_v56 = vor.u32 %v6012_v39, %v6009_v0  ;;  %v3302_v22 = vrot.slane %v3300_v54, 4  ;;  %v13555_v38 = vld [vmem:[#allocation2 + $0x150] sm:$0xf0] }
 0x2af   : > { %12078 = vmatmul.mubr.msk.bf16.gmra.mrb[92].mxu0 %vm2208_vm10, %v3290_v26  ;;  %v3309_v6 = vshrl.u32 %v13552_v61, 16  ;;  %v3312_v62 = vshll.u32 %v13552_v61, 16  ;;  %v6015_v42 = vshrl.u32 %v5734_v58, 16  ;;  %v6018_v63 = vshll.u32 %v5734_v58, 16  ;;  %v1165_v39 = vld [vmem:[#allocation2 + $0x168] sm:$0x10] }
 0x2b0   : > { %v3298_v16 = vor.u32 %v3297_v52, %v3294_v51  ;;  %v3305_v12 = vrot.slane %v3303_v59, 5  ;;  %v1160_v34 = vsel %vm14716_vm14, 0, %v1159_v40  ;;  %v3326_v3 = vshrl.u32 %v13553_v13, 16 }
 0x2b1   : > { %v3311_v37 = vrot.slane %v3309_v6, 4  ;;  %v3314_v31 = vrot.slane %v3312_v62, 5  ;;  %v6017_v7 = vrot.slane %v6015_v42, 4  ;;  %v6020_v44 = vrot.slane %v6018_v63, 5  ;;  %1161 = vst [vmem:[#allocation2 + $0x148] sm:$0x10] %v1160_v34 }
 0x2b2   : > { %v5735_v10 = vld [vmem:[#allocation2 + $0x138] sm:$0x1f]  ;;  %v6030_v8 = vor.u32 %v6029_v50, %v14919_v47  ;;  %v3306_v14 = vor.u32 %v3305_v12, %v3302_v22  ;;  %v3328_v41 = vrot.slane %v3326_v3, 4  ;;  %v3329_v53 = vshll.u32 %v13553_v13, 16  ;;  %v13556_v47 = vld [vmem:[#allocation2 + $0x150] sm:$0xf0] }
 0x2b3   : > { %v3003_v17 = vld [vmem:[#allocation2 + $0x138] sm:$0x1f]  ;;  %v6032_v21 = vshrl.u32 %v5735_v10, 16  ;;  %v6035_v55 = vshll.u32 %v5735_v10, 16  ;;  %v3315_v4 = vor.u32 %v3314_v31, %v3311_v37  ;;  %v6021_v36 = vor.u32 %v6020_v44, %v6017_v7  ;;  %v13557_v37 = vld [vmem:[#allocation2 + $0x160] sm:$0xf0] }
 0x2b4   : > { %v3317_v1 = vshrl.u32 %v3003_v17, 16  ;;  %v3307_v15 = vsel %vm3018_vm15, %v3298_v16, %v3306_v14  ;;  %v3320_v18 = vshll.u32 %v3003_v17, 16  ;;  %v6041_v28 = vshrl.u32 %v13554_v24, 16  ;;  %v13558_v7 = vld [vmem:[#allocation2 + $0x160] sm:$0xf0] }
 0x2b5   : > { %v6034_v11 = vrot.slane %v6032_v21, 4  ;;  %v6037_v2 = vrot.slane %v6035_v55, 5  ;;  %12081 = vmatprep.mubr.msk.bf16.mxu0 %vm2208_vm10, %v3307_v15  ;;  %v6022_v43 = vsel %vm3018_vm15, %v6013_v56, %v6021_v36  ;;  %v6044_v25 = vshll.u32 %v13554_v24, 16  ;;  %v1168_v15 = vld [vmem:[#allocation2 + $0x178] sm:$0x10] }
 0x2b6   : > { %v3319_v20 = vrot.slane %v3317_v1, 4  ;;  %v3322_v60 = vrot.slane %v3320_v18, 5  ;;  %12276 = vmatmul.mubr.msk.bf16.gmra.mrb[28].mxu1 %vm2208_vm10, %v6022_v43  ;;  %v3331_v30 = vrot.slane %v3329_v53, 5  ;;  %v1163_v33 = vsel %vm14716_vm14, 0, %v1162_v49 }
 0x2b7   : > { %v6038_v29 = vor.u32 %v6037_v2, %v6034_v11  ;;  %v6058_v0 = vshrl.u32 %v13555_v38, 16  ;;  %v6043_v9 = vrot.slane %v6041_v28, 4  ;;  %v6046_v19 = vrot.slane %v6044_v25, 5  ;;  %1164 = vst [vmem:[#allocation2 + $0x158] sm:$0x10] %v1163_v33 }
 0x2b8   : > { %v3323_v46 = vor.u32 %v3322_v60, %v3319_v20  ;;  %v6061_v5 = vshll.u32 %v13555_v38, 16  ;;  %v3004_v48 = vld [vmem:[#allocation2 + $0x148] sm:$0x1f]  ;;  %v3332_v23 = vor.u32 %v3331_v30, %v3328_v41  ;;  %v3343_v54 = vshrl.u32 %v13556_v47, 16 }
 0x2b9   : > { %v6039_v57 = vsel %vm3018_vm15, %v6030_v8, %v6038_v29  ;;  %v5736_v26 = vld [vmem:[#allocation2 + $0x148] sm:$0x1f]  ;;  %v3334_v51 = vshrl.u32 %v3004_v48, 16  ;;  %v3337_v52 = vshll.u32 %v3004_v48, 16  ;;  %v6060_v59 = vrot.slane %v6058_v0, 4 }
 0x2ba   : > { %12279 = vmatprep.mubr.msk.bf16.mxu1 %vm2208_vm10, %v6039_v57  ;;  %v3324_v50 = vsel %vm3018_vm15, %v3315_v4, %v3323_v46  ;;  %v6047_v40 = vor.u32 %v6046_v19, %v6043_v9  ;;  %v6049_v58 = vshrl.u32 %v5736_v26, 16  ;;  %v6052_v56 = vshll.u32 %v5736_v26, 16  ;;  %v13559_v0 = vld [vmem:[#allocation2 + $0x170] sm:$0xf0] }
 0x2bb   : > { %12082 = vmatmul.mubr.msk.bf16.gmra.mrb[96].mxu0 %vm2208_vm10, %v3324_v50  ;;  %v6063_v22 = vrot.slane %v6061_v5, 5  ;;  %v3336_v61 = vrot.slane %v3334_v51, 4  ;;  %v3339_v6 = vrot.slane %v3337_v52, 5  ;;  %v3346_v62 = vshll.u32 %v13556_v47, 16 }
 0x2bc   : > { %v1166_v42 = vsel %vm14716_vm14, 0, %v1165_v39  ;;  %v6051_v63 = vrot.slane %v6049_v58, 4  ;;  %v6054_v16 = vrot.slane %v6052_v56, 5  ;;  %v3345_v12 = vrot.slane %v3343_v54, 4  ;;  %v1171_v54 = vld [vmem:[#allocation2 + $0x188] sm:$0x10] }
 0x2bd   : > { %1167 = vst [vmem:[#allocation2 + $0x168] sm:$0x10] %v1166_v42  ;;  %v3360_v31 = vshrl.u32 %v13557_v37, 16  ;;  %v3340_v34 = vor.u32 %v3339_v6, %v3336_v61  ;;  %v3348_v13 = vrot.slane %v3346_v62, 5  ;;  %v3363_v3 = vshll.u32 %v13557_v37, 16 }
 0x2be   : > { %v6075_v44 = vshrl.u32 %v13558_v7, 16  ;;  %v6055_v10 = vor.u32 %v6054_v16, %v6051_v63  ;;  %v5737_v8 = vld [vmem:[#allocation2 + $0x158] sm:$0x1f]  ;;  %v6064_v14 = vor.u32 %v6063_v22, %v6060_v59  ;;  %v6078_v21 = vshll.u32 %v13558_v7, 16  ;;  %v13560_v56 = vld [vmem:[#allocation2 + $0x170] sm:$0xf0] }
 0x2bf   : > { %v3005_v17 = vld [vmem:[#allocation2 + $0x158] sm:$0x1f]  ;;  %v3341_v55 = vsel %vm3018_vm15, %v3332_v23, %v3340_v34  ;;  %v6066_v4 = vshrl.u32 %v5737_v8, 16  ;;  %v6069_v1 = vshll.u32 %v5737_v8, 16  ;;  %v3362_v36 = vrot.slane %v3360_v31, 4 }
 0x2c0   : > { %12085 = vmatprep.mubr.msk.bf16.mxu0 %vm2208_vm10, %v3341_v55  ;;  %v6056_v18 = vsel %vm3018_vm15, %v6047_v40, %v6055_v10  ;;  %v3351_v41 = vshrl.u32 %v3005_v17, 16  ;;  %v3354_v49 = vshll.u32 %v3005_v17, 16  ;;  %v3365_v11 = vrot.slane %v3363_v3, 5  ;;  %v13561_v42 = vld [vmem:[#allocation2 + $0x180] sm:$0xf0] }
 0x2c1   : > { %12280 = vmatmul.mubr.msk.bf16.gmra.mrb[32].mxu1 %vm2208_vm10, %v6056_v18  ;;  %v6068_v2 = vrot.slane %v6066_v4, 4  ;;  %v6071_v20 = vrot.slane %v6069_v1, 5  ;;  %v3349_v53 = vor.u32 %v3348_v13, %v3345_v12  ;;  %v6077_v43 = vrot.slane %v6075_v44, 4  ;;  %v13562_v34 = vld [vmem:[#allocation2 + $0x180] sm:$0xf0] }
 0x2c2   : > { %v3353_v60 = vrot.slane %v3351_v41, 4  ;;  %v3356_v24 = vrot.slane %v3354_v49, 5  ;;  %v6080_v28 = vrot.slane %v6078_v21, 5  ;;  %v1169_v25 = vsel %vm14716_vm14, 0, %v1168_v15  ;;  %v1174_v3 = vld [vmem:[#allocation2 + $0x198] sm:$0x10] }
 0x2c3   : > { %v6072_v29 = vor.u32 %v6071_v20, %v6068_v2  ;;  %v3366_v33 = vor.u32 %v3365_v11, %v3362_v36  ;;  %1170 = vst [vmem:[#allocation2 + $0x178] sm:$0x10] %v1169_v25  ;;  %v6092_v46 = vshrl.u32 %v13559_v0, 16  ;;  %v6095_v9 = vshll.u32 %v13559_v0, 16 }
 0x2c4   : > { %v3006_v30 = vld [vmem:[#allocation2 + $0x168] sm:$0x1f]  ;;  %v3357_v19 = vor.u32 %v3356_v24, %v3353_v60  ;;  %v6081_v40 = vor.u32 %v6080_v28, %v6077_v43  ;;  %v3377_v22 = vshrl.u32 %v13560_v56, 16  ;;  %v3380_v61 = vshll.u32 %v13560_v56, 16  ;;  %v13563_v43 = vld [vmem:[#allocation2 + $0x190] sm:$0xf0] }
 0x2c5   : > { %v5738_v38 = vld [vmem:[#allocation2 + $0x168] sm:$0x1f]  ;;  %v3368_v5 = vshrl.u32 %v3006_v30, 16  ;;  %v3371_v39 = vshll.u32 %v3006_v30, 16  ;;  %v6073_v48 = vsel %vm3018_vm15, %v6064_v14, %v6072_v29  ;;  %v14944_v26 = vrot.slane %v6092_v46, 4 }
 0x2c6   : > { %v6083_v57 = vshrl.u32 %v5738_v38, 16  ;;  %v6086_v23 = vshll.u32 %v5738_v38, 16  ;;  %v6097_v47 = vrot.slane %v6095_v9, 5  ;;  %12283 = vmatprep.mubr.msk.bf16.mxu1 %vm2208_vm10, %v6073_v48  ;;  %v3358_v50 = vsel %vm3018_vm15, %v3349_v53, %v3357_v19  ;;  %v13564_v29 = vld [vmem:[#allocation2 + $0x190] sm:$0xf0] }
 0x2c7   : > { %v3370_v51 = vrot.slane %v3368_v5, 4  ;;  %v3373_v52 = vrot.slane %v3371_v39, 5  ;;  %12086 = vmatmul.mubr.msk.bf16.gmra.mrb[100].mxu0 %vm2208_vm10, %v3358_v50  ;;  %v1172_v62 = vsel %vm14716_vm14, 0, %v1171_v54  ;;  %v3394_v63 = vshrl.u32 %v13561_v42, 16 }
 0x2c8   : > { %v6085_v59 = vrot.slane %v6083_v57, 4  ;;  %v6088_v58 = vrot.slane %v6086_v23, 5  ;;  %v3397_v16 = vshll.u32 %v13561_v42, 16  ;;  %v3379_v37 = vrot.slane %v3377_v22, 4  ;;  %1173 = vst [vmem:[#allocation2 + $0x188] sm:$0x10] %v1172_v62 }
 0x2c9   : > { %v3374_v6 = vor.u32 %v3373_v52, %v3370_v51  ;;  %v3382_v31 = vrot.slane %v3380_v61, 5  ;;  %v6109_v13 = vshrl.u32 %v13562_v34, 16  ;;  %v6098_v10 = vor.u32 %v6097_v47, %v14944_v26  ;;  %v1177_v23 = vld [vmem:[#allocation2 + $0x1a8] sm:$0x10]  ;;  %v13565_v61 = vld [vmem:[#allocation2 + $0x1a0] sm:$0xf0] }
 0x2ca   : > { %v6089_v12 = vor.u32 %v6088_v58, %v6085_v59  ;;  %v5739_v44 = vld [vmem:[#allocation2 + $0x178] sm:$0x1f]  ;;  %v14953_v14 = vrot.slane %v3394_v63, 4  ;;  %v3399_v4 = vrot.slane %v3397_v16, 5  ;;  %v6112_v11 = vshll.u32 %v13562_v34, 16 }
 0x2cb   : > { %v3375_v7 = vsel %vm3018_vm15, %v3366_v33, %v3374_v6  ;;  %v3007_v8 = vld [vmem:[#allocation2 + $0x178] sm:$0x1f]  ;;  %v6100_v21 = vshrl.u32 %v5739_v44, 16  ;;  %v6103_v55 = vshll.u32 %v5739_v44, 16  ;;  %v3383_v1 = vor.u32 %v3382_v31, %v3379_v37  ;;  %v13566_v37 = vld [vmem:[#allocation2 + $0x1a0] sm:$0xf0] }
 0x2cc   : > { %12089 = vmatprep.mubr.msk.bf16.mxu0 %vm2208_vm10, %v3375_v7  ;;  %v6090_v17 = vsel %vm3018_vm15, %v6081_v40, %v6089_v12  ;;  %v3385_v36 = vshrl.u32 %v3007_v8, 16  ;;  %v3388_v15 = vshll.u32 %v3007_v8, 16  ;;  %v6111_v18 = vrot.slane %v6109_v13, 4 }
 0x2cd   : > { %12284 = vmatmul.mubr.msk.bf16.gmra.mrb[36].mxu1 %vm2208_vm10, %v6090_v17  ;;  %v6102_v41 = vrot.slane %v6100_v21, 4  ;;  %v6105_v49 = vrot.slane %v6103_v55, 5  ;;  %v1175_v2 = vsel %vm14716_vm14, 0, %v1174_v3  ;;  %v6126_v60 = vshrl.u32 %v13563_v43, 16  ;;  %v1180_v17 = vld [vmem:[#allocation2 + $0x1b8] sm:$0x10] }
 0x2ce   : > { %v3387_v20 = vrot.slane %v3385_v36, 4  ;;  %v3390_v53 = vrot.slane %v3388_v15, 5  ;;  %1176 = vst [vmem:[#allocation2 + $0x198] sm:$0x10] %v1175_v2  ;;  %v6129_v24 = vshll.u32 %v13563_v43, 16  ;;  %v6114_v25 = vrot.slane %v6112_v11, 5 }
 0x2cf   : > { %v6106_v28 = vor.u32 %v6105_v49, %v6102_v41  ;;  %v3411_v30 = vshrl.u32 %v13564_v29, 16  ;;  %v3414_v33 = vshll.u32 %v13564_v29, 16  ;;  %v3008_v0 = vld [vmem:[#allocation2 + $0x188] sm:$0x1f]  ;;  %v3400_v46 = vor.u32 %v3399_v4, %v14953_v14  ;;  %v13567_v2 = vld [vmem:[#allocation2 + $0x1b0] sm:$0xf0] }
 0x2d0   : > { %v3391_v38 = vor.u32 %v3390_v53, %v3387_v20  ;;  %v5740_v9 = vld [vmem:[#allocation2 + $0x188] sm:$0x1f]  ;;  %v6128_v19 = vrot.slane %v6126_v60, 4  ;;  %v3402_v39 = vshrl.u32 %v3008_v0, 16  ;;  %v3405_v57 = vshll.u32 %v3008_v0, 16 }
 0x2d1   : > { %v6107_v5 = vsel %vm3018_vm15, %v6098_v10, %v6106_v28  ;;  %v6131_v48 = vrot.slane %v6129_v24, 5  ;;  %v6115_v47 = vor.u32 %v6114_v25, %v6111_v18  ;;  %v6117_v54 = vshrl.u32 %v5740_v9, 16  ;;  %v13568_v24 = vld [vmem:[#allocation2 + $0x1b0] sm:$0xf0]  ;;  %v1183_v29 = vld [vmem:[#allocation2 + $0x1c8] sm:$0x10] }
 0x2d2   : > { %12287 = vmatprep.mubr.msk.bf16.mxu1 %vm2208_vm10, %v6107_v5  ;;  %v3392_v26 = vsel %vm3018_vm15, %v3383_v1, %v3391_v38  ;;  %v6120_v50 = vshll.u32 %v5740_v9, 16  ;;  %v3404_v51 = vrot.slane %v3402_v39, 4  ;;  %v3407_v52 = vrot.slane %v3405_v57, 5 }
 0x2d3   : > { %12090 = vmatmul.mubr.msk.bf16.gmra.mrb[104].mxu0 %vm2208_vm10, %v3392_v26  ;;  %v3413_v59 = vrot.slane %v3411_v30, 4  ;;  %v3416_v40 = vrot.slane %v3414_v33, 5  ;;  %v6119_v58 = vrot.slane %v6117_v54, 4  ;;  %v1178_v22 = vsel %vm14716_vm14, 0, %v1177_v23 }
 0x2d4   : > { %v6122_v56 = vrot.slane %v6120_v50, 5  ;;  %v3428_v6 = vshrl.u32 %v13565_v61, 16  ;;  %v3408_v62 = vor.u32 %v3407_v52, %v3404_v51  ;;  %v6132_v63 = vor.u32 %v6131_v48, %v6128_v19  ;;  %1179 = vst [vmem:[#allocation2 + $0x1a8] sm:$0x10] %v1178_v22 }
 0x2d5   : > { %v5741_v42 = vld [vmem:[#allocation2 + $0x198] sm:$0x1f]  ;;  %v3431_v12 = vshll.u32 %v13565_v61, 16  ;;  %v6143_v31 = vshrl.u32 %v13566_v37, 16  ;;  %v3417_v36 = vor.u32 %v3416_v40, %v3413_v59  ;;  %v6146_v41 = vshll.u32 %v13566_v37, 16 }
 0x2d6   : > { %v3009_v16 = vld [vmem:[#allocation2 + $0x198] sm:$0x1f]  ;;  %v6123_v34 = vor.u32 %v6122_v56, %v6119_v58  ;;  %v6134_v13 = vshrl.u32 %v5741_v42, 16  ;;  %v6137_v3 = vshll.u32 %v5741_v42, 16  ;;  %v3409_v44 = vsel %vm3018_vm15, %v3400_v46, %v3408_v62  ;;  %v13569_v40 = vld [vmem:[#allocation2 + $0x1c0] sm:$0xf0] }
 0x2d7   : > { %v3419_v7 = vshrl.u32 %v3009_v16, 16  ;;  %v3422_v10 = vshll.u32 %v3009_v16, 16  ;;  %v3430_v8 = vrot.slane %v3428_v6, 4  ;;  %v3433_v14 = vrot.slane %v3431_v12, 5  ;;  %12093 = vmatprep.mubr.msk.bf16.mxu0 %vm2208_vm10, %v3409_v44  ;;  %v13570_v61 = vld [vmem:[#allocation2 + $0x1c0] sm:$0xf0] }
 0x2d8   : > { %v6124_v21 = vsel %vm3018_vm15, %v6115_v47, %v6123_v34  ;;  %v6136_v55 = vrot.slane %v6134_v13, 4  ;;  %v6139_v4 = vrot.slane %v6137_v3, 5  ;;  %v6145_v18 = vrot.slane %v6143_v31, 4  ;;  %v1186_v44 = vld [vmem:[#allocation2 + $0x1d8] sm:$0x10] }
 0x2d9   : > { %v3421_v1 = vrot.slane %v3419_v7, 4  ;;  %12288 = vmatmul.mubr.msk.bf16.gmra.mrb[40].mxu1 %vm2208_vm10, %v6124_v21  ;;  %v3424_v15 = vrot.slane %v3422_v10, 5  ;;  %v1181_v11 = vsel %vm14716_vm14, 0, %v1180_v17  ;;  %v6160_v20 = vshrl.u32 %v13567_v2, 16 }
 0x2da   : > { %v6140_v49 = vor.u32 %v6139_v4, %v6136_v55  ;;  %v6163_v53 = vshll.u32 %v13567_v2, 16  ;;  %v6148_v60 = vrot.slane %v6146_v41, 5  ;;  %1182 = vst [vmem:[#allocation2 + $0x1b8] sm:$0x10] %v1181_v11  ;;  %v3445_v28 = vshrl.u32 %v13568_v24, 16 }
 0x2db   : > { %v3425_v43 = vor.u32 %v3424_v15, %v3421_v1  ;;  %v3448_v25 = vshll.u32 %v13568_v24, 16  ;;  %v3010_v33 = vld [vmem:[#allocation2 + $0x1a8] sm:$0x1f]  ;;  %v3434_v38 = vor.u32 %v3433_v14, %v3430_v8  ;;  %v14974_v46 = vrot.slane %v6160_v20, 4 }
 0x2dc   : > { %v6141_v30 = vsel %vm3018_vm15, %v6132_v63, %v6140_v49  ;;  %v5742_v0 = vld [vmem:[#allocation2 + $0x1a8] sm:$0x1f]  ;;  %v3436_v19 = vshrl.u32 %v3010_v33, 16  ;;  %v3439_v5 = vshll.u32 %v3010_v33, 16  ;;  %v6165_v39 = vrot.slane %v6163_v53, 5 }
 0x2dd   : > { %12291 = vmatprep.mubr.msk.bf16.mxu1 %vm2208_vm10, %v6141_v30  ;;  %v3426_v9 = vsel %vm3018_vm15, %v3417_v36, %v3425_v43  ;;  %v6149_v57 = vor.u32 %v6148_v60, %v6145_v18  ;;  %v6151_v48 = vshrl.u32 %v5742_v0, 16  ;;  %v6154_v23 = vshll.u32 %v5742_v0, 16  ;;  %v13571_v18 = vld [vmem:[#allocation2 + $0x1d0] sm:$0xf0] }
 0x2de   : > { %12094 = vmatmul.mubr.msk.bf16.gmra.mrb[108].mxu0 %vm2208_vm10, %v3426_v9  ;;  %v3447_v26 = vrot.slane %v3445_v28, 4  ;;  %v3438_v47 = vrot.slane %v3436_v19, 4  ;;  %v3441_v54 = vrot.slane %v3439_v5, 5  ;;  %v3450_v50 = vrot.slane %v3448_v25, 5  ;;  %v13572_v43 = vld [vmem:[#allocation2 + $0x1d0] sm:$0xf0] }
 0x2df   : > { %v1184_v51 = vsel %vm14716_vm14, 0, %v1183_v29  ;;  %v6153_v52 = vrot.slane %v6151_v48, 4  ;;  %v6156_v59 = vrot.slane %v6154_v23, 5  ;;  %v3462_v58 = vshrl.u32 %v13569_v40, 16  ;;  %v1189_v9 = vld [vmem:[#allocation2 + $0x1e8] sm:$0x10] }
 0x2e0   : > { %1185 = vst [vmem:[#allocation2 + $0x1c8] sm:$0x10] %v1184_v51  ;;  %v3465_v56 = vshll.u32 %v13569_v40, 16  ;;  %v3442_v22 = vor.u32 %v3441_v54, %v3438_v47  ;;  %v6177_v6 = vshrl.u32 %v13570_v61, 16  ;;  %v6180_v62 = vshll.u32 %v13570_v61, 16 }
 0x2e1   : > { %v6157_v42 = vor.u32 %v6156_v59, %v6153_v52  ;;  %v5743_v63 = vld [vmem:[#allocation2 + $0x1b8] sm:$0x1f]  ;;  %v6166_v16 = vor.u32 %v6165_v39, %v14974_v46  ;;  %v3464_v37 = vrot.slane %v3462_v58, 4  ;;  %v3451_v8 = vor.u32 %v3450_v50, %v3447_v26  ;;  %v13573_v51 = vld [vmem:[#allocation2 + $0x1e0] sm:$0xf0] }
 0x2e2   : > { %v3011_v12 = vld [vmem:[#allocation2 + $0x1b8] sm:$0x1f]  ;;  %v3467_v31 = vrot.slane %v3465_v56, 5  ;;  %v3443_v34 = vsel %vm3018_vm15, %v3434_v38, %v3442_v22  ;;  %v6168_v13 = vshrl.u32 %v5743_v63, 16  ;;  %v6171_v3 = vshll.u32 %v5743_v63, 16 }
 0x2e3   : > { %v3453_v7 = vshrl.u32 %v3011_v12, 16  ;;  %12097 = vmatprep.mubr.msk.bf16.mxu0 %vm2208_vm10, %v3443_v34  ;;  %v6158_v10 = vsel %vm3018_vm15, %v6149_v57, %v6157_v42  ;;  %v3456_v14 = vshll.u32 %v3011_v12, 16  ;;  %v6179_v17 = vrot.slane %v6177_v6, 4  ;;  %v13574_v58 = vld [vmem:[#allocation2 + $0x1e0] sm:$0xf0] }
 0x2e4   : > { %12292 = vmatmul.mubr.msk.bf16.gmra.mrb[44].mxu1 %vm2208_vm10, %v6158_v10  ;;  %v6170_v21 = vrot.slane %v6168_v13, 4  ;;  %v6173_v55 = vrot.slane %v6171_v3, 5  ;;  %v6182_v1 = vrot.slane %v6180_v62, 5  ;;  %v1187_v15 = vsel %vm14716_vm14, 0, %v1186_v44  ;;  %v1192_v61 = vld [vmem:[#allocation2 + $0x1f8] sm:$0x10] }
 0x2e5   : > { %v3455_v4 = vrot.slane %v3453_v7, 4  ;;  %v3458_v36 = vrot.slane %v3456_v14, 5  ;;  %v6194_v41 = vshrl.u32 %v13571_v18, 16  ;;  %v6197_v49 = vshll.u32 %v13571_v18, 16  ;;  %1188 = vst [vmem:[#allocation2 + $0x1d8] sm:$0x10] %v1187_v15 }
 0x2e6   : > { %v6174_v11 = vor.u32 %v6173_v55, %v6170_v21  ;;  %v3468_v20 = vor.u32 %v3467_v31, %v3464_v37  ;;  %v3479_v60 = vshrl.u32 %v13572_v43, 16  ;;  %v3482_v24 = vshll.u32 %v13572_v43, 16 }
 0x2e7   : > { %v3012_v2 = vld [vmem:[#allocation2 + $0x1c8] sm:$0x1f]  ;;  %v3459_v28 = vor.u32 %v3458_v36, %v3455_v4  ;;  %v14989_v0 = vrot.slane %v6194_v41, 4  ;;  %v14991_v46 = vrot.slane %v6197_v49, 5  ;;  %v6183_v48 = vor.u32 %v6182_v1, %v6179_v17  ;;  %v13575_v36 = vld [vmem:[#allocation2 + $0x1f0] sm:$0xf0] }
 0x2e8   : > { %v5744_v53 = vld [vmem:[#allocation2 + $0x1c8] sm:$0x1f]  ;;  %v3470_v25 = vshrl.u32 %v3012_v2, 16  ;;  %v3473_v29 = vshll.u32 %v3012_v2, 16  ;;  %v6175_v33 = vsel %vm3018_vm15, %v6166_v16, %v6174_v11  ;;  %v3481_v26 = vrot.slane %v3479_v60, 4 }
 0x2e9   : > { %v6185_v30 = vshrl.u32 %v5744_v53, 16  ;;  %v6188_v38 = vshll.u32 %v5744_v53, 16  ;;  %12295 = vmatprep.mubr.msk.bf16.mxu1 %vm2208_vm10, %v6175_v33  ;;  %v3460_v19 = vsel %vm3018_vm15, %v3451_v8, %v3459_v28  ;;  %v3484_v47 = vrot.slane %v3482_v24, 5  ;;  %v1195_v8 = vld [vmem:[#allocation2 + $0x208] sm:$0x10] }
 0x2ea   : > { %v3472_v5 = vrot.slane %v3470_v25, 4  ;;  %v3475_v39 = vrot.slane %v3473_v29, 5  ;;  %12098 = vmatmul.mubr.msk.bf16.gmra.mrb[112].mxu0 %vm2208_vm10, %v3460_v19  ;;  %v1190_v50 = vsel %vm14716_vm14, 0, %v1189_v9  ;;  %v3496_v52 = vshrl.u32 %v13573_v51, 16  ;;  %v13576_v49 = vld [vmem:[#allocation2 + $0x1f0] sm:$0xf0] }
 0x2eb   : > { %v6187_v57 = vrot.slane %v6185_v30, 4  ;;  %v6190_v23 = vrot.slane %v6188_v38, 5  ;;  %v3499_v59 = vshll.u32 %v13573_v51, 16  ;;  %1191 = vst [vmem:[#allocation2 + $0x1e8] sm:$0x10] %v1190_v50  ;;  %v6211_v56 = vshrl.u32 %v13574_v58, 16 }
 0x2ec   : > { %v3476_v54 = vor.u32 %v3475_v39, %v3472_v5  ;;  %v6214_v22 = vshll.u32 %v13574_v58, 16  ;;  %v5745_v62 = vld [vmem:[#allocation2 + $0x1d8] sm:$0x1f]  ;;  %v6200_v42 = vor.u32 %v14991_v46, %v14989_v0  ;;  %v15001_v16 = vrot.slane %v3496_v52, 4  ;;  %v13578_v51 = vld [vmem:[#allocation2 + $0x200] sm:$0xf0] }
 0x2ed   : > { %v6191_v40 = vor.u32 %v6190_v23, %v6187_v57  ;;  %v3013_v63 = vld [vmem:[#allocation2 + $0x1d8] sm:$0x1f]  ;;  %v15003_v12 = vrot.slane %v3499_v59, 5  ;;  %v6202_v31 = vshrl.u32 %v5745_v62, 16  ;;  %v6205_v34 = vshll.u32 %v5745_v62, 16 }
 0x2ee   : > { %v3477_v6 = vsel %vm3018_vm15, %v3468_v20, %v3476_v54  ;;  %v3487_v13 = vshrl.u32 %v3013_v63, 16  ;;  %v3485_v3 = vor.u32 %v3484_v47, %v3481_v26  ;;  %v3490_v7 = vshll.u32 %v3013_v63, 16  ;;  %v1198_v5 = vld [vmem:[#allocation2 + $0x218] sm:$0x10]  ;;  %v13577_v47 = vld [vmem:[#allocation2 + $0x200] sm:$0xf0] }
 0x2ef   : > { %12101 = vmatprep.mubr.msk.bf16.mxu0 %vm2208_vm10, %v3477_v6  ;;  %v6192_v37 = vsel %vm3018_vm15, %v6183_v48, %v6191_v40  ;;  %v15008_v44 = vrot.slane %v6211_v56, 4  ;;  %v15010_v10 = vrot.slane %v6214_v22, 5  ;;  %v6204_v14 = vrot.slane %v6202_v31, 4 }
 0x2f0   : > { %12296 = vmatmul.mubr.msk.bf16.gmra.mrb[48].mxu1 %vm2208_vm10, %v6192_v37  ;;  %v6207_v17 = vrot.slane %v6205_v34, 5  ;;  %v3489_v21 = vrot.slane %v3487_v13, 4  ;;  %v1193_v55 = vsel %vm14716_vm14, 0, %v1192_v61  ;;  %v3492_v4 = vrot.slane %v3490_v7, 5 }
 0x2f1   : > { %v3502_v1 = vor.u32 %v15003_v12, %v15001_v16  ;;  %1194 = vst [vmem:[#allocation2 + $0x1f8] sm:$0x10] %v1193_v55  ;;  %v6228_v15 = vshrl.u32 %v13575_v36, 16  ;;  %v6231_v18 = vshll.u32 %v13575_v36, 16  ;;  %v3513_v11 = vshrl.u32 %v13576_v49, 16 }
 0x2f2   : > { %v6208_v41 = vor.u32 %v6207_v17, %v6204_v14  ;;  %v3516_v2 = vshll.u32 %v13576_v49, 16  ;;  %v1196_v20 = vsel %vm14716_vm14, 0, %v1195_v8  ;;  %v3493_v53 = vor.u32 %v3492_v4, %v3489_v21  ;;  %v3014_v43 = vld [vmem:[#allocation2 + $0x1e8] sm:$0x1f] }
 0x2f3   : > { %v5746_v60 = vld [vmem:[#allocation2 + $0x1e8] sm:$0x1f]  ;;  %v6217_v24 = vor.u32 %v15010_v10, %v15008_v44  ;;  %v6230_v28 = vrot.slane %v6228_v15, 4  ;;  %v6233_v25 = vrot.slane %v6231_v18, 5  ;;  %1197 = vst [vmem:[#allocation2 + $0x208] sm:$0x10] %v1196_v20 }
 0x2f4   : > { %v6209_v29 = vsel %vm3018_vm15, %v6200_v42, %v6208_v41  ;;  %v3504_v30 = vshrl.u32 %v3014_v43, 16  ;;  %v3507_v33 = vshll.u32 %v3014_v43, 16  ;;  %v6219_v38 = vshrl.u32 %v5746_v60, 16 }
 0x2f5   : > { %12299 = vmatprep.mubr.msk.bf16.mxu1 %vm2208_vm10, %v6209_v29  ;;  %v3494_v0 = vsel %vm3018_vm15, %v3485_v3, %v3493_v53  ;;  %v6222_v46 = vshll.u32 %v5746_v60, 16  ;;  %v6234_v9 = vor.u32 %v6233_v25, %v6230_v28  ;;  %v3515_v19 = vrot.slane %v3513_v11, 4  ;;  %v13579_v53 = vld [vmem:[#allocation2 + $0x210] sm:$0xf0] }
 0x2f6   : > { %12102 = vmatmul.mubr.msk.bf16.gmra.mrb[116].mxu0 %vm2208_vm10, %v3494_v0  ;;  %v3506_v39 = vrot.slane %v3504_v30, 4  ;;  %v3509_v57 = vrot.slane %v3507_v33, 5  ;;  %v6221_v48 = vrot.slane %v6219_v38, 4  ;;  %v3518_v23 = vrot.slane %v3516_v2, 5 }
 0x2f7   : > { %v6224_v26 = vrot.slane %v6222_v46, 5  ;;  %v3530_v54 = vshrl.u32 %v13577_v47, 16  ;;  %v3533_v50 = vshll.u32 %v13577_v47, 16  ;;  %v6245_v52 = vshrl.u32 %v13578_v51, 16  ;;  %v13580_v46 = vld [vmem:[#allocation2 + $0x210] sm:$0xf0] }
 0x2f8   : > { %v3510_v59 = vor.u32 %v3509_v57, %v3506_v39  ;;  %v5747_v40 = vld [vmem:[#allocation2 + $0x1f8] sm:$0x1f]  ;;  %v3519_v56 = vor.u32 %v3518_v23, %v3515_v19  ;;  %v6248_v22 = vshll.u32 %v13578_v51, 16  ;;  %v1199_v61 = vsel %vm14716_vm14, 0, %v1198_v5 }
 0x2f9   : > { %v3015_v58 = vld [vmem:[#allocation2 + $0x1f8] sm:$0x1f]  ;;  %v6225_v6 = vor.u32 %v6224_v26, %v6221_v48  ;;  %v6236_v62 = vshrl.u32 %v5747_v40, 16  ;;  %v6239_v42 = vshll.u32 %v5747_v40, 16  ;;  %1200 = vst [vmem:[#allocation2 + $0x218] sm:$0x10] %v1199_v61 }
 0x2fa   : > { %v3521_v63 = vshrl.u32 %v3015_v58, 16  ;;  %v3511_v16 = vsel %vm3018_vm15, %v3502_v1, %v3510_v59  ;;  %v3524_v12 = vshll.u32 %v3015_v58, 16  ;;  %v3016_v37 = vld [vmem:[#allocation2 + $0x208] sm:$0x1f]  ;;  %v3532_v31 = vrot.slane %v3530_v54, 4 }
 0x2fb   : > { %v3535_v34 = vrot.slane %v3533_v50, 5  ;;  %12105 = vmatprep.mubr.msk.bf16.mxu0 %vm2208_vm10, %v3511_v16  ;;  %v6226_v13 = vsel %vm3018_vm15, %v6217_v24, %v6225_v6  ;;  %v6238_v3 = vrot.slane %v6236_v62, 4  ;;  %v6241_v7 = vrot.slane %v6239_v42, 5  ;;  %v5748_v10 = vld [vmem:[#allocation2 + $0x208] sm:$0x1f] }
 0x2fc   : > { %v3523_v44 = vrot.slane %v3521_v63, 4  ;;  %12300 = vmatmul.mubr.msk.bf16.gmra.mrb[52].mxu1 %vm2208_vm10, %v6226_v13  ;;  %v3526_v8 = vrot.slane %v3524_v12, 5  ;;  %v3538_v17 = vshrl.u32 %v3016_v37, 16  ;;  %v3541_v21 = vshll.u32 %v3016_v37, 16  ;;  %v1201_v48 = vld [vmem:[#allocation2 + $0x228] sm:$0x10] }
 0x2fd   : > { %v3536_v14 = vor.u32 %v3535_v34, %v3532_v31  ;;  %v6242_v55 = vor.u32 %v6241_v7, %v6238_v3  ;;  %v6247_v4 = vrot.slane %v6245_v52, 4  ;;  %v6250_v1 = vrot.slane %v6248_v22, 5  ;;  %v6748_v40 = vld [vmem:[#allocation2 + $0x20] sm:$0xf8]  ;;  %v6749_v61 = vld [vmem:[#allocation2 + $0x28] sm:$0xf] }
 0x2fe   : > { %v6253_v36 = vshrl.u32 %v5748_v10, 16  ;;  %v3527_v15 = vor.u32 %v3526_v8, %v3523_v44  ;;  %v3540_v18 = vrot.slane %v3538_v17, 4  ;;  %v3543_v41 = vrot.slane %v3541_v21, 5  ;;  %v13581_v63 = vld [vmem:[#allocation2 + $0x220] sm:$0xf0] }
 0x2ff   : > { %v6256_v49 = vshll.u32 %v5748_v10, 16  ;;  %v6243_v11 = vsel %vm3018_vm15, %v6234_v9, %v6242_v55  ;;  %v6251_v2 = vor.u32 %v6250_v1, %v6247_v4  ;;  %v6262_v43 = vshrl.u32 %v13579_v53, 16  ;;  %v6750_v10 = vld [vmem:[#allocation2 + $0x30] sm:$0xf8]  ;;  %v15044_v55 = vld [vmem:[#allocation2 + $0x38] sm:$0xf] }
 0x300   : > { %v6255_v20 = vrot.slane %v6253_v36, 4  ;;  %12303 = vmatprep.mubr.msk.bf16.mxu1 %vm2208_vm10, %v6243_v11  ;;  %v3528_v60 = vsel %vm3018_vm15, %v3519_v56, %v3527_v15  ;;  %v3544_v24 = vor.u32 %v3543_v41, %v3540_v18  ;;  %v5749_v25 = vld [vmem:[#allocation2 + $0x218] sm:$0x1f]  ;;  %v6265_v29 = vshll.u32 %v13579_v53, 16  ;;  %v6752_v1 = vld [vmem:[#allocation2 + $0x40] sm:$0xf8] }
 0x301   : > { %v6258_v28 = vrot.slane %v6256_v49, 5  ;;  %v3017_v30 = vld [vmem:[#allocation2 + $0x218] sm:$0x1f]  ;;  %12106 = vmatmul.mubr.msk.bf16.gmra.mrb[120].mxu0 %vm2208_vm10, %v3528_v60  ;;  %v6264_v33 = vrot.slane %v6262_v43, 4  ;;  %v6270_v38 = vshrl.u32 %v5749_v25, 16  ;;  %v6273_v0 = vshll.u32 %v5749_v25, 16 }
 0x302   : > { %v3547_v9 = vshrl.u32 %v13580_v46, 16  ;;  %v3545_v19 = vsel %vm3018_vm15, %v3536_v14, %v3544_v24  ;;  %v6267_v39 = vrot.slane %v6265_v29, 5  ;;  %v3550_v57 = vshll.u32 %v13580_v46, 16  ;;  %v15046_v41 = vld [vmem:[#allocation2 + $0x48] sm:$0xf] }
 0x303   : > { %v6259_v5 = vor.u32 %v6258_v28, %v6255_v20  ;;  %12109 = vmatprep.mubr.msk.bf16.mxu0 %vm2208_vm10, %v3545_v19  ;;  %v6272_v23 = vrot.slane %v6270_v38, 4  ;;  %v6275_v26 = vrot.slane %v6273_v0, 5  ;;  %v3555_v54 = vshrl.u32 %v3017_v30, 16 }
 0x304   : > { %v3549_v47 = vrot.slane %v3547_v9, 4  ;;  %v6268_v51 = vor.u32 %v6267_v39, %v6264_v33  ;;  %v3552_v52 = vrot.slane %v3550_v57, 5  ;;  %v3558_v59 = vshll.u32 %v3017_v30, 16  ;;  %v6754_v39 = vld [vmem:[#allocation2 + $0x50] sm:$0xf8] }
 0x305   : > { %v6260_v50 = vsel %vm3018_vm15, %v6251_v2, %v6259_v5  ;;  %v6276_v58 = vor.u32 %v6275_v26, %v6272_v23  ;;  %v3557_v56 = vrot.slane %v3555_v54, 4  ;;  %v1202_v22 = vsel %vm14716_vm14, 0, %v1201_v48  ;;  %v6756_v57 = vld [vmem:[#allocation2 + $0x60] sm:$0xf8]  ;;  %v15055_v54 = vld [vmem:[#allocation2 + $0x58] sm:$0xf] }
 0x306   : > { %12304 = vmatmul.mubr.msk.bf16.gmra.mrb[56].mxu1 %vm2208_vm10, %v6260_v50  ;;  %v3553_v6 = vor.u32 %v3552_v52, %v3549_v47  ;;  %v3560_v62 = vrot.slane %v3558_v59, 5  ;;  %1203 = vst [vmem:[#allocation2 + $0x228] sm:$0x10] %v1202_v22  ;;  %v6279_v16 = vshrl.u32 %v13581_v63, 16  ;;  %v6282_v12 = vshll.u32 %v13581_v63, 16 }
 0x307   : > { %v6277_v42 = vsel %vm3018_vm15, %v6268_v51, %v6276_v58  ;;  %v6813_v37 = vshrl.u32 %v6748_v40, 16  ;;  %v6816_v34 = vshll.u32 %v6748_v40, 16  ;;  %v6821_v13 = vshrl.u32 %v6749_v61, 16  ;;  %v15058_v50 = vld [vmem:[#allocation2 + $0x68] sm:$0xf] }
 0x308   : > { %12307 = vmatprep.mubr.msk.bf16.mxu1 %vm2208_vm10, %v6277_v42  ;;  %v3561_v31 = vor.u32 %v3560_v62, %v3557_v56  ;;  %v6824_v3 = vshll.u32 %v6749_v61, 16  ;;  %v6281_v45 = vrot.slane %v6279_v16, 4  ;;  %v6284_v44 = vrot.slane %v6282_v12, 5  ;;  %v6758_v16 = vld [vmem:[#allocation2 + $0x70] sm:$0xf8] }
 0x309   : > { %v6815_v8 = vrot.slane %v6813_v37, 3  ;;  %v6818_v14 = vrot.slane %v6816_v34, 4  ;;  %v6823_v17 = vrot.slane %v6821_v13, 3  ;;  %v6830_v18 = vshrl.u32 %v6750_v10, 16  ;;  %v13582_v37 = vld [vmem:[#allocation6 + $0x1c] sm:$0xf] }
 0x30a   : > { %v3562_v7 = vsel %vm3018_vm15, %v3553_v6, %v3561_v31  ;;  %v6826_v21 = vrot.slane %v6824_v3, 4  ;;  %v6285_v49 = vor.u32 %v6284_v44, %v6281_v45  ;;  %v6833_v11 = vshll.u32 %v6750_v10, 16  ;;  %v15066_v3 = vld [vmem:[#allocation2 + $0x78] sm:$0xf] }
 0x30b   : > { %12110 = vmatmul.mubr.msk.bf16.gmra.mrb[124].mxu0 %vm2208_vm10, %v3562_v7  ;;  %v6838_v2 = vshrl.u32 %v15044_v55, 16  ;;  %v6841_v20 = vshll.u32 %v15044_v55, 16  ;;  %v6819_v60 = vor.u32 %v6818_v14, %v6815_v8  ;;  %v6847_v28 = vshrl.u32 %v6752_v1, 16  ;;  %v15068_v8 = vld [vmem:[#allocation6 + $0x20] sm:$0xf] }
 0x30c   : > { %v6827_v24 = vor.u32 %v6826_v21, %v6823_v17  ;;  %v6850_v25 = vshll.u32 %v6752_v1, 16  ;;  %v6855_v29 = vshrl.u32 %v15046_v41, 16  ;;  %v6858_v30 = vshll.u32 %v15046_v41, 16 }
 0x30d   : > { %v5750_v4 = vld [vmem:[#allocation2 + $0x228] sm:$0x1f]  ;;  %v6832_v38 = vrot.slane %v6830_v18, 3  ;;  %v6835_v0 = vrot.slane %v6833_v11, 4  ;;  %v6840_v46 = vrot.slane %v6838_v2, 3  ;;  %v6843_v9 = vrot.slane %v6841_v20, 4 }
 0x30e   : > { %v6287_v36 = vshrl.u32 %v5750_v4, 16  ;;  %v6290_v15 = vshll.u32 %v5750_v4, 16  ;;  %v6828_v5 = vsel %vm983_vm4, %v6819_v60, %v6827_v24  ;;  %v6849_v48 = vrot.slane %v6847_v28, 3  ;;  %v6760_v4 = vld [vmem:[#allocation2 + $0x80] sm:$0xf8] }
 0x30f   : > { %v6852_v23 = vrot.slane %v6850_v25, 4  ;;  %v6857_v26 = vrot.slane %v6855_v29, 3  ;;  %v6860_v47 = vrot.slane %v6858_v30, 4  ;;  %v6836_v51 = vor.u32 %v6835_v0, %v6832_v38  ;;  %v6762_v38 = vld [vmem:[#allocation2 + $0x90] sm:$0xf8] }
 0x310   : > { %v6289_v53 = vrot.slane %v6287_v36, 4  ;;  %v6292_v43 = vrot.slane %v6290_v15, 5  ;;  %v6844_v52 = vor.u32 %v6843_v9, %v6840_v46  ;;  %v6864_v59 = vshrl.u32 %v6754_v39, 16  ;;  %v15082_v9 = vld [vmem:[#allocation2 + $0x98] sm:$0xf] }
 0x311   : > { %v6867_v40 = vshll.u32 %v6754_v39, 16  ;;  %v6872_v58 = vshrl.u32 %v15055_v54, 16  ;;  %v6875_v56 = vshll.u32 %v15055_v54, 16  ;;  %v6881_v22 = vshrl.u32 %v6756_v57, 16 }
 0x312   : > { %v6293_v33 = vor.u32 %v6292_v43, %v6289_v53  ;;  %v6884_v61 = vshll.u32 %v6756_v57, 16  ;;  %v6853_v6 = vor.u32 %v6852_v23, %v6849_v48  ;;  %v6861_v62 = vor.u32 %v6860_v47, %v6857_v26  ;;  %v15086_v23 = vld [vmem:[#allocation2 + $0xa8] sm:$0xf] }
 0x313   : > { %v6889_v42 = vshrl.u32 %v15058_v50, 16  ;;  %v6892_v63 = vshll.u32 %v15058_v50, 16  ;;  %v6845_v12 = vsel %vm983_vm4, %v6836_v51, %v6844_v52  ;;  %v8097_v31 = vsel %vm2111_vm9, %v13582_v37, 0 }
 0x314   : > { %v6294_v19 = vsel %vm3018_vm15, %v6285_v49, %v6293_v33  ;;  %v6866_v34 = vrot.slane %v6864_v59, 3  ;;  %v6869_v13 = vrot.slane %v6867_v40, 4  ;;  %v6874_v7 = vrot.slane %v6872_v58, 3  ;;  %v15075_v49 = vld [vmem:[#allocation2 + $0x88] sm:$0xf] }
 0x315   : > { %12308 = vmatmul.mubr.msk.bf16.gmra.mrb[60].mxu1 %vm2208_vm10, %v6294_v19  ;;  %v6877_v45 = vrot.slane %v6875_v56, 4  ;;  %v6883_v44 = vrot.slane %v6881_v22, 3  ;;  %v6886_v10 = vrot.slane %v6884_v61, 4  ;;  %v6862_v14 = vsel %vm983_vm4, %v6853_v6, %v6861_v62  ;;  %v6764_v19 = vld [vmem:[#allocation2 + $0xa0] sm:$0xf8] }
 0x316   : > { %12313 = vmatprep.mubr.msk.bf16.mxu1 %vm2208_vm10, %v6828_v5  ;;  %v6891_v17 = vrot.slane %v6889_v42, 3  ;;  %v6894_v21 = vrot.slane %v6892_v63, 4  ;;  %v6898_v1 = vshrl.u32 %v6758_v16, 16  ;;  %v6901_v36 = vshll.u32 %v6758_v16, 16  ;;  %v6766_v42 = vld [vmem:[#allocation2 + $0xb0] sm:$0xf8] }
 0x317   : > { %v6906_v15 = vshrl.u32 %v15066_v3, 16  ;;  %v6909_v18 = vshll.u32 %v15066_v3, 16  ;;  %v6870_v11 = vor.u32 %v6869_v13, %v6866_v34  ;;  %v6878_v2 = vor.u32 %v6877_v45, %v6874_v7  ;;  %v15094_v13 = vld [vmem:[#allocation2 + $0xb8] sm:$0xf] }
 0x318   : > { %v6887_v20 = vor.u32 %v6886_v10, %v6883_v44  ;;  %v6915_v53 = vshrl.u32 %v6760_v4, 16  ;;  %v6895_v43 = vor.u32 %v6894_v21, %v6891_v17  ;;  %v6918_v60 = vshll.u32 %v6760_v4, 16  ;;  %v6768_v17 = vld [vmem:[#allocation2 + $0xc0] sm:$0xf8]  ;;  %v15098_v21 = vld [vmem:[#allocation2 + $0xc8] sm:$0xf] }
 0x319   : > { %v6923_v24 = vshrl.u32 %v15075_v49, 16  ;;  %v6926_v28 = vshll.u32 %v15075_v49, 16  ;;  %v6900_v25 = vrot.slane %v6898_v1, 3  ;;  %v6903_v29 = vrot.slane %v6901_v36, 4 }
 0x31a   : > { %v6908_v30 = vrot.slane %v6906_v15, 3  ;;  %v6911_v33 = vrot.slane %v6909_v18, 4  ;;  %v6879_v0 = vsel %vm983_vm4, %v6870_v11, %v6878_v2  ;;  %v6917_v46 = vrot.slane %v6915_v53, 3  ;;  %v995_v15 = vld [vmem:[#allocation2 + $0x110] sm:$0xf8] }
 0x31b   : > { %v6896_v5 = vsel %vm983_vm4, %v6887_v20, %v6895_v43  ;;  %v6920_v39 = vrot.slane %v6918_v60, 4  ;;  %v6925_v57 = vrot.slane %v6923_v24, 3  ;;  %v6928_v48 = vrot.slane %v6926_v28, 4  ;;  %v998_v2 = vld [vmem:[#allocation2 + $0x118] sm:$0x1f] }
 0x31c   : > { %v6904_v26 = vor.u32 %v6903_v29, %v6900_v25  ;;  %v6912_v47 = vor.u32 %v6911_v33, %v6908_v30  ;;  %v6932_v51 = vshrl.u32 %v6762_v38, 16  ;;  %v6935_v52 = vshll.u32 %v6762_v38, 16 }
 0x31d   : > { %12314 = vmatmul.mubr.msk.bf16.vlgmr.msra.gmra.mrb[0].mxu1 %vm2208_vm10, %v6845_v12  ;;  %v6940_v59 = vshrl.u32 %v15082_v9, 16  ;;  %v6943_v40 = vshll.u32 %v15082_v9, 16  ;;  %v6949_v58 = vshrl.u32 %v6764_v19, 16  ;;  %v6952_v56 = vshll.u32 %v6764_v19, 16 }
 0x31e   : > { %12378 = vmatpush3.bf16.msra.mxu1 %v8097_v31  ;;  %12317 = vmatprep.mubr.msk.bf16.mxu1 %vm2208_vm10, %v6862_v14  ;;  %v6957_v22 = vshrl.u32 %v15086_v23, 16  ;;  %v6960_v61 = vshll.u32 %v15086_v23, 16  ;;  %v6921_v6 = vor.u32 %v6920_v39, %v6917_v46  ;;  %v6929_v62 = vor.u32 %v6928_v48, %v6925_v57  ;;  %v15111_v39 = vld [vmem:[#allocation2 + $0xd8] sm:$0xf]  ;;  %v6772_v57 = vld [vmem:[#allocation2 + $0xe0] sm:$0xf8] }
 0x31f   : > { %13353 = vmatprep.subr.msk.bf16.mxu1 %vm2111_vm9, %v15068_v8  ;;  %v6913_v63 = vsel %vm983_vm4, %v6904_v26, %v6912_v47  ;;  %v6934_v16 = vrot.slane %v6932_v51, 3  ;;  %v6937_v12 = vrot.slane %v6935_v52, 4  ;;  %v6942_v37 = vrot.slane %v6940_v59, 3  ;;  %v15114_v52 = vld [vmem:[#allocation2 + $0xe8] sm:$0xf] }
 0x320   : > { %v6945_v31 = vrot.slane %v6943_v40, 4  ;;  %v6951_v34 = vrot.slane %v6949_v58, 3  ;;  %v6954_v7 = vrot.slane %v6952_v56, 4  ;;  %v6959_v45 = vrot.slane %v6957_v22, 3 }
 0x321   : > { %v6962_v44 = vrot.slane %v6960_v61, 4  ;;  %v6966_v10 = vshrl.u32 %v6766_v42, 16  ;;  %v6930_v14 = vsel %vm983_vm4, %v6921_v6, %v6929_v62  ;;  %v6969_v4 = vshll.u32 %v6766_v42, 16 }
 0x322   : > { %v6974_v1 = vshrl.u32 %v15094_v13, 16  ;;  %v6977_v36 = vshll.u32 %v15094_v13, 16  ;;  %v6938_v18 = vor.u32 %v6937_v12, %v6934_v16  ;;  %v6946_v11 = vor.u32 %v6945_v31, %v6942_v37 }
 0x323   : > { %v6955_v20 = vor.u32 %v6954_v7, %v6951_v34  ;;  %v6963_v53 = vor.u32 %v6962_v44, %v6959_v45  ;;  %v6968_v43 = vrot.slane %v6966_v10, 3  ;;  %v6983_v60 = vshrl.u32 %v6768_v17, 16 }
 0x324   : > { %v6986_v24 = vshll.u32 %v6768_v17, 16  ;;  %v6991_v28 = vshrl.u32 %v15098_v21, 16  ;;  %v6994_v25 = vshll.u32 %v15098_v21, 16  ;;  %v996_v29 = vsel %vm14004_vm5, 0, %v995_v15 }
 0x325   : > { %12318 = vmatmul.mubr.msk.bf16.gmra.mrb[4].mxu1 %vm2208_vm10, %v6879_v0  ;;  %v6971_v30 = vrot.slane %v6969_v4, 4  ;;  %v6976_v33 = vrot.slane %v6974_v1, 3  ;;  %v6979_v38 = vrot.slane %v6977_v36, 4  ;;  %997 = vst [vmem:[#allocation2 + $0x110] sm:$0xf8] %v996_v29  ;;  %v999_v0 = vsel %vm14012_vm6, 0, %v998_v2 }
 0x326   : > { %12321 = vmatprep.mubr.msk.bf16.mxu1 %vm2208_vm10, %v6896_v5  ;;  %1000 = vst [vmem:[#allocation2 + $0x118] sm:$0x1f] %v999_v0  ;;  %v6947_v46 = vsel %vm983_vm4, %v6938_v18, %v6946_v11  ;;  %v6964_v19 = vsel %vm983_vm4, %v6955_v20, %v6963_v53  ;;  %v6770_v5 = vld [vmem:[#allocation2 + $0xd0] sm:$0xf8]  ;;  %v6985_v48 = vrot.slane %v6983_v60, 3  ;;  %v6988_v26 = vrot.slane %v6986_v24, 4 }
 0x327   : > { %v6993_v47 = vrot.slane %v6991_v28, 3  ;;  %v6996_v51 = vrot.slane %v6994_v25, 4  ;;  %v6972_v59 = vor.u32 %v6971_v30, %v6968_v43  ;;  %v6980_v40 = vor.u32 %v6979_v38, %v6976_v33  ;;  %v6774_v18 = vld [vmem:[#allocation2 + $0xf0] sm:$0xf8]  ;;  %v15132_v2 = vld [vmem:[#allocation2 + $0xf8] sm:$0xf] }
 0x328   : > { %v7000_v58 = vshrl.u32 %v6770_v5, 16  ;;  %v7003_v56 = vshll.u32 %v6770_v5, 16  ;;  %v7008_v22 = vshrl.u32 %v15111_v39, 16  ;;  %v7011_v61 = vshll.u32 %v15111_v39, 16  ;;  %v6776_v20 = vld [vmem:[#allocation2 + $0x100] sm:$0xf8] }
 0x329   : > { %v7017_v6 = vshrl.u32 %v6772_v57, 16  ;;  %v7020_v62 = vshll.u32 %v6772_v57, 16  ;;  %v7025_v42 = vshrl.u32 %v15114_v52, 16  ;;  %v6989_v12 = vor.u32 %v6988_v26, %v6985_v48  ;;  %v15135_v53 = vld [vmem:[#allocation2 + $0x108] sm:$0xf] }
 0x32a   : > { %v6997_v37 = vor.u32 %v6996_v51, %v6993_v47  ;;  %v6981_v34 = vsel %vm983_vm4, %v6972_v59, %v6980_v40  ;;  %v7002_v45 = vrot.slane %v7000_v58, 3  ;;  %v7005_v44 = vrot.slane %v7003_v56, 4 }
 0x32b   : > { %v7010_v10 = vrot.slane %v7008_v22, 3  ;;  %v7019_v4 = vrot.slane %v7017_v6, 3  ;;  %v7022_v1 = vrot.slane %v7020_v62, 4  ;;  %v7027_v36 = vrot.slane %v7025_v42, 3 }
 0x32c   : > { %v6998_v11 = vsel %vm983_vm4, %v6989_v12, %v6997_v37  ;;  %v7006_v43 = vor.u32 %v7005_v44, %v7002_v45  ;;  %v7034_v24 = vshrl.u32 %v6774_v18, 16  ;;  %v7037_v28 = vshll.u32 %v6774_v18, 16  ;;  %v6778_v51 = vld [vmem:[#allocation2 + $0x110] sm:$0xf8]  ;;  %v6780_v12 = vld [vmem:[#allocation2 + $0x140] sm:$0xf8] }
 0x32d   : > { %12322 = vmatmul.mubr.msk.bf16.gmra.mrb[8].mxu1 %vm2208_vm10, %v6913_v63  ;;  %v7028_v63 = vshll.u32 %v15114_v52, 16  ;;  %v7023_v25 = vor.u32 %v7022_v1, %v7019_v4  ;;  %v7042_v30 = vshrl.u32 %v15132_v2, 16  ;;  %v7045_v33 = vshll.u32 %v15132_v2, 16  ;;  %v15148_v59 = vld [vmem:[#allocation2 + $0x118] sm:$0xf] }
 0x32e   : > { %12325 = vmatprep.mubr.msk.bf16.mxu1 %vm2208_vm10, %v6930_v14  ;;  %v7013_v14 = vrot.slane %v7011_v61, 4  ;;  %v7051_v0 = vshrl.u32 %v6776_v20, 16  ;;  %v7062_v5 = vshll.u32 %v15135_v53, 16  ;;  %v7036_v47 = vrot.slane %v7034_v24, 3 }
 0x32f   : > { %v7030_v15 = vrot.slane %v7028_v63, 4  ;;  %v7039_v56 = vrot.slane %v7037_v28, 4  ;;  %v7044_v22 = vrot.slane %v7042_v30, 3  ;;  %v7047_v61 = vrot.slane %v7045_v33, 4 }
 0x330   : > { %v7014_v60 = vor.u32 %v7013_v14, %v7010_v10  ;;  %v7053_v6 = vrot.slane %v7051_v0, 3  ;;  %v7064_v63 = vrot.slane %v7062_v5, 4  ;;  %v7068_v37 = vshrl.u32 %v6778_v51, 16  ;;  %v15157_v10 = vld [vmem:[#allocation2 + $0x148] sm:$0xf] }
 0x331   : > { %v7031_v29 = vor.u32 %v7030_v15, %v7027_v36  ;;  %v7076_v45 = vshrl.u32 %v15148_v59, 16  ;;  %v7079_v44 = vshll.u32 %v15148_v59, 16  ;;  %v7040_v14 = vor.u32 %v7039_v56, %v7036_v47  ;;  %v6782_v5 = vld [vmem:[#allocation2 + $0x150] sm:$0xf8]  ;;  %v6784_v56 = vld [vmem:[#allocation2 + $0x160] sm:$0xf8] }
 0x332   : > { %v7015_v26 = vsel %vm983_vm4, %v7006_v43, %v7014_v60  ;;  %v7048_v4 = vor.u32 %v7047_v61, %v7044_v22  ;;  %v7085_v1 = vshrl.u32 %v6780_v12, 16  ;;  %v7088_v36 = vshll.u32 %v6780_v12, 16 }
 0x333   : > { %v7032_v58 = vsel %vm983_vm4, %v7023_v25, %v7031_v29  ;;  %v7096_v43 = vshll.u32 %v15157_v10, 16  ;;  %v7070_v24 = vrot.slane %v7068_v37, 3  ;;  %v7078_v25 = vrot.slane %v7076_v45, 3 }
 0x334   : > { %v7081_v29 = vrot.slane %v7079_v44, 4  ;;  %v7049_v0 = vsel %vm983_vm4, %v7040_v14, %v7048_v4  ;;  %v7122_v44 = vshll.u32 %v6784_v56, 16 }
 0x335   : > { %12326 = vmatmul.mubr.msk.bf16.gmra.mrb[12].mxu1 %vm2208_vm10, %v6947_v46  ;;  %v7054_v46 = vshll.u32 %v6776_v20, 16  ;;  %v7093_v20 = vshrl.u32 %v15157_v10, 16 }
 0x336   : > { %12329 = vmatprep.mubr.msk.bf16.mxu1 %vm2208_vm10, %v6964_v19  ;;  %v7059_v19 = vshrl.u32 %v15135_v53, 16  ;;  %v7082_v61 = vor.u32 %v7081_v29, %v7078_v25  ;;  %v6788_v25 = vld [vmem:[#allocation2 + $0x180] sm:$0xf8] }
 0x337   : > { %v7056_v62 = vrot.slane %v7054_v46, 4  ;;  %v7087_v46 = vrot.slane %v7085_v1, 3 }
 0x338   : > { %v7061_v42 = vrot.slane %v7059_v19, 3  ;;  %v7090_v19 = vrot.slane %v7088_v36, 4 }
 0x339   : > { %v7057_v18 = vor.u32 %v7056_v62, %v7053_v6  ;;  %v15175_v6 = vld [vmem:[#allocation2 + $0x168] sm:$0xf]  ;;  %v7102_v62 = vshrl.u32 %v6782_v5, 16 }
 0x33a   : > { %v7091_v37 = vor.u32 %v7090_v19, %v7087_v46  ;;  %v7127_v14 = vshrl.u32 %v15175_v6, 16  ;;  %v7130_v4 = vshll.u32 %v15175_v6, 16  ;;  %v7124_v46 = vrot.slane %v7122_v44, 4 }
 0x33b   : > { %v7104_v36 = vrot.slane %v7102_v62, 3 }
 0x33c   : > { %v7129_v19 = vrot.slane %v7127_v14, 3 }
 0x33d   : > { %12330 = vmatmul.mubr.msk.bf16.gmra.mrb[16].mxu1 %vm2208_vm10, %v6981_v34  ;;  %v7071_v34 = vshll.u32 %v6778_v51, 16  ;;  %v7095_v51 = vrot.slane %v7093_v20, 3 }
 0x33e   : > { %v15121_v16 = vpop.f32.mrb[64].mxu0  ;;  %12333 = vmatprep.mubr.msk.bf16.mxu1 %vm2208_vm10, %v6998_v11  ;;  %v7065_v11 = vor.u32 %v7064_v63, %v7061_v42  ;;  %v7105_v42 = vshll.u32 %v6782_v5, 16  ;;  %v7132_v5 = vrot.slane %v7130_v4, 4 }
 0x33f   : > { %v15123_v31 = vpop.f32.mrb[65].mxu0  ;;  %v7073_v28 = vrot.slane %v7071_v34, 4  ;;  %v7119_v34 = vshrl.u32 %v6784_v56, 16 }
 0x340   : > { %v15126_v7 = vpop.f32.mrb[66].mxu0  ;;  %v7066_v47 = vsel %vm983_vm4, %v7057_v18, %v7065_v11  ;;  %v7107_v18 = vrot.slane %v7105_v42, 4  ;;  %v7133_v44 = vor.u32 %v7132_v5, %v7129_v19 }
 0x341   : > { %v15128_v17 = vpop.f32.mrb[67].mxu0  ;;  %v7074_v22 = vor.u32 %v7073_v28, %v7070_v24  ;;  %v7121_v24 = vrot.slane %v7119_v34, 3  ;;  %v6786_v28 = vld [vmem:[#allocation2 + $0x170] sm:$0xf8]  ;;  %v7156_v34 = vshll.u32 %v6788_v25, 16 }
 0x342   : > { %v7136_v62 = vshrl.u32 %v6786_v28, 16  ;;  %v7139_v42 = vshll.u32 %v6786_v28, 16  ;;  %v1004_v28 = vld [vmem:[#allocation2 + $0x238] sm:$0x1f] }
 0x343   : > { %v7083_v1 = vsel %vm983_vm4, %v7074_v22, %v7082_v61  ;;  %v7108_v22 = vor.u32 %v7107_v18, %v7104_v36 }
 0x344   : > { %v7138_v18 = vrot.slane %v7136_v62, 3  ;;  %v15215_v62 = vld [vmem:[#allocation2 + $0x1a8] sm:$0xf] }
 0x345   : > { %12334 = vmatmul.mubr.msk.bf16.gmra.mrb[20].mxu1 %vm2208_vm10, %v7015_v26  ;;  %v15170_v26 = vld [vmem:[#allocation2 + $0x158] sm:$0xf] }
 0x346   : > { %v15139_v38 = vpop.f32.mrb[68].mxu0  ;;  %12337 = vmatprep.mubr.msk.bf16.mxu1 %vm2208_vm10, %v7032_v58  ;;  %v7098_v58 = vrot.slane %v7096_v43, 4  ;;  %v7110_v63 = vshrl.u32 %v15170_v26, 16  ;;  %v7113_v12 = vshll.u32 %v15170_v26, 16 }
 0x347   : > { %v15143_v57 = vpop.f32.mrb[69].mxu0 }
 0x348   : > { %16223 = vst [vmem:[#allocation12_spill] sm:$0xff] %v15143_v57  ;;  %v15145_v48 = vpop.f32.mrb[70].mxu0  ;;  %v7099_v45 = vor.u32 %v7098_v58, %v7095_v51  ;;  %v7112_v11 = vrot.slane %v7110_v63, 3  ;;  %v7115_v20 = vrot.slane %v7113_v12, 4  ;;  %v15193_v58 = vld [vmem:[#allocation2 + $0x188] sm:$0xf] }
 0x349   : > { %16224 = vst [vmem:[#allocation13_spill] sm:$0xff] %v15145_v48  ;;  %v15150_v40 = vpop.f32.mrb[71].mxu0  ;;  %v7161_v14 = vshrl.u32 %v15193_v58, 16  ;;  %v7164_v4 = vshll.u32 %v15193_v58, 16  ;;  %v6806_v57 = vld [vmem:[#allocation2 + $0x210] sm:$0xf8] }
 0x34a   : > { %16225 = vst [vmem:[#allocation14_spill] sm:$0xff] %v15150_v40  ;;  %v7116_v61 = vor.u32 %v7115_v20, %v7112_v11  ;;  %v7141_v11 = vrot.slane %v7139_v42, 4  ;;  %v15258_v40 = vld [vmem:[#allocation2 + $0x1f8] sm:$0xf] }
 0x34b   : > { %v7163_v5 = vrot.slane %v7161_v14, 3 }
 0x34c   : > { %v7117_v36 = vsel %vm983_vm4, %v7108_v22, %v7116_v61 }
 0x34d   : > { %12338 = vmatmul.mubr.msk.bf16.gmra.mrb[24].mxu1 %vm2208_vm10, %v7049_v0  ;;  %v7100_v0 = vsel %vm983_vm4, %v7091_v37, %v7099_v45  ;;  %v7153_v37 = vshrl.u32 %v6788_v25, 16  ;;  %v7125_v45 = vor.u32 %v7124_v46, %v7121_v24  ;;  %v7158_v24 = vrot.slane %v7156_v34, 4 }
 0x34e   : > { %v15159_v15 = vpop.f32.mrb[72].mxu0  ;;  %12341 = vmatprep.mubr.msk.bf16.mxu1 %vm2208_vm10, %v7066_v47  ;;  %v15188_v47 = vld [vmem:[#allocation2 + $0x178] sm:$0xf]  ;;  %v1005_v34 = vsel %vm14012_vm6, 0, %v1004_v28  ;;  %v6796_v28 = vld [vmem:[#allocation2 + $0x1c0] sm:$0xf8] }
 0x34f   : > { %16226 = vst [vmem:[#allocation15_spill] sm:$0xff] %v15159_v15  ;;  %v15163_v60 = vpop.f32.mrb[73].mxu0  ;;  %v7144_v63 = vshrl.u32 %v15188_v47, 16  ;;  %v7147_v12 = vshll.u32 %v15188_v47, 16  ;;  %v7155_v25 = vrot.slane %v7153_v37, 3  ;;  %v7134_v19 = vsel %vm983_vm4, %v7125_v45, %v7133_v44 }
 0x350   : > { %16227 = vst [vmem:[#allocation16_spill] sm:$0xff] %v15163_v60  ;;  %v15165_v30 = vpop.f32.mrb[74].mxu0  ;;  %v7142_v45 = vor.u32 %v7141_v11, %v7138_v18  ;;  %1006 = vst [vmem:[#allocation2 + $0x238] sm:$0x1f] %v1005_v34  ;;  %v15228_v18 = vld [vmem:[#allocation2 + $0x1b8] sm:$0xf] }
 0x351   : > { %16228 = vst [vmem:[#allocation17_spill] sm:$0xff] %v15165_v30  ;;  %v15167_v33 = vpop.f32.mrb[75].mxu0  ;;  %v7159_v27 = vor.u32 %v7158_v24, %v7155_v25  ;;  %v15231_v11 = vld [vmem:[#allocation2 + $0x1c8] sm:$0xf] }
 0x352   : > { %16229 = vst [vmem:[#allocation18_spill] sm:$0xff] %v15167_v33  ;;  %v6792_v33 = vld [vmem:[#allocation2 + $0x1a0] sm:$0xf8] }
 0x355   : > { %12342 = vmatmul.mubr.msk.bf16.gmra.mrb[28].mxu1 %vm2208_vm10, %v7083_v1  ;;  %v6790_v1 = vld [vmem:[#allocation2 + $0x190] sm:$0xf8] }
 0x356   : > { %12345 = vmatprep.mubr.msk.bf16.mxu1 %vm2208_vm10, %v7100_v0  ;;  %v15201_v0 = vld [vmem:[#allocation2 + $0x198] sm:$0xf]  ;;  %v7170_v61 = vshrl.u32 %v6790_v1, 16 }
 0x357   : > { %v15182_v43 = vpop.f32.mrb[76].mxu0  ;;  %v7181_v37 = vshll.u32 %v15201_v0, 16 }
 0x358   : > { %16230 = vst [vmem:[#allocation19_spill] sm:$0xff] %v15182_v43  ;;  %v15184_v29 = vpop.f32.mrb[77].mxu0  ;;  %v7166_v43 = vrot.slane %v7164_v4, 4  ;;  %v7190_v4 = vshll.u32 %v6792_v33, 16 }
 0x359   : > { %16231 = vst [vmem:[#allocation20_spill] sm:$0xff] %v15184_v29  ;;  %v15190_v51 = vpop.f32.mrb[78].mxu0  ;;  %v7149_v29 = vrot.slane %v7147_v12, 4  ;;  %v7178_v12 = vshrl.u32 %v15201_v0, 16 }
 0x35a   : > { %16232 = vst [vmem:[#allocation21_spill] sm:$0xff] %v15190_v51  ;;  %v15195_v56 = vpop.f32.mrb[79].mxu0  ;;  %v7146_v51 = vrot.slane %v7144_v63, 3  ;;  %v7173_v63 = vshll.u32 %v6790_v1, 16  ;;  %v7167_v14 = vor.u32 %v7166_v43, %v7163_v5  ;;  %v7204_v5 = vshrl.u32 %v6794_v32, 16 }
 0x35b   : > { %16233 = vst [vmem:[#allocation22_spill] sm:$0xff] %v15195_v56  ;;  %v1001_v56 = vld [vmem:[#allocation2 + $0x230] sm:$0xf8] }
 0x35c   : > { %v1002_v22 = vsel %vm14004_vm5, 0, %v1001_v56  ;;  %v7150_v44 = vor.u32 %v7149_v29, %v7146_v51  ;;  %v7187_v56 = vshrl.u32 %v6792_v33, 16  ;;  %v7175_v1 = vrot.slane %v7173_v63, 4 }
 0x35d   : > { %12346 = vmatmul.mubr.msk.bf16.gmra.mrb[32].mxu1 %vm2208_vm10, %v7117_v36  ;;  %1003 = vst [vmem:[#allocation2 + $0x230] sm:$0xf8] %v1002_v22  ;;  %v7195_v36 = vshrl.u32 %v15215_v62, 16  ;;  %v7172_v22 = vrot.slane %v7170_v61, 3  ;;  %v7168_v29 = vsel %vm983_vm4, %v7159_v27, %v7167_v14  ;;  %v7192_v51 = vrot.slane %v7190_v4, 4 }
 0x35e   : > { %12349 = vmatprep.mubr.msk.bf16.mxu1 %vm2208_vm10, %v7134_v19  ;;  %v7198_v19 = vshll.u32 %v15215_v62, 16  ;;  %v7207_v61 = vshll.u32 %v6794_v32, 16  ;;  %v7212_v63 = vshrl.u32 %v15228_v18, 16  ;;  %v7232_v27 = vshll.u32 %v15231_v11, 16  ;;  %v6798_v14 = vld [vmem:[#allocation2 + $0x1d0] sm:$0xf8] }
 0x35f   : > { %v15204_v20 = vpop.f32.mrb[80].mxu0  ;;  %v7197_v43 = vrot.slane %v7195_v36, 3  ;;  %v7176_v25 = vor.u32 %v7175_v1, %v7172_v22 }
 0x360   : > { %16234 = vst [vmem:[#allocation23_spill] sm:$0xff] %v15204_v20  ;;  %v15206_v46 = vpop.f32.mrb[81].mxu0  ;;  %v7189_v20 = vrot.slane %v7187_v56, 3  ;;  %v7200_v33 = vrot.slane %v7198_v19, 4  ;;  %v7209_v36 = vrot.slane %v7207_v61, 4  ;;  %v7214_v1 = vrot.slane %v7212_v63, 3 }
 0x361   : > { %16235 = vst [vmem:[#allocation24_spill] sm:$0xff] %v15206_v46  ;;  %v15210_v30 = vpop.f32.mrb[82].mxu0  ;;  %v7151_v46 = vsel %vm983_vm4, %v7142_v45, %v7150_v44  ;;  %v7229_v44 = vshrl.u32 %v15231_v11, 16  ;;  %v15242_v19 = vld [vmem:[#allocation2 + $0x1d8] sm:$0xf] }
 0x362   : > { %16236 = vst [vmem:[#allocation25_spill] sm:$0xff] %v15210_v30  ;;  %v15217_v42 = vpop.f32.mrb[83].mxu0  ;;  %v7183_v30 = vrot.slane %v7181_v37, 4  ;;  %v7224_v37 = vshll.u32 %v6796_v28, 16  ;;  %v7193_v34 = vor.u32 %v7192_v51, %v7189_v20  ;;  %v7201_v45 = vor.u32 %v7200_v33, %v7197_v43 }
 0x363   : > { %16237 = vst [vmem:[#allocation26_spill] sm:$0xff] %v15217_v42  ;;  %v7180_v42 = vrot.slane %v7178_v12, 3  ;;  %v7215_v12 = vshll.u32 %v15228_v18, 16  ;;  %v7231_v43 = vrot.slane %v7229_v44, 3  ;;  %v7234_v33 = vrot.slane %v7232_v27, 4 }
 0x364   : > { %v7202_v51 = vsel %vm983_vm4, %v7193_v34, %v7201_v45  ;;  %v7246_v61 = vshrl.u32 %v15242_v19, 16  ;;  %v7249_v63 = vshll.u32 %v15242_v19, 16 }
 0x365   : > { %12350 = vmatmul.mubr.msk.bf16.gmra.mrb[36].mxu1 %vm2208_vm10, %v7151_v46  ;;  %v7184_v24 = vor.u32 %v7183_v30, %v7180_v42  ;;  %v7221_v46 = vshrl.u32 %v6796_v28, 16  ;;  %v7206_v42 = vrot.slane %v7204_v5, 3  ;;  %v7217_v20 = vrot.slane %v7215_v12, 4  ;;  %v15251_v5 = vld [vmem:[#allocation2 + $0x1e8] sm:$0xf] }
 0x366   : > { %12353 = vmatprep.mubr.msk.bf16.mxu1 %vm2208_vm10, %v7168_v29  ;;  %v7226_v28 = vrot.slane %v7224_v37, 4  ;;  %v7263_v34 = vshrl.u32 %v15251_v5, 16  ;;  %v7266_v45 = vshll.u32 %v15251_v5, 16 }
 0x367   : > { %v7185_v30 = vsel %vm983_vm4, %v7176_v25, %v7184_v24  ;;  %v7223_v32 = vrot.slane %v7221_v46, 3  ;;  %v7238_v25 = vshrl.u32 %v6798_v14, 16  ;;  %v7241_v24 = vshll.u32 %v6798_v14, 16 }
 0x368   : > { %v7210_v12 = vor.u32 %v7209_v36, %v7206_v42  ;;  %v7218_v46 = vor.u32 %v7217_v20, %v7214_v1  ;;  %v7251_v14 = vrot.slane %v7249_v63, 4  ;;  %v6804_v42 = vld [vmem:[#allocation2 + $0x200] sm:$0xf8]  ;;  %v7265_v1 = vrot.slane %v7263_v34, 3 }
 0x369   : > { %v7227_v37 = vor.u32 %v7226_v28, %v7223_v32  ;;  %v7240_v44 = vrot.slane %v7238_v25, 3  ;;  %v7243_v27 = vrot.slane %v7241_v24, 4  ;;  %v7268_v20 = vrot.slane %v7266_v45, 4  ;;  %v15262_v32 = vld [vmem:[#allocation2 + $0x208] sm:$0xf] }
 0x36a   : > { %v7219_v60 = vsel %vm983_vm4, %v7210_v12, %v7218_v46  ;;  %v7283_v24 = vshll.u32 %v15258_v40, 16  ;;  %v7292_v63 = vshll.u32 %v6804_v42, 16  ;;  %v7300_v12 = vshll.u32 %v15262_v32, 16 }
 0x36b   : > { %v7244_v28 = vor.u32 %v7243_v27, %v7240_v44 }
 0x36c   : > { %v15237_v56 = vpop.f32.mrb[84].mxu0  ;;  %v7302_v48 = vrot.slane %v7300_v12, 4 }
 0x36d   : > { %16238 = vst [vmem:[#allocation27_spill] sm:$0xff] %v15237_v56  ;;  %v15239_v4 = vpop.f32.mrb[85].mxu0  ;;  %12354 = vmatmul.mubr.msk.bf16.gmra.mrb[40].mxu1 %vm2208_vm10, %v7185_v30  ;;  %v7235_v30 = vor.u32 %v7234_v33, %v7231_v43  ;;  %v6802_v56 = vld [vmem:[#allocation2 + $0x1f0] sm:$0xf8] }
 0x36e   : > { %16239 = vst [vmem:[#allocation28_spill] sm:$0xff] %v15239_v4  ;;  %v15244_v22 = vpop.f32.mrb[86].mxu0  ;;  %v6800_v4 = vld [vmem:[#allocation2 + $0x1e0] sm:$0xf8]  ;;  %12357 = vmatprep.mubr.msk.bf16.mxu1 %vm2208_vm10, %v7202_v51  ;;  %v7248_v51 = vrot.slane %v7246_v61, 3  ;;  %v7272_v43 = vshrl.u32 %v6802_v56, 16 }
 0x36f   : > { %16240 = vst [vmem:[#allocation29_spill] sm:$0xff] %v15244_v22  ;;  %v15246_v29 = vpop.f32.mrb[87].mxu0  ;;  %v7258_v22 = vshll.u32 %v6800_v4, 16  ;;  %v7236_v36 = vsel %vm983_vm4, %v7227_v37, %v7235_v30  ;;  %v7275_v25 = vshll.u32 %v6802_v56, 16  ;;  %v7269_v30 = vor.u32 %v7268_v20, %v7265_v1  ;;  %v6808_v1 = vld [vmem:[#allocation2 + $0x220] sm:$0xf8] }
 0x370   : > { %16241 = vst [vmem:[#allocation30_spill] sm:$0xff] %v15246_v29  ;;  %v7255_v29 = vshrl.u32 %v6800_v4, 16  ;;  %v7252_v33 = vor.u32 %v7251_v14, %v7248_v51  ;;  %v7274_v45 = vrot.slane %v7272_v43, 3  ;;  %v7285_v14 = vrot.slane %v7283_v24, 4  ;;  %v15283_v20 = vld [vmem:[#allocation2 + $0x228] sm:$0xf] }
 0x371   : > { %v7260_v4 = vrot.slane %v7258_v22, 4  ;;  %v7297_v22 = vshrl.u32 %v15262_v32, 16  ;;  %v7277_v27 = vrot.slane %v7275_v25, 4  ;;  %v7309_v25 = vshll.u32 %v6806_v57, 16 }
 0x372   : > { %v7257_v15 = vrot.slane %v7255_v29, 3  ;;  %v7280_v29 = vshrl.u32 %v15258_v40, 16  ;;  %v7253_v44 = vsel %vm983_vm4, %v7244_v28, %v7252_v33  ;;  %v7306_v33 = vshrl.u32 %v6806_v57, 16 }
 0x373   : > { %v7278_v28 = vor.u32 %v7277_v27, %v7274_v45 }
 0x374   : > { %v7261_v37 = vor.u32 %v7260_v4, %v7257_v15  ;;  %v7282_v51 = vrot.slane %v7280_v29, 3  ;;  %v15280_v4 = vld [vmem:[#allocation2 + $0x218] sm:$0xf] }
 0x375   : > { %12358 = vmatmul.mubr.msk.bf16.gmra.mrb[44].mxu1 %vm2208_vm10, %v7219_v60  ;;  %v7289_v60 = vshrl.u32 %v6804_v42, 16  ;;  %v7294_v42 = vrot.slane %v7292_v63, 4  ;;  %v7314_v63 = vshrl.u32 %v15280_v4, 16 }
 0x376   : > { %12361 = vmatprep.mubr.msk.bf16.mxu1 %vm2208_vm10, %v7236_v36  ;;  %v7270_v15 = vsel %vm983_vm4, %v7261_v37, %v7269_v30  ;;  %v7286_v43 = vor.u32 %v7285_v14, %v7282_v51  ;;  %v7323_v37 = vshrl.u32 %v6808_v1, 16  ;;  %v7326_v30 = vshll.u32 %v6808_v1, 16 }
 0x377   : > { %v7291_v36 = vrot.slane %v7289_v60, 3  ;;  %v7308_v51 = vrot.slane %v7306_v33, 3 }
 0x378   : > { %v7287_v57 = vsel %vm983_vm4, %v7278_v28, %v7286_v43  ;;  %v7325_v1 = vrot.slane %v7323_v37, 3 }
 0x379   : > { %v7295_v24 = vor.u32 %v7294_v42, %v7291_v36  ;;  %v7311_v36 = vrot.slane %v7309_v25, 4  ;;  %v7316_v42 = vrot.slane %v7314_v63, 3 }
 0x37a   : > { %v15267_v61 = vpop.f32.mrb[88].mxu0 }
 0x37b   : > { %16242 = vst [vmem:[#allocation31_spill] sm:$0xff] %v15267_v61  ;;  %v15271_v46 = vpop.f32.mrb[89].mxu0  ;;  %v7299_v61 = vrot.slane %v7297_v22, 3  ;;  %v7317_v22 = vshll.u32 %v15280_v4, 16  ;;  %v7312_v33 = vor.u32 %v7311_v36, %v7308_v51  ;;  %v15323_v36 = vld [vmem:[#allocation2 + $0x30] sm:$0xf0] }
 0x37c   : > { %16243 = vst [vmem:[#allocation32_spill] sm:$0xff] %v15271_v46  ;;  %v15273_v34 = vpop.f32.mrb[90].mxu0 }
 0x37d   : > { %16244 = vst [vmem:[#allocation33_spill] sm:$0xff] %v15273_v34  ;;  %v15275_v56 = vpop.f32.mrb[91].mxu0  ;;  %12362 = vmatmul.mubr.msk.bf16.gmra.mrb[48].mxu1 %vm2208_vm10, %v7253_v44  ;;  %v7303_v60 = vor.u32 %v7302_v48, %v7299_v61  ;;  %v7331_v44 = vshrl.u32 %v15283_v20, 16  ;;  %v6810_v48 = vld [vmem:[#allocation2 + $0x230] sm:$0xf8] }
 0x37e   : > { %16245 = vst [vmem:[#allocation34_spill] sm:$0xff] %v15275_v56  ;;  %12365 = vmatprep.mubr.msk.bf16.mxu1 %vm2208_vm10, %v7270_v15  ;;  %v7334_v15 = vshll.u32 %v15283_v20, 16  ;;  %v15298_v61 = vld [vmem:[#allocation2 + $0x238] sm:$0xf] }
 0x37f   : > { %v7304_v14 = vsel %vm983_vm4, %v7295_v24, %v7303_v60  ;;  %v7333_v56 = vrot.slane %v7331_v44, 3  ;;  %v7348_v28 = vshrl.u32 %v15298_v61, 16  ;;  %v7351_v43 = vshll.u32 %v15298_v61, 16 }
 0x380   : > { %v7336_v34 = vrot.slane %v7334_v15, 4 }
 0x382   : > { %v15285_v29 = vpop.f32.mrb[92].mxu0  ;;  %v7337_v25 = vor.u32 %v7336_v34, %v7333_v56 }
 0x383   : > { %16246 = vst [vmem:[#allocation35_spill] sm:$0xff] %v15285_v29  ;;  %v15289_v12 = vpop.f32.mrb[93].mxu0  ;;  %v7328_v29 = vrot.slane %v7326_v30, 4 }
 0x384   : > { %16247 = vst [vmem:[#allocation36_spill] sm:$0xff] %v15289_v12  ;;  %v15293_v45 = vpop.f32.mrb[94].mxu0  ;;  %v7319_v12 = vrot.slane %v7317_v22, 4  ;;  %v7350_v22 = vrot.slane %v7348_v28, 3  ;;  %v7908_v28 = vrot.slane %v15044_v55, 4 }
 0x385   : > { %16248 = vst [vmem:[#allocation37_spill] sm:$0xff] %v15293_v45  ;;  %v15295_v27 = vpop.f32.mrb[95].mxu0  ;;  %12366 = vmatmul.mubr.msk.bf16.gmra.mrb[52].mxu1 %vm2208_vm10, %v7287_v57  ;;  %v7343_v45 = vshll.u32 %v6810_v48, 16  ;;  %v7329_v24 = vor.u32 %v7328_v29, %v7325_v1  ;;  %v7353_v57 = vrot.slane %v7351_v43, 4  ;;  %v15313_v29 = vld [vmem:[#allocation2 + $0x20] sm:$0xf0] }
 0x386   : > { %16249 = vst [vmem:[#allocation38_spill] sm:$0xff] %v15295_v27  ;;  %12369 = vmatprep.mubr.msk.bf16.mxu1 %vm2208_vm10, %v7304_v14  ;;  %v7340_v27 = vshrl.u32 %v6810_v48, 16  ;;  %v7320_v46 = vor.u32 %v7319_v12, %v7316_v42  ;;  %v15326_v42 = vld [vmem:[#allocation2 + $0x40] sm:$0xf0]  ;;  %v7907_v1 = vrot.slane %v15323_v36, 4 }
 0x387   : > { %v7345_v63 = vrot.slane %v7343_v45, 4  ;;  %v7338_v44 = vsel %vm983_vm4, %v7329_v24, %v7337_v25  ;;  %v7354_v12 = vor.u32 %v7353_v57, %v7350_v22  ;;  %v13583_v45 = vld [vmem:[#allocation2 + $0x28] sm:$0xf]  ;;  %v7910_v43 = vrot.slane %v15326_v42, 4 }
 0x388   : > { %v7342_v60 = vrot.slane %v7340_v27, 3  ;;  %v7321_v37 = vsel %vm983_vm4, %v7312_v33, %v7320_v46  ;;  %v7904_v46 = vrot.slane %v15313_v29, 4  ;;  %v7905_v27 = vrot.slane %v13583_v45, 4 }
 0x389   : > { %v7911_v33 = vrot.slane %v15046_v41, 4  ;;  %v7909_v22 = vsel %vm2111_vm9, %v7907_v1, %v7908_v28  ;;  %v15348_v41 = vld [vmem:[#allocation2 + $0x60] sm:$0xf0]  ;;  %v7920_v28 = vrot.slane %v15066_v3, 4 }
 0x38a   : > { %v7346_v51 = vor.u32 %v7345_v63, %v7342_v60  ;;  %v7906_v14 = vsel %vm2111_vm9, %v7904_v46, %v7905_v27  ;;  %v9125_v60 = vsel %vm2111_vm9, %v15068_v8, 0  ;;  %v7914_v8 = vrot.slane %v15055_v54, 4  ;;  %v15357_v27 = vld [vmem:[#allocation2 + $0x70] sm:$0xf0] }
 0x38b   : > { %v7912_v55 = vsel %vm2111_vm9, %v7910_v43, %v7911_v33 }
 0x38c   : > { %v7355_v48 = vsel %vm983_vm4, %v7346_v51, %v7354_v12  ;;  %v7916_v51 = vrot.slane %v15348_v41, 4  ;;  %v7917_v12 = vrot.slane %v15058_v50, 4  ;;  %v7919_v50 = vrot.slane %v15357_v27, 4 }
 0x38d   : > { %12370 = vmatmul.mubr.msk.bf16.gmra.mrb[56].mxu1 %vm2208_vm10, %v7321_v37  ;;  %v15345_v37 = vld [vmem:[#allocation2 + $0x50] sm:$0xf0] }
 0x38e   : > { %v15306_v30 = vpop.f32.mrb[96].mxu0  ;;  %12373 = vmatprep.mubr.msk.bf16.mxu1 %vm2208_vm10, %v7338_v44  ;;  %v7913_v44 = vrot.slane %v15345_v37, 4  ;;  %v7918_v45 = vsel %vm2111_vm9, %v7916_v51, %v7917_v12  ;;  %v7926_v51 = vrot.slane %v15082_v9, 4  ;;  %v15400_v9 = vld [vmem:[#allocation2 + $0xc0] sm:$0xf0] }
 0x38f   : > { %v15310_v15 = vpop.f32.mrb[97].mxu0 }
 0x390   : > { %v15315_v34 = vpop.f32.mrb[98].mxu0  ;;  %v7915_v46 = vsel %vm2111_vm9, %v7913_v44, %v7914_v8  ;;  %v15377_v44 = vld [vmem:[#allocation2 + $0x90] sm:$0xf0]  ;;  %v15380_v8 = vld [vmem:[#allocation2 + $0xa0] sm:$0xf0] }
 0x391   : > { %16250 = vst [vmem:[#allocation39_spill] sm:$0xff] %v15315_v34  ;;  %v15317_v56 = vpop.f32.mrb[99].mxu0  ;;  %v7925_v3 = vrot.slane %v15377_v44, 4  ;;  %v8455_v34 = vld [vmem:[#allocation2 + $0x58] sm:$0x1f] }
 0x392   : > { %16251 = vst [vmem:[#allocation40_spill] sm:$0xff] %v15317_v56 }
 0x395   : > { %12374 = vmatmul.mubr.msk.bf16.gmra.mrb[60].mxu1 %vm2208_vm10, %v7355_v48 }
 0x396   : > { %12379 = vmatprep.mubr.msk.bf16.mxu1 %vm2208_vm10, %v7906_v14  ;;  %v15362_v14 = vld [vmem:[#allocation2 + $0x80] sm:$0xf0] }
 0x397   : > { %v7922_v33 = vrot.slane %v15362_v14, 4 }
 0x39a   : > { %v15332_v24 = vpop.f32.mrb[100].mxu0 }
 0x39b   : > { %16252 = vst [vmem:[#allocation41_spill] sm:$0xff] %v15332_v24  ;;  %v15334_v25 = vpop.f32.mrb[101].mxu0 }
 0x39c   : > { %16253 = vst [vmem:[#allocation42_spill] sm:$0xff] %v15334_v25  ;;  %v15338_v63 = vpop.f32.mrb[102].mxu0 }
 0x39d   : > { %16254 = vst [vmem:[#allocation43_spill] sm:$0xff] %v15338_v63  ;;  %v15341_v57 = vpop.f32.mrb[103].mxu0  ;;  %12380 = vmatmul.mubr.msk.bf16.vlgmr.msra.gmra.mrb[0].mxu1 %vm2208_vm10, %v7909_v22  ;;  %v7921_v22 = vsel %vm2111_vm9, %v7919_v50, %v7920_v28 }
 0x39e   : > { %16255 = vst [vmem:[#allocation44_spill] sm:$0xff] %v15341_v57  ;;  %12444 = vmatpush3.bf16.msra.mxu1 %v9125_v60  ;;  %12383 = vmatprep.mubr.msk.bf16.mxu1 %vm2208_vm10, %v7912_v55  ;;  %v7923_v60 = vrot.slane %v15075_v49, 4  ;;  %v7928_v49 = vrot.slane %v15380_v8, 4  ;;  %v8502_v57 = vshrl.u32 %v15323_v36, 16 }
 0x3a0   : > { %v7924_v55 = vsel %vm2111_vm9, %v7922_v33, %v7923_v60  ;;  %v7927_v33 = vsel %vm2111_vm9, %v7925_v3, %v7926_v51 }
 0x3a5   : > { %12384 = vmatmul.mubr.msk.bf16.gmra.mrb[4].mxu1 %vm2208_vm10, %v7915_v46  ;;  %v7929_v46 = vrot.slane %v15086_v23, 4 }
 0x3a6   : > { %v15359_v48 = vpop.f32.mrb[104].mxu0  ;;  %12387 = vmatprep.mubr.msk.bf16.mxu1 %vm2208_vm10, %v7918_v45 }
 0x3a7   : > { %16256 = vst [vmem:[#allocation45_spill] sm:$0xff] %v15359_v48  ;;  %v15364_v1 = vpop.f32.mrb[105].mxu0  ;;  %v7930_v60 = vsel %vm2111_vm9, %v7928_v49, %v7929_v46  ;;  %v15409_v49 = vld [vmem:[#allocation2 + $0xd0] sm:$0xf0] }
 0x3a8   : > { %16257 = vst [vmem:[#allocation46_spill] sm:$0xff] %v15364_v1  ;;  %v15366_v54 = vpop.f32.mrb[106].mxu0 }
 0x3a9   : > { %16258 = vst [vmem:[#allocation47_spill] sm:$0xff] %v15366_v54  ;;  %v15370_v43 = vpop.f32.mrb[107].mxu0  ;;  %v8453_v54 = vld [vmem:[#allocation2 + $0x38] sm:$0x1f] }
 0x3aa   : > { %16259 = vst [vmem:[#allocation48_spill] sm:$0xff] %v15370_v43 }
 0x3ad   : > { %12388 = vmatmul.mubr.msk.bf16.gmra.mrb[8].mxu1 %vm2208_vm10, %v7921_v22  ;;  %v15397_v22 = vld [vmem:[#allocation2 + $0xb0] sm:$0xf0] }
 0x3ae   : > { %12391 = vmatprep.mubr.msk.bf16.mxu1 %vm2208_vm10, %v7924_v55  ;;  %v7931_v23 = vrot.slane %v15397_v22, 4  ;;  %v7932_v55 = vrot.slane %v15094_v13, 4 }
 0x3b0   : > { %v7933_v3 = vsel %vm2111_vm9, %v7931_v23, %v7932_v55  ;;  %v7938_v23 = vrot.slane %v15111_v39, 4 }
 0x3b1   : > { %v15384_v12 = vpop.f32.mrb[108].mxu0 }
 0x3b2   : > { %16260 = vst [vmem:[#allocation49_spill] sm:$0xff] %v15384_v12  ;;  %v15388_v45 = vpop.f32.mrb[109].mxu0 }
 0x3b3   : > { %16261 = vst [vmem:[#allocation50_spill] sm:$0xff] %v15388_v45  ;;  %v15390_v50 = vpop.f32.mrb[110].mxu0 }
 0x3b4   : > { %16262 = vst [vmem:[#allocation51_spill] sm:$0xff] %v15390_v50  ;;  %v15392_v28 = vpop.f32.mrb[111].mxu0  ;;  %v7934_v50 = vrot.slane %v15400_v9, 4 }
 0x3b5   : > { %16263 = vst [vmem:[#allocation52_spill] sm:$0xff] %v15392_v28  ;;  %12392 = vmatmul.mubr.msk.bf16.gmra.mrb[12].mxu1 %vm2208_vm10, %v7927_v33  ;;  %v7935_v28 = vrot.slane %v15098_v21, 4  ;;  %v15414_v33 = vld [vmem:[#allocation2 + $0xe0] sm:$0xf0]  ;;  %v7937_v21 = vrot.slane %v15409_v49, 4 }
 0x3b6   : > { %12395 = vmatprep.mubr.msk.bf16.mxu1 %vm2208_vm10, %v7930_v60 }
 0x3b7   : > { %v7936_v51 = vsel %vm2111_vm9, %v7934_v50, %v7935_v28  ;;  %v7940_v50 = vrot.slane %v15414_v33, 4  ;;  %v7941_v28 = vrot.slane %v15114_v52, 4  ;;  %v7947_v52 = vrot.slane %v15135_v53, 4 }
 0x3bd   : > { %12396 = vmatmul.mubr.msk.bf16.gmra.mrb[16].mxu1 %vm2208_vm10, %v7933_v3  ;;  %v15411_v46 = vpop.f32.mrb[112].mxu0  ;;  %v7939_v3 = vsel %vm2111_vm9, %v7937_v21, %v7938_v23 }
 0x3be   : > { %16264 = vst [vmem:[#allocation53_spill] sm:$0xff] %v15411_v46  ;;  %12399 = vmatprep.mubr.msk.bf16.mxu1 %vm2208_vm10, %v7936_v51  ;;  %v15416_v60 = vpop.f32.mrb[113].mxu0  ;;  %v7942_v51 = vsel %vm2111_vm9, %v7940_v50, %v7941_v28  ;;  %v15429_v46 = vld [vmem:[#allocation2 + $0xf0] sm:$0xf0] }
 0x3bf   : > { %16265 = vst [vmem:[#allocation54_spill] sm:$0xff] %v15416_v60  ;;  %v15418_v13 = vpop.f32.mrb[114].mxu0  ;;  %v7943_v39 = vrot.slane %v15429_v46, 4  ;;  %v15444_v50 = vld [vmem:[#allocation2 + $0x110] sm:$0xf0] }
 0x3c0   : > { %16266 = vst [vmem:[#allocation55_spill] sm:$0xff] %v15418_v13  ;;  %v15422_v55 = vpop.f32.mrb[115].mxu0  ;;  %v15432_v13 = vld [vmem:[#allocation2 + $0x100] sm:$0xf0]  ;;  %v7949_v53 = vrot.slane %v15444_v50, 4 }
 0x3c1   : > { %16267 = vst [vmem:[#allocation56_spill] sm:$0xff] %v15422_v55  ;;  %v7944_v55 = vrot.slane %v15132_v2, 4  ;;  %v7946_v60 = vrot.slane %v15432_v13, 4 }
 0x3c3   : > { %v7945_v28 = vsel %vm2111_vm9, %v7943_v39, %v7944_v55  ;;  %v7948_v2 = vsel %vm2111_vm9, %v7946_v60, %v7947_v52 }
 0x3c5   : > { %12400 = vmatmul.mubr.msk.bf16.gmra.mrb[20].mxu1 %vm2208_vm10, %v7939_v3 }
 0x3c6   : > { %12403 = vmatprep.mubr.msk.bf16.mxu1 %vm2208_vm10, %v7942_v51  ;;  %v7950_v51 = vrot.slane %v15148_v59, 4 }
 0x3c8   : > { %v7951_v55 = vsel %vm2111_vm9, %v7949_v53, %v7950_v51  ;;  %v7956_v53 = vrot.slane %v15170_v26, 4 }
 0x3c9   : > { %v15438_v45 = vpop.f32.mrb[116].mxu0 }
 0x3ca   : > { %16268 = vst [vmem:[#allocation57_spill] sm:$0xff] %v15438_v45  ;;  %v15440_v21 = vpop.f32.mrb[117].mxu0  ;;  %v15454_v45 = vld [vmem:[#allocation2 + $0x140] sm:$0xf0] }
 0x3cb   : > { %16269 = vst [vmem:[#allocation58_spill] sm:$0xff] %v15440_v21  ;;  %v15442_v23 = vpop.f32.mrb[118].mxu0  ;;  %v7953_v21 = vrot.slane %v15157_v10, 4 }
 0x3cc   : > { %16270 = vst [vmem:[#allocation59_spill] sm:$0xff] %v15442_v23  ;;  %v15447_v3 = vpop.f32.mrb[119].mxu0  ;;  %v7952_v23 = vrot.slane %v15454_v45, 4 }
 0x3cd   : > { %16271 = vst [vmem:[#allocation60_spill] sm:$0xff] %v15447_v3  ;;  %12404 = vmatmul.mubr.msk.bf16.gmra.mrb[24].mxu1 %vm2208_vm10, %v7945_v28  ;;  %v15465_v28 = vld [vmem:[#allocation2 + $0x150] sm:$0xf0] }
 0x3ce   : > { %12407 = vmatprep.mubr.msk.bf16.mxu1 %vm2208_vm10, %v7948_v2  ;;  %v7954_v60 = vsel %vm2111_vm9, %v7952_v23, %v7953_v21  ;;  %v15470_v2 = vld [vmem:[#allocation2 + $0x160] sm:$0xf0]  ;;  %v7955_v10 = vrot.slane %v15465_v28, 4  ;;  %v7959_v21 = vrot.slane %v15175_v6, 4 }
 0x3cf   : > { %v7958_v51 = vrot.slane %v15470_v2, 4 }
 0x3d0   : > { %v7957_v23 = vsel %vm2111_vm9, %v7955_v10, %v7956_v53  ;;  %v7962_v10 = vrot.slane %v15188_v47, 4 }
 0x3d4   : > { %v15459_v39 = vpop.f32.mrb[120].mxu0 }
 0x3d5   : > { %16272 = vst [vmem:[#allocation61_spill] sm:$0xff] %v15459_v39  ;;  %12408 = vmatmul.mubr.msk.bf16.gmra.mrb[28].mxu1 %vm2208_vm10, %v7951_v55  ;;  %v15463_v52 = vpop.f32.mrb[121].mxu0  ;;  %v7960_v55 = vsel %vm2111_vm9, %v7958_v51, %v7959_v21  ;;  %v7965_v21 = vrot.slane %v15193_v58, 4  ;;  %v7971_v58 = vrot.slane %v15215_v62, 4  ;;  %v7977_v62 = vrot.slane %v15231_v11, 4 }
 0x3d6   : > { %16273 = vst [vmem:[#allocation62_spill] sm:$0xff] %v15463_v52  ;;  %12411 = vmatprep.mubr.msk.bf16.mxu1 %vm2208_vm10, %v7954_v60  ;;  %v15468_v59 = vpop.f32.mrb[122].mxu0  ;;  %v15481_v60 = vld [vmem:[#allocation2 + $0x170] sm:$0xf0]  ;;  %v7986_v39 = vrot.slane %v15258_v40, 4  ;;  %v7992_v40 = vrot.slane %v15280_v4, 4 }
 0x3d7   : > { %16274 = vst [vmem:[#allocation63_spill] sm:$0xff] %v15468_v59  ;;  %v15472_v3 = vpop.f32.mrb[123].mxu0  ;;  %v7961_v6 = vrot.slane %v15481_v60, 4 }
 0x3d8   : > { %16275 = vst [vmem:[#allocation64_spill] sm:$0xff] %v15472_v3  ;;  %v15486_v3 = vld [vmem:[#allocation2 + $0x180] sm:$0xf0] }
 0x3d9   : > { %v7964_v51 = vrot.slane %v15486_v3, 4 }
 0x3dd   : > { %12412 = vmatmul.mubr.msk.bf16.gmra.mrb[32].mxu1 %vm2208_vm10, %v7957_v23  ;;  %v7963_v23 = vsel %vm2111_vm9, %v7961_v6, %v7962_v10 }
 0x3de   : > { %12415 = vmatprep.mubr.msk.bf16.mxu1 %vm2208_vm10, %v7960_v55  ;;  %v15484_v59 = vpop.f32.mrb[124].mxu0  ;;  %v7966_v55 = vsel %vm2111_vm9, %v7964_v51, %v7965_v21  ;;  %v15513_v51 = vld [vmem:[#allocation2 + $0x1b0] sm:$0xf0]  ;;  %v15516_v21 = vld [vmem:[#allocation2 + $0x1c0] sm:$0xf0] }
 0x3df   : > { %16276 = vst [vmem:[#allocation65_spill] sm:$0xff] %v15484_v59  ;;  %v15488_v52 = vpop.f32.mrb[125].mxu0  ;;  %v15501_v59 = vld [vmem:[#allocation2 + $0x190] sm:$0xf0] }
 0x3e0   : > { %16277 = vst [vmem:[#allocation66_spill] sm:$0xff] %v15488_v52  ;;  %v15490_v26 = vpop.f32.mrb[126].mxu0  ;;  %v7967_v47 = vrot.slane %v15501_v59, 4 }
 0x3e1   : > { %16278 = vst [vmem:[#allocation67_spill] sm:$0xff] %v15490_v26  ;;  %v15494_v53 = vpop.f32.mrb[127].mxu0  ;;  %v15504_v26 = vld [vmem:[#allocation2 + $0x1a0] sm:$0xf0] }
 0x3e2   : > { %16279 = vst [vmem:[#allocation68_spill] sm:$0xff] %v15494_v53  ;;  %v7968_v53 = vrot.slane %v15201_v0, 4  ;;  %v7970_v52 = vrot.slane %v15504_v26, 4  ;;  %v7974_v0 = vrot.slane %v15228_v18, 4  ;;  %v9644_v18 = vld [vmem:[%s16197_s3] sm:$0xf] }
 0x3e3   : > { %13354 = vmatprep.subr.msk.bf16.mxu0 %vm2111_vm9, %v9644_v18 }
 0x3e4   : > { %v7969_v6 = vsel %vm2111_vm9, %v7967_v47, %v7968_v53  ;;  %v7972_v10 = vsel %vm2111_vm9, %v7970_v52, %v7971_v58  ;;  %v15525_v47 = vld [vmem:[#allocation2 + $0x1d0] sm:$0xf0]  ;;  %v15528_v58 = vld [vmem:[#allocation2 + $0x1e0] sm:$0xf0] }
 0x3e5   : > { %12416 = vmatmul.mubr.msk.bf16.gmra.mrb[36].mxu1 %vm2208_vm10, %v7963_v23  ;;  %v7973_v23 = vrot.slane %v15513_v51, 4  ;;  %v7979_v11 = vrot.slane %v15525_v47, 4 }
 0x3e6   : > { %12419 = vmatprep.mubr.msk.bf16.mxu1 %vm2208_vm10, %v7966_v55  ;;  %v7976_v55 = vrot.slane %v15516_v21, 4 }
 0x3e7   : > { %v7975_v53 = vsel %vm2111_vm9, %v7973_v23, %v7974_v0  ;;  %v7983_v23 = vrot.slane %v15251_v5, 4 }
 0x3e8   : > { %v7978_v52 = vsel %vm2111_vm9, %v7976_v55, %v7977_v62  ;;  %v15541_v62 = vld [vmem:[#allocation2 + $0x1f0] sm:$0xf0] }
 0x3ed   : > { %12420 = vmatmul.mubr.msk.bf16.gmra.mrb[40].mxu1 %vm2208_vm10, %v7969_v6  ;;  %v7980_v6 = vrot.slane %v15242_v19, 4  ;;  %v7985_v19 = vrot.slane %v15541_v62, 4 }
 0x3ee   : > { %12423 = vmatprep.mubr.msk.bf16.mxu1 %vm2208_vm10, %v7972_v10  ;;  %v7982_v10 = vrot.slane %v15528_v58, 4 }
 0x3ef   : > { %v7981_v0 = vsel %vm2111_vm9, %v7979_v11, %v7980_v6  ;;  %v7989_v11 = vrot.slane %v15262_v32, 4  ;;  %v7987_v6 = vsel %vm2111_vm9, %v7985_v19, %v7986_v39  ;;  %v8488_v32 = vshll.u32 %v15313_v29, 16 }
 0x3f0   : > { %v7984_v55 = vsel %vm2111_vm9, %v7982_v10, %v7983_v23  ;;  %v15557_v23 = vld [vmem:[#allocation2 + $0x220] sm:$0xf0]  ;;  %v7995_v19 = vrot.slane %v15283_v20, 4  ;;  %v7998_v20 = vrot.slane %v15298_v61, 4 }
 0x3f1   : > { %v7994_v39 = vrot.slane %v15557_v23, 4  ;;  %v8490_v43 = vrot.slane %v8488_v32, 5 }
 0x3f3   : > { %v7996_v4 = vsel %vm2111_vm9, %v7994_v39, %v7995_v19  ;;  %v8522_v39 = vshll.u32 %v15326_v42, 16 }
 0x3f5   : > { %12424 = vmatmul.mubr.msk.bf16.gmra.mrb[44].mxu1 %vm2208_vm10, %v7975_v53  ;;  %v9746_v53 = vsel %vm2111_vm9, %v9644_v18, 0  ;;  %v15554_v18 = vld [vmem:[#allocation2 + $0x210] sm:$0xf0] }
 0x3f6   : > { %12427 = vmatprep.mubr.msk.bf16.mxu1 %vm2208_vm10, %v7978_v52  ;;  %v15545_v52 = vld [vmem:[#allocation2 + $0x200] sm:$0xf0]  ;;  %12510 = vmatpush3.bf16.msra.mxu0 %v9746_v53  ;;  %v8485_v53 = vshrl.u32 %v15313_v29, 16 }
 0x3f7   : > { %v7988_v5 = vrot.slane %v15545_v52, 4 }
 0x3f8   : > { %v8487_v12 = vrot.slane %v8485_v53, 4  ;;  %v8513_v53 = vshll.u32 %v8453_v54, 16 }
 0x3f9   : > { %v7990_v10 = vsel %vm2111_vm9, %v7988_v5, %v7989_v11 }
 0x3fa   : > { %v8491_v32 = vor.u32 %v8490_v43, %v8487_v12  ;;  %v8515_v24 = vrot.slane %v8513_v53, 5 }
 0x3fd   : > { %12428 = vmatmul.mubr.msk.bf16.gmra.mrb[48].mxu1 %vm2208_vm10, %v7981_v0  ;;  %v8452_v0 = vld [vmem:[#allocation2 + $0x28] sm:$0x1f] }
 0x3fe   : > { %12431 = vmatprep.mubr.msk.bf16.mxu1 %vm2208_vm10, %v7984_v55  ;;  %v7991_v55 = vrot.slane %v15554_v18, 4  ;;  %v8493_v5 = vshrl.u32 %v8452_v0, 16  ;;  %v8496_v11 = vshll.u32 %v8452_v0, 16  ;;  %v8454_v0 = vld [vmem:[#allocation2 + $0x48] sm:$0x1f] }
 0x3ff   : > { %v8527_v19 = vshrl.u32 %v8454_v0, 16 }
 0x400   : > { %v8495_v1 = vrot.slane %v8493_v5, 4  ;;  %v8498_v48 = vrot.slane %v8496_v11, 5  ;;  %v8530_v5 = vshll.u32 %v8454_v0, 16  ;;  %v8547_v0 = vshll.u32 %v8455_v34, 16 }
 0x401   : > { %v8529_v43 = vrot.slane %v8527_v19, 4 }
 0x402   : > { %v8499_v63 = vor.u32 %v8498_v48, %v8495_v1  ;;  %v8532_v12 = vrot.slane %v8530_v5, 5 }
 0x404   : > { %v8533_v53 = vor.u32 %v8532_v12, %v8529_v43 }
 0x405   : > { %12432 = vmatmul.mubr.msk.bf16.gmra.mrb[52].mxu1 %vm2208_vm10, %v7987_v6  ;;  %v15565_v6 = vld [vmem:[#allocation2 + $0x230] sm:$0xf0] }
 0x406   : > { %12435 = vmatprep.mubr.msk.bf16.mxu1 %vm2208_vm10, %v7990_v10  ;;  %v7993_v10 = vsel %vm2111_vm9, %v7991_v55, %v7992_v40  ;;  %v7997_v29 = vrot.slane %v15565_v6, 4  ;;  %v8505_v55 = vshll.u32 %v15323_v36, 16  ;;  %v8510_v40 = vshrl.u32 %v8453_v54, 16 }
 0x407   : > { %v8500_v36 = vsel %vm3018_vm15, %v8491_v32, %v8499_v63  ;;  %v8524_v54 = vrot.slane %v8522_v39, 5 }
 0x408   : > { %v7999_v11 = vsel %vm2111_vm9, %v7997_v29, %v7998_v20  ;;  %v8507_v25 = vrot.slane %v8505_v55, 5  ;;  %v8512_v61 = vrot.slane %v8510_v40, 4  ;;  %v8536_v29 = vshrl.u32 %v15345_v37, 16 }
 0x409   : > { %v8544_v20 = vshrl.u32 %v8455_v34, 16  ;;  %v8553_v55 = vshrl.u32 %v15348_v41, 16  ;;  %v8556_v40 = vshll.u32 %v15348_v41, 16  ;;  %v8570_v41 = vshrl.u32 %v15357_v27, 16 }
 0x40a   : > { %v8516_v1 = vor.u32 %v8515_v24, %v8512_v61  ;;  %v8538_v19 = vrot.slane %v8536_v29, 4  ;;  %v8549_v24 = vrot.slane %v8547_v0, 5  ;;  %v8457_v61 = vld [vmem:[#allocation2 + $0x78] sm:$0x1f]  ;;  %v8587_v29 = vshrl.u32 %v15362_v14, 16 }
 0x40b   : > { %v8578_v43 = vshrl.u32 %v8457_v61, 16  ;;  %v8581_v12 = vshll.u32 %v8457_v61, 16  ;;  %v8604_v61 = vshrl.u32 %v15377_v44, 16 }
 0x40d   : > { %12436 = vmatmul.mubr.msk.bf16.gmra.mrb[56].mxu1 %vm2208_vm10, %v7993_v10  ;;  %v8519_v10 = vshrl.u32 %v15326_v42, 16  ;;  %v8456_v42 = vld [vmem:[#allocation2 + $0x68] sm:$0x1f] }
 0x40e   : > { %12439 = vmatprep.mubr.msk.bf16.mxu1 %vm2208_vm10, %v7996_v4  ;;  %v8504_v4 = vrot.slane %v8502_v57, 4  ;;  %v8539_v57 = vshll.u32 %v15345_v37, 16  ;;  %v8561_v32 = vshrl.u32 %v8456_v42, 16 }
 0x40f   : > { %v8521_v56 = vrot.slane %v8519_v10, 4  ;;  %v8564_v10 = vshll.u32 %v8456_v42, 16 }
 0x410   : > { %v8508_v48 = vor.u32 %v8507_v25, %v8504_v4  ;;  %v8541_v5 = vrot.slane %v8539_v57, 5  ;;  %v8546_v25 = vrot.slane %v8544_v20, 4  ;;  %v8558_v4 = vrot.slane %v8556_v40, 5 }
 0x411   : > { %v8525_v63 = vor.u32 %v8524_v54, %v8521_v56  ;;  %v8563_v37 = vrot.slane %v8561_v32, 4  ;;  %v8458_v56 = vld [vmem:[#allocation2 + $0x88] sm:$0x1f]  ;;  %v8573_v54 = vshll.u32 %v15357_v27, 16  ;;  %v8590_v20 = vshll.u32 %v15362_v14, 16 }
 0x412   : > { %v8517_v39 = vsel %vm3018_vm15, %v8508_v48, %v8516_v1  ;;  %v8542_v42 = vor.u32 %v8541_v5, %v8538_v19  ;;  %v8550_v48 = vor.u32 %v8549_v24, %v8546_v25  ;;  %v8595_v0 = vshrl.u32 %v8458_v56, 16  ;;  %v8459_v24 = vld [vmem:[#allocation2 + $0x98] sm:$0x1f]  ;;  %v8460_v14 = vld [vmem:[#allocation2 + $0xa8] sm:$0x1f] }
 0x413   : > { %v8534_v34 = vsel %vm3018_vm15, %v8525_v63, %v8533_v53  ;;  %v8572_v40 = vrot.slane %v8570_v41, 4  ;;  %v8575_v63 = vrot.slane %v8573_v54, 5  ;;  %v8580_v53 = vrot.slane %v8578_v43, 4 }
 0x414   : > { %v8583_v32 = vrot.slane %v8581_v12, 5  ;;  %v8592_v19 = vrot.slane %v8590_v20, 5  ;;  %v8597_v5 = vrot.slane %v8595_v0, 4  ;;  %v8624_v41 = vshll.u32 %v15380_v8, 16 }
 0x415   : > { %12440 = vmatmul.mubr.msk.bf16.gmra.mrb[60].mxu1 %vm2208_vm10, %v7999_v11  ;;  %v8555_v11 = vrot.slane %v8553_v55, 4  ;;  %v8598_v55 = vshll.u32 %v8458_v56, 16  ;;  %v8621_v56 = vshrl.u32 %v15380_v8, 16  ;;  %v8629_v12 = vshrl.u32 %v8460_v14, 16  ;;  %v8462_v8 = vld [vmem:[#allocation2 + $0xc8] sm:$0x1f] }
 0x416   : > { %12445 = vmatprep.mubr.msk.bf16.mxu1 %vm2208_vm10, %v8500_v36  ;;  %v8566_v36 = vrot.slane %v8564_v10, 5  ;;  %v8551_v10 = vsel %vm3018_vm15, %v8542_v42, %v8550_v48  ;;  %v8632_v42 = vshll.u32 %v8460_v14, 16 }
 0x417   : > { %v8559_v1 = vor.u32 %v8558_v4, %v8555_v11  ;;  %v8600_v25 = vrot.slane %v8598_v55, 5  ;;  %v8576_v11 = vor.u32 %v8575_v63, %v8572_v40  ;;  %v8584_v4 = vor.u32 %v8583_v32, %v8580_v53  ;;  %v8461_v40 = vld [vmem:[#allocation2 + $0xb8] sm:$0x1f] }
 0x418   : > { %v8567_v57 = vor.u32 %v8566_v36, %v8563_v37  ;;  %v8612_v37 = vshrl.u32 %v8459_v24, 16  ;;  %v8615_v36 = vshll.u32 %v8459_v24, 16  ;;  %v8623_v0 = vrot.slane %v8621_v56, 4 }
 0x419   : > { %v8601_v43 = vor.u32 %v8600_v25, %v8597_v5  ;;  %v8585_v48 = vsel %vm3018_vm15, %v8576_v11, %v8584_v4  ;;  %v8626_v55 = vrot.slane %v8624_v41, 5  ;;  %v8631_v63 = vrot.slane %v8629_v12, 4 }
 0x41a   : > { %v8568_v27 = vsel %vm3018_vm15, %v8559_v1, %v8567_v57  ;;  %v8606_v1 = vrot.slane %v8604_v61, 4  ;;  %v8614_v57 = vrot.slane %v8612_v37, 4  ;;  %v8617_v20 = vrot.slane %v8615_v36, 5 }
 0x41b   : > { %v8634_v53 = vrot.slane %v8632_v42, 5  ;;  %v8638_v32 = vshrl.u32 %v15397_v22, 16  ;;  %v8627_v25 = vor.u32 %v8626_v55, %v8623_v0  ;;  %v8655_v24 = vshrl.u32 %v15400_v9, 16 }
 0x41c   : > { %v8618_v5 = vor.u32 %v8617_v20, %v8614_v57  ;;  %v8658_v11 = vshll.u32 %v15400_v9, 16  ;;  %v8663_v4 = vshrl.u32 %v8462_v8, 16  ;;  %v8666_v61 = vshll.u32 %v8462_v8, 16  ;;  %v8464_v9 = vld [vmem:[#allocation2 + $0xe8] sm:$0x1f] }
 0x41d   : > { %12446 = vmatmul.mubr.msk.bf16.vlgmr.msra.gmra.mrb[0].mxu1 %vm2208_vm10, %v8517_v39  ;;  %v8589_v39 = vrot.slane %v8587_v29, 4  ;;  %v8635_v14 = vor.u32 %v8634_v53, %v8631_v63  ;;  %v8672_v57 = vshrl.u32 %v15409_v49, 16  ;;  %v8675_v20 = vshll.u32 %v15409_v49, 16 }
 0x41e   : > { %12449 = vmatprep.mubr.msk.bf16.mxu1 %vm2208_vm10, %v8534_v34  ;;  %v8607_v34 = vshll.u32 %v15377_v44, 16  ;;  %v8665_v12 = vrot.slane %v8663_v4, 4  ;;  %v8668_v42 = vrot.slane %v8666_v61, 5  ;;  %v8697_v8 = vshrl.u32 %v8464_v9, 16 }
 0x41f   : > { %v8593_v54 = vor.u32 %v8592_v19, %v8589_v39  ;;  %v8646_v39 = vshrl.u32 %v8461_v40, 16  ;;  %v8706_v61 = vshrl.u32 %v15429_v46, 16 }
 0x420   : > { %v8609_v29 = vrot.slane %v8607_v34, 5  ;;  %v8640_v34 = vrot.slane %v8638_v32, 4  ;;  %v8669_v53 = vor.u32 %v8668_v42, %v8665_v12  ;;  %v8700_v32 = vshll.u32 %v8464_v9, 16 }
 0x421   : > { %v8602_v44 = vsel %vm3018_vm15, %v8593_v54, %v8601_v43  ;;  %v8648_v36 = vrot.slane %v8646_v39, 4  ;;  %v8657_v54 = vrot.slane %v8655_v24, 4  ;;  %v8660_v43 = vrot.slane %v8658_v11, 5 }
 0x422   : > { %v8610_v19 = vor.u32 %v8609_v29, %v8606_v1  ;;  %v8674_v39 = vrot.slane %v8672_v57, 4  ;;  %v8699_v11 = vrot.slane %v8697_v8, 4  ;;  %v8702_v4 = vrot.slane %v8700_v32, 5 }
 0x423   : > { %v8661_v63 = vor.u32 %v8660_v43, %v8657_v54  ;;  %v8726_v12 = vshll.u32 %v15432_v13, 16  ;;  %v8708_v9 = vrot.slane %v8706_v61, 4  ;;  %v8743_v8 = vshll.u32 %v15444_v50, 16 }
 0x424   : > { %v8619_v41 = vsel %vm3018_vm15, %v8610_v19, %v8618_v5  ;;  %v8703_v43 = vor.u32 %v8702_v4, %v8699_v11 }
 0x425   : > { %12450 = vmatmul.mubr.msk.bf16.gmra.mrb[4].mxu1 %vm2208_vm10, %v8551_v10  ;;  %v8641_v10 = vshll.u32 %v15397_v22, 16  ;;  %v8636_v22 = vsel %vm3018_vm15, %v8627_v25, %v8635_v14  ;;  %v8465_v14 = vld [vmem:[#allocation2 + $0xf8] sm:$0x1f]  ;;  %v8670_v49 = vsel %vm3018_vm15, %v8661_v63, %v8669_v53  ;;  %v8468_v53 = vld [vmem:[#allocation2 + $0x148] sm:$0x1f]  ;;  %v8745_v4 = vrot.slane %v8743_v8, 5 }
 0x426   : > { %12453 = vmatprep.mubr.msk.bf16.mxu1 %vm2208_vm10, %v8568_v27  ;;  %v8649_v27 = vshll.u32 %v8461_v40, 16  ;;  %v8689_v40 = vshrl.u32 %v15414_v33, 16 }
 0x427   : > { %v8643_v37 = vrot.slane %v8641_v10, 5 }
 0x428   : > { %v8651_v56 = vrot.slane %v8649_v27, 5  ;;  %v8677_v27 = vrot.slane %v8675_v20, 5  ;;  %v8691_v25 = vrot.slane %v8689_v40, 4  ;;  %v8467_v20 = vld [vmem:[#allocation2 + $0x118] sm:$0x1f]  ;;  %v8728_v40 = vrot.slane %v8726_v12, 5 }
 0x429   : > { %v8644_v1 = vor.u32 %v8643_v37, %v8640_v34  ;;  %v8709_v34 = vshll.u32 %v15429_v46, 16  ;;  %v8714_v37 = vshrl.u32 %v8465_v14, 16  ;;  %v8748_v32 = vshrl.u32 %v8467_v20, 16 }
 0x42a   : > { %v8652_v29 = vor.u32 %v8651_v56, %v8648_v36  ;;  %v8717_v36 = vshll.u32 %v8465_v14, 16  ;;  %v8678_v56 = vor.u32 %v8677_v27, %v8674_v39  ;;  %v8777_v12 = vshll.u32 %v15465_v28, 16 }
 0x42c   : > { %v8653_v10 = vsel %vm3018_vm15, %v8644_v1, %v8652_v29  ;;  %v8711_v1 = vrot.slane %v8709_v34, 5  ;;  %v8716_v29 = vrot.slane %v8714_v37, 4  ;;  %v8719_v57 = vrot.slane %v8717_v36, 5 }
 0x42d   : > { %12454 = vmatmul.mubr.msk.bf16.gmra.mrb[8].mxu1 %vm2208_vm10, %v8585_v48  ;;  %v8463_v48 = vld [vmem:[#allocation2 + $0xd8] sm:$0x1f] }
 0x42e   : > { %12457 = vmatprep.mubr.msk.bf16.mxu1 %vm2208_vm10, %v8602_v44  ;;  %v8680_v0 = vshrl.u32 %v8463_v48, 16  ;;  %v8683_v55 = vshll.u32 %v8463_v48, 16  ;;  %v8692_v44 = vshll.u32 %v15414_v33, 16  ;;  %v8466_v33 = vld [vmem:[#allocation2 + $0x108] sm:$0x1f]  ;;  %v8712_v39 = vor.u32 %v8711_v1, %v8708_v9 }
 0x42f   : > { %v8731_v42 = vshrl.u32 %v8466_v33, 16  ;;  %v8734_v48 = vshll.u32 %v8466_v33, 16  ;;  %v8720_v27 = vor.u32 %v8719_v57, %v8716_v29  ;;  %v8750_v33 = vrot.slane %v8748_v32, 4 }
 0x430   : > { %v8682_v19 = vrot.slane %v8680_v0, 4  ;;  %v8685_v5 = vrot.slane %v8683_v55, 5  ;;  %v8694_v24 = vrot.slane %v8692_v44, 5  ;;  %v8791_v57 = vshrl.u32 %v15470_v2, 16 }
 0x431   : > { %v8733_v44 = vrot.slane %v8731_v42, 4  ;;  %v8736_v63 = vrot.slane %v8734_v48, 5  ;;  %v8721_v34 = vsel %vm3018_vm15, %v8712_v39, %v8720_v27  ;;  %v8470_v42 = vld [vmem:[#allocation2 + $0x168] sm:$0x1f] }
 0x432   : > { %v8695_v54 = vor.u32 %v8694_v24, %v8691_v25  ;;  %v8765_v25 = vshrl.u32 %v8468_v53, 16  ;;  %v8768_v24 = vshll.u32 %v8468_v53, 16  ;;  %v8793_v8 = vrot.slane %v8791_v57, 4  ;;  %v8472_v27 = vld [vmem:[#allocation2 + $0x188] sm:$0x1f] }
 0x434   : > { %v8704_v55 = vsel %vm3018_vm15, %v8695_v54, %v8703_v43  ;;  %v8767_v36 = vrot.slane %v8765_v25, 4  ;;  %v8774_v43 = vshrl.u32 %v15465_v28, 16  ;;  %v8471_v28 = vld [vmem:[#allocation2 + $0x178] sm:$0x1f]  ;;  %v8811_v25 = vshll.u32 %v15481_v60, 16 }
 0x435   : > { %12458 = vmatmul.mubr.msk.bf16.gmra.mrb[12].mxu1 %vm2208_vm10, %v8619_v41  ;;  %v8686_v41 = vor.u32 %v8685_v5, %v8682_v19  ;;  %v8757_v19 = vshrl.u32 %v15454_v45, 16  ;;  %v8760_v5 = vshll.u32 %v15454_v45, 16 }
 0x436   : > { %12461 = vmatprep.mubr.msk.bf16.mxu1 %vm2208_vm10, %v8636_v22  ;;  %v8723_v22 = vshrl.u32 %v15432_v13, 16  ;;  %v8740_v13 = vshrl.u32 %v15444_v50, 16 }
 0x437   : > { %v8687_v0 = vsel %vm3018_vm15, %v8678_v56, %v8686_v41  ;;  %v8759_v37 = vrot.slane %v8757_v19, 4  ;;  %v8762_v50 = vrot.slane %v8760_v5, 5  ;;  %v8770_v56 = vrot.slane %v8768_v24, 5  ;;  %v8469_v41 = vld [vmem:[#allocation2 + $0x158] sm:$0x1f] }
 0x438   : > { %v8725_v46 = vrot.slane %v8723_v22, 4  ;;  %v8742_v11 = vrot.slane %v8740_v13, 4  ;;  %v8782_v48 = vshrl.u32 %v8469_v41, 16  ;;  %v8785_v9 = vshll.u32 %v8469_v41, 16 }
 0x439   : > { %v8763_v1 = vor.u32 %v8762_v50, %v8759_v37  ;;  %v8771_v29 = vor.u32 %v8770_v56, %v8767_v36  ;;  %v8808_v19 = vshrl.u32 %v15481_v60, 16  ;;  %v8816_v24 = vshrl.u32 %v8471_v28, 16 }
 0x43a   : > { %v8729_v14 = vor.u32 %v8728_v40, %v8725_v46  ;;  %v8746_v45 = vor.u32 %v8745_v4, %v8742_v11  ;;  %v8802_v46 = vshll.u32 %v8470_v42, 16  ;;  %v8776_v40 = vrot.slane %v8774_v43, 4  ;;  %v8473_v43 = vld [vmem:[#allocation2 + $0x198] sm:$0x1f] }
 0x43b   : > { %v8787_v53 = vrot.slane %v8785_v9, 5  ;;  %v8772_v13 = vsel %vm3018_vm15, %v8763_v1, %v8771_v29  ;;  %v8828_v11 = vshll.u32 %v15486_v3, 16  ;;  %v8833_v4 = vshrl.u32 %v8472_v27, 16 }
 0x43c   : > { %v8804_v39 = vrot.slane %v8802_v46, 5  ;;  %v8810_v37 = vrot.slane %v8808_v19, 4  ;;  %v8813_v36 = vrot.slane %v8811_v25, 5  ;;  %v8818_v56 = vrot.slane %v8816_v24, 4  ;;  %v8476_v19 = vld [vmem:[#allocation2 + $0x1c8] sm:$0x1f] }
 0x43d   : > { %12462 = vmatmul.mubr.msk.bf16.gmra.mrb[16].mxu1 %vm2208_vm10, %v8653_v10  ;;  %v8751_v10 = vshll.u32 %v8467_v20, 16  ;;  %v8794_v20 = vshll.u32 %v15470_v2, 16  ;;  %v8850_v9 = vshrl.u32 %v8473_v43, 16  ;;  %v8853_v1 = vshll.u32 %v8473_v43, 16  ;;  %v8477_v43 = vld [vmem:[#allocation2 + $0x1d8] sm:$0x1f] }
 0x43e   : > { %12465 = vmatprep.mubr.msk.bf16.mxu1 %vm2208_vm10, %v8670_v49  ;;  %v8737_v49 = vor.u32 %v8736_v63, %v8733_v44  ;;  %v8779_v44 = vrot.slane %v8777_v12, 5  ;;  %v8784_v63 = vrot.slane %v8782_v48, 4  ;;  %v8474_v48 = vld [vmem:[#allocation2 + $0x1a8] sm:$0x1f]  ;;  %v8814_v29 = vor.u32 %v8813_v36, %v8810_v37 }
 0x43f   : > { %v8753_v61 = vrot.slane %v8751_v10, 5  ;;  %v8796_v32 = vrot.slane %v8794_v20, 5  ;;  %v8859_v46 = vshrl.u32 %v15504_v26, 16  ;;  %v8879_v24 = vshll.u32 %v15513_v51, 16 }
 0x440   : > { %v8738_v54 = vsel %vm3018_vm15, %v8729_v14, %v8737_v49  ;;  %v8780_v2 = vor.u32 %v8779_v44, %v8776_v40  ;;  %v8788_v5 = vor.u32 %v8787_v53, %v8784_v63  ;;  %v8819_v14 = vshll.u32 %v8471_v28, 16 }
 0x441   : > { %v8754_v22 = vor.u32 %v8753_v61, %v8750_v33  ;;  %v8825_v49 = vshrl.u32 %v15486_v3, 16  ;;  %v8836_v33 = vshll.u32 %v8472_v27, 16  ;;  %v8797_v61 = vor.u32 %v8796_v32, %v8793_v8  ;;  %v8475_v32 = vld [vmem:[#allocation2 + $0x1b8] sm:$0x1f] }
 0x442   : > { %v8789_v50 = vsel %vm3018_vm15, %v8780_v2, %v8788_v5  ;;  %v8821_v41 = vrot.slane %v8819_v14, 5  ;;  %v8842_v3 = vshrl.u32 %v15501_v59, 16  ;;  %v8867_v40 = vshrl.u32 %v8474_v48, 16 }
 0x443   : > { %v8838_v60 = vrot.slane %v8836_v33, 5  ;;  %v8870_v44 = vshll.u32 %v8474_v48, 16  ;;  %v8855_v28 = vrot.slane %v8853_v1, 5  ;;  %v8876_v5 = vshrl.u32 %v15513_v51, 16 }
 0x444   : > { %v8822_v57 = vor.u32 %v8821_v41, %v8818_v56  ;;  %v8844_v63 = vrot.slane %v8842_v3, 4  ;;  %v8869_v27 = vrot.slane %v8867_v40, 4  ;;  %v8884_v14 = vshrl.u32 %v8475_v32, 16 }
 0x445   : > { %12466 = vmatmul.mubr.msk.bf16.gmra.mrb[20].mxu1 %vm2208_vm10, %v8687_v0  ;;  %v8799_v0 = vshrl.u32 %v8470_v42, 16  ;;  %v8845_v42 = vshll.u32 %v15501_v59, 16  ;;  %v8872_v2 = vrot.slane %v8870_v44, 5  ;;  %v8901_v33 = vshrl.u32 %v8476_v19, 16 }
 0x446   : > { %12469 = vmatprep.mubr.msk.bf16.mxu1 %vm2208_vm10, %v8704_v55  ;;  %v8755_v55 = vsel %vm3018_vm15, %v8746_v45, %v8754_v22  ;;  %v8830_v45 = vrot.slane %v8828_v11, 5  ;;  %v8835_v22 = vrot.slane %v8833_v4, 4  ;;  %v8823_v8 = vsel %vm3018_vm15, %v8814_v29, %v8822_v57 }
 0x447   : > { %v8801_v10 = vrot.slane %v8799_v0, 4  ;;  %v8847_v53 = vrot.slane %v8845_v42, 5  ;;  %v8893_v11 = vshrl.u32 %v15516_v21, 16  ;;  %v8896_v4 = vshll.u32 %v15516_v21, 16  ;;  %v8478_v42 = vld [vmem:[#allocation2 + $0x1e8] sm:$0x1f] }
 0x448   : > { %v8839_v0 = vor.u32 %v8838_v60, %v8835_v22  ;;  %v8873_v37 = vor.u32 %v8872_v2, %v8869_v27  ;;  %v8881_v56 = vrot.slane %v8879_v24, 5  ;;  %v8886_v41 = vrot.slane %v8884_v14, 4  ;;  %v8480_v27 = vld [vmem:[#allocation2 + $0x208] sm:$0x1f] }
 0x449   : > { %v8898_v22 = vrot.slane %v8896_v4, 5  ;;  %v8903_v60 = vrot.slane %v8901_v33, 4  ;;  %v8910_v21 = vshrl.u32 %v15525_v47, 16  ;;  %v8913_v3 = vshll.u32 %v15525_v47, 16 }
 0x44a   : > { %v8918_v48 = vshrl.u32 %v8477_v43, 16  ;;  %v8938_v40 = vshll.u32 %v8478_v42, 16  ;;  %v8944_v2 = vshrl.u32 %v15541_v62, 16  ;;  %v8961_v24 = vshrl.u32 %v15545_v52, 16 }
 0x44b   : > { %v8912_v44 = vrot.slane %v8910_v21, 4  ;;  %v8964_v14 = vshll.u32 %v15545_v52, 16  ;;  %v8482_v52 = vld [vmem:[#allocation2 + $0x228] sm:$0x1f] }
 0x44d   : > { %12470 = vmatmul.mubr.msk.bf16.gmra.mrb[24].mxu1 %vm2208_vm10, %v8721_v34  ;;  %v8805_v34 = vor.u32 %v8804_v39, %v8801_v10  ;;  %v8861_v10 = vrot.slane %v8859_v46, 4  ;;  %v8930_v46 = vshll.u32 %v15528_v58, 16 }
 0x44e   : > { %12473 = vmatprep.mubr.msk.bf16.mxu1 %vm2208_vm10, %v8738_v54  ;;  %v8827_v54 = vrot.slane %v8825_v49, 4  ;;  %v8887_v49 = vshll.u32 %v8475_v32, 16 }
 0x44f   : > { %v8806_v12 = vsel %vm3018_vm15, %v8797_v61, %v8805_v34  ;;  %v8904_v61 = vshll.u32 %v8476_v19, 16  ;;  %v8932_v32 = vrot.slane %v8930_v46, 5 }
 0x450   : > { %v8831_v20 = vor.u32 %v8830_v45, %v8827_v54  ;;  %v8889_v54 = vrot.slane %v8887_v49, 5  ;;  %v8895_v45 = vrot.slane %v8893_v11, 4  ;;  %v8969_v49 = vshrl.u32 %v8480_v27, 16 }
 0x451   : > { %v8906_v51 = vrot.slane %v8904_v61, 5  ;;  %v8972_v11 = vshll.u32 %v8480_v27, 16  ;;  %v8946_v61 = vrot.slane %v8944_v2, 4 }
 0x452   : > { %v8840_v59 = vsel %vm3018_vm15, %v8831_v20, %v8839_v0  ;;  %v8890_v29 = vor.u32 %v8889_v54, %v8886_v41  ;;  %v8899_v57 = vor.u32 %v8898_v22, %v8895_v45  ;;  %v8927_v0 = vshrl.u32 %v15528_v58, 16  ;;  %v8481_v22 = vld [vmem:[#allocation2 + $0x218] sm:$0x1f] }
 0x453   : > { %v8907_v20 = vor.u32 %v8906_v51, %v8903_v60  ;;  %v8966_v41 = vrot.slane %v8964_v14, 5  ;;  %v8971_v54 = vrot.slane %v8969_v49, 4 }
 0x455   : > { %12474 = vmatmul.mubr.msk.bf16.gmra.mrb[28].mxu1 %vm2208_vm10, %v8755_v55  ;;  %v8862_v55 = vshll.u32 %v15504_v26, 16  ;;  %v8848_v26 = vor.u32 %v8847_v53, %v8844_v63  ;;  %v8915_v63 = vrot.slane %v8913_v3, 5  ;;  %v8920_v53 = vrot.slane %v8918_v48, 4 }
 0x456   : > { %12477 = vmatprep.mubr.msk.bf16.mxu1 %vm2208_vm10, %v8772_v13  ;;  %v8852_v13 = vrot.slane %v8850_v9, 4  ;;  %v8921_v9 = vshll.u32 %v8477_v43, 16  ;;  %v8908_v47 = vsel %vm3018_vm15, %v8899_v57, %v8907_v20  ;;  %v8978_v43 = vshrl.u32 %v15554_v18, 16  ;;  %v15692_v20 = vld [vmem:[%s16198_s4] sm:$0xff]  }
 0x457   : > { %v8864_v39 = vrot.slane %v8862_v55, 5  ;;  %v8935_v55 = vshrl.u32 %v8478_v42, 16  ;;  %v8916_v58 = vor.u32 %v8915_v63, %v8912_v44  ;;  %v8986_v42 = vshrl.u32 %v8481_v22, 16  ;;  %12575 = vmatprep.subr.bf16.mxu0 %v15692_v20 }
 0x458   : > { %v8856_v25 = vor.u32 %v8855_v28, %v8852_v13  ;;  %v8923_v13 = vrot.slane %v8921_v9, 5  ;;  %v8989_v48 = vshll.u32 %v8481_v22, 16  ;;  %v8995_v9 = vshrl.u32 %v15557_v23, 16 }
 0x459   : > { %v8865_v34 = vor.u32 %v8864_v39, %v8861_v10  ;;  %v8937_v10 = vrot.slane %v8935_v55, 4  ;;  %v8940_v39 = vrot.slane %v8938_v40, 5  ;;  %v9006_v57 = vshll.u32 %v8482_v52, 16  ;;  %v8483_v55 = vld [vmem:[#allocation2 + $0x238] sm:$0x1f] }
 0x45a   : > { %v8857_v36 = vsel %vm3018_vm15, %v8848_v26, %v8856_v25  ;;  %v8924_v19 = vor.u32 %v8923_v13, %v8920_v53  ;;  %v8947_v26 = vshll.u32 %v15541_v62, 16  ;;  %v8974_v62 = vrot.slane %v8972_v11, 5 }
 0x45b   : > { %v8941_v33 = vor.u32 %v8940_v39, %v8937_v10  ;;  %v8980_v46 = vrot.slane %v8978_v43, 4  ;;  %v8988_v44 = vrot.slane %v8986_v42, 4  ;;  %v8991_v63 = vrot.slane %v8989_v48, 5 }
 0x45c   : > { %v8975_v3 = vor.u32 %v8974_v62, %v8971_v54  ;;  %v9482_v11 = vsub.s32 1, %v14088_v35 }
 0x45d   : > { %12478 = vmatmul.mubr.msk.bf16.gmra.mrb[32].mxu1 %vm2208_vm10, %v8789_v50  ;;  %v8878_v50 = vrot.slane %v8876_v5, 4  ;;  %v8992_v39 = vor.u32 %v8991_v63, %v8988_v44 }
 0x45e   : > { %12481 = vmatprep.mubr.msk.bf16.mxu1 %vm2208_vm10, %v8806_v12  ;;  %v8874_v12 = vsel %vm3018_vm15, %v8865_v34, %v8873_v37  ;;  %v8925_v34 = vsel %vm3018_vm15, %v8916_v58, %v8924_v19  ;;  %v8949_v37 = vrot.slane %v8947_v26, 5 }
 0x45f   : > { %v8882_v1 = vor.u32 %v8881_v56, %v8878_v50  ;;  %v8963_v56 = vrot.slane %v8961_v24, 4 }
 0x460   : > { %v8950_v60 = vor.u32 %v8949_v37, %v8946_v61 }
 0x461   : > { %v8891_v28 = vsel %vm3018_vm15, %v8882_v1, %v8890_v29  ;;  %v8967_v21 = vor.u32 %v8966_v41, %v8963_v56  ;;  %v8998_v1 = vshll.u32 %v15557_v23, 16  ;;  %v9003_v29 = vshrl.u32 %v8482_v52, 16 }
 0x462   : > { %v8997_v23 = vrot.slane %v8995_v9, 4 }
 0x463   : > { %v9000_v53 = vrot.slane %v8998_v1, 5  ;;  %v9005_v13 = vrot.slane %v9003_v29, 4 }
 0x465   : > { %12482 = vmatmul.mubr.msk.bf16.gmra.mrb[36].mxu1 %vm2208_vm10, %v8823_v8  ;;  %v8479_v8 = vld [vmem:[#allocation2 + $0x1f8] sm:$0x1f]  ;;  %v9001_v27 = vor.u32 %v9000_v53, %v8997_v23 }
 0x466   : > { %12485 = vmatprep.mubr.msk.bf16.mxu1 %vm2208_vm10, %v8840_v59  ;;  %v8929_v59 = vrot.slane %v8927_v0, 4  ;;  %v8952_v5 = vshrl.u32 %v8479_v8, 16  ;;  %v8955_v25 = vshll.u32 %v8479_v8, 16  ;;  %v9015_v8 = vshll.u32 %v15565_v6, 16 }
 0x468   : > { %v8933_v4 = vor.u32 %v8932_v32, %v8929_v59  ;;  %v8954_v50 = vrot.slane %v8952_v5, 4  ;;  %v9020_v59 = vshrl.u32 %v8483_v55, 16  ;;  %v9023_v32 = vshll.u32 %v8483_v55, 16 }
 0x469   : > { %v9017_v19 = vrot.slane %v9015_v8, 5 }
 0x46a   : > { %v8942_v45 = vsel %vm3018_vm15, %v8933_v4, %v8941_v33  ;;  %v9022_v26 = vrot.slane %v9020_v59, 4  ;;  %v9025_v5 = vrot.slane %v9023_v32, 5  ;;  %v15711_v4 = vld [vmem:[%s16199_s5] sm:$0xf]  ;;  %v16284_v32 = vld [vmem:[#allocation16_spill] sm:$0xff] }
 0x46b   : > { %v15714_v33 = vrot.slane %v15711_v4, %v9482_v11 }
 0x46d   : > { %12486 = vmatmul.mubr.msk.bf16.gmra.mrb[40].mxu1 %vm2208_vm10, %v8857_v36  ;;  %v8957_v36 = vrot.slane %v8955_v25, 5 }
 0x46e   : > { %12489 = vmatprep.mubr.msk.bf16.mxu1 %vm2208_vm10, %v8874_v12  ;;  %v8981_v12 = vshll.u32 %v15554_v18, 16  ;;  %v8976_v18 = vsel %vm3018_vm15, %v8967_v21, %v8975_v3 }
 0x46f   : > { %v8958_v51 = vor.u32 %v8957_v36, %v8954_v50 }
 0x470   : > { %v8983_v40 = vrot.slane %v8981_v12, 5 }
 0x471   : > { %v8959_v0 = vsel %vm3018_vm15, %v8950_v60, %v8958_v51 }
 0x472   : > { %v8984_v10 = vor.u32 %v8983_v40, %v8980_v46  ;;  %v16282_v46 = vld [vmem:[#allocation14_spill] sm:$0xff] }
 0x474   : > { %v8993_v25 = vsel %vm3018_vm15, %v8984_v10, %v8992_v39 }
 0x475   : > { %12490 = vmatmul.mubr.msk.bf16.gmra.mrb[44].mxu1 %vm2208_vm10, %v8891_v28  ;;  %v9008_v28 = vrot.slane %v9006_v57, 5 }
 0x476   : > { %12493 = vmatprep.mubr.msk.bf16.mxu1 %vm2208_vm10, %v8908_v47  ;;  %v9012_v47 = vshrl.u32 %v15565_v6, 16  ;;  %v9026_v6 = vor.u32 %v9025_v5, %v9022_v26  ;;  %v16286_v26 = vld [vmem:[#allocation18_spill] sm:$0xff] }
 0x477   : > { %v9009_v58 = vor.u32 %v9008_v28, %v9005_v13  ;;  %v16283_v28 = vld [vmem:[#allocation15_spill] sm:$0xff] }
 0x478   : > { %v9014_v2 = vrot.slane %v9012_v47, 4 }
 0x479   : > { %v9010_v24 = vsel %vm3018_vm15, %v9001_v27, %v9009_v58  ;;  %v16285_v58 = vld [vmem:[#allocation17_spill] sm:$0xff] }
 0x47a   : > { %v9018_v14 = vor.u32 %v9017_v19, %v9014_v2 }
 0x47c   : > { %v9027_v49 = vsel %vm3018_vm15, %v9018_v14, %v9026_v6 }
 0x47d   : > { %12494 = vmatmul.mubr.msk.bf16.gmra.mrb[48].mxu1 %vm2208_vm10, %v8925_v34 }
 0x47e   : > { %12497 = vmatprep.mubr.msk.bf16.mxu1 %vm2208_vm10, %v8942_v45 }
 0x485   : > { %12498 = vmatmul.mubr.msk.bf16.gmra.mrb[52].mxu1 %vm2208_vm10, %v8959_v0 }
 0x486   : > { %12501 = vmatprep.mubr.msk.bf16.mxu1 %vm2208_vm10, %v8976_v18 }
 0x48d   : > { %12502 = vmatmul.mubr.msk.bf16.gmra.mrb[56].mxu1 %vm2208_vm10, %v8993_v25 }
 0x48e   : > { %12505 = vmatprep.mubr.msk.bf16.mxu1 %vm2208_vm10, %v9010_v24 }
 0x495   : > { %12506 = vmatmul.mubr.msk.bf16.gmra.mrb[60].mxu1 %vm2208_vm10, %v9027_v49 }
 0x4f0   : > { %v12447_v61 = vpop.f32.mrb[0].mxu1 }
 0x4f1   : > { %v12641_v34 = vadd.f32 %v12447_v61, %v15121_v16  ;;  %v9161_v37 = vpop.f32.mrb[1].mxu1 }
 0x4f2   : > { %v12642_v50 = vadd.f32 %v9161_v37, %v15123_v31  ;;  %v12448_v36 = vpop.f32.mrb[2].mxu1  ;;  %v16287_v37 = vld [vmem:[#allocation19_spill] sm:$0xff] }
 0x4f3   : > { %v9486_v56 = vadd.f32 %v12641_v34, %v15714_v33  ;;  %v12643_v41 = vadd.f32 %v12448_v36, %v15126_v7  ;;  %v9164_v54 = vpop.f32.mrb[3].mxu1  ;;  %v16280_v7 = vld [vmem:[#allocation12_spill] sm:$0xff] }
 0x4f4   : > { %v9484_v62 = vadd.f32 %v12642_v50, %v15714_v33  ;;  %v12644_v45 = vadd.f32 %v9164_v54, %v15128_v17  ;;  %v16281_v17 = vld [vmem:[#allocation13_spill] sm:$0xff] }
 0x4f5   : > { %v9487_v22 = vadd.f32 %v12643_v41, %v15714_v33  ;;  %v9550_v60 = vmax.f32 %v9486_v56, 0.0  ;;  %v16288_v41 = vld [vmem:[#allocation20_spill] sm:$0xff] }
 0x4f6   : > { %v9485_v52 = vadd.f32 %v12644_v45, %v15714_v33  ;;  %v9548_v16 = vmax.f32 %v9484_v62, 0.0 }
 0x4f7   : > { %v9551_v51 = vmax.f32 %v9487_v22, 0.0  ;;  %v16289_v22 = vld [vmem:[#allocation21_spill] sm:$0xff] }
 0x4f8   : > { %v9549_v43 = vmax.f32 %v9485_v52, 0.0  ;;  %v12451_v12 = vpop.f32.mrb[4].mxu1 }
 0x4f9   : > { %v9613_v31 = vpack.c.bf16 %v9551_v51, %v9550_v60  ;;  %v12645_v21 = vadd.f32 %v12451_v12, %v15139_v38  ;;  %v9177_v3 = vpop.f32.mrb[5].mxu1 }
 0x4fa   : > { %v9612_v42 = vpack.c.bf16 %v9549_v43, %v9548_v16  ;;  %v12646_v48 = vadd.f32 %v9177_v3, %v16280_v7  ;;  %v12452_v9 = vpop.f32.mrb[6].mxu1  ;;  %v16290_v16 = vld [vmem:[#allocation22_spill] sm:$0xff] }
 0x4fb   : > { %v9490_v1 = vadd.f32 %v12645_v21, %v15714_v33  ;;  %v12647_v29 = vadd.f32 %v12452_v9, %v16281_v17  ;;  %v9180_v57 = vpop.f32.mrb[7].mxu1 }
 0x4fc   : > { %v9488_v0 = vadd.f32 %v12646_v48, %v15714_v33  ;;  %v12648_v55 = vadd.f32 %v9180_v57, %v16282_v46  ;;  %12511 = vmatprep.mubr.msk.bf16.mxu0 %vm2208_vm10, %v9612_v42 }
 0x4fd   : > { %v9491_v18 = vadd.f32 %v12647_v29, %v15714_v33  ;;  %12512 = vmatmul.mubr.msk.bf16.vlgmr.msra.gmra.mrb[128].mxu0 %vm2208_vm10, %v9613_v31  ;;  %v9554_v40 = vmax.f32 %v9490_v1, 0.0  ;;  %v16291_v1 = vld [vmem:[#allocation23_spill] sm:$0xff] }
 0x4fe   : > { %v9489_v38 = vadd.f32 %v12648_v55, %v15714_v33  ;;  %12576 = vmatpush3.bf16.msra.mxu0 %v15692_v20  ;;  %v9552_v63 = vmax.f32 %v9488_v0, 0.0  ;;  %v16292_v0 = vld [vmem:[#allocation24_spill] sm:$0xff] }
 0x4ff   : > { %v9555_v44 = vmax.f32 %v9491_v18, 0.0 }
 0x500   : > { %v9553_v23 = vmax.f32 %v9489_v38, 0.0  ;;  %v12455_v53 = vpop.f32.mrb[8].mxu1  ;;  %v16293_v38 = vld [vmem:[#allocation25_spill] sm:$0xff] }
 0x501   : > { %v9615_v13 = vpack.c.bf16 %v9555_v44, %v9554_v40  ;;  %v12649_v47 = vadd.f32 %v12455_v53, %v16283_v28  ;;  %v9193_v8 = vpop.f32.mrb[9].mxu1 }
 0x502   : > { %v9614_v59 = vpack.c.bf16 %v9553_v23, %v9552_v63  ;;  %v12650_v10 = vadd.f32 %v9193_v8, %v16284_v32  ;;  %v12456_v39 = vpop.f32.mrb[10].mxu1  ;;  %v16294_v23 = vld [vmem:[#allocation26_spill] sm:$0xff] }
 0x503   : > { %v9494_v27 = vadd.f32 %v12649_v47, %v15714_v33  ;;  %v12651_v2 = vadd.f32 %v12456_v39, %v16285_v58  ;;  %v9196_v19 = vpop.f32.mrb[11].mxu1 }
 0x504   : > { %v9492_v20 = vadd.f32 %v12650_v10, %v15714_v33  ;;  %v12652_v5 = vadd.f32 %v9196_v19, %v16286_v26  ;;  %12515 = vmatprep.mubr.msk.bf16.mxu0 %vm2208_vm10, %v9614_v59 }
 0x505   : > { %v9495_v25 = vadd.f32 %v12651_v2, %v15714_v33  ;;  %12516 = vmatmul.mubr.msk.bf16.gmra.mrb[132].mxu0 %vm2208_vm10, %v9615_v13  ;;  %v9558_v14 = vmax.f32 %v9494_v27, 0.0  ;;  %v16295_v27 = vld [vmem:[#allocation27_spill] sm:$0xff] }
 0x506   : > { %v9493_v24 = vadd.f32 %v12652_v5, %v15714_v33  ;;  %v9556_v49 = vmax.f32 %v9492_v20, 0.0  ;;  %v16296_v20 = vld [vmem:[#allocation28_spill] sm:$0xff] }
 0x507   : > { %v9559_v6 = vmax.f32 %v9495_v25, 0.0 }
 0x508   : > { %v9557_v11 = vmax.f32 %v9493_v24, 0.0  ;;  %v12459_v61 = vpop.f32.mrb[12].mxu1  ;;  %v16297_v24 = vld [vmem:[#allocation29_spill] sm:$0xff] }
 0x509   : > { %v9617_v34 = vpack.c.bf16 %v9559_v6, %v9558_v14  ;;  %v12653_v50 = vadd.f32 %v12459_v61, %v16287_v37  ;;  %v9209_v36 = vpop.f32.mrb[13].mxu1 }
 0x50a   : > { %v9616_v56 = vpack.c.bf16 %v9557_v11, %v9556_v49  ;;  %v12654_v54 = vadd.f32 %v9209_v36, %v16288_v41  ;;  %v12460_v62 = vpop.f32.mrb[14].mxu1  ;;  %v16298_v11 = vld [vmem:[#allocation30_spill] sm:$0xff] }
 0x50b   : > { %v9498_v45 = vadd.f32 %v12653_v50, %v15714_v33  ;;  %v12655_v52 = vadd.f32 %v12460_v62, %v16289_v22  ;;  %v9212_v60 = vpop.f32.mrb[15].mxu1 }
 0x50c   : > { %v9496_v51 = vadd.f32 %v12654_v54, %v15714_v33  ;;  %v12656_v43 = vadd.f32 %v9212_v60, %v16290_v16  ;;  %12519 = vmatprep.mubr.msk.bf16.mxu0 %vm2208_vm10, %v9616_v56 }
 0x50d   : > { %v9499_v12 = vadd.f32 %v12655_v52, %v15714_v33  ;;  %12520 = vmatmul.mubr.msk.bf16.gmra.mrb[136].mxu0 %vm2208_vm10, %v9617_v34  ;;  %v9562_v21 = vmax.f32 %v9498_v45, 0.0  ;;  %v16299_v45 = vld [vmem:[#allocation31_spill] sm:$0xff] }
 0x50e   : > { %v9497_v31 = vadd.f32 %v12656_v43, %v15714_v33  ;;  %v9560_v42 = vmax.f32 %v9496_v51, 0.0  ;;  %v16300_v51 = vld [vmem:[#allocation32_spill] sm:$0xff] }
 0x50f   : > { %v9563_v3 = vmax.f32 %v9499_v12, 0.0 }
 0x510   : > { %v9561_v7 = vmax.f32 %v9497_v31, 0.0  ;;  %v12463_v48 = vpop.f32.mrb[16].mxu1  ;;  %v16301_v31 = vld [vmem:[#allocation33_spill] sm:$0xff] }
 0x511   : > { %v9619_v9 = vpack.c.bf16 %v9563_v3, %v9562_v21  ;;  %v12657_v17 = vadd.f32 %v12463_v48, %v16291_v1  ;;  %v9225_v29 = vpop.f32.mrb[17].mxu1 }
 0x512   : > { %v9618_v57 = vpack.c.bf16 %v9561_v7, %v9560_v42  ;;  %v12658_v46 = vadd.f32 %v9225_v29, %v16292_v0  ;;  %v12464_v55 = vpop.f32.mrb[18].mxu1  ;;  %v16302_v7 = vld [vmem:[#allocation34_spill] sm:$0xff] }
 0x513   : > { %v9502_v18 = vadd.f32 %v12657_v17, %v15714_v33  ;;  %v12659_v40 = vadd.f32 %v12464_v55, %v16293_v38  ;;  %v9228_v44 = vpop.f32.mrb[19].mxu1 }
 0x514   : > { %v9500_v63 = vadd.f32 %v12658_v46, %v15714_v33  ;;  %v12660_v53 = vadd.f32 %v9228_v44, %v16294_v23  ;;  %12523 = vmatprep.mubr.msk.bf16.mxu0 %vm2208_vm10, %v9618_v57 }
 0x515   : > { %v9503_v13 = vadd.f32 %v12659_v40, %v15714_v33  ;;  %12524 = vmatmul.mubr.msk.bf16.gmra.mrb[140].mxu0 %vm2208_vm10, %v9619_v9  ;;  %v9566_v47 = vmax.f32 %v9502_v18, 0.0  ;;  %v16303_v18 = vld [vmem:[#allocation35_spill] sm:$0xff] }
 0x516   : > { %v9501_v28 = vadd.f32 %v12660_v53, %v15714_v33  ;;  %v9564_v59 = vmax.f32 %v9500_v63, 0.0  ;;  %v16304_v63 = vld [vmem:[#allocation36_spill] sm:$0xff] }
 0x517   : > { %v9567_v8 = vmax.f32 %v9503_v13, 0.0 }
 0x518   : > { %v9565_v32 = vmax.f32 %v9501_v28, 0.0  ;;  %v12467_v10 = vpop.f32.mrb[20].mxu1  ;;  %v16305_v28 = vld [vmem:[#allocation37_spill] sm:$0xff] }
 0x519   : > { %v9621_v39 = vpack.c.bf16 %v9567_v8, %v9566_v47  ;;  %v12661_v58 = vadd.f32 %v12467_v10, %v16295_v27  ;;  %v9241_v2 = vpop.f32.mrb[21].mxu1 }
 0x51a   : > { %v9620_v19 = vpack.c.bf16 %v9565_v32, %v9564_v59  ;;  %v12662_v26 = vadd.f32 %v9241_v2, %v16296_v20  ;;  %v12468_v5 = vpop.f32.mrb[22].mxu1  ;;  %v16306_v32 = vld [vmem:[#allocation38_spill] sm:$0xff] }
 0x51b   : > { %v9506_v25 = vadd.f32 %v12661_v58, %v15714_v33  ;;  %v12663_v14 = vadd.f32 %v12468_v5, %v16297_v24  ;;  %v9244_v6 = vpop.f32.mrb[23].mxu1 }
 0x51c   : > { %v9504_v49 = vadd.f32 %v12662_v26, %v15714_v33  ;;  %v12664_v61 = vadd.f32 %v9244_v6, %v16298_v11  ;;  %12527 = vmatprep.mubr.msk.bf16.mxu0 %vm2208_vm10, %v9620_v19 }
 0x51d   : > { %v9507_v34 = vadd.f32 %v12663_v14, %v15714_v33  ;;  %12528 = vmatmul.mubr.msk.bf16.gmra.mrb[144].mxu0 %vm2208_vm10, %v9621_v39  ;;  %v9570_v50 = vmax.f32 %v9506_v25, 0.0 }
 0x51e   : > { %v9505_v37 = vadd.f32 %v12664_v61, %v15714_v33  ;;  %v9568_v56 = vmax.f32 %v9504_v49, 0.0  ;;  %v16307_v61 = vld [vmem:[#allocation39_spill] sm:$0xff] }
 0x51f   : > { %v9571_v36 = vmax.f32 %v9507_v34, 0.0 }
 0x520   : > { %v9569_v41 = vmax.f32 %v9505_v37, 0.0  ;;  %v12471_v54 = vpop.f32.mrb[24].mxu1 }
 0x521   : > { %v9623_v62 = vpack.c.bf16 %v9571_v36, %v9570_v50  ;;  %v12665_v22 = vadd.f32 %v12471_v54, %v16299_v45  ;;  %v9257_v52 = vpop.f32.mrb[25].mxu1  ;;  %v16308_v36 = vld [vmem:[#allocation40_spill] sm:$0xff] }
 0x522   : > { %v9622_v60 = vpack.c.bf16 %v9569_v41, %v9568_v56  ;;  %v12666_v16 = vadd.f32 %v9257_v52, %v16300_v51  ;;  %v12472_v43 = vpop.f32.mrb[26].mxu1 }
 0x523   : > { %v9510_v12 = vadd.f32 %v12665_v22, %v15714_v33  ;;  %v12667_v21 = vadd.f32 %v12472_v43, %v16301_v31  ;;  %v9260_v3 = vpop.f32.mrb[27].mxu1 }
 0x524   : > { %v9508_v42 = vadd.f32 %v12666_v16, %v15714_v33  ;;  %v12668_v48 = vadd.f32 %v9260_v3, %v16302_v7  ;;  %12531 = vmatprep.mubr.msk.bf16.mxu0 %vm2208_vm10, %v9622_v60  ;;  %v16309_v60 = vld [vmem:[#allocation41_spill] sm:$0xff] }
 0x525   : > { %v9511_v9 = vadd.f32 %v12667_v21, %v15714_v33  ;;  %12532 = vmatmul.mubr.msk.bf16.gmra.mrb[148].mxu0 %vm2208_vm10, %v9623_v62  ;;  %v9574_v17 = vmax.f32 %v9510_v12, 0.0  ;;  %v16310_v12 = vld [vmem:[#allocation42_spill] sm:$0xff] }
 0x526   : > { %v9509_v1 = vadd.f32 %v12668_v48, %v15714_v33  ;;  %v9572_v57 = vmax.f32 %v9508_v42, 0.0  ;;  %v16311_v42 = vld [vmem:[#allocation43_spill] sm:$0xff] }
 0x527   : > { %v9575_v29 = vmax.f32 %v9511_v9, 0.0 }
 0x528   : > { %v9573_v0 = vmax.f32 %v9509_v1, 0.0  ;;  %v12475_v46 = vpop.f32.mrb[28].mxu1  ;;  %v16312_v1 = vld [vmem:[#allocation44_spill] sm:$0xff] }
 0x529   : > { %v9625_v55 = vpack.c.bf16 %v9575_v29, %v9574_v17  ;;  %v12669_v38 = vadd.f32 %v12475_v46, %v16303_v18  ;;  %v9273_v40 = vpop.f32.mrb[29].mxu1 }
 0x52a   : > { %v9624_v44 = vpack.c.bf16 %v9573_v0, %v9572_v57  ;;  %v12670_v23 = vadd.f32 %v9273_v40, %v16304_v63  ;;  %v12476_v53 = vpop.f32.mrb[30].mxu1 }
 0x52b   : > { %v9514_v13 = vadd.f32 %v12669_v38, %v15714_v33  ;;  %v12671_v47 = vadd.f32 %v12476_v53, %v16305_v28  ;;  %v9276_v8 = vpop.f32.mrb[31].mxu1 }
 0x52c   : > { %v9512_v59 = vadd.f32 %v12670_v23, %v15714_v33  ;;  %v12672_v10 = vadd.f32 %v9276_v8, %v16306_v32  ;;  %12535 = vmatprep.mubr.msk.bf16.mxu0 %vm2208_vm10, %v9624_v44  ;;  %v16313_v44 = vld [vmem:[#allocation45_spill] sm:$0xff] }
 0x52d   : > { %v9515_v39 = vadd.f32 %v12671_v47, %v15714_v33  ;;  %12536 = vmatmul.mubr.msk.bf16.gmra.mrb[152].mxu0 %vm2208_vm10, %v9625_v55  ;;  %v9578_v58 = vmax.f32 %v9514_v13, 0.0  ;;  %v16314_v13 = vld [vmem:[#allocation46_spill] sm:$0xff] }
 0x52e   : > { %v9513_v27 = vadd.f32 %v12672_v10, %v15714_v33  ;;  %v9576_v19 = vmax.f32 %v9512_v59, 0.0  ;;  %v16315_v59 = vld [vmem:[#allocation47_spill] sm:$0xff] }
 0x52f   : > { %v9579_v2 = vmax.f32 %v9515_v39, 0.0 }
 0x530   : > { %v9577_v20 = vmax.f32 %v9513_v27, 0.0  ;;  %v12479_v26 = vpop.f32.mrb[32].mxu1  ;;  %v16316_v27 = vld [vmem:[#allocation48_spill] sm:$0xff] }
 0x531   : > { %v9627_v5 = vpack.c.bf16 %v9579_v2, %v9578_v58  ;;  %v12673_v25 = vadd.f32 %v12479_v26, %v15306_v30  ;;  %v9289_v24 = vpop.f32.mrb[33].mxu1 }
 0x532   : > { %v9626_v14 = vpack.c.bf16 %v9577_v20, %v9576_v19  ;;  %v12674_v6 = vadd.f32 %v9289_v24, %v15310_v15  ;;  %v12480_v49 = vpop.f32.mrb[34].mxu1 }
 0x533   : > { %v9518_v11 = vadd.f32 %v12673_v25, %v15714_v33  ;;  %v12675_v34 = vadd.f32 %v12480_v49, %v16307_v61  ;;  %v9292_v37 = vpop.f32.mrb[35].mxu1 }
 0x534   : > { %v9516_v50 = vadd.f32 %v12674_v6, %v15714_v33  ;;  %v12676_v56 = vadd.f32 %v9292_v37, %v16308_v36  ;;  %12539 = vmatprep.mubr.msk.bf16.mxu0 %vm2208_vm10, %v9626_v14  ;;  %v16317_v6 = vld [vmem:[#allocation49_spill] sm:$0xff] }
 0x535   : > { %v9519_v41 = vadd.f32 %v12675_v34, %v15714_v33  ;;  %12540 = vmatmul.mubr.msk.bf16.gmra.mrb[156].mxu0 %vm2208_vm10, %v9627_v5  ;;  %v9582_v54 = vmax.f32 %v9518_v11, 0.0  ;;  %v16318_v34 = vld [vmem:[#allocation50_spill] sm:$0xff] }
 0x536   : > { %v9517_v30 = vadd.f32 %v12676_v56, %v15714_v33  ;;  %v9580_v62 = vmax.f32 %v9516_v50, 0.0  ;;  %v16319_v56 = vld [vmem:[#allocation51_spill] sm:$0xff] }
 0x537   : > { %v9583_v15 = vmax.f32 %v9519_v41, 0.0 }
 0x538   : > { %v9581_v45 = vmax.f32 %v9517_v30, 0.0  ;;  %v12483_v22 = vpop.f32.mrb[36].mxu1 }
 0x539   : > { %v9629_v52 = vpack.c.bf16 %v9583_v15, %v9582_v54  ;;  %v12677_v51 = vadd.f32 %v12483_v22, %v16309_v60  ;;  %v9305_v16 = vpop.f32.mrb[37].mxu1  ;;  %v16320_v15 = vld [vmem:[#allocation52_spill] sm:$0xff] }
 0x53a   : > { %v9628_v43 = vpack.c.bf16 %v9581_v45, %v9580_v62  ;;  %v12678_v31 = vadd.f32 %v9305_v16, %v16310_v12  ;;  %v12484_v21 = vpop.f32.mrb[38].mxu1 }
 0x53b   : > { %v9522_v3 = vadd.f32 %v12677_v51, %v15714_v33  ;;  %v12679_v7 = vadd.f32 %v12484_v21, %v16311_v42  ;;  %v9308_v48 = vpop.f32.mrb[39].mxu1 }
 0x53c   : > { %v9520_v9 = vadd.f32 %v12678_v31, %v15714_v33  ;;  %v12680_v17 = vadd.f32 %v9308_v48, %v16312_v1  ;;  %12543 = vmatprep.mubr.msk.bf16.mxu0 %vm2208_vm10, %v9628_v43  ;;  %v16321_v31 = vld [vmem:[#allocation53_spill] sm:$0xff] }
 0x53d   : > { %v9523_v29 = vadd.f32 %v12679_v7, %v15714_v33  ;;  %12544 = vmatmul.mubr.msk.bf16.gmra.mrb[160].mxu0 %vm2208_vm10, %v9629_v52  ;;  %v9586_v0 = vmax.f32 %v9522_v3, 0.0  ;;  %v16322_v7 = vld [vmem:[#allocation54_spill] sm:$0xff] }
 0x53e   : > { %v9521_v57 = vadd.f32 %v12680_v17, %v15714_v33  ;;  %v9584_v55 = vmax.f32 %v9520_v9, 0.0  ;;  %v16323_v17 = vld [vmem:[#allocation55_spill] sm:$0xff] }
 0x53f   : > { %v9587_v46 = vmax.f32 %v9523_v29, 0.0 }
 0x540   : > { %v9585_v18 = vmax.f32 %v9521_v57, 0.0  ;;  %v12487_v38 = vpop.f32.mrb[40].mxu1 }
 0x541   : > { %v9631_v40 = vpack.c.bf16 %v9587_v46, %v9586_v0  ;;  %v12681_v63 = vadd.f32 %v12487_v38, %v16313_v44  ;;  %v9321_v23 = vpop.f32.mrb[41].mxu1  ;;  %v16324_v46 = vld [vmem:[#allocation56_spill] sm:$0xff] }
 0x542   : > { %v9630_v53 = vpack.c.bf16 %v9585_v18, %v9584_v55  ;;  %v12682_v28 = vadd.f32 %v9321_v23, %v16314_v13  ;;  %v12488_v47 = vpop.f32.mrb[42].mxu1 }
 0x543   : > { %v9526_v8 = vadd.f32 %v12681_v63, %v15714_v33  ;;  %v12683_v32 = vadd.f32 %v12488_v47, %v16315_v59  ;;  %v9324_v10 = vpop.f32.mrb[43].mxu1 }
 0x544   : > { %v9524_v39 = vadd.f32 %v12682_v28, %v15714_v33  ;;  %v12684_v58 = vadd.f32 %v9324_v10, %v16316_v27  ;;  %12547 = vmatprep.mubr.msk.bf16.mxu0 %vm2208_vm10, %v9630_v53  ;;  %v16325_v28 = vld [vmem:[#allocation57_spill] sm:$0xff] }
 0x545   : > { %v9527_v2 = vadd.f32 %v12683_v32, %v15714_v33  ;;  %12548 = vmatmul.mubr.msk.bf16.gmra.mrb[164].mxu0 %vm2208_vm10, %v9631_v40  ;;  %v9590_v20 = vmax.f32 %v9526_v8, 0.0  ;;  %v16326_v32 = vld [vmem:[#allocation58_spill] sm:$0xff] }
 0x546   : > { %v9525_v19 = vadd.f32 %v12684_v58, %v15714_v33  ;;  %v9588_v5 = vmax.f32 %v9524_v39, 0.0  ;;  %v16327_v58 = vld [vmem:[#allocation59_spill] sm:$0xff] }
 0x547   : > { %v9591_v26 = vmax.f32 %v9527_v2, 0.0 }
 0x548   : > { %v9589_v25 = vmax.f32 %v9525_v19, 0.0  ;;  %v12491_v24 = vpop.f32.mrb[44].mxu1 }
 0x549   : > { %v9633_v14 = vpack.c.bf16 %v9591_v26, %v9590_v20  ;;  %v12685_v49 = vadd.f32 %v12491_v24, %v16317_v6  ;;  %v9337_v11 = vpop.f32.mrb[45].mxu1  ;;  %v16328_v26 = vld [vmem:[#allocation60_spill] sm:$0xff] }
 0x54a   : > { %v9632_v61 = vpack.c.bf16 %v9589_v25, %v9588_v5  ;;  %v12686_v37 = vadd.f32 %v9337_v11, %v16318_v34  ;;  %v12492_v50 = vpop.f32.mrb[46].mxu1 }
 0x54b   : > { %v9530_v36 = vadd.f32 %v12685_v49, %v15714_v33  ;;  %v12687_v41 = vadd.f32 %v12492_v50, %v16319_v56  ;;  %v9340_v30 = vpop.f32.mrb[47].mxu1 }
 0x54c   : > { %v9528_v54 = vadd.f32 %v12686_v37, %v15714_v33  ;;  %v12688_v62 = vadd.f32 %v9340_v30, %v16320_v15  ;;  %12551 = vmatprep.mubr.msk.bf16.mxu0 %vm2208_vm10, %v9632_v61  ;;  %v16329_v37 = vld [vmem:[#allocation61_spill] sm:$0xff] }
 0x54d   : > { %v9531_v45 = vadd.f32 %v12687_v41, %v15714_v33  ;;  %12552 = vmatmul.mubr.msk.bf16.gmra.mrb[168].mxu0 %vm2208_vm10, %v9633_v14  ;;  %v9594_v52 = vmax.f32 %v9530_v36, 0.0  ;;  %v16330_v41 = vld [vmem:[#allocation62_spill] sm:$0xff] }
 0x54e   : > { %v9529_v22 = vadd.f32 %v12688_v62, %v15714_v33  ;;  %v9592_v51 = vmax.f32 %v9528_v54, 0.0  ;;  %v16331_v62 = vld [vmem:[#allocation63_spill] sm:$0xff] }
 0x54f   : > { %v9595_v60 = vmax.f32 %v9531_v45, 0.0 }
 0x550   : > { %v9593_v16 = vmax.f32 %v9529_v22, 0.0  ;;  %v12495_v43 = vpop.f32.mrb[48].mxu1 }
 0x551   : > { %v9635_v12 = vpack.c.bf16 %v9595_v60, %v9594_v52  ;;  %v12689_v21 = vadd.f32 %v12495_v43, %v16321_v31  ;;  %v9353_v3 = vpop.f32.mrb[49].mxu1  ;;  %v16332_v60 = vld [vmem:[#allocation64_spill] sm:$0xff] }
 0x552   : > { %v9634_v42 = vpack.c.bf16 %v9593_v16, %v9592_v51  ;;  %v12690_v48 = vadd.f32 %v9353_v3, %v16322_v7  ;;  %v12496_v9 = vpop.f32.mrb[50].mxu1 }
 0x553   : > { %v9534_v1 = vadd.f32 %v12689_v21, %v15714_v33  ;;  %v12691_v29 = vadd.f32 %v12496_v9, %v16323_v17  ;;  %v9356_v57 = vpop.f32.mrb[51].mxu1 }
 0x554   : > { %v9532_v0 = vadd.f32 %v12690_v48, %v15714_v33  ;;  %v12692_v55 = vadd.f32 %v9356_v57, %v16324_v46  ;;  %12555 = vmatprep.mubr.msk.bf16.mxu0 %vm2208_vm10, %v9634_v42  ;;  %v16333_v48 = vld [vmem:[#allocation65_spill] sm:$0xff] }
 0x555   : > { %v9535_v18 = vadd.f32 %v12691_v29, %v15714_v33  ;;  %12556 = vmatmul.mubr.msk.bf16.gmra.mrb[172].mxu0 %vm2208_vm10, %v9635_v12  ;;  %v9598_v40 = vmax.f32 %v9534_v1, 0.0  ;;  %v16334_v29 = vld [vmem:[#allocation66_spill] sm:$0xff] }
 0x556   : > { %v9533_v38 = vadd.f32 %v12692_v55, %v15714_v33  ;;  %v9596_v63 = vmax.f32 %v9532_v0, 0.0  ;;  %v16335_v55 = vld [vmem:[#allocation67_spill] sm:$0xff] }
 0x557   : > { %v9599_v44 = vmax.f32 %v9535_v18, 0.0 }
 0x558   : > { %v9597_v23 = vmax.f32 %v9533_v38, 0.0  ;;  %v12499_v53 = vpop.f32.mrb[52].mxu1 }
 0x559   : > { %v9637_v13 = vpack.c.bf16 %v9599_v44, %v9598_v40  ;;  %v12693_v47 = vadd.f32 %v12499_v53, %v16325_v28  ;;  %v9369_v8 = vpop.f32.mrb[53].mxu1  ;;  %v16336_v44 = vld [vmem:[#allocation68_spill] sm:$0xff] }
 0x55a   : > { %v9636_v59 = vpack.c.bf16 %v9597_v23, %v9596_v63  ;;  %v12694_v10 = vadd.f32 %v9369_v8, %v16326_v32  ;;  %v12500_v39 = vpop.f32.mrb[54].mxu1 }
 0x55b   : > { %v9538_v27 = vadd.f32 %v12693_v47, %v15714_v33  ;;  %v12695_v2 = vadd.f32 %v12500_v39, %v16327_v58  ;;  %v9372_v19 = vpop.f32.mrb[55].mxu1  ;;  %v13586_v39 = vld [vmem:[%s13940_s11 + $0x8] sm:$0xff]   ;;  %v13589_v58 = vld [vmem:[%s13940_s11 + $0x20] sm:$0xff]  }
 0x55c   : > { %v9536_v20 = vadd.f32 %v12694_v10, %v15714_v33  ;;  %v12696_v5 = vadd.f32 %v9372_v19, %v16328_v26  ;;  %12559 = vmatprep.mubr.msk.bf16.mxu0 %vm2208_vm10, %v9636_v59  ;;  %v13585_v10 = vld [vmem:[%s13940_s11] sm:$0xff]   ;;  %v13591_v19 = vld [vmem:[%s13940_s11 + $0x30] sm:$0xff]  }
 0x55d   : > { %v9539_v25 = vadd.f32 %v12695_v2, %v15714_v33  ;;  %12560 = vmatmul.mubr.msk.bf16.gmra.mrb[176].mxu0 %vm2208_vm10, %v9637_v13  ;;  %v9602_v14 = vmax.f32 %v9538_v27, 0.0  ;;  %v13588_v27 = vld [vmem:[%s13940_s11 + $0x18] sm:$0xff]   ;;  %v13590_v2 = vld [vmem:[%s13940_s11 + $0x28] sm:$0xff]   ;;  %v13593_v26 = vld [vmem:[%s13940_s11 + $0x40] sm:$0xff]  }
 0x55e   : > { %v9537_v24 = vadd.f32 %v12696_v5, %v15714_v33  ;;  %v9600_v49 = vmax.f32 %v9536_v20, 0.0  ;;  %v13592_v20 = vld [vmem:[%s13940_s11 + $0x38] sm:$0xff]   ;;  %v13594_v5 = vld [vmem:[%s13940_s11 + $0x48] sm:$0xff]  }
 0x55f   : > { %v9603_v6 = vmax.f32 %v9539_v25, 0.0  ;;  %v13595_v25 = vld [vmem:[%s13940_s11 + $0x50] sm:$0xff]  }
 0x560   : > { %v9601_v11 = vmax.f32 %v9537_v24, 0.0  ;;  %v12503_v61 = vpop.f32.mrb[56].mxu1  ;;  %v13596_v24 = vld [vmem:[%s13940_s11 + $0x58] sm:$0xff]  }
 0x561   : > { %v9639_v34 = vpack.c.bf16 %v9603_v6, %v9602_v14  ;;  %v12697_v50 = vadd.f32 %v12503_v61, %v16329_v37  ;;  %v9385_v36 = vpop.f32.mrb[57].mxu1  ;;  %v13597_v14 = vld [vmem:[%s13940_s11 + $0x60] sm:$0xff]   ;;  %v13598_v6 = vld [vmem:[%s13940_s11 + $0x68] sm:$0xff]   ;;  %v13603_v37 = vld [vmem:[%s13940_s11 + $0x90] sm:$0xff]  }
 0x562   : > { %v9638_v56 = vpack.c.bf16 %v9601_v11, %v9600_v49  ;;  %v12698_v30 = vadd.f32 %v9385_v36, %v16330_v41  ;;  %v12504_v54 = vpop.f32.mrb[58].mxu1  ;;  %v13599_v49 = vld [vmem:[%s13940_s11 + $0x70] sm:$0xff]   ;;  %v13600_v11 = vld [vmem:[%s13940_s11 + $0x78] sm:$0xff]   ;;  %v13601_v61 = vld [vmem:[%s13940_s11 + $0x80] sm:$0xff]  }
 0x563   : > { %v9542_v15 = vadd.f32 %v12697_v50, %v15714_v33  ;;  %v12699_v45 = vadd.f32 %v12504_v54, %v16331_v62  ;;  %v9388_v22 = vpop.f32.mrb[59].mxu1  ;;  %v13604_v50 = vld [vmem:[%s13940_s11 + $0x98] sm:$0xff]   ;;  %v13605_v36 = vld [vmem:[%s13940_s11 + $0xa0] sm:$0xff]   ;;  %v13607_v41 = vld [vmem:[%s13940_s11 + $0xb0] sm:$0xff]  }
 0x564   : > { %v9540_v52 = vadd.f32 %v12698_v30, %v15714_v33  ;;  %v12700_v51 = vadd.f32 %v9388_v22, %v16332_v60  ;;  %12563 = vmatprep.mubr.msk.bf16.mxu0 %vm2208_vm10, %v9638_v56  ;;  %v13606_v56 = vld [vmem:[%s13940_s11 + $0xa8] sm:$0xff]   ;;  %v13608_v30 = vld [vmem:[%s13940_s11 + $0xb8] sm:$0xff]   ;;  %v13609_v54 = vld [vmem:[%s13940_s11 + $0xc0] sm:$0xff]  }
 0x565   : > { %v9543_v16 = vadd.f32 %v12699_v45, %v15714_v33  ;;  %12564 = vmatmul.mubr.msk.bf16.gmra.mrb[180].mxu0 %vm2208_vm10, %v9639_v34  ;;  %v9606_v12 = vmax.f32 %v9542_v15, 0.0  ;;  %v13602_v34 = vld [vmem:[%s13940_s11 + $0x88] sm:$0xff]   ;;  %v13611_v62 = vld [vmem:[%s13940_s11 + $0xd0] sm:$0xff]   ;;  %v13612_v45 = vld [vmem:[%s13940_s11 + $0xd8] sm:$0xff]  }
 0x566   : > { %v9541_v43 = vadd.f32 %v12700_v51, %v15714_v33  ;;  %v9604_v21 = vmax.f32 %v9540_v52, 0.0  ;;  %v13610_v15 = vld [vmem:[%s13940_s11 + $0xc8] sm:$0xff]   ;;  %v13613_v22 = vld [vmem:[%s13940_s11 + $0xe0] sm:$0xff]   ;;  %v13615_v60 = vld [vmem:[%s13940_s11 + $0xf0] sm:$0xff]  }
 0x567   : > { %v9607_v31 = vmax.f32 %v9543_v16, 0.0  ;;  %v13614_v52 = vld [vmem:[%s13940_s11 + $0xe8] sm:$0xff]   ;;  %v13616_v51 = vld [vmem:[%s13940_s11 + $0xf8] sm:$0xff]   ;;  %v9647_v16 = vsub.s32 2, %v14088_v35 }
 0x568   : > { %v9605_v3 = vmax.f32 %v9541_v43, 0.0  ;;  %v12507_v42 = vpop.f32.mrb[60].mxu1  ;;  %v10041_v43 = vsub.s32 3, %v14088_v35 }
 0x569   : > { %v9641_v7 = vpack.c.bf16 %v9607_v31, %v9606_v12  ;;  %v12701_v9 = vadd.f32 %v12507_v42, %v16333_v48  ;;  %v9401_v1 = vpop.f32.mrb[61].mxu1  ;;  %v9648_v12 = vrot.slane %v15711_v4, %v9647_v16 }
 0x56a   : > { %v9640_v17 = vpack.c.bf16 %v9605_v3, %v9604_v21  ;;  %v12702_v57 = vadd.f32 %v9401_v1, %v16334_v29  ;;  %v12508_v0 = vpop.f32.mrb[62].mxu1  ;;  %v10042_v31 = vrot.slane %v15711_v4, %v10041_v43 }
 0x56b   : > { %v9546_v46 = vadd.f32 %v12701_v9, %v15714_v33  ;;  %v12703_v18 = vadd.f32 %v12508_v0, %v16335_v55  ;;  %v9404_v38 = vpop.f32.mrb[63].mxu1 }
 0x56c   : > { %v9544_v40 = vadd.f32 %v12702_v57, %v15714_v33  ;;  %v12704_v63 = vadd.f32 %v9404_v38, %v16336_v44  ;;  %12567 = vmatprep.mubr.msk.bf16.mxu0 %vm2208_vm10, %v9640_v17  ;;  %v15945_v21 = vadd.f32 %v10042_v31, %v9648_v12 }
 0x56d   : > { %v9547_v23 = vadd.f32 %v12703_v18, %v15714_v33  ;;  %12568 = vmatmul.mubr.msk.bf16.gmra.mrb[184].mxu0 %vm2208_vm10, %v9641_v7  ;;  %v9610_v13 = vmax.f32 %v9546_v46, 0.0 }
 0x56e   : > { %v9545_v53 = vadd.f32 %v12704_v63, %v15714_v33  ;;  %v9608_v47 = vmax.f32 %v9544_v40, 0.0  ;;  %v13587_v33 = vld [vmem:[%s13940_s11 + $0x10] sm:$0xff]  }
 0x56f   : > { %v9611_v28 = vmax.f32 %v9547_v23, 0.0 }
 0x570   : > { %v9609_v8 = vmax.f32 %v9545_v53, 0.0 }
 0x571   : > { %v9643_v59 = vpack.c.bf16 %v9611_v28, %v9610_v13 }
 0x572   : > { %v9642_v32 = vpack.c.bf16 %v9609_v8, %v9608_v47 }
 0x574   : > { %12571 = vmatprep.mubr.msk.bf16.mxu0 %vm2208_vm10, %v9642_v32 }
 0x575   : > { %12572 = vmatmul.mubr.msk.bf16.gmra.mrb[188].mxu0 %vm2208_vm10, %v9643_v59 }
 0x576   : > { %12577 = vmatprep.mubr.msk.bf16.mxu0 %vm526_vm0, %v13585_v10 }
 0x57d   : > { %12578 = vmatmul.mubr.msk.bf16.vlgmr.msra.gmra.mrb[128].mxu0 %vm526_vm0, %v13586_v39 }
 0x57e   : > { %12581 = vmatprep.mubr.msk.bf16.mxu0 %vm526_vm0, %v13587_v33 }
 0x585   : > { %12582 = vmatmul.mubr.msk.bf16.gmra.mrb[132].mxu0 %vm526_vm0, %v13588_v27 }
 0x586   : > { %12585 = vmatprep.mubr.msk.bf16.mxu0 %vm526_vm0, %v13589_v58 }
 0x58d   : > { %12586 = vmatmul.mubr.msk.bf16.gmra.mrb[136].mxu0 %vm526_vm0, %v13590_v2 }
 0x58e   : > { %12589 = vmatprep.mubr.msk.bf16.mxu0 %vm526_vm0, %v13591_v19 }
 0x595   : > { %12590 = vmatmul.mubr.msk.bf16.gmra.mrb[140].mxu0 %vm526_vm0, %v13592_v20 }
 0x596   : > { %12593 = vmatprep.mubr.msk.bf16.mxu0 %vm526_vm0, %v13593_v26 }
 0x59d   : > { %12594 = vmatmul.mubr.msk.bf16.gmra.mrb[144].mxu0 %vm526_vm0, %v13594_v5 }
 0x59e   : > { %12597 = vmatprep.mubr.msk.bf16.mxu0 %vm526_vm0, %v13595_v25 }
 0x5a5   : > { %12598 = vmatmul.mubr.msk.bf16.gmra.mrb[148].mxu0 %vm526_vm0, %v13596_v24 }
 0x5a6   : > { %12601 = vmatprep.mubr.msk.bf16.mxu0 %vm526_vm0, %v13597_v14 }
 0x5ad   : > { %12602 = vmatmul.mubr.msk.bf16.gmra.mrb[152].mxu0 %vm526_vm0, %v13598_v6 }
 0x5ae   : > { %12605 = vmatprep.mubr.msk.bf16.mxu0 %vm526_vm0, %v13599_v49 }
 0x5b5   : > { %12606 = vmatmul.mubr.msk.bf16.gmra.mrb[156].mxu0 %vm526_vm0, %v13600_v11 }
 0x5b6   : > { %12609 = vmatprep.mubr.msk.bf16.mxu0 %vm526_vm0, %v13601_v61 }
 0x5bd   : > { %12610 = vmatmul.mubr.msk.bf16.gmra.mrb[160].mxu0 %vm526_vm0, %v13602_v34 }
 0x5be   : > { %12613 = vmatprep.mubr.msk.bf16.mxu0 %vm526_vm0, %v13603_v37 }
 0x5c5   : > { %12614 = vmatmul.mubr.msk.bf16.gmra.mrb[164].mxu0 %vm526_vm0, %v13604_v50 }
 0x5c6   : > { %12617 = vmatprep.mubr.msk.bf16.mxu0 %vm526_vm0, %v13605_v36 }
 0x5cd   : > { %12618 = vmatmul.mubr.msk.bf16.gmra.mrb[168].mxu0 %vm526_vm0, %v13606_v56 }
 0x5ce   : > { %12621 = vmatprep.mubr.msk.bf16.mxu0 %vm526_vm0, %v13607_v41 }
 0x5d5   : > { %12622 = vmatmul.mubr.msk.bf16.gmra.mrb[172].mxu0 %vm526_vm0, %v13608_v30 }
 0x5d6   : > { %12625 = vmatprep.mubr.msk.bf16.mxu0 %vm526_vm0, %v13609_v54 }
 0x5dd   : > { %12626 = vmatmul.mubr.msk.bf16.gmra.mrb[176].mxu0 %vm526_vm0, %v13610_v15 }
 0x5de   : > { %12629 = vmatprep.mubr.msk.bf16.mxu0 %vm526_vm0, %v13611_v62 }
 0x5e5   : > { %12630 = vmatmul.mubr.msk.bf16.gmra.mrb[180].mxu0 %vm526_vm0, %v13612_v45 }
 0x5e6   : > { %12633 = vmatprep.mubr.msk.bf16.mxu0 %vm526_vm0, %v13613_v22 }
 0x5ed   : > { %12634 = vmatmul.mubr.msk.bf16.gmra.mrb[184].mxu0 %vm526_vm0, %v13614_v52 }
 0x5ee   : > { %12637 = vmatprep.mubr.msk.bf16.mxu0 %vm526_vm0, %v13615_v60 }
 0x5f5   : > { %12638 = vmatmul.mubr.msk.bf16.gmra.mrb[188].mxu0 %vm526_vm0, %v13616_v51  ;;  %vm10722_vm0 = vcmask 257024  }
 0x650   : > { %v12579_v3 = vpop.f32.mrb[128].mxu0 }
 0x651   : > { %v12706_v42 = vadd.f32 %v15945_v21, %v12579_v3  ;;  %v10083_v7 = vpop.f32.mrb[129].mxu0 }
 0x652   : > { %v12708_v48 = vadd.f32 %v15945_v21, %v10083_v7  ;;  %v12580_v9 = vpop.f32.mrb[130].mxu0 }
 0x653   : > { %v10404_v1 = vmax.f32 %v12706_v42, 0.0  ;;  %v12710_v17 = vadd.f32 %v15945_v21, %v12580_v9  ;;  %v10086_v29 = vpop.f32.mrb[131].mxu0 }
 0x654   : > { %v10402_v35 = vmax.f32 %v12708_v48, 0.0  ;;  %v12712_v57 = vadd.f32 %v15945_v21, %v10086_v29 }
 0x655   : > { %v11389_v0 = vpack.c.bf16 %v10404_v1, %v10404_v1  ;;  %v10405_v4 = vmax.f32 %v12710_v17, 0.0 }
 0x656   : > { %v11387_v46 = vpack.c.bf16 %v10402_v35, %v10402_v35  ;;  %v10403_v55 = vmax.f32 %v12712_v57, 0.0 }
 0x657   : > { %10725 = vst.msk [vmem:[%s15953_s18 + $0x8] sm:$0xf] %vm10722_vm0, %v11389_v0  ;;  %v11390_v18 = vpack.c.bf16 %v10405_v4, %v10405_v4 }
 0x658   : > { %10723 = vst.msk [vmem:[%s15953_s18] sm:$0xf] %vm10722_vm0, %v11387_v46  ;;  %v11388_v38 = vpack.c.bf16 %v10403_v55, %v10403_v55  ;;  %v12583_v40 = vpop.f32.mrb[132].mxu0 }
 0x659   : > { %10726 = vst.msk [vmem:[%s15953_s18 + $0xc] sm:$0xf] %vm10722_vm0, %v11390_v18  ;;  %v12714_v44 = vadd.f32 %v15945_v21, %v12583_v40  ;;  %v10099_v63 = vpop.f32.mrb[133].mxu0 }
 0x65a   : > { %10724 = vst.msk [vmem:[%s15953_s18 + $0x4] sm:$0xf] %vm10722_vm0, %v11388_v38  ;;  %v12716_v23 = vadd.f32 %v15945_v21, %v10099_v63  ;;  %v12584_v53 = vpop.f32.mrb[134].mxu0 }
 0x65b   : > { %v10408_v13 = vmax.f32 %v12714_v44, 0.0  ;;  %v12718_v28 = vadd.f32 %v15945_v21, %v12584_v53  ;;  %v10102_v47 = vpop.f32.mrb[135].mxu0 }
 0x65c   : > { %v10406_v8 = vmax.f32 %v12716_v23, 0.0  ;;  %v12720_v59 = vadd.f32 %v15945_v21, %v10102_v47 }
 0x65d   : > { %v11393_v32 = vpack.c.bf16 %v10408_v13, %v10408_v13  ;;  %v10409_v10 = vmax.f32 %v12718_v28, 0.0 }
 0x65e   : > { %v11391_v39 = vpack.c.bf16 %v10406_v8, %v10406_v8  ;;  %v10407_v33 = vmax.f32 %v12720_v59, 0.0 }
 0x65f   : > { %10729 = vst.msk [vmem:[%s15953_s18 + $0x18] sm:$0xf] %vm10722_vm0, %v11393_v32  ;;  %v11394_v27 = vpack.c.bf16 %v10409_v10, %v10409_v10 }
 0x660   : > { %10727 = vst.msk [vmem:[%s15953_s18 + $0x10] sm:$0xf] %vm10722_vm0, %v11391_v39  ;;  %v11392_v58 = vpack.c.bf16 %v10407_v33, %v10407_v33  ;;  %v12587_v2 = vpop.f32.mrb[136].mxu0 }
 0x661   : > { %10730 = vst.msk [vmem:[%s15953_s18 + $0x1c] sm:$0xf] %vm10722_vm0, %v11394_v27  ;;  %v12722_v19 = vadd.f32 %v15945_v21, %v12587_v2  ;;  %v10115_v20 = vpop.f32.mrb[137].mxu0 }
 0x662   : > { %10728 = vst.msk [vmem:[%s15953_s18 + $0x14] sm:$0xf] %vm10722_vm0, %v11392_v58  ;;  %v12724_v26 = vadd.f32 %v15945_v21, %v10115_v20  ;;  %v12588_v5 = vpop.f32.mrb[138].mxu0 }
 0x663   : > { %v10412_v25 = vmax.f32 %v12722_v19, 0.0  ;;  %v12726_v24 = vadd.f32 %v15945_v21, %v12588_v5  ;;  %v10118_v14 = vpop.f32.mrb[139].mxu0 }
 0x664   : > { %v10410_v6 = vmax.f32 %v12724_v26, 0.0  ;;  %v12728_v49 = vadd.f32 %v15945_v21, %v10118_v14 }
 0x665   : > { %v11397_v11 = vpack.c.bf16 %v10412_v25, %v10412_v25  ;;  %v10413_v61 = vmax.f32 %v12726_v24, 0.0 }
 0x666   : > { %v11395_v34 = vpack.c.bf16 %v10410_v6, %v10410_v6  ;;  %v10411_v37 = vmax.f32 %v12728_v49, 0.0 }
 0x667   : > { %10733 = vst.msk [vmem:[%s15953_s18 + $0x28] sm:$0xf] %vm10722_vm0, %v11397_v11  ;;  %v11398_v50 = vpack.c.bf16 %v10413_v61, %v10413_v61 }
 0x668   : > { %10731 = vst.msk [vmem:[%s15953_s18 + $0x20] sm:$0xf] %vm10722_vm0, %v11395_v34  ;;  %v11396_v36 = vpack.c.bf16 %v10411_v37, %v10411_v37  ;;  %v12591_v56 = vpop.f32.mrb[140].mxu0 }
 0x669   : > { %10734 = vst.msk [vmem:[%s15953_s18 + $0x2c] sm:$0xf] %vm10722_vm0, %v11398_v50  ;;  %v12730_v41 = vadd.f32 %v15945_v21, %v12591_v56  ;;  %v10131_v30 = vpop.f32.mrb[141].mxu0 }
 0x66a   : > { %10732 = vst.msk [vmem:[%s15953_s18 + $0x24] sm:$0xf] %vm10722_vm0, %v11396_v36  ;;  %v12732_v54 = vadd.f32 %v15945_v21, %v10131_v30  ;;  %v12592_v15 = vpop.f32.mrb[142].mxu0 }
 0x66b   : > { %v10416_v62 = vmax.f32 %v12730_v41, 0.0  ;;  %v12734_v45 = vadd.f32 %v15945_v21, %v12592_v15  ;;  %v10134_v22 = vpop.f32.mrb[143].mxu0 }
 0x66c   : > { %v10414_v52 = vmax.f32 %v12732_v54, 0.0  ;;  %v12736_v60 = vadd.f32 %v15945_v21, %v10134_v22 }
 0x66d   : > { %v11401_v51 = vpack.c.bf16 %v10416_v62, %v10416_v62  ;;  %v10417_v16 = vmax.f32 %v12734_v45, 0.0 }
 0x66e   : > { %v11399_v43 = vpack.c.bf16 %v10414_v52, %v10414_v52  ;;  %v10415_v12 = vmax.f32 %v12736_v60, 0.0 }
 0x66f   : > { %10737 = vst.msk [vmem:[%s15953_s18 + $0x38] sm:$0xf] %vm10722_vm0, %v11401_v51  ;;  %v11402_v31 = vpack.c.bf16 %v10417_v16, %v10417_v16 }
 0x670   : > { %10735 = vst.msk [vmem:[%s15953_s18 + $0x30] sm:$0xf] %vm10722_vm0, %v11399_v43  ;;  %v11400_v3 = vpack.c.bf16 %v10415_v12, %v10415_v12  ;;  %v12595_v42 = vpop.f32.mrb[144].mxu0 }
 0x671   : > { %10738 = vst.msk [vmem:[%s15953_s18 + $0x3c] sm:$0xf] %vm10722_vm0, %v11402_v31  ;;  %v12738_v7 = vadd.f32 %v15945_v21, %v12595_v42  ;;  %v10147_v48 = vpop.f32.mrb[145].mxu0 }
 0x672   : > { %10736 = vst.msk [vmem:[%s15953_s18 + $0x34] sm:$0xf] %vm10722_vm0, %v11400_v3  ;;  %v12740_v9 = vadd.f32 %v15945_v21, %v10147_v48  ;;  %v12596_v1 = vpop.f32.mrb[146].mxu0 }
 0x673   : > { %v10420_v17 = vmax.f32 %v12738_v7, 0.0  ;;  %v12742_v29 = vadd.f32 %v15945_v21, %v12596_v1  ;;  %v10150_v35 = vpop.f32.mrb[147].mxu0 }
 0x674   : > { %v10418_v57 = vmax.f32 %v12740_v9, 0.0  ;;  %v12744_v0 = vadd.f32 %v15945_v21, %v10150_v35 }
 0x675   : > { %v11405_v4 = vpack.c.bf16 %v10420_v17, %v10420_v17  ;;  %v10421_v46 = vmax.f32 %v12742_v29, 0.0 }
 0x676   : > { %v11403_v55 = vpack.c.bf16 %v10418_v57, %v10418_v57  ;;  %v10419_v18 = vmax.f32 %v12744_v0, 0.0 }
 0x677   : > { %10741 = vst.msk [vmem:[%s15953_s18 + $0x48] sm:$0xf] %vm10722_vm0, %v11405_v4  ;;  %v11406_v38 = vpack.c.bf16 %v10421_v46, %v10421_v46 }
 0x678   : > { %10739 = vst.msk [vmem:[%s15953_s18 + $0x40] sm:$0xf] %vm10722_vm0, %v11403_v55  ;;  %v11404_v40 = vpack.c.bf16 %v10419_v18, %v10419_v18  ;;  %v12599_v44 = vpop.f32.mrb[148].mxu0 }
 0x679   : > { %10742 = vst.msk [vmem:[%s15953_s18 + $0x4c] sm:$0xf] %vm10722_vm0, %v11406_v38  ;;  %v12746_v63 = vadd.f32 %v15945_v21, %v12599_v44  ;;  %v10163_v23 = vpop.f32.mrb[149].mxu0 }
 0x67a   : > { %10740 = vst.msk [vmem:[%s15953_s18 + $0x44] sm:$0xf] %vm10722_vm0, %v11404_v40  ;;  %v12748_v53 = vadd.f32 %v15945_v21, %v10163_v23  ;;  %v12600_v13 = vpop.f32.mrb[150].mxu0 }
 0x67b   : > { %v10424_v28 = vmax.f32 %v12746_v63, 0.0  ;;  %v12750_v47 = vadd.f32 %v15945_v21, %v12600_v13  ;;  %v10166_v8 = vpop.f32.mrb[151].mxu0 }
 0x67c   : > { %v10422_v59 = vmax.f32 %v12748_v53, 0.0  ;;  %v12752_v32 = vadd.f32 %v15945_v21, %v10166_v8 }
 0x67d   : > { %v11409_v10 = vpack.c.bf16 %v10424_v28, %v10424_v28  ;;  %v10425_v39 = vmax.f32 %v12750_v47, 0.0 }
 0x67e   : > { %v11407_v33 = vpack.c.bf16 %v10422_v59, %v10422_v59  ;;  %v10423_v27 = vmax.f32 %v12752_v32, 0.0 }
 0x67f   : > { %10745 = vst.msk [vmem:[%s15953_s18 + $0x58] sm:$0xf] %vm10722_vm0, %v11409_v10  ;;  %v11410_v58 = vpack.c.bf16 %v10425_v39, %v10425_v39 }
 0x680   : > { %10743 = vst.msk [vmem:[%s15953_s18 + $0x50] sm:$0xf] %vm10722_vm0, %v11407_v33  ;;  %v11408_v2 = vpack.c.bf16 %v10423_v27, %v10423_v27  ;;  %v12603_v19 = vpop.f32.mrb[152].mxu0 }
 0x681   : > { %10746 = vst.msk [vmem:[%s15953_s18 + $0x5c] sm:$0xf] %vm10722_vm0, %v11410_v58  ;;  %v12754_v20 = vadd.f32 %v15945_v21, %v12603_v19  ;;  %v10179_v26 = vpop.f32.mrb[153].mxu0 }
 0x682   : > { %10744 = vst.msk [vmem:[%s15953_s18 + $0x54] sm:$0xf] %vm10722_vm0, %v11408_v2  ;;  %v12756_v5 = vadd.f32 %v15945_v21, %v10179_v26  ;;  %v12604_v25 = vpop.f32.mrb[154].mxu0 }
 0x683   : > { %v10428_v24 = vmax.f32 %v12754_v20, 0.0  ;;  %v12758_v14 = vadd.f32 %v15945_v21, %v12604_v25  ;;  %v10182_v6 = vpop.f32.mrb[155].mxu0 }
 0x684   : > { %v10426_v49 = vmax.f32 %v12756_v5, 0.0  ;;  %v12760_v11 = vadd.f32 %v15945_v21, %v10182_v6 }
 0x685   : > { %v11413_v61 = vpack.c.bf16 %v10428_v24, %v10428_v24  ;;  %v10429_v34 = vmax.f32 %v12758_v14, 0.0 }
 0x686   : > { %v11411_v37 = vpack.c.bf16 %v10426_v49, %v10426_v49  ;;  %v10427_v50 = vmax.f32 %v12760_v11, 0.0 }
 0x687   : > { %10749 = vst.msk [vmem:[%s15953_s18 + $0x68] sm:$0xf] %vm10722_vm0, %v11413_v61  ;;  %v11414_v36 = vpack.c.bf16 %v10429_v34, %v10429_v34 }
 0x688   : > { %10747 = vst.msk [vmem:[%s15953_s18 + $0x60] sm:$0xf] %vm10722_vm0, %v11411_v37  ;;  %v11412_v56 = vpack.c.bf16 %v10427_v50, %v10427_v50  ;;  %v12607_v41 = vpop.f32.mrb[156].mxu0 }
 0x689   : > { %10750 = vst.msk [vmem:[%s15953_s18 + $0x6c] sm:$0xf] %vm10722_vm0, %v11414_v36  ;;  %v12762_v30 = vadd.f32 %v15945_v21, %v12607_v41  ;;  %v10195_v54 = vpop.f32.mrb[157].mxu0 }
 0x68a   : > { %10748 = vst.msk [vmem:[%s15953_s18 + $0x64] sm:$0xf] %vm10722_vm0, %v11412_v56  ;;  %v12764_v15 = vadd.f32 %v15945_v21, %v10195_v54  ;;  %v12608_v62 = vpop.f32.mrb[158].mxu0 }
 0x68b   : > { %v10432_v45 = vmax.f32 %v12762_v30, 0.0  ;;  %v12766_v22 = vadd.f32 %v15945_v21, %v12608_v62  ;;  %v10198_v52 = vpop.f32.mrb[159].mxu0 }
 0x68c   : > { %v10430_v60 = vmax.f32 %v12764_v15, 0.0  ;;  %v12768_v51 = vadd.f32 %v15945_v21, %v10198_v52 }
 0x68d   : > { %v11417_v16 = vpack.c.bf16 %v10432_v45, %v10432_v45  ;;  %v10433_v43 = vmax.f32 %v12766_v22, 0.0 }
 0x68e   : > { %v11415_v12 = vpack.c.bf16 %v10430_v60, %v10430_v60  ;;  %v10431_v31 = vmax.f32 %v12768_v51, 0.0 }
 0x68f   : > { %10753 = vst.msk [vmem:[%s15953_s18 + $0x78] sm:$0xf] %vm10722_vm0, %v11417_v16  ;;  %v11418_v3 = vpack.c.bf16 %v10433_v43, %v10433_v43 }
 0x690   : > { %10751 = vst.msk [vmem:[%s15953_s18 + $0x70] sm:$0xf] %vm10722_vm0, %v11415_v12  ;;  %v11416_v42 = vpack.c.bf16 %v10431_v31, %v10431_v31  ;;  %v12611_v7 = vpop.f32.mrb[160].mxu0 }
 0x691   : > { %10754 = vst.msk [vmem:[%s15953_s18 + $0x7c] sm:$0xf] %vm10722_vm0, %v11418_v3  ;;  %v12770_v48 = vadd.f32 %v15945_v21, %v12611_v7  ;;  %v10211_v9 = vpop.f32.mrb[161].mxu0 }
 0x692   : > { %10752 = vst.msk [vmem:[%s15953_s18 + $0x74] sm:$0xf] %vm10722_vm0, %v11416_v42  ;;  %v12772_v1 = vadd.f32 %v15945_v21, %v10211_v9  ;;  %v12612_v17 = vpop.f32.mrb[162].mxu0 }
 0x693   : > { %v10436_v29 = vmax.f32 %v12770_v48, 0.0  ;;  %v12774_v35 = vadd.f32 %v15945_v21, %v12612_v17  ;;  %v10214_v57 = vpop.f32.mrb[163].mxu0 }
 0x694   : > { %v10434_v0 = vmax.f32 %v12772_v1, 0.0  ;;  %v12776_v4 = vadd.f32 %v15945_v21, %v10214_v57 }
 0x695   : > { %v11421_v46 = vpack.c.bf16 %v10436_v29, %v10436_v29  ;;  %v10437_v55 = vmax.f32 %v12774_v35, 0.0 }
 0x696   : > { %v11419_v18 = vpack.c.bf16 %v10434_v0, %v10434_v0  ;;  %v10435_v38 = vmax.f32 %v12776_v4, 0.0 }
 0x697   : > { %10757 = vst.msk [vmem:[%s15953_s18 + $0x88] sm:$0xf] %vm10722_vm0, %v11421_v46  ;;  %v11422_v40 = vpack.c.bf16 %v10437_v55, %v10437_v55 }
 0x698   : > { %10755 = vst.msk [vmem:[%s15953_s18 + $0x80] sm:$0xf] %vm10722_vm0, %v11419_v18  ;;  %v11420_v44 = vpack.c.bf16 %v10435_v38, %v10435_v38  ;;  %v12615_v63 = vpop.f32.mrb[164].mxu0 }
 0x699   : > { %10758 = vst.msk [vmem:[%s15953_s18 + $0x8c] sm:$0xf] %vm10722_vm0, %v11422_v40  ;;  %v12778_v23 = vadd.f32 %v15945_v21, %v12615_v63  ;;  %v10227_v53 = vpop.f32.mrb[165].mxu0 }
 0x69a   : > { %10756 = vst.msk [vmem:[%s15953_s18 + $0x84] sm:$0xf] %vm10722_vm0, %v11420_v44  ;;  %v12780_v13 = vadd.f32 %v15945_v21, %v10227_v53  ;;  %v12616_v28 = vpop.f32.mrb[166].mxu0 }
 0x69b   : > { %v10440_v47 = vmax.f32 %v12778_v23, 0.0  ;;  %v12782_v8 = vadd.f32 %v15945_v21, %v12616_v28  ;;  %v10230_v59 = vpop.f32.mrb[167].mxu0 }
 0x69c   : > { %v10438_v32 = vmax.f32 %v12780_v13, 0.0  ;;  %v12784_v10 = vadd.f32 %v15945_v21, %v10230_v59 }
 0x69d   : > { %v11425_v39 = vpack.c.bf16 %v10440_v47, %v10440_v47  ;;  %v10441_v33 = vmax.f32 %v12782_v8, 0.0 }
 0x69e   : > { %v11423_v27 = vpack.c.bf16 %v10438_v32, %v10438_v32  ;;  %v10439_v58 = vmax.f32 %v12784_v10, 0.0 }
 0x69f   : > { %10761 = vst.msk [vmem:[%s15953_s18 + $0x98] sm:$0xf] %vm10722_vm0, %v11425_v39  ;;  %v11426_v2 = vpack.c.bf16 %v10441_v33, %v10441_v33 }
 0x6a0   : > { %10759 = vst.msk [vmem:[%s15953_s18 + $0x90] sm:$0xf] %vm10722_vm0, %v11423_v27  ;;  %v11424_v19 = vpack.c.bf16 %v10439_v58, %v10439_v58  ;;  %v12619_v20 = vpop.f32.mrb[168].mxu0 }
 0x6a1   : > { %10762 = vst.msk [vmem:[%s15953_s18 + $0x9c] sm:$0xf] %vm10722_vm0, %v11426_v2  ;;  %v12786_v26 = vadd.f32 %v15945_v21, %v12619_v20  ;;  %v10243_v5 = vpop.f32.mrb[169].mxu0 }
 0x6a2   : > { %10760 = vst.msk [vmem:[%s15953_s18 + $0x94] sm:$0xf] %vm10722_vm0, %v11424_v19  ;;  %v12788_v25 = vadd.f32 %v15945_v21, %v10243_v5  ;;  %v12620_v24 = vpop.f32.mrb[170].mxu0 }
 0x6a3   : > { %v10444_v14 = vmax.f32 %v12786_v26, 0.0  ;;  %v12790_v6 = vadd.f32 %v15945_v21, %v12620_v24  ;;  %v10246_v49 = vpop.f32.mrb[171].mxu0 }
 0x6a4   : > { %v10442_v11 = vmax.f32 %v12788_v25, 0.0  ;;  %v12792_v61 = vadd.f32 %v15945_v21, %v10246_v49 }
 0x6a5   : > { %v11429_v34 = vpack.c.bf16 %v10444_v14, %v10444_v14  ;;  %v10445_v37 = vmax.f32 %v12790_v6, 0.0 }
 0x6a6   : > { %v11427_v50 = vpack.c.bf16 %v10442_v11, %v10442_v11  ;;  %v10443_v36 = vmax.f32 %v12792_v61, 0.0 }
 0x6a7   : > { %10765 = vst.msk [vmem:[%s15953_s18 + $0xa8] sm:$0xf] %vm10722_vm0, %v11429_v34  ;;  %v11430_v56 = vpack.c.bf16 %v10445_v37, %v10445_v37 }
 0x6a8   : > { %10763 = vst.msk [vmem:[%s15953_s18 + $0xa0] sm:$0xf] %vm10722_vm0, %v11427_v50  ;;  %v11428_v41 = vpack.c.bf16 %v10443_v36, %v10443_v36  ;;  %v12623_v30 = vpop.f32.mrb[172].mxu0 }
 0x6a9   : > { %10766 = vst.msk [vmem:[%s15953_s18 + $0xac] sm:$0xf] %vm10722_vm0, %v11430_v56  ;;  %v12794_v54 = vadd.f32 %v15945_v21, %v12623_v30  ;;  %v10259_v15 = vpop.f32.mrb[173].mxu0 }
 0x6aa   : > { %10764 = vst.msk [vmem:[%s15953_s18 + $0xa4] sm:$0xf] %vm10722_vm0, %v11428_v41  ;;  %v12796_v62 = vadd.f32 %v15945_v21, %v10259_v15  ;;  %v12624_v45 = vpop.f32.mrb[174].mxu0 }
 0x6ab   : > { %v10448_v22 = vmax.f32 %v12794_v54, 0.0  ;;  %v12798_v52 = vadd.f32 %v15945_v21, %v12624_v45  ;;  %v10262_v60 = vpop.f32.mrb[175].mxu0 }
 0x6ac   : > { %v10446_v51 = vmax.f32 %v12796_v62, 0.0  ;;  %v12800_v16 = vadd.f32 %v15945_v21, %v10262_v60 }
 0x6ad   : > { %v11433_v43 = vpack.c.bf16 %v10448_v22, %v10448_v22  ;;  %v10449_v12 = vmax.f32 %v12798_v52, 0.0 }
 0x6ae   : > { %v11431_v31 = vpack.c.bf16 %v10446_v51, %v10446_v51  ;;  %v10447_v3 = vmax.f32 %v12800_v16, 0.0 }
 0x6af   : > { %10769 = vst.msk [vmem:[%s15953_s18 + $0xb8] sm:$0xf] %vm10722_vm0, %v11433_v43  ;;  %v11434_v42 = vpack.c.bf16 %v10449_v12, %v10449_v12 }
 0x6b0   : > { %10767 = vst.msk [vmem:[%s15953_s18 + $0xb0] sm:$0xf] %vm10722_vm0, %v11431_v31  ;;  %v11432_v7 = vpack.c.bf16 %v10447_v3, %v10447_v3  ;;  %v12627_v48 = vpop.f32.mrb[176].mxu0 }
 0x6b1   : > { %10770 = vst.msk [vmem:[%s15953_s18 + $0xbc] sm:$0xf] %vm10722_vm0, %v11434_v42  ;;  %v12802_v9 = vadd.f32 %v15945_v21, %v12627_v48  ;;  %v10275_v1 = vpop.f32.mrb[177].mxu0 }
 0x6b2   : > { %10768 = vst.msk [vmem:[%s15953_s18 + $0xb4] sm:$0xf] %vm10722_vm0, %v11432_v7  ;;  %v12804_v17 = vadd.f32 %v15945_v21, %v10275_v1  ;;  %v12628_v29 = vpop.f32.mrb[178].mxu0 }
 0x6b3   : > { %v10452_v35 = vmax.f32 %v12802_v9, 0.0  ;;  %v12806_v57 = vadd.f32 %v15945_v21, %v12628_v29  ;;  %v10278_v0 = vpop.f32.mrb[179].mxu0 }
 0x6b4   : > { %v10450_v4 = vmax.f32 %v12804_v17, 0.0  ;;  %v12808_v46 = vadd.f32 %v15945_v21, %v10278_v0 }
 0x6b5   : > { %v11437_v55 = vpack.c.bf16 %v10452_v35, %v10452_v35  ;;  %v10453_v18 = vmax.f32 %v12806_v57, 0.0 }
 0x6b6   : > { %v11435_v38 = vpack.c.bf16 %v10450_v4, %v10450_v4  ;;  %v10451_v40 = vmax.f32 %v12808_v46, 0.0 }
 0x6b7   : > { %10773 = vst.msk [vmem:[%s15953_s18 + $0xc8] sm:$0xf] %vm10722_vm0, %v11437_v55  ;;  %v11438_v44 = vpack.c.bf16 %v10453_v18, %v10453_v18 }
 0x6b8   : > { %10771 = vst.msk [vmem:[%s15953_s18 + $0xc0] sm:$0xf] %vm10722_vm0, %v11435_v38  ;;  %v11436_v63 = vpack.c.bf16 %v10451_v40, %v10451_v40  ;;  %v12631_v23 = vpop.f32.mrb[180].mxu0 }
 0x6b9   : > { %10774 = vst.msk [vmem:[%s15953_s18 + $0xcc] sm:$0xf] %vm10722_vm0, %v11438_v44  ;;  %v12810_v53 = vadd.f32 %v15945_v21, %v12631_v23  ;;  %v10291_v13 = vpop.f32.mrb[181].mxu0 }
 0x6ba   : > { %10772 = vst.msk [vmem:[%s15953_s18 + $0xc4] sm:$0xf] %vm10722_vm0, %v11436_v63  ;;  %v12812_v28 = vadd.f32 %v15945_v21, %v10291_v13  ;;  %v12632_v47 = vpop.f32.mrb[182].mxu0 }
 0x6bb   : > { %v10456_v8 = vmax.f32 %v12810_v53, 0.0  ;;  %v12814_v59 = vadd.f32 %v15945_v21, %v12632_v47  ;;  %v10294_v32 = vpop.f32.mrb[183].mxu0 }
 0x6bc   : > { %v10454_v10 = vmax.f32 %v12812_v28, 0.0  ;;  %v12816_v39 = vadd.f32 %v15945_v21, %v10294_v32 }
 0x6bd   : > { %v11441_v33 = vpack.c.bf16 %v10456_v8, %v10456_v8  ;;  %v10457_v27 = vmax.f32 %v12814_v59, 0.0 }
 0x6be   : > { %v11439_v58 = vpack.c.bf16 %v10454_v10, %v10454_v10  ;;  %v10455_v2 = vmax.f32 %v12816_v39, 0.0 }
 0x6bf   : > { %10777 = vst.msk [vmem:[%s15953_s18 + $0xd8] sm:$0xf] %vm10722_vm0, %v11441_v33  ;;  %v11442_v19 = vpack.c.bf16 %v10457_v27, %v10457_v27 }
 0x6c0   : > { %10775 = vst.msk [vmem:[%s15953_s18 + $0xd0] sm:$0xf] %vm10722_vm0, %v11439_v58  ;;  %v11440_v20 = vpack.c.bf16 %v10455_v2, %v10455_v2  ;;  %v12635_v26 = vpop.f32.mrb[184].mxu0 }
 0x6c1   : > { %10778 = vst.msk [vmem:[%s15953_s18 + $0xdc] sm:$0xf] %vm10722_vm0, %v11442_v19  ;;  %v12818_v5 = vadd.f32 %v15945_v21, %v12635_v26  ;;  %v10307_v25 = vpop.f32.mrb[185].mxu0 }
 0x6c2   : > { %10776 = vst.msk [vmem:[%s15953_s18 + $0xd4] sm:$0xf] %vm10722_vm0, %v11440_v20  ;;  %v12820_v24 = vadd.f32 %v15945_v21, %v10307_v25  ;;  %v12636_v14 = vpop.f32.mrb[186].mxu0 }
 0x6c3   : > { %v10460_v6 = vmax.f32 %v12818_v5, 0.0  ;;  %v12822_v49 = vadd.f32 %v15945_v21, %v12636_v14  ;;  %v10310_v11 = vpop.f32.mrb[187].mxu0 }
 0x6c4   : > { %v10458_v61 = vmax.f32 %v12820_v24, 0.0  ;;  %v12824_v34 = vadd.f32 %v15945_v21, %v10310_v11 }
 0x6c5   : > { %v11445_v37 = vpack.c.bf16 %v10460_v6, %v10460_v6  ;;  %v10461_v50 = vmax.f32 %v12822_v49, 0.0 }
 0x6c6   : > { %v11443_v36 = vpack.c.bf16 %v10458_v61, %v10458_v61  ;;  %v10459_v56 = vmax.f32 %v12824_v34, 0.0 }
 0x6c7   : > { %10781 = vst.msk [vmem:[%s15953_s18 + $0xe8] sm:$0xf] %vm10722_vm0, %v11445_v37  ;;  %v11446_v41 = vpack.c.bf16 %v10461_v50, %v10461_v50 }
 0x6c8   : > { %10779 = vst.msk [vmem:[%s15953_s18 + $0xe0] sm:$0xf] %vm10722_vm0, %v11443_v36  ;;  %v11444_v30 = vpack.c.bf16 %v10459_v56, %v10459_v56  ;;  %v12639_v54 = vpop.f32.mrb[188].mxu0 }
 0x6c9   : > { %10782 = vst.msk [vmem:[%s15953_s18 + $0xec] sm:$0xf] %vm10722_vm0, %v11446_v41  ;;  %v12826_v15 = vadd.f32 %v15945_v21, %v12639_v54  ;;  %v10323_v62 = vpop.f32.mrb[189].mxu0 }
 0x6ca   : > { %10780 = vst.msk [vmem:[%s15953_s18 + $0xe4] sm:$0xf] %vm10722_vm0, %v11444_v30  ;;  %v12828_v45 = vadd.f32 %v15945_v21, %v10323_v62  ;;  %v12640_v22 = vpop.f32.mrb[190].mxu0 }
 0x6cb   : > { %v10464_v52 = vmax.f32 %v12826_v15, 0.0  ;;  %v12830_v60 = vadd.f32 %v15945_v21, %v12640_v22  ;;  %v10326_v51 = vpop.f32.mrb[191].mxu0 }
 0x6cc   : > { %v10462_v16 = vmax.f32 %v12828_v45, 0.0  ;;  %v12832_v43 = vadd.f32 %v15945_v21, %v10326_v51 }
 0x6cd   : > { %v11449_v12 = vpack.c.bf16 %v10464_v52, %v10464_v52  ;;  %v10465_v31 = vmax.f32 %v12830_v60, 0.0 }
 0x6ce   : > { %v11447_v3 = vpack.c.bf16 %v10462_v16, %v10462_v16  ;;  %v10463_v42 = vmax.f32 %v12832_v43, 0.0 }
 0x6cf   : > { %10785 = vst.msk [vmem:[%s15953_s18 + $0xf8] sm:$0xf] %vm10722_vm0, %v11449_v12  ;;  %v11450_v7 = vpack.c.bf16 %v10465_v31, %v10465_v31 }
 0x6d0   : > { %10783 = vst.msk [vmem:[%s15953_s18 + $0xf0] sm:$0xf] %vm10722_vm0, %v11447_v3  ;;  %v11448_v21 = vpack.c.bf16 %v10463_v42, %v10463_v42 }
 0x6d1   : > { %10786 = vst.msk [vmem:[%s15953_s18 + $0xfc] sm:$0xf] %vm10722_vm0, %v11450_v7 }
 0x6d2   : > { %10784 = vst.msk [vmem:[%s15953_s18 + $0xf4] sm:$0xf] %vm10722_vm0, %v11448_v21 }
 0x6d3   : > { %13688 = shalt.err (!%p13685_p7)
}
 0x6d4   : > { %s13689_s30 = scalar_lea.hbm %s16142_s20, 4096  ;;  %s13693_s16 = scalar_lea.hbm %s16200_s6, 8192 }
 0x6d5   : > { %p13690_p9 = scmp.ne.s32.totalorder %s16142_s20, %s13689_s30  ;;  %p13694_p5 = scmp.lt.u32.totalorder %s16142_s20, %s16200_s6 }
 0x6d6   : > { %p13695_p11 = scmp.lt.u32.totalorder %s13693_s16, %s13689_s30  ;;  %p13697_p4 = scmp.lt.u32.totalorder %s13689_s30, %s16142_s20 }
 0x6d7   : > { %p13691_p1 = pnand %p13690_p9, %p13883_p12 }
 0x6d8   : > { %p13696_p2 = por %p13695_p11, %p13694_p5 }
 0x6d9   : > { %p13692_p0 = pneg %p13691_p1 }
 0x6da   : > { %p13698_p6 = por %p13697_p4, %p13696_p2 }
 0x6dc   : > { %p13699_p8 = pnand %p13698_p6, %p13692_p0 }
 0x6de   : > { %13702 = shalt.err (!%p13699_p8)
}
 0x6df   : > { %s13752_s11 = smov 64   ;;  %s13753_s29 = smov 4  }
 0x6e0   : > { %13361 = dma.vmem_to_hbm [thread:$0]  (%p13883_p12), %s16144_s7, 4096, %s16142_s20, %s10788_s25, %s13752_s11, %s13752_s11, %s13753_s29  }
 0x6e1 PF: > { %s10817_s27 = sand.u32 1, %s13733_s21   ;;  %p16337_p10 = scmp.ne.s32.totalorder %s16205_s28, 0 }
 0x6e2   : > { %p16338_p13 = scmp.ge.s32.totalorder %s13745_s24, 2  ;;  %s10818_s26 = scalar_lea.sflag [#allocation5], %s10817_s27 }
 0x6e4   : > { %p13372_p3 = pnand %p16338_p13, %p16337_p10 }
 0x6e6   : > { %13728 = dma.done.wait (!%p13372_p3), %s10818_s26, 4096  }
 0x6e7   : > { %13730 = vsyncadd (!%p13372_p3), %s10818_s26, 4294963200  ;;  %p20_p7 = scmp.ge.s32.totalorder %s13845_s9, 4   ;;  %s16339_s21 = smov %s13737_s22 }
 0x6e8   : > { %s16340_s22 = smov %s13741_s23  ;;  %s16341_s23 = smov %s13879_s13 }
 0x6e9   : > { %s16342_s24 = smov %s13845_s9  ;;  %22 = sbr.rel (!%p20_p7) target bundleno = 6 (0x6), region = 96 }
 0x6f0   :  { %10823 = vsyncpa [#allocation4], 1 }
 0x6f1   :  { %10825 = vsyncpa [#allocation4 + $0x1], 1 }
 0x6f2   :  { %10826 = vsyncpa [#allocation7], 1 }
 0x6f3   :  { %10827 = vsyncpa [#allocation5], 1 }
 0x6f4   :  { %10829 = vsyncpa [#allocation5 + $0x1], 1 }

</bundles_post_ra>
